<compile_context>
chip_gen: v7x
topology: tpu7x:2x2x1
jax: 0.10.0
libtpu: 0.0.40
codegen_flags: <defaults>
</compile_context>

<pallas_src>
import functools
import numpy as np
import jax
import jax.numpy as jnp
from jax.experimental import pallas as pl
from jax.experimental.pallas import tpu as pltpu

K = 7
STRIDE = 4
DOWN_CHANNELS = [8, 11, 16, 22, 32]
N_LAYERS = 19          # 2 (conv1x1) + 4*2 (down) + 4*2 (up) + 1 (last)
MARG = 8               # zero-margin columns on each side of the data in `act`
ACT_ROWS = 48          # >= max conv input channels (44 at the widest concat)


# ----------------------------- layer bookkeeping ---------------------------- #
def _layer_defs(in_channels, out_channels):
    dc = DOWN_CHANNELS
    uc = dc[::-1]
    defs = [(dc[0], in_channels, "conv"), (dc[0], dc[0], "conv")]
    for s in range(1, 5):
        defs.append((dc[s - 1], dc[s - 1], "conv"))        # k7/s4/p0 downsample
        defs.append((dc[s], dc[s - 1], "conv"))            # k7/s1/p3
    for s in range(4):
        defs.append((uc[s + 1], uc[s], "convT"))           # ConvTranspose k7/s4
        defs.append((uc[s + 1], 2 * uc[s + 1], "conv"))    # k7/s1/p3 after concat
    defs.append((out_channels, uc[-1], "conv"))            # last conv + softmax
    assert len(defs) == N_LAYERS
    return defs


def _meta(in_channels, out_channels):
    """Static (woff, boff, cout, cin) packing offsets for every layer."""
    defs = _layer_defs(in_channels, out_channels)
    meta, woff, boff = [], 0, 0
    for cout, cin, _ in defs:
        meta.append((woff, boff, cout, cin))
        woff += K * cout
        boff += cout
    return tuple(meta), woff, boff


# -------------------------- constants for strided ops ----------------------- #
def _np_select_down(lfull, lout):
    d = np.zeros((lfull, lout), np.float32)
    d[np.arange(lout) * STRIDE, np.arange(lout)] = 1.0
    return d


def _np_zero_upsample(lin):
    lup = STRIDE * (lin - 1) + 1
    z = np.zeros((lin, lup), np.float32)
    z[np.arange(lin), np.arange(lin) * STRIDE] = 1.0
    return z


# -------------------------------- fused kernel ------------------------------ #
def _unet_kernel(x_ref, w_ref, b_ref, d1, d2, d3, z1, z2, z3, out_ref, act,
                 *, meta, lens, l0, lpad):
    d_refs = (d1, d2, d3)
    z_refs = (z1, z2, z3)
    L = lens

    def relu(v):
        return jnp.maximum(v, 0.0)

    def place(vals, lin):
        """Store channel-stacked values (bf16) at column MARG, zero the margins."""
        c0 = 0
        for v in vals:
            c = v.shape[0]
            act[c0:c0 + c, MARG:MARG + lin] = v.astype(jnp.bfloat16)
            c0 += c
        zeros = jnp.zeros((c0, MARG), jnp.bfloat16)
        act[0:c0, 0:MARG] = zeros
        act[0:c0, MARG + lin:MARG + lin + MARG] = zeros

    def conv(idx, lin, pad, lout=None):
        """Stride-1 conv: one bf16 slab load + 7 shifted value slices + 7 dots."""
        woff, boff, cout, cin = meta[idx]
        if lout is None:
            lout = lin + 2 * pad - (K - 1)
        width = lout + (K - 1)
        start = MARG - pad
        slab = act[0:cin, start:start + width]                       # bf16 load (once)
        out = jnp.dot(w_ref[woff:woff + cout, 0:cin], slab[:, 0:lout],
                      preferred_element_type=jnp.float32)
        out = out + b_ref[boff:boff + cout, :]                       # bias folded in
        for k in range(1, K):
            wk = w_ref[woff + k * cout:woff + (k + 1) * cout, 0:cin]
            out = out + jnp.dot(wk, slab[:, k:k + lout],
                                preferred_element_type=jnp.float32)
        return out

    # ------------------------------ down path ------------------------------ #
    x = x_ref[0]                                           # (cin0, lpad) f32
    place([x[:, 0:l0]], L[0])
    h = relu(conv(0, L[0], 3))
    place([h], L[0])
    h = relu(conv(1, L[0], 3))
    skips = [h]

    for s in range(1, 5):
        lin, lnx = L[s - 1], L[s]
        # k7/s4/p0 downsample: stride-1 conv, ReLU, then bf16 column-select.
        place([h], lin)
        yfull = relu(conv(2 * s, lin, 0))                  # (cin, lin - 6)
        if lin - (K - 1) == lnx:                           # deepest stage: identity
            h = yfull
        else:
            h = jnp.dot(yfull.astype(jnp.bfloat16), d_refs[s - 1][...],
                        preferred_element_type=jnp.float32)
        # k7/s1/p3 conv to the next channel count.
        place([h], lnx)
        h = relu(conv(2 * s + 1, lnx, 3))
        skips.append(h)

    # ------------------------------- up path ------------------------------- #
    # TODO(synk): the reference forward indexes skip_connections[i+1], which is
    # not runnable in PyTorch (channel/length mismatch at torch.cat); the
    # standard reversed U-Net pairing skip_connections[-(i+2)] is kept.
    for s in range(4):
        lin, lout = L[4 - s], L[3 - s]
        lup = STRIDE * (lin - 1) + 1
        # ConvTranspose1d(k7, s4): bf16 zero-upsample matmul (exact), then a
        # stride-1 pad-(K-1) conv with pre-flipped weights.
        if lin == 1:
            u = h
        else:
            u = jnp.dot(h.astype(jnp.bfloat16), z_refs[s - 1][...],
                        preferred_element_type=jnp.float32)
        place([u], lup)
        xu = relu(conv(10 + 2 * s, lup, K - 1))            # (cout, lout)
        # torch.cat((up, skip), dim=1) then k7/s1/p3 conv (2*cout -> cout)
        place([xu, skips[3 - s]], lout)
        h = relu(conv(11 + 2 * s, lout, 3))

    # --------------- last conv + channel softmax (lane-dense) -------------- #
    place([h], L[0])
    z = conv(18, L[0], 3, lout=lpad)                       # (out_ch, lpad)
    z = z - jnp.max(z, axis=0, keepdims=True)
    e = jnp.exp(z)
    p = e / jnp.sum(e, axis=0, keepdims=True)              # exact normalization
    out_ref[0] = p.astype(out_ref.dtype)


# ----------------------------------- forward -------------------------------- #
def unet_forward(params, x, *, out_channels=3):
    """x: (B, in_channels, L) f32 -> (B, out_channels, L) channel-softmax probs."""
    B, cin0, L0 = x.shape
    lens = [L0]
    for _ in range(4):
        lens.append((lens[-1] - K) // STRIDE + 1)
    for i in range(4):   # ConvTranspose outputs must line up with the skips
        assert STRIDE * lens[i + 1] + 3 == lens[i], (
            "sequence length must round-trip through the 4 stride-4 stages "
            f"(e.g. L=511); got lens={lens}")
    assert lens[-1] >= 1

    meta, wrows, brows = _meta(cin0, out_channels)
    wpk, bpk = params["wpk"], params["bpk"]
    assert wpk.shape[0] >= wrows and bpk.shape[0] >= brows

    lpad = ((L0 + 127) // 128) * 128                 # lane-dense I/O
    assert lpad - L0 <= MARG - 3                     # extra output cols read zero margin
    act_cols = ((MARG + lpad + MARG + 127) // 128) * 128

    x_p = jnp.pad(x, ((0, 0), (0, 0), (0, lpad - L0)))

    # bf16 0/1 selection (down) and zero-upsample (up) matrices; deepest stage
    # (length 1) is handled as an identity inside the kernel.
    d_consts = [jnp.asarray(_np_select_down(lens[s - 1] - (K - 1), lens[s]),
                            dtype=jnp.bfloat16) for s in (1, 2, 3)]
    z_consts = [jnp.asarray(_np_zero_upsample(lens[4 - s]),
                            dtype=jnp.bfloat16) for s in (1, 2, 3)]

    kernel = functools.partial(_unet_kernel, meta=meta, lens=tuple(lens),
                               l0=L0, lpad=lpad)

    in_specs = [pl.BlockSpec((1, cin0, lpad), lambda b: (b, 0, 0)),
                pl.BlockSpec(wpk.shape, lambda b: (0, 0)),
                pl.BlockSpec(bpk.shape, lambda b: (0, 0))]
    in_specs += [pl.BlockSpec(c.shape, lambda b: (0, 0))
                 for c in (d_consts + z_consts)]

    out = pl.pallas_call(
        kernel,
        out_shape=jax.ShapeDtypeStruct((B, out_channels, lpad), jnp.float32),
        grid_spec=pltpu.PrefetchScalarGridSpec(
            num_scalar_prefetch=0,
            grid=(B,),
            in_specs=in_specs,
            out_specs=pl.BlockSpec((1, out_channels, lpad), lambda b: (b, 0, 0)),
            scratch_shapes=[pltpu.VMEM((ACT_ROWS, act_cols), jnp.bfloat16)]),
        compiler_params=pltpu.CompilerParams(
            dimension_semantics=("parallel",)),
    )(x_p, wpk, bpk, *d_consts, *z_consts)
    return out[:, :, :L0]


# ------------------------------- parameter init ----------------------------- #
def init_unet_params(key, in_channels=3, out_channels=3):
    """Packs all layers into one bf16 tap buffer + one f32 bias buffer.

    Returns (params, raw) where raw keeps the per-layer PyTorch-layout weights
    for the pure-JAX reference check."""
    defs = _layer_defs(in_channels, out_channels)
    meta, wrows, brows = _meta(in_channels, out_channels)
    cmax = ((max(cin for _, cin, _ in defs) + 7) // 8) * 8
    wpk = np.zeros((((wrows + 7) // 8) * 8, cmax), np.float32)
    bpk = np.zeros((((brows + 7) // 8) * 8, 1), np.float32)
    raw = []
    keys = jax.random.split(key, len(defs))
    for (cout, cin, kind), (woff, boff, _, _), k in zip(defs, meta, keys):
        kw, kb = jax.random.split(k)
        if kind == "conv":
            bound = 1.0 / np.sqrt(cin * K)
            w = jax.random.uniform(kw, (cout, cin, K), jnp.float32, -bound, bound)
            b = jax.random.uniform(kb, (cout,), jnp.float32, -bound, bound)
            taps = np.transpose(np.asarray(w), (2, 0, 1))               # (K, cout, cin)
        else:   # nn.ConvTranspose1d weight layout (cin, cout, K); pre-flip taps
            bound = 1.0 / np.sqrt(cout * K)
            w = jax.random.uniform(kw, (cin, cout, K), jnp.float32, -bound, bound)
            b = jax.random.uniform(kb, (cout,), jnp.float32, -bound, bound)
            taps = np.transpose(np.asarray(w)[:, :, ::-1], (2, 1, 0))   # (K, cout, cin)
        for kk in range(K):
            wpk[woff + kk * cout:woff + (kk + 1) * cout, 0:cin] = taps[kk]
        bpk[boff:boff + cout, 0] = np.asarray(b)
        raw.append((w, b))
    params = {"wpk": jnp.asarray(wpk, jnp.bfloat16),
              "bpk": jnp.asarray(bpk, jnp.float32)}
    return params, raw


# ------------------------- pure-JAX reference (check) ----------------------- #
def unet_reference(raw, x, *, out_channels=3):
    """Mirrors the kernel's numerics: bf16 weights, bf16 activation storage."""
    del out_channels
    f32 = jnp.float32
    dn = ("NCH", "OIH", "NCH")
    rnd = lambda a: a.astype(jnp.bfloat16).astype(f32)
    relu = lambda a: jnp.maximum(a, 0.0)

    def conv(h, w, b, stride, pad):
        y = jax.lax.conv_general_dilated(
            h, rnd(w), window_strides=(stride,), padding=[(pad, pad)],
            dimension_numbers=dn, precision=jax.lax.Precision.HIGHEST)
        return y + b[None, :, None]

    def convT(h, w, b):
        wflip = jnp.transpose(rnd(w)[:, :, ::-1], (1, 0, 2))
        y = jax.lax.conv_general_dilated(
            h, wflip, window_strides=(1,), padding=[(K - 1, K - 1)],
            lhs_dilation=(STRIDE,), dimension_numbers=dn,
            precision=jax.lax.Precision.HIGHEST)
        return y + b[None, :, None]

    h = rnd(x.astype(f32))
    h = rnd(relu(conv(h, *raw[0], 1, 3)))
    h = rnd(relu(conv(h, *raw[1], 1, 3)))
    skips = [h]
    for s in range(1, 5):
        h = rnd(relu(conv(h, *raw[2 * s], STRIDE, 0)))
        h = rnd(relu(conv(h, *raw[2 * s + 1], 1, 3)))
        skips.append(h)
    for s in range(4):
        h = rnd(relu(convT(h, *raw[10 + 2 * s])))
        h = jnp.concatenate([h, skips[3 - s]], axis=1)
        h = rnd(relu(conv(h, *raw[11 + 2 * s], 1, 3)))
    z = conv(h, *raw[18], 1, 3)
    return jax.nn.softmax(z, axis=1)


if __name__ == "__main__":
    key = jax.random.PRNGKey(0)
    kp, kx = jax.random.split(key)
    params, raw = init_unet_params(kp, in_channels=3, out_channels=3)

    # L=511 so each stride-4 stage divides exactly (511->127->31->7->1) and the
    # ConvTranspose1d outputs line up with the skip connections.
    B, C, L = 2, 3, 511
    x = jax.random.normal(kx, (B, C, L), jnp.float32)

    fwd = jax.jit(unet_forward)
    out = jax.block_until_ready(fwd(params, x))
    assert out.shape == (B, 3, L), out.shape
    assert bool(jnp.all(jnp.isfinite(out)))
    assert bool(jnp.allclose(jnp.sum(out, axis=1), 1.0, atol=1e-3))

    ref = unet_reference(raw, x)
    err = float(jnp.max(jnp.abs(out - ref)))
    assert err < 1e-2, f"max |kernel - reference| = {err}"
    print("KERNEL_OK")
</pallas_src>

<mosaic_0001>
module attributes {stable_mosaic.version = 11 : i64} {
  func.func @_unet_kernel(%arg0: i32, %arg1: memref<1x3x512xf32, #tpu.memory_space<vmem>>, %arg2: memref<1904x48xbf16, #tpu.memory_space<vmem>>, %arg3: memref<272x1xf32, #tpu.memory_space<vmem>>, %arg4: memref<505x127xbf16, #tpu.memory_space<vmem>>, %arg5: memref<121x31xbf16, #tpu.memory_space<vmem>>, %arg6: memref<25x7xbf16, #tpu.memory_space<vmem>>, %arg7: memref<7x25xbf16, #tpu.memory_space<vmem>>, %arg8: memref<31x121xbf16, #tpu.memory_space<vmem>>, %arg9: memref<127x505xbf16, #tpu.memory_space<vmem>>, %arg10: memref<1x3x512xf32, #tpu.memory_space<vmem>>, %arg11: memref<48x640xbf16, #tpu.memory_space<vmem>>) attributes {dimension_semantics = [#tpu.dimension_semantics<parallel>], iteration_bounds = array<i64: 2>, scalar_prefetch = 0 : i64, scratch_operands = 1 : i64, tpu.core_type = #tpu.core_type<tc>, window_params = [{transform_indices = @transform_0, window_bounds = array<i64: 1, 3, 512>}, {pipeline_mode = #tpu.pipeline_mode<synchronous>, transform_indices = @transform_1, window_bounds = array<i64: 1904, 48>}, {pipeline_mode = #tpu.pipeline_mode<synchronous>, transform_indices = @transform_2, window_bounds = array<i64: 272, 1>}, {pipeline_mode = #tpu.pipeline_mode<synchronous>, transform_indices = @transform_3, window_bounds = array<i64: 505, 127>}, {pipeline_mode = #tpu.pipeline_mode<synchronous>, transform_indices = @transform_4, window_bounds = array<i64: 121, 31>}, {pipeline_mode = #tpu.pipeline_mode<synchronous>, transform_indices = @transform_5, window_bounds = array<i64: 25, 7>}, {pipeline_mode = #tpu.pipeline_mode<synchronous>, transform_indices = @transform_6, window_bounds = array<i64: 7, 25>}, {pipeline_mode = #tpu.pipeline_mode<synchronous>, transform_indices = @transform_7, window_bounds = array<i64: 31, 121>}, {pipeline_mode = #tpu.pipeline_mode<synchronous>, transform_indices = @transform_8, window_bounds = array<i64: 127, 505>}, {transform_indices = @transform_9, window_bounds = array<i64: 1, 3, 512>}]} {
    %c0 = arith.constant 0 : index
    %c0_0 = arith.constant 0 : index
    %c0_1 = arith.constant 0 : index
    %0 = vector.load %arg1[%c0, %c0_0, %c0_1] : memref<1x3x512xf32, #tpu.memory_space<vmem>>, vector<1x3x512xf32>
    %1 = vector.shape_cast %0 : vector<1x3x512xf32> to vector<3x512xf32>
    %2 = vector.extract_strided_slice %1 {offsets = [0, 0], sizes = [3, 511], strides = [1, 1]} : vector<3x512xf32> to vector<3x511xf32>
    %3 = arith.truncf %2 : vector<3x511xf32> to vector<3x511xbf16>
    %c0_2 = arith.constant 0 : index
    %c8 = arith.constant 8 : index
    %4 = vector.load %arg11[%c0_2, %c8] : memref<48x640xbf16, #tpu.memory_space<vmem>>, vector<3x511xbf16>
    tpu.vector_store %arg11[%c0_2, %c8], %3 {strides = array<i32>} : memref<48x640xbf16, #tpu.memory_space<vmem>>, vector<3x511xbf16>,
    %cst = arith.constant 0.000000e+00 : bf16
    %5 = vector.broadcast %cst : bf16 to vector<3x8xbf16>
    %c0_3 = arith.constant 0 : index
    %c0_4 = arith.constant 0 : index
    %6 = vector.load %arg11[%c0_3, %c0_4] : memref<48x640xbf16, #tpu.memory_space<vmem>>, vector<3x8xbf16>
    tpu.vector_store %arg11[%c0_3, %c0_4], %5 {strides = array<i32>} : memref<48x640xbf16, #tpu.memory_space<vmem>>, vector<3x8xbf16>,
    %c0_5 = arith.constant 0 : index
    %c519 = arith.constant 519 : index
    %7 = vector.load %arg11[%c0_5, %c519] : memref<48x640xbf16, #tpu.memory_space<vmem>>, vector<3x8xbf16>
    tpu.vector_store %arg11[%c0_5, %c519], %5 {strides = array<i32>} : memref<48x640xbf16, #tpu.memory_space<vmem>>, vector<3x8xbf16>,
    %c0_6 = arith.constant 0 : index
    %c5 = arith.constant 5 : index
    %8 = vector.load %arg11[%c0_6, %c5] : memref<48x640xbf16, #tpu.memory_space<vmem>>, vector<3x517xbf16>
    %c0_7 = arith.constant 0 : index
    %c0_8 = arith.constant 0 : index
    %9 = vector.load %arg2[%c0_7, %c0_8] : memref<1904x48xbf16, #tpu.memory_space<vmem>>, vector<8x3xbf16>
    %10 = vector.extract_strided_slice %8 {offsets = [0, 0], sizes = [3, 511], strides = [1, 1]} : vector<3x517xbf16> to vector<3x511xbf16>
    %cst_9 = arith.constant dense<0.000000e+00> : vector<8x511xf32>
    %11 = tpu.matmul %9, %10, %cst_9 {dimension_numbers = #tpu.dot_dimension_numbers<[1], [0], [0], [1], [0, 0, 1, 1], [], []>} : vector<8x3xbf16>, vector<3x511xbf16>, vector<8x511xf32> -> vector<8x511xf32>
    %c0_10 = arith.constant 0 : index
    %c0_11 = arith.constant 0 : index
    %12 = vector.load %arg3[%c0_10, %c0_11] : memref<272x1xf32, #tpu.memory_space<vmem>>, vector<8x1xf32>
    %13 = vector.broadcast %12 : vector<8x1xf32> to vector<8x511xf32>
    %14 = arith.addf %11, %13 : vector<8x511xf32>
    %c8_12 = arith.constant 8 : index
    %c0_13 = arith.constant 0 : index
    %15 = vector.load %arg2[%c8_12, %c0_13] : memref<1904x48xbf16, #tpu.memory_space<vmem>>, vector<8x3xbf16>
    %16 = vector.extract_strided_slice %8 {offsets = [0, 1], sizes = [3, 511], strides = [1, 1]} : vector<3x517xbf16> to vector<3x511xbf16>
    %cst_14 = arith.constant dense<0.000000e+00> : vector<8x511xf32>
    %17 = tpu.matmul %15, %16, %cst_14 {dimension_numbers = #tpu.dot_dimension_numbers<[1], [0], [0], [1], [0, 0, 1, 1], [], []>} : vector<8x3xbf16>, vector<3x511xbf16>, vector<8x511xf32> -> vector<8x511xf32>
    %18 = arith.addf %14, %17 : vector<8x511xf32>
    %c16 = arith.constant 16 : index
    %c0_15 = arith.constant 0 : index
    %19 = vector.load %arg2[%c16, %c0_15] : memref<1904x48xbf16, #tpu.memory_space<vmem>>, vector<8x3xbf16>
    %20 = vector.extract_strided_slice %8 {offsets = [0, 2], sizes = [3, 511], strides = [1, 1]} : vector<3x517xbf16> to vector<3x511xbf16>
    %cst_16 = arith.constant dense<0.000000e+00> : vector<8x511xf32>
    %21 = tpu.matmul %19, %20, %cst_16 {dimension_numbers = #tpu.dot_dimension_numbers<[1], [0], [0], [1], [0, 0, 1, 1], [], []>} : vector<8x3xbf16>, vector<3x511xbf16>, vector<8x511xf32> -> vector<8x511xf32>
    %22 = arith.addf %18, %21 : vector<8x511xf32>
    %c24 = arith.constant 24 : index
    %c0_17 = arith.constant 0 : index
    %23 = vector.load %arg2[%c24, %c0_17] : memref<1904x48xbf16, #tpu.memory_space<vmem>>, vector<8x3xbf16>
    %24 = vector.extract_strided_slice %8 {offsets = [0, 3], sizes = [3, 511], strides = [1, 1]} : vector<3x517xbf16> to vector<3x511xbf16>
    %cst_18 = arith.constant dense<0.000000e+00> : vector<8x511xf32>
    %25 = tpu.matmul %23, %24, %cst_18 {dimension_numbers = #tpu.dot_dimension_numbers<[1], [0], [0], [1], [0, 0, 1, 1], [], []>} : vector<8x3xbf16>, vector<3x511xbf16>, vector<8x511xf32> -> vector<8x511xf32>
    %26 = arith.addf %22, %25 : vector<8x511xf32>
    %c32 = arith.constant 32 : index
    %c0_19 = arith.constant 0 : index
    %27 = vector.load %arg2[%c32, %c0_19] : memref<1904x48xbf16, #tpu.memory_space<vmem>>, vector<8x3xbf16>
    %28 = vector.extract_strided_slice %8 {offsets = [0, 4], sizes = [3, 511], strides = [1, 1]} : vector<3x517xbf16> to vector<3x511xbf16>
    %cst_20 = arith.constant dense<0.000000e+00> : vector<8x511xf32>
    %29 = tpu.matmul %27, %28, %cst_20 {dimension_numbers = #tpu.dot_dimension_numbers<[1], [0], [0], [1], [0, 0, 1, 1], [], []>} : vector<8x3xbf16>, vector<3x511xbf16>, vector<8x511xf32> -> vector<8x511xf32>
    %30 = arith.addf %26, %29 : vector<8x511xf32>
    %c40 = arith.constant 40 : index
    %c0_21 = arith.constant 0 : index
    %31 = vector.load %arg2[%c40, %c0_21] : memref<1904x48xbf16, #tpu.memory_space<vmem>>, vector<8x3xbf16>
    %32 = vector.extract_strided_slice %8 {offsets = [0, 5], sizes = [3, 511], strides = [1, 1]} : vector<3x517xbf16> to vector<3x511xbf16>
    %cst_22 = arith.constant dense<0.000000e+00> : vector<8x511xf32>
    %33 = tpu.matmul %31, %32, %cst_22 {dimension_numbers = #tpu.dot_dimension_numbers<[1], [0], [0], [1], [0, 0, 1, 1], [], []>} : vector<8x3xbf16>, vector<3x511xbf16>, vector<8x511xf32> -> vector<8x511xf32>
    %34 = arith.addf %30, %33 : vector<8x511xf32>
    %c48 = arith.constant 48 : index
    %c0_23 = arith.constant 0 : index
    %35 = vector.load %arg2[%c48, %c0_23] : memref<1904x48xbf16, #tpu.memory_space<vmem>>, vector<8x3xbf16>
    %36 = vector.extract_strided_slice %8 {offsets = [0, 6], sizes = [3, 511], strides = [1, 1]} : vector<3x517xbf16> to vector<3x511xbf16>
    %cst_24 = arith.constant dense<0.000000e+00> : vector<8x511xf32>
    %37 = tpu.matmul %35, %36, %cst_24 {dimension_numbers = #tpu.dot_dimension_numbers<[1], [0], [0], [1], [0, 0, 1, 1], [], []>} : vector<8x3xbf16>, vector<3x511xbf16>, vector<8x511xf32> -> vector<8x511xf32>
    %38 = arith.addf %34, %37 : vector<8x511xf32>
    %cst_25 = arith.constant 0.000000e+00 : f32
    %39 = vector.broadcast %cst_25 : f32 to vector<8x511xf32>
    %40 = arith.maximumf %38, %39 : vector<8x511xf32>
    %41 = arith.truncf %40 : vector<8x511xf32> to vector<8x511xbf16>
    %c0_26 = arith.constant 0 : index
    %c8_27 = arith.constant 8 : index
    %42 = vector.load %arg11[%c0_26, %c8_27] : memref<48x640xbf16, #tpu.memory_space<vmem>>, vector<8x511xbf16>
    tpu.vector_store %arg11[%c0_26, %c8_27], %41 {strides = array<i32>} : memref<48x640xbf16, #tpu.memory_space<vmem>>, vector<8x511xbf16>,
    %cst_28 = arith.constant 0.000000e+00 : bf16
    %43 = vector.broadcast %cst_28 : bf16 to vector<8x8xbf16>
    %c0_29 = arith.constant 0 : index
    %c0_30 = arith.constant 0 : index
    %44 = vector.load %arg11[%c0_29, %c0_30] : memref<48x640xbf16, #tpu.memory_space<vmem>>, vector<8x8xbf16>
    tpu.vector_store %arg11[%c0_29, %c0_30], %43 {strides = array<i32>} : memref<48x640xbf16, #tpu.memory_space<vmem>>, vector<8x8xbf16>,
    %c0_31 = arith.constant 0 : index
    %c519_32 = arith.constant 519 : index
    %45 = vector.load %arg11[%c0_31, %c519_32] : memref<48x640xbf16, #tpu.memory_space<vmem>>, vector<8x8xbf16>
    tpu.vector_store %arg11[%c0_31, %c519_32], %43 {strides = array<i32>} : memref<48x640xbf16, #tpu.memory_space<vmem>>, vector<8x8xbf16>,
    %c0_33 = arith.constant 0 : index
    %c5_34 = arith.constant 5 : index
    %46 = vector.load %arg11[%c0_33, %c5_34] : memref<48x640xbf16, #tpu.memory_space<vmem>>, vector<8x517xbf16>
    %c56 = arith.constant 56 : index
    %c0_35 = arith.constant 0 : index
    %47 = vector.load %arg2[%c56, %c0_35] : memref<1904x48xbf16, #tpu.memory_space<vmem>>, vector<8x8xbf16>
    %48 = vector.extract_strided_slice %46 {offsets = [0, 0], sizes = [8, 511], strides = [1, 1]} : vector<8x517xbf16> to vector<8x511xbf16>
    %cst_36 = arith.constant dense<0.000000e+00> : vector<8x511xf32>
    %49 = tpu.matmul %47, %48, %cst_36 {dimension_numbers = #tpu.dot_dimension_numbers<[1], [0], [0], [1], [0, 0, 1, 1], [], []>} : vector<8x8xbf16>, vector<8x511xbf16>, vector<8x511xf32> -> vector<8x511xf32>
    %c8_37 = arith.constant 8 : index
    %c0_38 = arith.constant 0 : index
    %50 = vector.load %arg3[%c8_37, %c0_38] : memref<272x1xf32, #tpu.memory_space<vmem>>, vector<8x1xf32>
    %51 = vector.broadcast %50 : vector<8x1xf32> to vector<8x511xf32>
    %52 = arith.addf %49, %51 : vector<8x511xf32>
    %c64 = arith.constant 64 : index
    %c0_39 = arith.constant 0 : index
    %53 = vector.load %arg2[%c64, %c0_39] : memref<1904x48xbf16, #tpu.memory_space<vmem>>, vector<8x8xbf16>
    %54 = vector.extract_strided_slice %46 {offsets = [0, 1], sizes = [8, 511], strides = [1, 1]} : vector<8x517xbf16> to vector<8x511xbf16>
    %cst_40 = arith.constant dense<0.000000e+00> : vector<8x511xf32>
    %55 = tpu.matmul %53, %54, %cst_40 {dimension_numbers = #tpu.dot_dimension_numbers<[1], [0], [0], [1], [0, 0, 1, 1], [], []>} : vector<8x8xbf16>, vector<8x511xbf16>, vector<8x511xf32> -> vector<8x511xf32>
    %56 = arith.addf %52, %55 : vector<8x511xf32>
    %c72 = arith.constant 72 : index
    %c0_41 = arith.constant 0 : index
    %57 = vector.load %arg2[%c72, %c0_41] : memref<1904x48xbf16, #tpu.memory_space<vmem>>, vector<8x8xbf16>
    %58 = vector.extract_strided_slice %46 {offsets = [0, 2], sizes = [8, 511], strides = [1, 1]} : vector<8x517xbf16> to vector<8x511xbf16>
    %cst_42 = arith.constant dense<0.000000e+00> : vector<8x511xf32>
    %59 = tpu.matmul %57, %58, %cst_42 {dimension_numbers = #tpu.dot_dimension_numbers<[1], [0], [0], [1], [0, 0, 1, 1], [], []>} : vector<8x8xbf16>, vector<8x511xbf16>, vector<8x511xf32> -> vector<8x511xf32>
    %60 = arith.addf %56, %59 : vector<8x511xf32>
    %c80 = arith.constant 80 : index
    %c0_43 = arith.constant 0 : index
    %61 = vector.load %arg2[%c80, %c0_43] : memref<1904x48xbf16, #tpu.memory_space<vmem>>, vector<8x8xbf16>
    %62 = vector.extract_strided_slice %46 {offsets = [0, 3], sizes = [8, 511], strides = [1, 1]} : vector<8x517xbf16> to vector<8x511xbf16>
    %cst_44 = arith.constant dense<0.000000e+00> : vector<8x511xf32>
    %63 = tpu.matmul %61, %62, %cst_44 {dimension_numbers = #tpu.dot_dimension_numbers<[1], [0], [0], [1], [0, 0, 1, 1], [], []>} : vector<8x8xbf16>, vector<8x511xbf16>, vector<8x511xf32> -> vector<8x511xf32>
    %64 = arith.addf %60, %63 : vector<8x511xf32>
    %c88 = arith.constant 88 : index
    %c0_45 = arith.constant 0 : index
    %65 = vector.load %arg2[%c88, %c0_45] : memref<1904x48xbf16, #tpu.memory_space<vmem>>, vector<8x8xbf16>
    %66 = vector.extract_strided_slice %46 {offsets = [0, 4], sizes = [8, 511], strides = [1, 1]} : vector<8x517xbf16> to vector<8x511xbf16>
    %cst_46 = arith.constant dense<0.000000e+00> : vector<8x511xf32>
    %67 = tpu.matmul %65, %66, %cst_46 {dimension_numbers = #tpu.dot_dimension_numbers<[1], [0], [0], [1], [0, 0, 1, 1], [], []>} : vector<8x8xbf16>, vector<8x511xbf16>, vector<8x511xf32> -> vector<8x511xf32>
    %68 = arith.addf %64, %67 : vector<8x511xf32>
    %c96 = arith.constant 96 : index
    %c0_47 = arith.constant 0 : index
    %69 = vector.load %arg2[%c96, %c0_47] : memref<1904x48xbf16, #tpu.memory_space<vmem>>, vector<8x8xbf16>
    %70 = vector.extract_strided_slice %46 {offsets = [0, 5], sizes = [8, 511], strides = [1, 1]} : vector<8x517xbf16> to vector<8x511xbf16>
    %cst_48 = arith.constant dense<0.000000e+00> : vector<8x511xf32>
    %71 = tpu.matmul %69, %70, %cst_48 {dimension_numbers = #tpu.dot_dimension_numbers<[1], [0], [0], [1], [0, 0, 1, 1], [], []>} : vector<8x8xbf16>, vector<8x511xbf16>, vector<8x511xf32> -> vector<8x511xf32>
    %72 = arith.addf %68, %71 : vector<8x511xf32>
    %c104 = arith.constant 104 : index
    %c0_49 = arith.constant 0 : index
    %73 = vector.load %arg2[%c104, %c0_49] : memref<1904x48xbf16, #tpu.memory_space<vmem>>, vector<8x8xbf16>
    %74 = vector.extract_strided_slice %46 {offsets = [0, 6], sizes = [8, 511], strides = [1, 1]} : vector<8x517xbf16> to vector<8x511xbf16>
    %cst_50 = arith.constant dense<0.000000e+00> : vector<8x511xf32>
    %75 = tpu.matmul %73, %74, %cst_50 {dimension_numbers = #tpu.dot_dimension_numbers<[1], [0], [0], [1], [0, 0, 1, 1], [], []>} : vector<8x8xbf16>, vector<8x511xbf16>, vector<8x511xf32> -> vector<8x511xf32>
    %76 = arith.addf %72, %75 : vector<8x511xf32>
    %cst_51 = arith.constant 0.000000e+00 : f32
    %77 = vector.broadcast %cst_51 : f32 to vector<8x511xf32>
    %78 = arith.maximumf %76, %77 : vector<8x511xf32>
    %79 = arith.truncf %78 : vector<8x511xf32> to vector<8x511xbf16>
    %c0_52 = arith.constant 0 : index
    %c8_53 = arith.constant 8 : index
    %80 = vector.load %arg11[%c0_52, %c8_53] : memref<48x640xbf16, #tpu.memory_space<vmem>>, vector<8x511xbf16>
    tpu.vector_store %arg11[%c0_52, %c8_53], %79 {strides = array<i32>} : memref<48x640xbf16, #tpu.memory_space<vmem>>, vector<8x511xbf16>,
    %cst_54 = arith.constant 0.000000e+00 : bf16
    %81 = vector.broadcast %cst_54 : bf16 to vector<8x8xbf16>
    %c0_55 = arith.constant 0 : index
    %c0_56 = arith.constant 0 : index
    %82 = vector.load %arg11[%c0_55, %c0_56] : memref<48x640xbf16, #tpu.memory_space<vmem>>, vector<8x8xbf16>
    tpu.vector_store %arg11[%c0_55, %c0_56], %81 {strides = array<i32>} : memref<48x640xbf16, #tpu.memory_space<vmem>>, vector<8x8xbf16>,
    %c0_57 = arith.constant 0 : index
    %c519_58 = arith.constant 519 : index
    %83 = vector.load %arg11[%c0_57, %c519_58] : memref<48x640xbf16, #tpu.memory_space<vmem>>, vector<8x8xbf16>
    tpu.vector_store %arg11[%c0_57, %c519_58], %81 {strides = array<i32>} : memref<48x640xbf16, #tpu.memory_space<vmem>>, vector<8x8xbf16>,
    %c0_59 = arith.constant 0 : index
    %c8_60 = arith.constant 8 : index
    %84 = vector.load %arg11[%c0_59, %c8_60] : memref<48x640xbf16, #tpu.memory_space<vmem>>, vector<8x511xbf16>
    %c112 = arith.constant 112 : index
    %c0_61 = arith.constant 0 : index
    %85 = vector.load %arg2[%c112, %c0_61] : memref<1904x48xbf16, #tpu.memory_space<vmem>>, vector<8x8xbf16>
    %86 = vector.extract_strided_slice %84 {offsets = [0, 0], sizes = [8, 505], strides = [1, 1]} : vector<8x511xbf16> to vector<8x505xbf16>
    %cst_62 = arith.constant dense<0.000000e+00> : vector<8x505xf32>
    %87 = tpu.matmul %85, %86, %cst_62 {dimension_numbers = #tpu.dot_dimension_numbers<[1], [0], [0], [1], [0, 0, 1, 1], [], []>} : vector<8x8xbf16>, vector<8x505xbf16>, vector<8x505xf32> -> vector<8x505xf32>
    %c16_63 = arith.constant 16 : index
    %c0_64 = arith.constant 0 : index
    %88 = vector.load %arg3[%c16_63, %c0_64] : memref<272x1xf32, #tpu.memory_space<vmem>>, vector<8x1xf32>
    %89 = vector.broadcast %88 : vector<8x1xf32> to vector<8x505xf32>
    %90 = arith.addf %87, %89 : vector<8x505xf32>
    %c120 = arith.constant 120 : index
    %c0_65 = arith.constant 0 : index
    %91 = vector.load %arg2[%c120, %c0_65] : memref<1904x48xbf16, #tpu.memory_space<vmem>>, vector<8x8xbf16>
    %92 = vector.extract_strided_slice %84 {offsets = [0, 1], sizes = [8, 505], strides = [1, 1]} : vector<8x511xbf16> to vector<8x505xbf16>
    %cst_66 = arith.constant dense<0.000000e+00> : vector<8x505xf32>
    %93 = tpu.matmul %91, %92, %cst_66 {dimension_numbers = #tpu.dot_dimension_numbers<[1], [0], [0], [1], [0, 0, 1, 1], [], []>} : vector<8x8xbf16>, vector<8x505xbf16>, vector<8x505xf32> -> vector<8x505xf32>
    %94 = arith.addf %90, %93 : vector<8x505xf32>
    %c128 = arith.constant 128 : index
    %c0_67 = arith.constant 0 : index
    %95 = vector.load %arg2[%c128, %c0_67] : memref<1904x48xbf16, #tpu.memory_space<vmem>>, vector<8x8xbf16>
    %96 = vector.extract_strided_slice %84 {offsets = [0, 2], sizes = [8, 505], strides = [1, 1]} : vector<8x511xbf16> to vector<8x505xbf16>
    %cst_68 = arith.constant dense<0.000000e+00> : vector<8x505xf32>
    %97 = tpu.matmul %95, %96, %cst_68 {dimension_numbers = #tpu.dot_dimension_numbers<[1], [0], [0], [1], [0, 0, 1, 1], [], []>} : vector<8x8xbf16>, vector<8x505xbf16>, vector<8x505xf32> -> vector<8x505xf32>
    %98 = arith.addf %94, %97 : vector<8x505xf32>
    %c136 = arith.constant 136 : index
    %c0_69 = arith.constant 0 : index
    %99 = vector.load %arg2[%c136, %c0_69] : memref<1904x48xbf16, #tpu.memory_space<vmem>>, vector<8x8xbf16>
    %100 = vector.extract_strided_slice %84 {offsets = [0, 3], sizes = [8, 505], strides = [1, 1]} : vector<8x511xbf16> to vector<8x505xbf16>
    %cst_70 = arith.constant dense<0.000000e+00> : vector<8x505xf32>
    %101 = tpu.matmul %99, %100, %cst_70 {dimension_numbers = #tpu.dot_dimension_numbers<[1], [0], [0], [1], [0, 0, 1, 1], [], []>} : vector<8x8xbf16>, vector<8x505xbf16>, vector<8x505xf32> -> vector<8x505xf32>
    %102 = arith.addf %98, %101 : vector<8x505xf32>
    %c144 = arith.constant 144 : index
    %c0_71 = arith.constant 0 : index
    %103 = vector.load %arg2[%c144, %c0_71] : memref<1904x48xbf16, #tpu.memory_space<vmem>>, vector<8x8xbf16>
    %104 = vector.extract_strided_slice %84 {offsets = [0, 4], sizes = [8, 505], strides = [1, 1]} : vector<8x511xbf16> to vector<8x505xbf16>
    %cst_72 = arith.constant dense<0.000000e+00> : vector<8x505xf32>
    %105 = tpu.matmul %103, %104, %cst_72 {dimension_numbers = #tpu.dot_dimension_numbers<[1], [0], [0], [1], [0, 0, 1, 1], [], []>} : vector<8x8xbf16>, vector<8x505xbf16>, vector<8x505xf32> -> vector<8x505xf32>
    %106 = arith.addf %102, %105 : vector<8x505xf32>
    %c152 = arith.constant 152 : index
    %c0_73 = arith.constant 0 : index
    %107 = vector.load %arg2[%c152, %c0_73] : memref<1904x48xbf16, #tpu.memory_space<vmem>>, vector<8x8xbf16>
    %108 = vector.extract_strided_slice %84 {offsets = [0, 5], sizes = [8, 505], strides = [1, 1]} : vector<8x511xbf16> to vector<8x505xbf16>
    %cst_74 = arith.constant dense<0.000000e+00> : vector<8x505xf32>
    %109 = tpu.matmul %107, %108, %cst_74 {dimension_numbers = #tpu.dot_dimension_numbers<[1], [0], [0], [1], [0, 0, 1, 1], [], []>} : vector<8x8xbf16>, vector<8x505xbf16>, vector<8x505xf32> -> vector<8x505xf32>
    %110 = arith.addf %106, %109 : vector<8x505xf32>
    %c160 = arith.constant 160 : index
    %c0_75 = arith.constant 0 : index
    %111 = vector.load %arg2[%c160, %c0_75] : memref<1904x48xbf16, #tpu.memory_space<vmem>>, vector<8x8xbf16>
    %112 = vector.extract_strided_slice %84 {offsets = [0, 6], sizes = [8, 505], strides = [1, 1]} : vector<8x511xbf16> to vector<8x505xbf16>
    %cst_76 = arith.constant dense<0.000000e+00> : vector<8x505xf32>
    %113 = tpu.matmul %111, %112, %cst_76 {dimension_numbers = #tpu.dot_dimension_numbers<[1], [0], [0], [1], [0, 0, 1, 1], [], []>} : vector<8x8xbf16>, vector<8x505xbf16>, vector<8x505xf32> -> vector<8x505xf32>
    %114 = arith.addf %110, %113 : vector<8x505xf32>
    %cst_77 = arith.constant 0.000000e+00 : f32
    %115 = vector.broadcast %cst_77 : f32 to vector<8x505xf32>
    %116 = arith.maximumf %114, %115 : vector<8x505xf32>
    %117 = arith.truncf %116 : vector<8x505xf32> to vector<8x505xbf16>
    %c0_78 = arith.constant 0 : index
    %c0_79 = arith.constant 0 : index
    %118 = vector.load %arg4[%c0_78, %c0_79] : memref<505x127xbf16, #tpu.memory_space<vmem>>, vector<505x127xbf16>
    %cst_80 = arith.constant dense<0.000000e+00> : vector<8x127xf32>
    %119 = tpu.matmul %117, %118, %cst_80 {dimension_numbers = #tpu.dot_dimension_numbers<[1], [0], [0], [1], [0, 0, 1, 1], [], []>} : vector<8x505xbf16>, vector<505x127xbf16>, vector<8x127xf32> -> vector<8x127xf32>
    %120 = arith.truncf %119 : vector<8x127xf32> to vector<8x127xbf16>
    %c0_81 = arith.constant 0 : index
    %c8_82 = arith.constant 8 : index
    %121 = vector.load %arg11[%c0_81, %c8_82] : memref<48x640xbf16, #tpu.memory_space<vmem>>, vector<8x127xbf16>
    tpu.vector_store %arg11[%c0_81, %c8_82], %120 {strides = array<i32>} : memref<48x640xbf16, #tpu.memory_space<vmem>>, vector<8x127xbf16>,
    %cst_83 = arith.constant 0.000000e+00 : bf16
    %122 = vector.broadcast %cst_83 : bf16 to vector<8x8xbf16>
    %c0_84 = arith.constant 0 : index
    %c0_85 = arith.constant 0 : index
    %123 = vector.load %arg11[%c0_84, %c0_85] : memref<48x640xbf16, #tpu.memory_space<vmem>>, vector<8x8xbf16>
    tpu.vector_store %arg11[%c0_84, %c0_85], %122 {strides = array<i32>} : memref<48x640xbf16, #tpu.memory_space<vmem>>, vector<8x8xbf16>,
    %c0_86 = arith.constant 0 : index
    %c135 = arith.constant 135 : index
    %124 = vector.load %arg11[%c0_86, %c135] : memref<48x640xbf16, #tpu.memory_space<vmem>>, vector<8x8xbf16>
    tpu.vector_store %arg11[%c0_86, %c135], %122 {strides = array<i32>} : memref<48x640xbf16, #tpu.memory_space<vmem>>, vector<8x8xbf16>,
    %c0_87 = arith.constant 0 : index
    %c5_88 = arith.constant 5 : index
    %125 = vector.load %arg11[%c0_87, %c5_88] : memref<48x640xbf16, #tpu.memory_space<vmem>>, vector<8x133xbf16>
    %c168 = arith.constant 168 : index
    %c0_89 = arith.constant 0 : index
    %126 = vector.load %arg2[%c168, %c0_89] : memref<1904x48xbf16, #tpu.memory_space<vmem>>, vector<11x8xbf16>
    %127 = vector.extract_strided_slice %125 {offsets = [0, 0], sizes = [8, 127], strides = [1, 1]} : vector<8x133xbf16> to vector<8x127xbf16>
    %cst_90 = arith.constant dense<0.000000e+00> : vector<11x127xf32>
    %128 = tpu.matmul %126, %127, %cst_90 {dimension_numbers = #tpu.dot_dimension_numbers<[1], [0], [0], [1], [0, 0, 1, 1], [], []>} : vector<11x8xbf16>, vector<8x127xbf16>, vector<11x127xf32> -> vector<11x127xf32>
    %c24_91 = arith.constant 24 : index
    %c0_92 = arith.constant 0 : index
    %129 = vector.load %arg3[%c24_91, %c0_92] : memref<272x1xf32, #tpu.memory_space<vmem>>, vector<11x1xf32>
    %130 = vector.broadcast %129 : vector<11x1xf32> to vector<11x127xf32>
    %131 = arith.addf %128, %130 : vector<11x127xf32>
    %c179 = arith.constant 179 : index
    %c0_93 = arith.constant 0 : index
    %132 = vector.load %arg2[%c179, %c0_93] : memref<1904x48xbf16, #tpu.memory_space<vmem>>, vector<11x8xbf16>
    %133 = vector.extract_strided_slice %125 {offsets = [0, 1], sizes = [8, 127], strides = [1, 1]} : vector<8x133xbf16> to vector<8x127xbf16>
    %cst_94 = arith.constant dense<0.000000e+00> : vector<11x127xf32>
    %134 = tpu.matmul %132, %133, %cst_94 {dimension_numbers = #tpu.dot_dimension_numbers<[1], [0], [0], [1], [0, 0, 1, 1], [], []>} : vector<11x8xbf16>, vector<8x127xbf16>, vector<11x127xf32> -> vector<11x127xf32>
    %135 = arith.addf %131, %134 : vector<11x127xf32>
    %c190 = arith.constant 190 : index
    %c0_95 = arith.constant 0 : index
    %136 = vector.load %arg2[%c190, %c0_95] : memref<1904x48xbf16, #tpu.memory_space<vmem>>, vector<11x8xbf16>
    %137 = vector.extract_strided_slice %125 {offsets = [0, 2], sizes = [8, 127], strides = [1, 1]} : vector<8x133xbf16> to vector<8x127xbf16>
    %cst_96 = arith.constant dense<0.000000e+00> : vector<11x127xf32>
    %138 = tpu.matmul %136, %137, %cst_96 {dimension_numbers = #tpu.dot_dimension_numbers<[1], [0], [0], [1], [0, 0, 1, 1], [], []>} : vector<11x8xbf16>, vector<8x127xbf16>, vector<11x127xf32> -> vector<11x127xf32>
    %139 = arith.addf %135, %138 : vector<11x127xf32>
    %c201 = arith.constant 201 : index
    %c0_97 = arith.constant 0 : index
    %140 = vector.load %arg2[%c201, %c0_97] : memref<1904x48xbf16, #tpu.memory_space<vmem>>, vector<11x8xbf16>
    %141 = vector.extract_strided_slice %125 {offsets = [0, 3], sizes = [8, 127], strides = [1, 1]} : vector<8x133xbf16> to vector<8x127xbf16>
    %cst_98 = arith.constant dense<0.000000e+00> : vector<11x127xf32>
    %142 = tpu.matmul %140, %141, %cst_98 {dimension_numbers = #tpu.dot_dimension_numbers<[1], [0], [0], [1], [0, 0, 1, 1], [], []>} : vector<11x8xbf16>, vector<8x127xbf16>, vector<11x127xf32> -> vector<11x127xf32>
    %143 = arith.addf %139, %142 : vector<11x127xf32>
    %c212 = arith.constant 212 : index
    %c0_99 = arith.constant 0 : index
    %144 = vector.load %arg2[%c212, %c0_99] : memref<1904x48xbf16, #tpu.memory_space<vmem>>, vector<11x8xbf16>
    %145 = vector.extract_strided_slice %125 {offsets = [0, 4], sizes = [8, 127], strides = [1, 1]} : vector<8x133xbf16> to vector<8x127xbf16>
    %cst_100 = arith.constant dense<0.000000e+00> : vector<11x127xf32>
    %146 = tpu.matmul %144, %145, %cst_100 {dimension_numbers = #tpu.dot_dimension_numbers<[1], [0], [0], [1], [0, 0, 1, 1], [], []>} : vector<11x8xbf16>, vector<8x127xbf16>, vector<11x127xf32> -> vector<11x127xf32>
    %147 = arith.addf %143, %146 : vector<11x127xf32>
    %c223 = arith.constant 223 : index
    %c0_101 = arith.constant 0 : index
    %148 = vector.load %arg2[%c223, %c0_101] : memref<1904x48xbf16, #tpu.memory_space<vmem>>, vector<11x8xbf16>
    %149 = vector.extract_strided_slice %125 {offsets = [0, 5], sizes = [8, 127], strides = [1, 1]} : vector<8x133xbf16> to vector<8x127xbf16>
    %cst_102 = arith.constant dense<0.000000e+00> : vector<11x127xf32>
    %150 = tpu.matmul %148, %149, %cst_102 {dimension_numbers = #tpu.dot_dimension_numbers<[1], [0], [0], [1], [0, 0, 1, 1], [], []>} : vector<11x8xbf16>, vector<8x127xbf16>, vector<11x127xf32> -> vector<11x127xf32>
    %151 = arith.addf %147, %150 : vector<11x127xf32>
    %c234 = arith.constant 234 : index
    %c0_103 = arith.constant 0 : index
    %152 = vector.load %arg2[%c234, %c0_103] : memref<1904x48xbf16, #tpu.memory_space<vmem>>, vector<11x8xbf16>
    %153 = vector.extract_strided_slice %125 {offsets = [0, 6], sizes = [8, 127], strides = [1, 1]} : vector<8x133xbf16> to vector<8x127xbf16>
    %cst_104 = arith.constant dense<0.000000e+00> : vector<11x127xf32>
    %154 = tpu.matmul %152, %153, %cst_104 {dimension_numbers = #tpu.dot_dimension_numbers<[1], [0], [0], [1], [0, 0, 1, 1], [], []>} : vector<11x8xbf16>, vector<8x127xbf16>, vector<11x127xf32> -> vector<11x127xf32>
    %155 = arith.addf %151, %154 : vector<11x127xf32>
    %cst_105 = arith.constant 0.000000e+00 : f32
    %156 = vector.broadcast %cst_105 : f32 to vector<11x127xf32>
    %157 = arith.maximumf %155, %156 : vector<11x127xf32>
    %158 = arith.truncf %157 : vector<11x127xf32> to vector<11x127xbf16>
    %c0_106 = arith.constant 0 : index
    %c8_107 = arith.constant 8 : index
    %159 = vector.load %arg11[%c0_106, %c8_107] : memref<48x640xbf16, #tpu.memory_space<vmem>>, vector<11x127xbf16>
    tpu.vector_store %arg11[%c0_106, %c8_107], %158 {strides = array<i32>} : memref<48x640xbf16, #tpu.memory_space<vmem>>, vector<11x127xbf16>,
    %cst_108 = arith.constant 0.000000e+00 : bf16
    %160 = vector.broadcast %cst_108 : bf16 to vector<11x8xbf16>
    %c0_109 = arith.constant 0 : index
    %c0_110 = arith.constant 0 : index
    %161 = vector.load %arg11[%c0_109, %c0_110] : memref<48x640xbf16, #tpu.memory_space<vmem>>, vector<11x8xbf16>
    tpu.vector_store %arg11[%c0_109, %c0_110], %160 {strides = array<i32>} : memref<48x640xbf16, #tpu.memory_space<vmem>>, vector<11x8xbf16>,
    %c0_111 = arith.constant 0 : index
    %c135_112 = arith.constant 135 : index
    %162 = vector.load %arg11[%c0_111, %c135_112] : memref<48x640xbf16, #tpu.memory_space<vmem>>, vector<11x8xbf16>
    tpu.vector_store %arg11[%c0_111, %c135_112], %160 {strides = array<i32>} : memref<48x640xbf16, #tpu.memory_space<vmem>>, vector<11x8xbf16>,
    %c0_113 = arith.constant 0 : index
    %c8_114 = arith.constant 8 : index
    %163 = vector.load %arg11[%c0_113, %c8_114] : memref<48x640xbf16, #tpu.memory_space<vmem>>, vector<11x127xbf16>
    %c245 = arith.constant 245 : index
    %c0_115 = arith.constant 0 : index
    %164 = vector.load %arg2[%c245, %c0_115] : memref<1904x48xbf16, #tpu.memory_space<vmem>>, vector<11x11xbf16>
    %165 = vector.extract_strided_slice %163 {offsets = [0, 0], sizes = [11, 121], strides = [1, 1]} : vector<11x127xbf16> to vector<11x121xbf16>
    %cst_116 = arith.constant dense<0.000000e+00> : vector<11x121xf32>
    %166 = tpu.matmul %164, %165, %cst_116 {dimension_numbers = #tpu.dot_dimension_numbers<[1], [0], [0], [1], [0, 0, 1, 1], [], []>} : vector<11x11xbf16>, vector<11x121xbf16>, vector<11x121xf32> -> vector<11x121xf32>
    %c35 = arith.constant 35 : index
    %c0_117 = arith.constant 0 : index
    %167 = vector.load %arg3[%c35, %c0_117] : memref<272x1xf32, #tpu.memory_space<vmem>>, vector<11x1xf32>
    %168 = vector.broadcast %167 : vector<11x1xf32> to vector<11x121xf32>
    %169 = arith.addf %166, %168 : vector<11x121xf32>
    %c256 = arith.constant 256 : index
    %c0_118 = arith.constant 0 : index
    %170 = vector.load %arg2[%c256, %c0_118] : memref<1904x48xbf16, #tpu.memory_space<vmem>>, vector<11x11xbf16>
    %171 = vector.extract_strided_slice %163 {offsets = [0, 1], sizes = [11, 121], strides = [1, 1]} : vector<11x127xbf16> to vector<11x121xbf16>
    %cst_119 = arith.constant dense<0.000000e+00> : vector<11x121xf32>
    %172 = tpu.matmul %170, %171, %cst_119 {dimension_numbers = #tpu.dot_dimension_numbers<[1], [0], [0], [1], [0, 0, 1, 1], [], []>} : vector<11x11xbf16>, vector<11x121xbf16>, vector<11x121xf32> -> vector<11x121xf32>
    %173 = arith.addf %169, %172 : vector<11x121xf32>
    %c267 = arith.constant 267 : index
    %c0_120 = arith.constant 0 : index
    %174 = vector.load %arg2[%c267, %c0_120] : memref<1904x48xbf16, #tpu.memory_space<vmem>>, vector<11x11xbf16>
    %175 = vector.extract_strided_slice %163 {offsets = [0, 2], sizes = [11, 121], strides = [1, 1]} : vector<11x127xbf16> to vector<11x121xbf16>
    %cst_121 = arith.constant dense<0.000000e+00> : vector<11x121xf32>
    %176 = tpu.matmul %174, %175, %cst_121 {dimension_numbers = #tpu.dot_dimension_numbers<[1], [0], [0], [1], [0, 0, 1, 1], [], []>} : vector<11x11xbf16>, vector<11x121xbf16>, vector<11x121xf32> -> vector<11x121xf32>
    %177 = arith.addf %173, %176 : vector<11x121xf32>
    %c278 = arith.constant 278 : index
    %c0_122 = arith.constant 0 : index
    %178 = vector.load %arg2[%c278, %c0_122] : memref<1904x48xbf16, #tpu.memory_space<vmem>>, vector<11x11xbf16>
    %179 = vector.extract_strided_slice %163 {offsets = [0, 3], sizes = [11, 121], strides = [1, 1]} : vector<11x127xbf16> to vector<11x121xbf16>
    %cst_123 = arith.constant dense<0.000000e+00> : vector<11x121xf32>
    %180 = tpu.matmul %178, %179, %cst_123 {dimension_numbers = #tpu.dot_dimension_numbers<[1], [0], [0], [1], [0, 0, 1, 1], [], []>} : vector<11x11xbf16>, vector<11x121xbf16>, vector<11x121xf32> -> vector<11x121xf32>
    %181 = arith.addf %177, %180 : vector<11x121xf32>
    %c289 = arith.constant 289 : index
    %c0_124 = arith.constant 0 : index
    %182 = vector.load %arg2[%c289, %c0_124] : memref<1904x48xbf16, #tpu.memory_space<vmem>>, vector<11x11xbf16>
    %183 = vector.extract_strided_slice %163 {offsets = [0, 4], sizes = [11, 121], strides = [1, 1]} : vector<11x127xbf16> to vector<11x121xbf16>
    %cst_125 = arith.constant dense<0.000000e+00> : vector<11x121xf32>
    %184 = tpu.matmul %182, %183, %cst_125 {dimension_numbers = #tpu.dot_dimension_numbers<[1], [0], [0], [1], [0, 0, 1, 1], [], []>} : vector<11x11xbf16>, vector<11x121xbf16>, vector<11x121xf32> -> vector<11x121xf32>
    %185 = arith.addf %181, %184 : vector<11x121xf32>
    %c300 = arith.constant 300 : index
    %c0_126 = arith.constant 0 : index
    %186 = vector.load %arg2[%c300, %c0_126] : memref<1904x48xbf16, #tpu.memory_space<vmem>>, vector<11x11xbf16>
    %187 = vector.extract_strided_slice %163 {offsets = [0, 5], sizes = [11, 121], strides = [1, 1]} : vector<11x127xbf16> to vector<11x121xbf16>
    %cst_127 = arith.constant dense<0.000000e+00> : vector<11x121xf32>
    %188 = tpu.matmul %186, %187, %cst_127 {dimension_numbers = #tpu.dot_dimension_numbers<[1], [0], [0], [1], [0, 0, 1, 1], [], []>} : vector<11x11xbf16>, vector<11x121xbf16>, vector<11x121xf32> -> vector<11x121xf32>
    %189 = arith.addf %185, %188 : vector<11x121xf32>
    %c311 = arith.constant 311 : index
    %c0_128 = arith.constant 0 : index
    %190 = vector.load %arg2[%c311, %c0_128] : memref<1904x48xbf16, #tpu.memory_space<vmem>>, vector<11x11xbf16>
    %191 = vector.extract_strided_slice %163 {offsets = [0, 6], sizes = [11, 121], strides = [1, 1]} : vector<11x127xbf16> to vector<11x121xbf16>
    %cst_129 = arith.constant dense<0.000000e+00> : vector<11x121xf32>
    %192 = tpu.matmul %190, %191, %cst_129 {dimension_numbers = #tpu.dot_dimension_numbers<[1], [0], [0], [1], [0, 0, 1, 1], [], []>} : vector<11x11xbf16>, vector<11x121xbf16>, vector<11x121xf32> -> vector<11x121xf32>
    %193 = arith.addf %189, %192 : vector<11x121xf32>
    %cst_130 = arith.constant 0.000000e+00 : f32
    %194 = vector.broadcast %cst_130 : f32 to vector<11x121xf32>
    %195 = arith.maximumf %193, %194 : vector<11x121xf32>
    %196 = arith.truncf %195 : vector<11x121xf32> to vector<11x121xbf16>
    %c0_131 = arith.constant 0 : index
    %c0_132 = arith.constant 0 : index
    %197 = vector.load %arg5[%c0_131, %c0_132] : memref<121x31xbf16, #tpu.memory_space<vmem>>, vector<121x31xbf16>
    %cst_133 = arith.constant dense<0.000000e+00> : vector<11x31xf32>
    %198 = tpu.matmul %196, %197, %cst_133 {dimension_numbers = #tpu.dot_dimension_numbers<[1], [0], [0], [1], [0, 0, 1, 1], [], []>} : vector<11x121xbf16>, vector<121x31xbf16>, vector<11x31xf32> -> vector<11x31xf32>
    %199 = arith.truncf %198 : vector<11x31xf32> to vector<11x31xbf16>
    %c0_134 = arith.constant 0 : index
    %c8_135 = arith.constant 8 : index
    %200 = vector.load %arg11[%c0_134, %c8_135] : memref<48x640xbf16, #tpu.memory_space<vmem>>, vector<11x31xbf16>
    tpu.vector_store %arg11[%c0_134, %c8_135], %199 {strides = array<i32>} : memref<48x640xbf16, #tpu.memory_space<vmem>>, vector<11x31xbf16>,
    %cst_136 = arith.constant 0.000000e+00 : bf16
    %201 = vector.broadcast %cst_136 : bf16 to vector<11x8xbf16>
    %c0_137 = arith.constant 0 : index
    %c0_138 = arith.constant 0 : index
    %202 = vector.load %arg11[%c0_137, %c0_138] : memref<48x640xbf16, #tpu.memory_space<vmem>>, vector<11x8xbf16>
    tpu.vector_store %arg11[%c0_137, %c0_138], %201 {strides = array<i32>} : memref<48x640xbf16, #tpu.memory_space<vmem>>, vector<11x8xbf16>,
    %c0_139 = arith.constant 0 : index
    %c39 = arith.constant 39 : index
    %203 = vector.load %arg11[%c0_139, %c39] : memref<48x640xbf16, #tpu.memory_space<vmem>>, vector<11x8xbf16>
    tpu.vector_store %arg11[%c0_139, %c39], %201 {strides = array<i32>} : memref<48x640xbf16, #tpu.memory_space<vmem>>, vector<11x8xbf16>,
    %c0_140 = arith.constant 0 : index
    %c5_141 = arith.constant 5 : index
    %204 = vector.load %arg11[%c0_140, %c5_141] : memref<48x640xbf16, #tpu.memory_space<vmem>>, vector<11x37xbf16>
    %c322 = arith.constant 322 : index
    %c0_142 = arith.constant 0 : index
    %205 = vector.load %arg2[%c322, %c0_142] : memref<1904x48xbf16, #tpu.memory_space<vmem>>, vector<16x11xbf16>
    %206 = vector.extract_strided_slice %204 {offsets = [0, 0], sizes = [11, 31], strides = [1, 1]} : vector<11x37xbf16> to vector<11x31xbf16>
    %cst_143 = arith.constant dense<0.000000e+00> : vector<16x31xf32>
    %207 = tpu.matmul %205, %206, %cst_143 {dimension_numbers = #tpu.dot_dimension_numbers<[1], [0], [0], [1], [0, 0, 1, 1], [], []>} : vector<16x11xbf16>, vector<11x31xbf16>, vector<16x31xf32> -> vector<16x31xf32>
    %c46 = arith.constant 46 : index
    %c0_144 = arith.constant 0 : index
    %208 = vector.load %arg3[%c46, %c0_144] : memref<272x1xf32, #tpu.memory_space<vmem>>, vector<16x1xf32>
    %209 = vector.broadcast %208 : vector<16x1xf32> to vector<16x31xf32>
    %210 = arith.addf %207, %209 : vector<16x31xf32>
    %c338 = arith.constant 338 : index
    %c0_145 = arith.constant 0 : index
    %211 = vector.load %arg2[%c338, %c0_145] : memref<1904x48xbf16, #tpu.memory_space<vmem>>, vector<16x11xbf16>
    %212 = vector.extract_strided_slice %204 {offsets = [0, 1], sizes = [11, 31], strides = [1, 1]} : vector<11x37xbf16> to vector<11x31xbf16>
    %cst_146 = arith.constant dense<0.000000e+00> : vector<16x31xf32>
    %213 = tpu.matmul %211, %212, %cst_146 {dimension_numbers = #tpu.dot_dimension_numbers<[1], [0], [0], [1], [0, 0, 1, 1], [], []>} : vector<16x11xbf16>, vector<11x31xbf16>, vector<16x31xf32> -> vector<16x31xf32>
    %214 = arith.addf %210, %213 : vector<16x31xf32>
    %c354 = arith.constant 354 : index
    %c0_147 = arith.constant 0 : index
    %215 = vector.load %arg2[%c354, %c0_147] : memref<1904x48xbf16, #tpu.memory_space<vmem>>, vector<16x11xbf16>
    %216 = vector.extract_strided_slice %204 {offsets = [0, 2], sizes = [11, 31], strides = [1, 1]} : vector<11x37xbf16> to vector<11x31xbf16>
    %cst_148 = arith.constant dense<0.000000e+00> : vector<16x31xf32>
    %217 = tpu.matmul %215, %216, %cst_148 {dimension_numbers = #tpu.dot_dimension_numbers<[1], [0], [0], [1], [0, 0, 1, 1], [], []>} : vector<16x11xbf16>, vector<11x31xbf16>, vector<16x31xf32> -> vector<16x31xf32>
    %218 = arith.addf %214, %217 : vector<16x31xf32>
    %c370 = arith.constant 370 : index
    %c0_149 = arith.constant 0 : index
    %219 = vector.load %arg2[%c370, %c0_149] : memref<1904x48xbf16, #tpu.memory_space<vmem>>, vector<16x11xbf16>
    %220 = vector.extract_strided_slice %204 {offsets = [0, 3], sizes = [11, 31], strides = [1, 1]} : vector<11x37xbf16> to vector<11x31xbf16>
    %cst_150 = arith.constant dense<0.000000e+00> : vector<16x31xf32>
    %221 = tpu.matmul %219, %220, %cst_150 {dimension_numbers = #tpu.dot_dimension_numbers<[1], [0], [0], [1], [0, 0, 1, 1], [], []>} : vector<16x11xbf16>, vector<11x31xbf16>, vector<16x31xf32> -> vector<16x31xf32>
    %222 = arith.addf %218, %221 : vector<16x31xf32>
    %c386 = arith.constant 386 : index
    %c0_151 = arith.constant 0 : index
    %223 = vector.load %arg2[%c386, %c0_151] : memref<1904x48xbf16, #tpu.memory_space<vmem>>, vector<16x11xbf16>
    %224 = vector.extract_strided_slice %204 {offsets = [0, 4], sizes = [11, 31], strides = [1, 1]} : vector<11x37xbf16> to vector<11x31xbf16>
    %cst_152 = arith.constant dense<0.000000e+00> : vector<16x31xf32>
    %225 = tpu.matmul %223, %224, %cst_152 {dimension_numbers = #tpu.dot_dimension_numbers<[1], [0], [0], [1], [0, 0, 1, 1], [], []>} : vector<16x11xbf16>, vector<11x31xbf16>, vector<16x31xf32> -> vector<16x31xf32>
    %226 = arith.addf %222, %225 : vector<16x31xf32>
    %c402 = arith.constant 402 : index
    %c0_153 = arith.constant 0 : index
    %227 = vector.load %arg2[%c402, %c0_153] : memref<1904x48xbf16, #tpu.memory_space<vmem>>, vector<16x11xbf16>
    %228 = vector.extract_strided_slice %204 {offsets = [0, 5], sizes = [11, 31], strides = [1, 1]} : vector<11x37xbf16> to vector<11x31xbf16>
    %cst_154 = arith.constant dense<0.000000e+00> : vector<16x31xf32>
    %229 = tpu.matmul %227, %228, %cst_154 {dimension_numbers = #tpu.dot_dimension_numbers<[1], [0], [0], [1], [0, 0, 1, 1], [], []>} : vector<16x11xbf16>, vector<11x31xbf16>, vector<16x31xf32> -> vector<16x31xf32>
    %230 = arith.addf %226, %229 : vector<16x31xf32>
    %c418 = arith.constant 418 : index
    %c0_155 = arith.constant 0 : index
    %231 = vector.load %arg2[%c418, %c0_155] : memref<1904x48xbf16, #tpu.memory_space<vmem>>, vector<16x11xbf16>
    %232 = vector.extract_strided_slice %204 {offsets = [0, 6], sizes = [11, 31], strides = [1, 1]} : vector<11x37xbf16> to vector<11x31xbf16>
    %cst_156 = arith.constant dense<0.000000e+00> : vector<16x31xf32>
    %233 = tpu.matmul %231, %232, %cst_156 {dimension_numbers = #tpu.dot_dimension_numbers<[1], [0], [0], [1], [0, 0, 1, 1], [], []>} : vector<16x11xbf16>, vector<11x31xbf16>, vector<16x31xf32> -> vector<16x31xf32>
    %234 = arith.addf %230, %233 : vector<16x31xf32>
    %cst_157 = arith.constant 0.000000e+00 : f32
    %235 = vector.broadcast %cst_157 : f32 to vector<16x31xf32>
    %236 = arith.maximumf %234, %235 : vector<16x31xf32>
    %237 = arith.truncf %236 : vector<16x31xf32> to vector<16x31xbf16>
    %c0_158 = arith.constant 0 : index
    %c8_159 = arith.constant 8 : index
    %238 = vector.load %arg11[%c0_158, %c8_159] : memref<48x640xbf16, #tpu.memory_space<vmem>>, vector<16x31xbf16>
    tpu.vector_store %arg11[%c0_158, %c8_159], %237 {strides = array<i32>} : memref<48x640xbf16, #tpu.memory_space<vmem>>, vector<16x31xbf16>,
    %cst_160 = arith.constant 0.000000e+00 : bf16
    %239 = vector.broadcast %cst_160 : bf16 to vector<16x8xbf16>
    %c0_161 = arith.constant 0 : index
    %c0_162 = arith.constant 0 : index
    %240 = vector.load %arg11[%c0_161, %c0_162] : memref<48x640xbf16, #tpu.memory_space<vmem>>, vector<16x8xbf16>
    tpu.vector_store %arg11[%c0_161, %c0_162], %239 {strides = array<i32>} : memref<48x640xbf16, #tpu.memory_space<vmem>>, vector<16x8xbf16>,
    %c0_163 = arith.constant 0 : index
    %c39_164 = arith.constant 39 : index
    %241 = vector.load %arg11[%c0_163, %c39_164] : memref<48x640xbf16, #tpu.memory_space<vmem>>, vector<16x8xbf16>
    tpu.vector_store %arg11[%c0_163, %c39_164], %239 {strides = array<i32>} : memref<48x640xbf16, #tpu.memory_space<vmem>>, vector<16x8xbf16>,
    %c0_165 = arith.constant 0 : index
    %c8_166 = arith.constant 8 : index
    %242 = vector.load %arg11[%c0_165, %c8_166] : memref<48x640xbf16, #tpu.memory_space<vmem>>, vector<16x31xbf16>
    %c434 = arith.constant 434 : index
    %c0_167 = arith.constant 0 : index
    %243 = vector.load %arg2[%c434, %c0_167] : memref<1904x48xbf16, #tpu.memory_space<vmem>>, vector<16x16xbf16>
    %244 = vector.extract_strided_slice %242 {offsets = [0, 0], sizes = [16, 25], strides = [1, 1]} : vector<16x31xbf16> to vector<16x25xbf16>
    %cst_168 = arith.constant dense<0.000000e+00> : vector<16x25xf32>
    %245 = tpu.matmul %243, %244, %cst_168 {dimension_numbers = #tpu.dot_dimension_numbers<[1], [0], [0], [1], [0, 0, 1, 1], [], []>} : vector<16x16xbf16>, vector<16x25xbf16>, vector<16x25xf32> -> vector<16x25xf32>
    %c62 = arith.constant 62 : index
    %c0_169 = arith.constant 0 : index
    %246 = vector.load %arg3[%c62, %c0_169] : memref<272x1xf32, #tpu.memory_space<vmem>>, vector<16x1xf32>
    %247 = vector.broadcast %246 : vector<16x1xf32> to vector<16x25xf32>
    %248 = arith.addf %245, %247 : vector<16x25xf32>
    %c450 = arith.constant 450 : index
    %c0_170 = arith.constant 0 : index
    %249 = vector.load %arg2[%c450, %c0_170] : memref<1904x48xbf16, #tpu.memory_space<vmem>>, vector<16x16xbf16>
    %250 = vector.extract_strided_slice %242 {offsets = [0, 1], sizes = [16, 25], strides = [1, 1]} : vector<16x31xbf16> to vector<16x25xbf16>
    %cst_171 = arith.constant dense<0.000000e+00> : vector<16x25xf32>
    %251 = tpu.matmul %249, %250, %cst_171 {dimension_numbers = #tpu.dot_dimension_numbers<[1], [0], [0], [1], [0, 0, 1, 1], [], []>} : vector<16x16xbf16>, vector<16x25xbf16>, vector<16x25xf32> -> vector<16x25xf32>
    %252 = arith.addf %248, %251 : vector<16x25xf32>
    %c466 = arith.constant 466 : index
    %c0_172 = arith.constant 0 : index
    %253 = vector.load %arg2[%c466, %c0_172] : memref<1904x48xbf16, #tpu.memory_space<vmem>>, vector<16x16xbf16>
    %254 = vector.extract_strided_slice %242 {offsets = [0, 2], sizes = [16, 25], strides = [1, 1]} : vector<16x31xbf16> to vector<16x25xbf16>
    %cst_173 = arith.constant dense<0.000000e+00> : vector<16x25xf32>
    %255 = tpu.matmul %253, %254, %cst_173 {dimension_numbers = #tpu.dot_dimension_numbers<[1], [0], [0], [1], [0, 0, 1, 1], [], []>} : vector<16x16xbf16>, vector<16x25xbf16>, vector<16x25xf32> -> vector<16x25xf32>
    %256 = arith.addf %252, %255 : vector<16x25xf32>
    %c482 = arith.constant 482 : index
    %c0_174 = arith.constant 0 : index
    %257 = vector.load %arg2[%c482, %c0_174] : memref<1904x48xbf16, #tpu.memory_space<vmem>>, vector<16x16xbf16>
    %258 = vector.extract_strided_slice %242 {offsets = [0, 3], sizes = [16, 25], strides = [1, 1]} : vector<16x31xbf16> to vector<16x25xbf16>
    %cst_175 = arith.constant dense<0.000000e+00> : vector<16x25xf32>
    %259 = tpu.matmul %257, %258, %cst_175 {dimension_numbers = #tpu.dot_dimension_numbers<[1], [0], [0], [1], [0, 0, 1, 1], [], []>} : vector<16x16xbf16>, vector<16x25xbf16>, vector<16x25xf32> -> vector<16x25xf32>
    %260 = arith.addf %256, %259 : vector<16x25xf32>
    %c498 = arith.constant 498 : index
    %c0_176 = arith.constant 0 : index
    %261 = vector.load %arg2[%c498, %c0_176] : memref<1904x48xbf16, #tpu.memory_space<vmem>>, vector<16x16xbf16>
    %262 = vector.extract_strided_slice %242 {offsets = [0, 4], sizes = [16, 25], strides = [1, 1]} : vector<16x31xbf16> to vector<16x25xbf16>
    %cst_177 = arith.constant dense<0.000000e+00> : vector<16x25xf32>
    %263 = tpu.matmul %261, %262, %cst_177 {dimension_numbers = #tpu.dot_dimension_numbers<[1], [0], [0], [1], [0, 0, 1, 1], [], []>} : vector<16x16xbf16>, vector<16x25xbf16>, vector<16x25xf32> -> vector<16x25xf32>
    %264 = arith.addf %260, %263 : vector<16x25xf32>
    %c514 = arith.constant 514 : index
    %c0_178 = arith.constant 0 : index
    %265 = vector.load %arg2[%c514, %c0_178] : memref<1904x48xbf16, #tpu.memory_space<vmem>>, vector<16x16xbf16>
    %266 = vector.extract_strided_slice %242 {offsets = [0, 5], sizes = [16, 25], strides = [1, 1]} : vector<16x31xbf16> to vector<16x25xbf16>
    %cst_179 = arith.constant dense<0.000000e+00> : vector<16x25xf32>
    %267 = tpu.matmul %265, %266, %cst_179 {dimension_numbers = #tpu.dot_dimension_numbers<[1], [0], [0], [1], [0, 0, 1, 1], [], []>} : vector<16x16xbf16>, vector<16x25xbf16>, vector<16x25xf32> -> vector<16x25xf32>
    %268 = arith.addf %264, %267 : vector<16x25xf32>
    %c530 = arith.constant 530 : index
    %c0_180 = arith.constant 0 : index
    %269 = vector.load %arg2[%c530, %c0_180] : memref<1904x48xbf16, #tpu.memory_space<vmem>>, vector<16x16xbf16>
    %270 = vector.extract_strided_slice %242 {offsets = [0, 6], sizes = [16, 25], strides = [1, 1]} : vector<16x31xbf16> to vector<16x25xbf16>
    %cst_181 = arith.constant dense<0.000000e+00> : vector<16x25xf32>
    %271 = tpu.matmul %269, %270, %cst_181 {dimension_numbers = #tpu.dot_dimension_numbers<[1], [0], [0], [1], [0, 0, 1, 1], [], []>} : vector<16x16xbf16>, vector<16x25xbf16>, vector<16x25xf32> -> vector<16x25xf32>
    %272 = arith.addf %268, %271 : vector<16x25xf32>
    %cst_182 = arith.constant 0.000000e+00 : f32
    %273 = vector.broadcast %cst_182 : f32 to vector<16x25xf32>
    %274 = arith.maximumf %272, %273 : vector<16x25xf32>
    %275 = arith.truncf %274 : vector<16x25xf32> to vector<16x25xbf16>
    %c0_183 = arith.constant 0 : index
    %c0_184 = arith.constant 0 : index
    %276 = vector.load %arg6[%c0_183, %c0_184] : memref<25x7xbf16, #tpu.memory_space<vmem>>, vector<25x7xbf16>
    %cst_185 = arith.constant dense<0.000000e+00> : vector<16x7xf32>
    %277 = tpu.matmul %275, %276, %cst_185 {dimension_numbers = #tpu.dot_dimension_numbers<[1], [0], [0], [1], [0, 0, 1, 1], [], []>} : vector<16x25xbf16>, vector<25x7xbf16>, vector<16x7xf32> -> vector<16x7xf32>
    %278 = arith.truncf %277 : vector<16x7xf32> to vector<16x7xbf16>
    %c0_186 = arith.constant 0 : index
    %c8_187 = arith.constant 8 : index
    %279 = vector.load %arg11[%c0_186, %c8_187] : memref<48x640xbf16, #tpu.memory_space<vmem>>, vector<16x7xbf16>
    tpu.vector_store %arg11[%c0_186, %c8_187], %278 {strides = array<i32>} : memref<48x640xbf16, #tpu.memory_space<vmem>>, vector<16x7xbf16>,
    %cst_188 = arith.constant 0.000000e+00 : bf16
    %280 = vector.broadcast %cst_188 : bf16 to vector<16x8xbf16>
    %c0_189 = arith.constant 0 : index
    %c0_190 = arith.constant 0 : index
    %281 = vector.load %arg11[%c0_189, %c0_190] : memref<48x640xbf16, #tpu.memory_space<vmem>>, vector<16x8xbf16>
    tpu.vector_store %arg11[%c0_189, %c0_190], %280 {strides = array<i32>} : memref<48x640xbf16, #tpu.memory_space<vmem>>, vector<16x8xbf16>,
    %c0_191 = arith.constant 0 : index
    %c15 = arith.constant 15 : index
    %282 = vector.load %arg11[%c0_191, %c15] : memref<48x640xbf16, #tpu.memory_space<vmem>>, vector<16x8xbf16>
    tpu.vector_store %arg11[%c0_191, %c15], %280 {strides = array<i32>} : memref<48x640xbf16, #tpu.memory_space<vmem>>, vector<16x8xbf16>,
    %c0_192 = arith.constant 0 : index
    %c5_193 = arith.constant 5 : index
    %283 = vector.load %arg11[%c0_192, %c5_193] : memref<48x640xbf16, #tpu.memory_space<vmem>>, vector<16x13xbf16>
    %c546 = arith.constant 546 : index
    %c0_194 = arith.constant 0 : index
    %284 = vector.load %arg2[%c546, %c0_194] : memref<1904x48xbf16, #tpu.memory_space<vmem>>, vector<22x16xbf16>
    %285 = vector.extract_strided_slice %283 {offsets = [0, 0], sizes = [16, 7], strides = [1, 1]} : vector<16x13xbf16> to vector<16x7xbf16>
    %cst_195 = arith.constant dense<0.000000e+00> : vector<22x7xf32>
    %286 = tpu.matmul %284, %285, %cst_195 {dimension_numbers = #tpu.dot_dimension_numbers<[1], [0], [0], [1], [0, 0, 1, 1], [], []>} : vector<22x16xbf16>, vector<16x7xbf16>, vector<22x7xf32> -> vector<22x7xf32>
    %c78 = arith.constant 78 : index
    %c0_196 = arith.constant 0 : index
    %287 = vector.load %arg3[%c78, %c0_196] : memref<272x1xf32, #tpu.memory_space<vmem>>, vector<22x1xf32>
    %288 = vector.broadcast %287 : vector<22x1xf32> to vector<22x7xf32>
    %289 = arith.addf %286, %288 : vector<22x7xf32>
    %c568 = arith.constant 568 : index
    %c0_197 = arith.constant 0 : index
    %290 = vector.load %arg2[%c568, %c0_197] : memref<1904x48xbf16, #tpu.memory_space<vmem>>, vector<22x16xbf16>
    %291 = vector.extract_strided_slice %283 {offsets = [0, 1], sizes = [16, 7], strides = [1, 1]} : vector<16x13xbf16> to vector<16x7xbf16>
    %cst_198 = arith.constant dense<0.000000e+00> : vector<22x7xf32>
    %292 = tpu.matmul %290, %291, %cst_198 {dimension_numbers = #tpu.dot_dimension_numbers<[1], [0], [0], [1], [0, 0, 1, 1], [], []>} : vector<22x16xbf16>, vector<16x7xbf16>, vector<22x7xf32> -> vector<22x7xf32>
    %293 = arith.addf %289, %292 : vector<22x7xf32>
    %c590 = arith.constant 590 : index
    %c0_199 = arith.constant 0 : index
    %294 = vector.load %arg2[%c590, %c0_199] : memref<1904x48xbf16, #tpu.memory_space<vmem>>, vector<22x16xbf16>
    %295 = vector.extract_strided_slice %283 {offsets = [0, 2], sizes = [16, 7], strides = [1, 1]} : vector<16x13xbf16> to vector<16x7xbf16>
    %cst_200 = arith.constant dense<0.000000e+00> : vector<22x7xf32>
    %296 = tpu.matmul %294, %295, %cst_200 {dimension_numbers = #tpu.dot_dimension_numbers<[1], [0], [0], [1], [0, 0, 1, 1], [], []>} : vector<22x16xbf16>, vector<16x7xbf16>, vector<22x7xf32> -> vector<22x7xf32>
    %297 = arith.addf %293, %296 : vector<22x7xf32>
    %c612 = arith.constant 612 : index
    %c0_201 = arith.constant 0 : index
    %298 = vector.load %arg2[%c612, %c0_201] : memref<1904x48xbf16, #tpu.memory_space<vmem>>, vector<22x16xbf16>
    %299 = vector.extract_strided_slice %283 {offsets = [0, 3], sizes = [16, 7], strides = [1, 1]} : vector<16x13xbf16> to vector<16x7xbf16>
    %cst_202 = arith.constant dense<0.000000e+00> : vector<22x7xf32>
    %300 = tpu.matmul %298, %299, %cst_202 {dimension_numbers = #tpu.dot_dimension_numbers<[1], [0], [0], [1], [0, 0, 1, 1], [], []>} : vector<22x16xbf16>, vector<16x7xbf16>, vector<22x7xf32> -> vector<22x7xf32>
    %301 = arith.addf %297, %300 : vector<22x7xf32>
    %c634 = arith.constant 634 : index
    %c0_203 = arith.constant 0 : index
    %302 = vector.load %arg2[%c634, %c0_203] : memref<1904x48xbf16, #tpu.memory_space<vmem>>, vector<22x16xbf16>
    %303 = vector.extract_strided_slice %283 {offsets = [0, 4], sizes = [16, 7], strides = [1, 1]} : vector<16x13xbf16> to vector<16x7xbf16>
    %cst_204 = arith.constant dense<0.000000e+00> : vector<22x7xf32>
    %304 = tpu.matmul %302, %303, %cst_204 {dimension_numbers = #tpu.dot_dimension_numbers<[1], [0], [0], [1], [0, 0, 1, 1], [], []>} : vector<22x16xbf16>, vector<16x7xbf16>, vector<22x7xf32> -> vector<22x7xf32>
    %305 = arith.addf %301, %304 : vector<22x7xf32>
    %c656 = arith.constant 656 : index
    %c0_205 = arith.constant 0 : index
    %306 = vector.load %arg2[%c656, %c0_205] : memref<1904x48xbf16, #tpu.memory_space<vmem>>, vector<22x16xbf16>
    %307 = vector.extract_strided_slice %283 {offsets = [0, 5], sizes = [16, 7], strides = [1, 1]} : vector<16x13xbf16> to vector<16x7xbf16>
    %cst_206 = arith.constant dense<0.000000e+00> : vector<22x7xf32>
    %308 = tpu.matmul %306, %307, %cst_206 {dimension_numbers = #tpu.dot_dimension_numbers<[1], [0], [0], [1], [0, 0, 1, 1], [], []>} : vector<22x16xbf16>, vector<16x7xbf16>, vector<22x7xf32> -> vector<22x7xf32>
    %309 = arith.addf %305, %308 : vector<22x7xf32>
    %c678 = arith.constant 678 : index
    %c0_207 = arith.constant 0 : index
    %310 = vector.load %arg2[%c678, %c0_207] : memref<1904x48xbf16, #tpu.memory_space<vmem>>, vector<22x16xbf16>
    %311 = vector.extract_strided_slice %283 {offsets = [0, 6], sizes = [16, 7], strides = [1, 1]} : vector<16x13xbf16> to vector<16x7xbf16>
    %cst_208 = arith.constant dense<0.000000e+00> : vector<22x7xf32>
    %312 = tpu.matmul %310, %311, %cst_208 {dimension_numbers = #tpu.dot_dimension_numbers<[1], [0], [0], [1], [0, 0, 1, 1], [], []>} : vector<22x16xbf16>, vector<16x7xbf16>, vector<22x7xf32> -> vector<22x7xf32>
    %313 = arith.addf %309, %312 : vector<22x7xf32>
    %cst_209 = arith.constant 0.000000e+00 : f32
    %314 = vector.broadcast %cst_209 : f32 to vector<22x7xf32>
    %315 = arith.maximumf %313, %314 : vector<22x7xf32>
    %316 = arith.truncf %315 : vector<22x7xf32> to vector<22x7xbf16>
    %c0_210 = arith.constant 0 : index
    %c8_211 = arith.constant 8 : index
    %317 = vector.load %arg11[%c0_210, %c8_211] : memref<48x640xbf16, #tpu.memory_space<vmem>>, vector<22x7xbf16>
    tpu.vector_store %arg11[%c0_210, %c8_211], %316 {strides = array<i32>} : memref<48x640xbf16, #tpu.memory_space<vmem>>, vector<22x7xbf16>,
    %cst_212 = arith.constant 0.000000e+00 : bf16
    %318 = vector.broadcast %cst_212 : bf16 to vector<22x8xbf16>
    %c0_213 = arith.constant 0 : index
    %c0_214 = arith.constant 0 : index
    %319 = vector.load %arg11[%c0_213, %c0_214] : memref<48x640xbf16, #tpu.memory_space<vmem>>, vector<22x8xbf16>
    tpu.vector_store %arg11[%c0_213, %c0_214], %318 {strides = array<i32>} : memref<48x640xbf16, #tpu.memory_space<vmem>>, vector<22x8xbf16>,
    %c0_215 = arith.constant 0 : index
    %c15_216 = arith.constant 15 : index
    %320 = vector.load %arg11[%c0_215, %c15_216] : memref<48x640xbf16, #tpu.memory_space<vmem>>, vector<22x8xbf16>
    tpu.vector_store %arg11[%c0_215, %c15_216], %318 {strides = array<i32>} : memref<48x640xbf16, #tpu.memory_space<vmem>>, vector<22x8xbf16>,
    %c0_217 = arith.constant 0 : index
    %c8_218 = arith.constant 8 : index
    %321 = vector.load %arg11[%c0_217, %c8_218] : memref<48x640xbf16, #tpu.memory_space<vmem>>, vector<22x7xbf16>
    %c700 = arith.constant 700 : index
    %c0_219 = arith.constant 0 : index
    %322 = vector.load %arg2[%c700, %c0_219] : memref<1904x48xbf16, #tpu.memory_space<vmem>>, vector<22x22xbf16>
    %323 = vector.extract_strided_slice %321 {offsets = [0, 0], sizes = [22, 1], strides = [1, 1]} : vector<22x7xbf16> to vector<22x1xbf16>
    %cst_220 = arith.constant dense<0.000000e+00> : vector<22x1xf32>
    %324 = tpu.matmul %322, %323, %cst_220 {dimension_numbers = #tpu.dot_dimension_numbers<[1], [0], [0], [1], [0, 0, 1, 1], [], []>} : vector<22x22xbf16>, vector<22x1xbf16>, vector<22x1xf32> -> vector<22x1xf32>
    %c100 = arith.constant 100 : index
    %c0_221 = arith.constant 0 : index
    %325 = vector.load %arg3[%c100, %c0_221] : memref<272x1xf32, #tpu.memory_space<vmem>>, vector<22x1xf32>
    %326 = arith.addf %324, %325 : vector<22x1xf32>
    %c722 = arith.constant 722 : index
    %c0_222 = arith.constant 0 : index
    %327 = vector.load %arg2[%c722, %c0_222] : memref<1904x48xbf16, #tpu.memory_space<vmem>>, vector<22x22xbf16>
    %328 = vector.extract_strided_slice %321 {offsets = [0, 1], sizes = [22, 1], strides = [1, 1]} : vector<22x7xbf16> to vector<22x1xbf16>
    %cst_223 = arith.constant dense<0.000000e+00> : vector<22x1xf32>
    %329 = tpu.matmul %327, %328, %cst_223 {dimension_numbers = #tpu.dot_dimension_numbers<[1], [0], [0], [1], [0, 0, 1, 1], [], []>} : vector<22x22xbf16>, vector<22x1xbf16>, vector<22x1xf32> -> vector<22x1xf32>
    %330 = arith.addf %326, %329 : vector<22x1xf32>
    %c744 = arith.constant 744 : index
    %c0_224 = arith.constant 0 : index
    %331 = vector.load %arg2[%c744, %c0_224] : memref<1904x48xbf16, #tpu.memory_space<vmem>>, vector<22x22xbf16>
    %332 = vector.extract_strided_slice %321 {offsets = [0, 2], sizes = [22, 1], strides = [1, 1]} : vector<22x7xbf16> to vector<22x1xbf16>
    %cst_225 = arith.constant dense<0.000000e+00> : vector<22x1xf32>
    %333 = tpu.matmul %331, %332, %cst_225 {dimension_numbers = #tpu.dot_dimension_numbers<[1], [0], [0], [1], [0, 0, 1, 1], [], []>} : vector<22x22xbf16>, vector<22x1xbf16>, vector<22x1xf32> -> vector<22x1xf32>
    %334 = arith.addf %330, %333 : vector<22x1xf32>
    %c766 = arith.constant 766 : index
    %c0_226 = arith.constant 0 : index
    %335 = vector.load %arg2[%c766, %c0_226] : memref<1904x48xbf16, #tpu.memory_space<vmem>>, vector<22x22xbf16>
    %336 = vector.extract_strided_slice %321 {offsets = [0, 3], sizes = [22, 1], strides = [1, 1]} : vector<22x7xbf16> to vector<22x1xbf16>
    %cst_227 = arith.constant dense<0.000000e+00> : vector<22x1xf32>
    %337 = tpu.matmul %335, %336, %cst_227 {dimension_numbers = #tpu.dot_dimension_numbers<[1], [0], [0], [1], [0, 0, 1, 1], [], []>} : vector<22x22xbf16>, vector<22x1xbf16>, vector<22x1xf32> -> vector<22x1xf32>
    %338 = arith.addf %334, %337 : vector<22x1xf32>
    %c788 = arith.constant 788 : index
    %c0_228 = arith.constant 0 : index
    %339 = vector.load %arg2[%c788, %c0_228] : memref<1904x48xbf16, #tpu.memory_space<vmem>>, vector<22x22xbf16>
    %340 = vector.extract_strided_slice %321 {offsets = [0, 4], sizes = [22, 1], strides = [1, 1]} : vector<22x7xbf16> to vector<22x1xbf16>
    %cst_229 = arith.constant dense<0.000000e+00> : vector<22x1xf32>
    %341 = tpu.matmul %339, %340, %cst_229 {dimension_numbers = #tpu.dot_dimension_numbers<[1], [0], [0], [1], [0, 0, 1, 1], [], []>} : vector<22x22xbf16>, vector<22x1xbf16>, vector<22x1xf32> -> vector<22x1xf32>
    %342 = arith.addf %338, %341 : vector<22x1xf32>
    %c810 = arith.constant 810 : index
    %c0_230 = arith.constant 0 : index
    %343 = vector.load %arg2[%c810, %c0_230] : memref<1904x48xbf16, #tpu.memory_space<vmem>>, vector<22x22xbf16>
    %344 = vector.extract_strided_slice %321 {offsets = [0, 5], sizes = [22, 1], strides = [1, 1]} : vector<22x7xbf16> to vector<22x1xbf16>
    %cst_231 = arith.constant dense<0.000000e+00> : vector<22x1xf32>
    %345 = tpu.matmul %343, %344, %cst_231 {dimension_numbers = #tpu.dot_dimension_numbers<[1], [0], [0], [1], [0, 0, 1, 1], [], []>} : vector<22x22xbf16>, vector<22x1xbf16>, vector<22x1xf32> -> vector<22x1xf32>
    %346 = arith.addf %342, %345 : vector<22x1xf32>
    %c832 = arith.constant 832 : index
    %c0_232 = arith.constant 0 : index
    %347 = vector.load %arg2[%c832, %c0_232] : memref<1904x48xbf16, #tpu.memory_space<vmem>>, vector<22x22xbf16>
    %348 = vector.extract_strided_slice %321 {offsets = [0, 6], sizes = [22, 1], strides = [1, 1]} : vector<22x7xbf16> to vector<22x1xbf16>
    %cst_233 = arith.constant dense<0.000000e+00> : vector<22x1xf32>
    %349 = tpu.matmul %347, %348, %cst_233 {dimension_numbers = #tpu.dot_dimension_numbers<[1], [0], [0], [1], [0, 0, 1, 1], [], []>} : vector<22x22xbf16>, vector<22x1xbf16>, vector<22x1xf32> -> vector<22x1xf32>
    %350 = arith.addf %346, %349 : vector<22x1xf32>
    %cst_234 = arith.constant 0.000000e+00 : f32
    %351 = vector.broadcast %cst_234 : f32 to vector<22x1xf32>
    %352 = arith.maximumf %350, %351 : vector<22x1xf32>
    %353 = arith.truncf %352 : vector<22x1xf32> to vector<22x1xbf16>
    %c0_235 = arith.constant 0 : index
    %c8_236 = arith.constant 8 : index
    %354 = vector.load %arg11[%c0_235, %c8_236] : memref<48x640xbf16, #tpu.memory_space<vmem>>, vector<22x1xbf16>
    tpu.vector_store %arg11[%c0_235, %c8_236], %353 {strides = array<i32>} : memref<48x640xbf16, #tpu.memory_space<vmem>>, vector<22x1xbf16>,
    %cst_237 = arith.constant 0.000000e+00 : bf16
    %355 = vector.broadcast %cst_237 : bf16 to vector<22x8xbf16>
    %c0_238 = arith.constant 0 : index
    %c0_239 = arith.constant 0 : index
    %356 = vector.load %arg11[%c0_238, %c0_239] : memref<48x640xbf16, #tpu.memory_space<vmem>>, vector<22x8xbf16>
    tpu.vector_store %arg11[%c0_238, %c0_239], %355 {strides = array<i32>} : memref<48x640xbf16, #tpu.memory_space<vmem>>, vector<22x8xbf16>,
    %c0_240 = arith.constant 0 : index
    %c9 = arith.constant 9 : index
    %357 = vector.load %arg11[%c0_240, %c9] : memref<48x640xbf16, #tpu.memory_space<vmem>>, vector<22x8xbf16>
    tpu.vector_store %arg11[%c0_240, %c9], %355 {strides = array<i32>} : memref<48x640xbf16, #tpu.memory_space<vmem>>, vector<22x8xbf16>,
    %c0_241 = arith.constant 0 : index
    %c5_242 = arith.constant 5 : index
    %358 = vector.load %arg11[%c0_241, %c5_242] : memref<48x640xbf16, #tpu.memory_space<vmem>>, vector<22x7xbf16>
    %c854 = arith.constant 854 : index
    %c0_243 = arith.constant 0 : index
    %359 = vector.load %arg2[%c854, %c0_243] : memref<1904x48xbf16, #tpu.memory_space<vmem>>, vector<32x22xbf16>
    %360 = vector.extract_strided_slice %358 {offsets = [0, 0], sizes = [22, 1], strides = [1, 1]} : vector<22x7xbf16> to vector<22x1xbf16>
    %cst_244 = arith.constant dense<0.000000e+00> : vector<32x1xf32>
    %361 = tpu.matmul %359, %360, %cst_244 {dimension_numbers = #tpu.dot_dimension_numbers<[1], [0], [0], [1], [0, 0, 1, 1], [], []>} : vector<32x22xbf16>, vector<22x1xbf16>, vector<32x1xf32> -> vector<32x1xf32>
    %c122 = arith.constant 122 : index
    %c0_245 = arith.constant 0 : index
    %362 = vector.load %arg3[%c122, %c0_245] : memref<272x1xf32, #tpu.memory_space<vmem>>, vector<32x1xf32>
    %363 = arith.addf %361, %362 : vector<32x1xf32>
    %c886 = arith.constant 886 : index
    %c0_246 = arith.constant 0 : index
    %364 = vector.load %arg2[%c886, %c0_246] : memref<1904x48xbf16, #tpu.memory_space<vmem>>, vector<32x22xbf16>
    %365 = vector.extract_strided_slice %358 {offsets = [0, 1], sizes = [22, 1], strides = [1, 1]} : vector<22x7xbf16> to vector<22x1xbf16>
    %cst_247 = arith.constant dense<0.000000e+00> : vector<32x1xf32>
    %366 = tpu.matmul %364, %365, %cst_247 {dimension_numbers = #tpu.dot_dimension_numbers<[1], [0], [0], [1], [0, 0, 1, 1], [], []>} : vector<32x22xbf16>, vector<22x1xbf16>, vector<32x1xf32> -> vector<32x1xf32>
    %367 = arith.addf %363, %366 : vector<32x1xf32>
    %c918 = arith.constant 918 : index
    %c0_248 = arith.constant 0 : index
    %368 = vector.load %arg2[%c918, %c0_248] : memref<1904x48xbf16, #tpu.memory_space<vmem>>, vector<32x22xbf16>
    %369 = vector.extract_strided_slice %358 {offsets = [0, 2], sizes = [22, 1], strides = [1, 1]} : vector<22x7xbf16> to vector<22x1xbf16>
    %cst_249 = arith.constant dense<0.000000e+00> : vector<32x1xf32>
    %370 = tpu.matmul %368, %369, %cst_249 {dimension_numbers = #tpu.dot_dimension_numbers<[1], [0], [0], [1], [0, 0, 1, 1], [], []>} : vector<32x22xbf16>, vector<22x1xbf16>, vector<32x1xf32> -> vector<32x1xf32>
    %371 = arith.addf %367, %370 : vector<32x1xf32>
    %c950 = arith.constant 950 : index
    %c0_250 = arith.constant 0 : index
    %372 = vector.load %arg2[%c950, %c0_250] : memref<1904x48xbf16, #tpu.memory_space<vmem>>, vector<32x22xbf16>
    %373 = vector.extract_strided_slice %358 {offsets = [0, 3], sizes = [22, 1], strides = [1, 1]} : vector<22x7xbf16> to vector<22x1xbf16>
    %cst_251 = arith.constant dense<0.000000e+00> : vector<32x1xf32>
    %374 = tpu.matmul %372, %373, %cst_251 {dimension_numbers = #tpu.dot_dimension_numbers<[1], [0], [0], [1], [0, 0, 1, 1], [], []>} : vector<32x22xbf16>, vector<22x1xbf16>, vector<32x1xf32> -> vector<32x1xf32>
    %375 = arith.addf %371, %374 : vector<32x1xf32>
    %c982 = arith.constant 982 : index
    %c0_252 = arith.constant 0 : index
    %376 = vector.load %arg2[%c982, %c0_252] : memref<1904x48xbf16, #tpu.memory_space<vmem>>, vector<32x22xbf16>
    %377 = vector.extract_strided_slice %358 {offsets = [0, 4], sizes = [22, 1], strides = [1, 1]} : vector<22x7xbf16> to vector<22x1xbf16>
    %cst_253 = arith.constant dense<0.000000e+00> : vector<32x1xf32>
    %378 = tpu.matmul %376, %377, %cst_253 {dimension_numbers = #tpu.dot_dimension_numbers<[1], [0], [0], [1], [0, 0, 1, 1], [], []>} : vector<32x22xbf16>, vector<22x1xbf16>, vector<32x1xf32> -> vector<32x1xf32>
    %379 = arith.addf %375, %378 : vector<32x1xf32>
    %c1014 = arith.constant 1014 : index
    %c0_254 = arith.constant 0 : index
    %380 = vector.load %arg2[%c1014, %c0_254] : memref<1904x48xbf16, #tpu.memory_space<vmem>>, vector<32x22xbf16>
    %381 = vector.extract_strided_slice %358 {offsets = [0, 5], sizes = [22, 1], strides = [1, 1]} : vector<22x7xbf16> to vector<22x1xbf16>
    %cst_255 = arith.constant dense<0.000000e+00> : vector<32x1xf32>
    %382 = tpu.matmul %380, %381, %cst_255 {dimension_numbers = #tpu.dot_dimension_numbers<[1], [0], [0], [1], [0, 0, 1, 1], [], []>} : vector<32x22xbf16>, vector<22x1xbf16>, vector<32x1xf32> -> vector<32x1xf32>
    %383 = arith.addf %379, %382 : vector<32x1xf32>
    %c1046 = arith.constant 1046 : index
    %c0_256 = arith.constant 0 : index
    %384 = vector.load %arg2[%c1046, %c0_256] : memref<1904x48xbf16, #tpu.memory_space<vmem>>, vector<32x22xbf16>
    %385 = vector.extract_strided_slice %358 {offsets = [0, 6], sizes = [22, 1], strides = [1, 1]} : vector<22x7xbf16> to vector<22x1xbf16>
    %cst_257 = arith.constant dense<0.000000e+00> : vector<32x1xf32>
    %386 = tpu.matmul %384, %385, %cst_257 {dimension_numbers = #tpu.dot_dimension_numbers<[1], [0], [0], [1], [0, 0, 1, 1], [], []>} : vector<32x22xbf16>, vector<22x1xbf16>, vector<32x1xf32> -> vector<32x1xf32>
    %387 = arith.addf %383, %386 : vector<32x1xf32>
    %cst_258 = arith.constant 0.000000e+00 : f32
    %388 = vector.broadcast %cst_258 : f32 to vector<32x1xf32>
    %389 = arith.maximumf %387, %388 : vector<32x1xf32>
    %390 = arith.truncf %389 : vector<32x1xf32> to vector<32x1xbf16>
    %c0_259 = arith.constant 0 : index
    %c8_260 = arith.constant 8 : index
    %391 = vector.load %arg11[%c0_259, %c8_260] : memref<48x640xbf16, #tpu.memory_space<vmem>>, vector<32x1xbf16>
    tpu.vector_store %arg11[%c0_259, %c8_260], %390 {strides = array<i32>} : memref<48x640xbf16, #tpu.memory_space<vmem>>, vector<32x1xbf16>,
    %cst_261 = arith.constant 0.000000e+00 : bf16
    %392 = vector.broadcast %cst_261 : bf16 to vector<32x8xbf16>
    %c0_262 = arith.constant 0 : index
    %c0_263 = arith.constant 0 : index
    %393 = vector.load %arg11[%c0_262, %c0_263] : memref<48x640xbf16, #tpu.memory_space<vmem>>, vector<32x8xbf16>
    tpu.vector_store %arg11[%c0_262, %c0_263], %392 {strides = array<i32>} : memref<48x640xbf16, #tpu.memory_space<vmem>>, vector<32x8xbf16>,
    %c0_264 = arith.constant 0 : index
    %c9_265 = arith.constant 9 : index
    %394 = vector.load %arg11[%c0_264, %c9_265] : memref<48x640xbf16, #tpu.memory_space<vmem>>, vector<32x8xbf16>
    tpu.vector_store %arg11[%c0_264, %c9_265], %392 {strides = array<i32>} : memref<48x640xbf16, #tpu.memory_space<vmem>>, vector<32x8xbf16>,
    %c0_266 = arith.constant 0 : index
    %c2 = arith.constant 2 : index
    %395 = vector.load %arg11[%c0_266, %c2] : memref<48x640xbf16, #tpu.memory_space<vmem>>, vector<32x13xbf16>
    %c1078 = arith.constant 1078 : index
    %c0_267 = arith.constant 0 : index
    %396 = vector.load %arg2[%c1078, %c0_267] : memref<1904x48xbf16, #tpu.memory_space<vmem>>, vector<22x32xbf16>
    %397 = vector.extract_strided_slice %395 {offsets = [0, 0], sizes = [32, 7], strides = [1, 1]} : vector<32x13xbf16> to vector<32x7xbf16>
    %cst_268 = arith.constant dense<0.000000e+00> : vector<22x7xf32>
    %398 = tpu.matmul %396, %397, %cst_268 {dimension_numbers = #tpu.dot_dimension_numbers<[1], [0], [0], [1], [0, 0, 1, 1], [], []>} : vector<22x32xbf16>, vector<32x7xbf16>, vector<22x7xf32> -> vector<22x7xf32>
    %c154 = arith.constant 154 : index
    %c0_269 = arith.constant 0 : index
    %399 = vector.load %arg3[%c154, %c0_269] : memref<272x1xf32, #tpu.memory_space<vmem>>, vector<22x1xf32>
    %400 = vector.broadcast %399 : vector<22x1xf32> to vector<22x7xf32>
    %401 = arith.addf %398, %400 : vector<22x7xf32>
    %c1100 = arith.constant 1100 : index
    %c0_270 = arith.constant 0 : index
    %402 = vector.load %arg2[%c1100, %c0_270] : memref<1904x48xbf16, #tpu.memory_space<vmem>>, vector<22x32xbf16>
    %403 = vector.extract_strided_slice %395 {offsets = [0, 1], sizes = [32, 7], strides = [1, 1]} : vector<32x13xbf16> to vector<32x7xbf16>
    %cst_271 = arith.constant dense<0.000000e+00> : vector<22x7xf32>
    %404 = tpu.matmul %402, %403, %cst_271 {dimension_numbers = #tpu.dot_dimension_numbers<[1], [0], [0], [1], [0, 0, 1, 1], [], []>} : vector<22x32xbf16>, vector<32x7xbf16>, vector<22x7xf32> -> vector<22x7xf32>
    %405 = arith.addf %401, %404 : vector<22x7xf32>
    %c1122 = arith.constant 1122 : index
    %c0_272 = arith.constant 0 : index
    %406 = vector.load %arg2[%c1122, %c0_272] : memref<1904x48xbf16, #tpu.memory_space<vmem>>, vector<22x32xbf16>
    %407 = vector.extract_strided_slice %395 {offsets = [0, 2], sizes = [32, 7], strides = [1, 1]} : vector<32x13xbf16> to vector<32x7xbf16>
    %cst_273 = arith.constant dense<0.000000e+00> : vector<22x7xf32>
    %408 = tpu.matmul %406, %407, %cst_273 {dimension_numbers = #tpu.dot_dimension_numbers<[1], [0], [0], [1], [0, 0, 1, 1], [], []>} : vector<22x32xbf16>, vector<32x7xbf16>, vector<22x7xf32> -> vector<22x7xf32>
    %409 = arith.addf %405, %408 : vector<22x7xf32>
    %c1144 = arith.constant 1144 : index
    %c0_274 = arith.constant 0 : index
    %410 = vector.load %arg2[%c1144, %c0_274] : memref<1904x48xbf16, #tpu.memory_space<vmem>>, vector<22x32xbf16>
    %411 = vector.extract_strided_slice %395 {offsets = [0, 3], sizes = [32, 7], strides = [1, 1]} : vector<32x13xbf16> to vector<32x7xbf16>
    %cst_275 = arith.constant dense<0.000000e+00> : vector<22x7xf32>
    %412 = tpu.matmul %410, %411, %cst_275 {dimension_numbers = #tpu.dot_dimension_numbers<[1], [0], [0], [1], [0, 0, 1, 1], [], []>} : vector<22x32xbf16>, vector<32x7xbf16>, vector<22x7xf32> -> vector<22x7xf32>
    %413 = arith.addf %409, %412 : vector<22x7xf32>
    %c1166 = arith.constant 1166 : index
    %c0_276 = arith.constant 0 : index
    %414 = vector.load %arg2[%c1166, %c0_276] : memref<1904x48xbf16, #tpu.memory_space<vmem>>, vector<22x32xbf16>
    %415 = vector.extract_strided_slice %395 {offsets = [0, 4], sizes = [32, 7], strides = [1, 1]} : vector<32x13xbf16> to vector<32x7xbf16>
    %cst_277 = arith.constant dense<0.000000e+00> : vector<22x7xf32>
    %416 = tpu.matmul %414, %415, %cst_277 {dimension_numbers = #tpu.dot_dimension_numbers<[1], [0], [0], [1], [0, 0, 1, 1], [], []>} : vector<22x32xbf16>, vector<32x7xbf16>, vector<22x7xf32> -> vector<22x7xf32>
    %417 = arith.addf %413, %416 : vector<22x7xf32>
    %c1188 = arith.constant 1188 : index
    %c0_278 = arith.constant 0 : index
    %418 = vector.load %arg2[%c1188, %c0_278] : memref<1904x48xbf16, #tpu.memory_space<vmem>>, vector<22x32xbf16>
    %419 = vector.extract_strided_slice %395 {offsets = [0, 5], sizes = [32, 7], strides = [1, 1]} : vector<32x13xbf16> to vector<32x7xbf16>
    %cst_279 = arith.constant dense<0.000000e+00> : vector<22x7xf32>
    %420 = tpu.matmul %418, %419, %cst_279 {dimension_numbers = #tpu.dot_dimension_numbers<[1], [0], [0], [1], [0, 0, 1, 1], [], []>} : vector<22x32xbf16>, vector<32x7xbf16>, vector<22x7xf32> -> vector<22x7xf32>
    %421 = arith.addf %417, %420 : vector<22x7xf32>
    %c1210 = arith.constant 1210 : index
    %c0_280 = arith.constant 0 : index
    %422 = vector.load %arg2[%c1210, %c0_280] : memref<1904x48xbf16, #tpu.memory_space<vmem>>, vector<22x32xbf16>
    %423 = vector.extract_strided_slice %395 {offsets = [0, 6], sizes = [32, 7], strides = [1, 1]} : vector<32x13xbf16> to vector<32x7xbf16>
    %cst_281 = arith.constant dense<0.000000e+00> : vector<22x7xf32>
    %424 = tpu.matmul %422, %423, %cst_281 {dimension_numbers = #tpu.dot_dimension_numbers<[1], [0], [0], [1], [0, 0, 1, 1], [], []>} : vector<22x32xbf16>, vector<32x7xbf16>, vector<22x7xf32> -> vector<22x7xf32>
    %425 = arith.addf %421, %424 : vector<22x7xf32>
    %cst_282 = arith.constant 0.000000e+00 : f32
    %426 = vector.broadcast %cst_282 : f32 to vector<22x7xf32>
    %427 = arith.maximumf %425, %426 : vector<22x7xf32>
    %428 = arith.truncf %427 : vector<22x7xf32> to vector<22x7xbf16>
    %c0_283 = arith.constant 0 : index
    %c8_284 = arith.constant 8 : index
    %429 = vector.load %arg11[%c0_283, %c8_284] : memref<48x640xbf16, #tpu.memory_space<vmem>>, vector<22x7xbf16>
    tpu.vector_store %arg11[%c0_283, %c8_284], %428 {strides = array<i32>} : memref<48x640xbf16, #tpu.memory_space<vmem>>, vector<22x7xbf16>,
    %430 = arith.truncf %315 : vector<22x7xf32> to vector<22x7xbf16>
    %c22 = arith.constant 22 : index
    %c8_285 = arith.constant 8 : index
    %431 = vector.load %arg11[%c22, %c8_285] : memref<48x640xbf16, #tpu.memory_space<vmem>>, vector<22x7xbf16>
    tpu.vector_store %arg11[%c22, %c8_285], %430 {strides = array<i32>} : memref<48x640xbf16, #tpu.memory_space<vmem>>, vector<22x7xbf16>,
    %cst_286 = arith.constant 0.000000e+00 : bf16
    %432 = vector.broadcast %cst_286 : bf16 to vector<44x8xbf16>
    %c0_287 = arith.constant 0 : index
    %c0_288 = arith.constant 0 : index
    %433 = vector.load %arg11[%c0_287, %c0_288] : memref<48x640xbf16, #tpu.memory_space<vmem>>, vector<44x8xbf16>
    tpu.vector_store %arg11[%c0_287, %c0_288], %432 {strides = array<i32>} : memref<48x640xbf16, #tpu.memory_space<vmem>>, vector<44x8xbf16>,
    %c0_289 = arith.constant 0 : index
    %c15_290 = arith.constant 15 : index
    %434 = vector.load %arg11[%c0_289, %c15_290] : memref<48x640xbf16, #tpu.memory_space<vmem>>, vector<44x8xbf16>
    tpu.vector_store %arg11[%c0_289, %c15_290], %432 {strides = array<i32>} : memref<48x640xbf16, #tpu.memory_space<vmem>>, vector<44x8xbf16>,
    %c0_291 = arith.constant 0 : index
    %c5_292 = arith.constant 5 : index
    %435 = vector.load %arg11[%c0_291, %c5_292] : memref<48x640xbf16, #tpu.memory_space<vmem>>, vector<44x13xbf16>
    %c1232 = arith.constant 1232 : index
    %c0_293 = arith.constant 0 : index
    %436 = vector.load %arg2[%c1232, %c0_293] : memref<1904x48xbf16, #tpu.memory_space<vmem>>, vector<22x44xbf16>
    %437 = vector.extract_strided_slice %435 {offsets = [0, 0], sizes = [44, 7], strides = [1, 1]} : vector<44x13xbf16> to vector<44x7xbf16>
    %cst_294 = arith.constant dense<0.000000e+00> : vector<22x7xf32>
    %438 = tpu.matmul %436, %437, %cst_294 {dimension_numbers = #tpu.dot_dimension_numbers<[1], [0], [0], [1], [0, 0, 1, 1], [], []>} : vector<22x44xbf16>, vector<44x7xbf16>, vector<22x7xf32> -> vector<22x7xf32>
    %c176 = arith.constant 176 : index
    %c0_295 = arith.constant 0 : index
    %439 = vector.load %arg3[%c176, %c0_295] : memref<272x1xf32, #tpu.memory_space<vmem>>, vector<22x1xf32>
    %440 = vector.broadcast %439 : vector<22x1xf32> to vector<22x7xf32>
    %441 = arith.addf %438, %440 : vector<22x7xf32>
    %c1254 = arith.constant 1254 : index
    %c0_296 = arith.constant 0 : index
    %442 = vector.load %arg2[%c1254, %c0_296] : memref<1904x48xbf16, #tpu.memory_space<vmem>>, vector<22x44xbf16>
    %443 = vector.extract_strided_slice %435 {offsets = [0, 1], sizes = [44, 7], strides = [1, 1]} : vector<44x13xbf16> to vector<44x7xbf16>
    %cst_297 = arith.constant dense<0.000000e+00> : vector<22x7xf32>
    %444 = tpu.matmul %442, %443, %cst_297 {dimension_numbers = #tpu.dot_dimension_numbers<[1], [0], [0], [1], [0, 0, 1, 1], [], []>} : vector<22x44xbf16>, vector<44x7xbf16>, vector<22x7xf32> -> vector<22x7xf32>
    %445 = arith.addf %441, %444 : vector<22x7xf32>
    %c1276 = arith.constant 1276 : index
    %c0_298 = arith.constant 0 : index
    %446 = vector.load %arg2[%c1276, %c0_298] : memref<1904x48xbf16, #tpu.memory_space<vmem>>, vector<22x44xbf16>
    %447 = vector.extract_strided_slice %435 {offsets = [0, 2], sizes = [44, 7], strides = [1, 1]} : vector<44x13xbf16> to vector<44x7xbf16>
    %cst_299 = arith.constant dense<0.000000e+00> : vector<22x7xf32>
    %448 = tpu.matmul %446, %447, %cst_299 {dimension_numbers = #tpu.dot_dimension_numbers<[1], [0], [0], [1], [0, 0, 1, 1], [], []>} : vector<22x44xbf16>, vector<44x7xbf16>, vector<22x7xf32> -> vector<22x7xf32>
    %449 = arith.addf %445, %448 : vector<22x7xf32>
    %c1298 = arith.constant 1298 : index
    %c0_300 = arith.constant 0 : index
    %450 = vector.load %arg2[%c1298, %c0_300] : memref<1904x48xbf16, #tpu.memory_space<vmem>>, vector<22x44xbf16>
    %451 = vector.extract_strided_slice %435 {offsets = [0, 3], sizes = [44, 7], strides = [1, 1]} : vector<44x13xbf16> to vector<44x7xbf16>
    %cst_301 = arith.constant dense<0.000000e+00> : vector<22x7xf32>
    %452 = tpu.matmul %450, %451, %cst_301 {dimension_numbers = #tpu.dot_dimension_numbers<[1], [0], [0], [1], [0, 0, 1, 1], [], []>} : vector<22x44xbf16>, vector<44x7xbf16>, vector<22x7xf32> -> vector<22x7xf32>
    %453 = arith.addf %449, %452 : vector<22x7xf32>
    %c1320 = arith.constant 1320 : index
    %c0_302 = arith.constant 0 : index
    %454 = vector.load %arg2[%c1320, %c0_302] : memref<1904x48xbf16, #tpu.memory_space<vmem>>, vector<22x44xbf16>
    %455 = vector.extract_strided_slice %435 {offsets = [0, 4], sizes = [44, 7], strides = [1, 1]} : vector<44x13xbf16> to vector<44x7xbf16>
    %cst_303 = arith.constant dense<0.000000e+00> : vector<22x7xf32>
    %456 = tpu.matmul %454, %455, %cst_303 {dimension_numbers = #tpu.dot_dimension_numbers<[1], [0], [0], [1], [0, 0, 1, 1], [], []>} : vector<22x44xbf16>, vector<44x7xbf16>, vector<22x7xf32> -> vector<22x7xf32>
    %457 = arith.addf %453, %456 : vector<22x7xf32>
    %c1342 = arith.constant 1342 : index
    %c0_304 = arith.constant 0 : index
    %458 = vector.load %arg2[%c1342, %c0_304] : memref<1904x48xbf16, #tpu.memory_space<vmem>>, vector<22x44xbf16>
    %459 = vector.extract_strided_slice %435 {offsets = [0, 5], sizes = [44, 7], strides = [1, 1]} : vector<44x13xbf16> to vector<44x7xbf16>
    %cst_305 = arith.constant dense<0.000000e+00> : vector<22x7xf32>
    %460 = tpu.matmul %458, %459, %cst_305 {dimension_numbers = #tpu.dot_dimension_numbers<[1], [0], [0], [1], [0, 0, 1, 1], [], []>} : vector<22x44xbf16>, vector<44x7xbf16>, vector<22x7xf32> -> vector<22x7xf32>
    %461 = arith.addf %457, %460 : vector<22x7xf32>
    %c1364 = arith.constant 1364 : index
    %c0_306 = arith.constant 0 : index
    %462 = vector.load %arg2[%c1364, %c0_306] : memref<1904x48xbf16, #tpu.memory_space<vmem>>, vector<22x44xbf16>
    %463 = vector.extract_strided_slice %435 {offsets = [0, 6], sizes = [44, 7], strides = [1, 1]} : vector<44x13xbf16> to vector<44x7xbf16>
    %cst_307 = arith.constant dense<0.000000e+00> : vector<22x7xf32>
    %464 = tpu.matmul %462, %463, %cst_307 {dimension_numbers = #tpu.dot_dimension_numbers<[1], [0], [0], [1], [0, 0, 1, 1], [], []>} : vector<22x44xbf16>, vector<44x7xbf16>, vector<22x7xf32> -> vector<22x7xf32>
    %465 = arith.addf %461, %464 : vector<22x7xf32>
    %cst_308 = arith.constant 0.000000e+00 : f32
    %466 = vector.broadcast %cst_308 : f32 to vector<22x7xf32>
    %467 = arith.maximumf %465, %466 : vector<22x7xf32>
    %468 = arith.truncf %467 : vector<22x7xf32> to vector<22x7xbf16>
    %c0_309 = arith.constant 0 : index
    %c0_310 = arith.constant 0 : index
    %469 = vector.load %arg7[%c0_309, %c0_310] : memref<7x25xbf16, #tpu.memory_space<vmem>>, vector<7x25xbf16>
    %cst_311 = arith.constant dense<0.000000e+00> : vector<22x25xf32>
    %470 = tpu.matmul %468, %469, %cst_311 {dimension_numbers = #tpu.dot_dimension_numbers<[1], [0], [0], [1], [0, 0, 1, 1], [], []>} : vector<22x7xbf16>, vector<7x25xbf16>, vector<22x25xf32> -> vector<22x25xf32>
    %471 = arith.truncf %470 : vector<22x25xf32> to vector<22x25xbf16>
    %c0_312 = arith.constant 0 : index
    %c8_313 = arith.constant 8 : index
    %472 = vector.load %arg11[%c0_312, %c8_313] : memref<48x640xbf16, #tpu.memory_space<vmem>>, vector<22x25xbf16>
    tpu.vector_store %arg11[%c0_312, %c8_313], %471 {strides = array<i32>} : memref<48x640xbf16, #tpu.memory_space<vmem>>, vector<22x25xbf16>,
    %cst_314 = arith.constant 0.000000e+00 : bf16
    %473 = vector.broadcast %cst_314 : bf16 to vector<22x8xbf16>
    %c0_315 = arith.constant 0 : index
    %c0_316 = arith.constant 0 : index
    %474 = vector.load %arg11[%c0_315, %c0_316] : memref<48x640xbf16, #tpu.memory_space<vmem>>, vector<22x8xbf16>
    tpu.vector_store %arg11[%c0_315, %c0_316], %473 {strides = array<i32>} : memref<48x640xbf16, #tpu.memory_space<vmem>>, vector<22x8xbf16>,
    %c0_317 = arith.constant 0 : index
    %c33 = arith.constant 33 : index
    %475 = vector.load %arg11[%c0_317, %c33] : memref<48x640xbf16, #tpu.memory_space<vmem>>, vector<22x8xbf16>
    tpu.vector_store %arg11[%c0_317, %c33], %473 {strides = array<i32>} : memref<48x640xbf16, #tpu.memory_space<vmem>>, vector<22x8xbf16>,
    %c0_318 = arith.constant 0 : index
    %c2_319 = arith.constant 2 : index
    %476 = vector.load %arg11[%c0_318, %c2_319] : memref<48x640xbf16, #tpu.memory_space<vmem>>, vector<22x37xbf16>
    %c1386 = arith.constant 1386 : index
    %c0_320 = arith.constant 0 : index
    %477 = vector.load %arg2[%c1386, %c0_320] : memref<1904x48xbf16, #tpu.memory_space<vmem>>, vector<16x22xbf16>
    %478 = vector.extract_strided_slice %476 {offsets = [0, 0], sizes = [22, 31], strides = [1, 1]} : vector<22x37xbf16> to vector<22x31xbf16>
    %cst_321 = arith.constant dense<0.000000e+00> : vector<16x31xf32>
    %479 = tpu.matmul %477, %478, %cst_321 {dimension_numbers = #tpu.dot_dimension_numbers<[1], [0], [0], [1], [0, 0, 1, 1], [], []>} : vector<16x22xbf16>, vector<22x31xbf16>, vector<16x31xf32> -> vector<16x31xf32>
    %c198 = arith.constant 198 : index
    %c0_322 = arith.constant 0 : index
    %480 = vector.load %arg3[%c198, %c0_322] : memref<272x1xf32, #tpu.memory_space<vmem>>, vector<16x1xf32>
    %481 = vector.broadcast %480 : vector<16x1xf32> to vector<16x31xf32>
    %482 = arith.addf %479, %481 : vector<16x31xf32>
    %c1402 = arith.constant 1402 : index
    %c0_323 = arith.constant 0 : index
    %483 = vector.load %arg2[%c1402, %c0_323] : memref<1904x48xbf16, #tpu.memory_space<vmem>>, vector<16x22xbf16>
    %484 = vector.extract_strided_slice %476 {offsets = [0, 1], sizes = [22, 31], strides = [1, 1]} : vector<22x37xbf16> to vector<22x31xbf16>
    %cst_324 = arith.constant dense<0.000000e+00> : vector<16x31xf32>
    %485 = tpu.matmul %483, %484, %cst_324 {dimension_numbers = #tpu.dot_dimension_numbers<[1], [0], [0], [1], [0, 0, 1, 1], [], []>} : vector<16x22xbf16>, vector<22x31xbf16>, vector<16x31xf32> -> vector<16x31xf32>
    %486 = arith.addf %482, %485 : vector<16x31xf32>
    %c1418 = arith.constant 1418 : index
    %c0_325 = arith.constant 0 : index
    %487 = vector.load %arg2[%c1418, %c0_325] : memref<1904x48xbf16, #tpu.memory_space<vmem>>, vector<16x22xbf16>
    %488 = vector.extract_strided_slice %476 {offsets = [0, 2], sizes = [22, 31], strides = [1, 1]} : vector<22x37xbf16> to vector<22x31xbf16>
    %cst_326 = arith.constant dense<0.000000e+00> : vector<16x31xf32>
    %489 = tpu.matmul %487, %488, %cst_326 {dimension_numbers = #tpu.dot_dimension_numbers<[1], [0], [0], [1], [0, 0, 1, 1], [], []>} : vector<16x22xbf16>, vector<22x31xbf16>, vector<16x31xf32> -> vector<16x31xf32>
    %490 = arith.addf %486, %489 : vector<16x31xf32>
    %c1434 = arith.constant 1434 : index
    %c0_327 = arith.constant 0 : index
    %491 = vector.load %arg2[%c1434, %c0_327] : memref<1904x48xbf16, #tpu.memory_space<vmem>>, vector<16x22xbf16>
    %492 = vector.extract_strided_slice %476 {offsets = [0, 3], sizes = [22, 31], strides = [1, 1]} : vector<22x37xbf16> to vector<22x31xbf16>
    %cst_328 = arith.constant dense<0.000000e+00> : vector<16x31xf32>
    %493 = tpu.matmul %491, %492, %cst_328 {dimension_numbers = #tpu.dot_dimension_numbers<[1], [0], [0], [1], [0, 0, 1, 1], [], []>} : vector<16x22xbf16>, vector<22x31xbf16>, vector<16x31xf32> -> vector<16x31xf32>
    %494 = arith.addf %490, %493 : vector<16x31xf32>
    %c1450 = arith.constant 1450 : index
    %c0_329 = arith.constant 0 : index
    %495 = vector.load %arg2[%c1450, %c0_329] : memref<1904x48xbf16, #tpu.memory_space<vmem>>, vector<16x22xbf16>
    %496 = vector.extract_strided_slice %476 {offsets = [0, 4], sizes = [22, 31], strides = [1, 1]} : vector<22x37xbf16> to vector<22x31xbf16>
    %cst_330 = arith.constant dense<0.000000e+00> : vector<16x31xf32>
    %497 = tpu.matmul %495, %496, %cst_330 {dimension_numbers = #tpu.dot_dimension_numbers<[1], [0], [0], [1], [0, 0, 1, 1], [], []>} : vector<16x22xbf16>, vector<22x31xbf16>, vector<16x31xf32> -> vector<16x31xf32>
    %498 = arith.addf %494, %497 : vector<16x31xf32>
    %c1466 = arith.constant 1466 : index
    %c0_331 = arith.constant 0 : index
    %499 = vector.load %arg2[%c1466, %c0_331] : memref<1904x48xbf16, #tpu.memory_space<vmem>>, vector<16x22xbf16>
    %500 = vector.extract_strided_slice %476 {offsets = [0, 5], sizes = [22, 31], strides = [1, 1]} : vector<22x37xbf16> to vector<22x31xbf16>
    %cst_332 = arith.constant dense<0.000000e+00> : vector<16x31xf32>
    %501 = tpu.matmul %499, %500, %cst_332 {dimension_numbers = #tpu.dot_dimension_numbers<[1], [0], [0], [1], [0, 0, 1, 1], [], []>} : vector<16x22xbf16>, vector<22x31xbf16>, vector<16x31xf32> -> vector<16x31xf32>
    %502 = arith.addf %498, %501 : vector<16x31xf32>
    %c1482 = arith.constant 1482 : index
    %c0_333 = arith.constant 0 : index
    %503 = vector.load %arg2[%c1482, %c0_333] : memref<1904x48xbf16, #tpu.memory_space<vmem>>, vector<16x22xbf16>
    %504 = vector.extract_strided_slice %476 {offsets = [0, 6], sizes = [22, 31], strides = [1, 1]} : vector<22x37xbf16> to vector<22x31xbf16>
    %cst_334 = arith.constant dense<0.000000e+00> : vector<16x31xf32>
    %505 = tpu.matmul %503, %504, %cst_334 {dimension_numbers = #tpu.dot_dimension_numbers<[1], [0], [0], [1], [0, 0, 1, 1], [], []>} : vector<16x22xbf16>, vector<22x31xbf16>, vector<16x31xf32> -> vector<16x31xf32>
    %506 = arith.addf %502, %505 : vector<16x31xf32>
    %cst_335 = arith.constant 0.000000e+00 : f32
    %507 = vector.broadcast %cst_335 : f32 to vector<16x31xf32>
    %508 = arith.maximumf %506, %507 : vector<16x31xf32>
    %509 = arith.truncf %508 : vector<16x31xf32> to vector<16x31xbf16>
    %c0_336 = arith.constant 0 : index
    %c8_337 = arith.constant 8 : index
    %510 = vector.load %arg11[%c0_336, %c8_337] : memref<48x640xbf16, #tpu.memory_space<vmem>>, vector<16x31xbf16>
    tpu.vector_store %arg11[%c0_336, %c8_337], %509 {strides = array<i32>} : memref<48x640xbf16, #tpu.memory_space<vmem>>, vector<16x31xbf16>,
    %511 = arith.truncf %236 : vector<16x31xf32> to vector<16x31xbf16>
    %c16_338 = arith.constant 16 : index
    %c8_339 = arith.constant 8 : index
    %512 = vector.load %arg11[%c16_338, %c8_339] : memref<48x640xbf16, #tpu.memory_space<vmem>>, vector<16x31xbf16>
    tpu.vector_store %arg11[%c16_338, %c8_339], %511 {strides = array<i32>} : memref<48x640xbf16, #tpu.memory_space<vmem>>, vector<16x31xbf16>,
    %cst_340 = arith.constant 0.000000e+00 : bf16
    %513 = vector.broadcast %cst_340 : bf16 to vector<32x8xbf16>
    %c0_341 = arith.constant 0 : index
    %c0_342 = arith.constant 0 : index
    %514 = vector.load %arg11[%c0_341, %c0_342] : memref<48x640xbf16, #tpu.memory_space<vmem>>, vector<32x8xbf16>
    tpu.vector_store %arg11[%c0_341, %c0_342], %513 {strides = array<i32>} : memref<48x640xbf16, #tpu.memory_space<vmem>>, vector<32x8xbf16>,
    %c0_343 = arith.constant 0 : index
    %c39_344 = arith.constant 39 : index
    %515 = vector.load %arg11[%c0_343, %c39_344] : memref<48x640xbf16, #tpu.memory_space<vmem>>, vector<32x8xbf16>
    tpu.vector_store %arg11[%c0_343, %c39_344], %513 {strides = array<i32>} : memref<48x640xbf16, #tpu.memory_space<vmem>>, vector<32x8xbf16>,
    %c0_345 = arith.constant 0 : index
    %c5_346 = arith.constant 5 : index
    %516 = vector.load %arg11[%c0_345, %c5_346] : memref<48x640xbf16, #tpu.memory_space<vmem>>, vector<32x37xbf16>
    %c1498 = arith.constant 1498 : index
    %c0_347 = arith.constant 0 : index
    %517 = vector.load %arg2[%c1498, %c0_347] : memref<1904x48xbf16, #tpu.memory_space<vmem>>, vector<16x32xbf16>
    %518 = vector.extract_strided_slice %516 {offsets = [0, 0], sizes = [32, 31], strides = [1, 1]} : vector<32x37xbf16> to vector<32x31xbf16>
    %cst_348 = arith.constant dense<0.000000e+00> : vector<16x31xf32>
    %519 = tpu.matmul %517, %518, %cst_348 {dimension_numbers = #tpu.dot_dimension_numbers<[1], [0], [0], [1], [0, 0, 1, 1], [], []>} : vector<16x32xbf16>, vector<32x31xbf16>, vector<16x31xf32> -> vector<16x31xf32>
    %c214 = arith.constant 214 : index
    %c0_349 = arith.constant 0 : index
    %520 = vector.load %arg3[%c214, %c0_349] : memref<272x1xf32, #tpu.memory_space<vmem>>, vector<16x1xf32>
    %521 = vector.broadcast %520 : vector<16x1xf32> to vector<16x31xf32>
    %522 = arith.addf %519, %521 : vector<16x31xf32>
    %c1514 = arith.constant 1514 : index
    %c0_350 = arith.constant 0 : index
    %523 = vector.load %arg2[%c1514, %c0_350] : memref<1904x48xbf16, #tpu.memory_space<vmem>>, vector<16x32xbf16>
    %524 = vector.extract_strided_slice %516 {offsets = [0, 1], sizes = [32, 31], strides = [1, 1]} : vector<32x37xbf16> to vector<32x31xbf16>
    %cst_351 = arith.constant dense<0.000000e+00> : vector<16x31xf32>
    %525 = tpu.matmul %523, %524, %cst_351 {dimension_numbers = #tpu.dot_dimension_numbers<[1], [0], [0], [1], [0, 0, 1, 1], [], []>} : vector<16x32xbf16>, vector<32x31xbf16>, vector<16x31xf32> -> vector<16x31xf32>
    %526 = arith.addf %522, %525 : vector<16x31xf32>
    %c1530 = arith.constant 1530 : index
    %c0_352 = arith.constant 0 : index
    %527 = vector.load %arg2[%c1530, %c0_352] : memref<1904x48xbf16, #tpu.memory_space<vmem>>, vector<16x32xbf16>
    %528 = vector.extract_strided_slice %516 {offsets = [0, 2], sizes = [32, 31], strides = [1, 1]} : vector<32x37xbf16> to vector<32x31xbf16>
    %cst_353 = arith.constant dense<0.000000e+00> : vector<16x31xf32>
    %529 = tpu.matmul %527, %528, %cst_353 {dimension_numbers = #tpu.dot_dimension_numbers<[1], [0], [0], [1], [0, 0, 1, 1], [], []>} : vector<16x32xbf16>, vector<32x31xbf16>, vector<16x31xf32> -> vector<16x31xf32>
    %530 = arith.addf %526, %529 : vector<16x31xf32>
    %c1546 = arith.constant 1546 : index
    %c0_354 = arith.constant 0 : index
    %531 = vector.load %arg2[%c1546, %c0_354] : memref<1904x48xbf16, #tpu.memory_space<vmem>>, vector<16x32xbf16>
    %532 = vector.extract_strided_slice %516 {offsets = [0, 3], sizes = [32, 31], strides = [1, 1]} : vector<32x37xbf16> to vector<32x31xbf16>
    %cst_355 = arith.constant dense<0.000000e+00> : vector<16x31xf32>
    %533 = tpu.matmul %531, %532, %cst_355 {dimension_numbers = #tpu.dot_dimension_numbers<[1], [0], [0], [1], [0, 0, 1, 1], [], []>} : vector<16x32xbf16>, vector<32x31xbf16>, vector<16x31xf32> -> vector<16x31xf32>
    %534 = arith.addf %530, %533 : vector<16x31xf32>
    %c1562 = arith.constant 1562 : index
    %c0_356 = arith.constant 0 : index
    %535 = vector.load %arg2[%c1562, %c0_356] : memref<1904x48xbf16, #tpu.memory_space<vmem>>, vector<16x32xbf16>
    %536 = vector.extract_strided_slice %516 {offsets = [0, 4], sizes = [32, 31], strides = [1, 1]} : vector<32x37xbf16> to vector<32x31xbf16>
    %cst_357 = arith.constant dense<0.000000e+00> : vector<16x31xf32>
    %537 = tpu.matmul %535, %536, %cst_357 {dimension_numbers = #tpu.dot_dimension_numbers<[1], [0], [0], [1], [0, 0, 1, 1], [], []>} : vector<16x32xbf16>, vector<32x31xbf16>, vector<16x31xf32> -> vector<16x31xf32>
    %538 = arith.addf %534, %537 : vector<16x31xf32>
    %c1578 = arith.constant 1578 : index
    %c0_358 = arith.constant 0 : index
    %539 = vector.load %arg2[%c1578, %c0_358] : memref<1904x48xbf16, #tpu.memory_space<vmem>>, vector<16x32xbf16>
    %540 = vector.extract_strided_slice %516 {offsets = [0, 5], sizes = [32, 31], strides = [1, 1]} : vector<32x37xbf16> to vector<32x31xbf16>
    %cst_359 = arith.constant dense<0.000000e+00> : vector<16x31xf32>
    %541 = tpu.matmul %539, %540, %cst_359 {dimension_numbers = #tpu.dot_dimension_numbers<[1], [0], [0], [1], [0, 0, 1, 1], [], []>} : vector<16x32xbf16>, vector<32x31xbf16>, vector<16x31xf32> -> vector<16x31xf32>
    %542 = arith.addf %538, %541 : vector<16x31xf32>
    %c1594 = arith.constant 1594 : index
    %c0_360 = arith.constant 0 : index
    %543 = vector.load %arg2[%c1594, %c0_360] : memref<1904x48xbf16, #tpu.memory_space<vmem>>, vector<16x32xbf16>
    %544 = vector.extract_strided_slice %516 {offsets = [0, 6], sizes = [32, 31], strides = [1, 1]} : vector<32x37xbf16> to vector<32x31xbf16>
    %cst_361 = arith.constant dense<0.000000e+00> : vector<16x31xf32>
    %545 = tpu.matmul %543, %544, %cst_361 {dimension_numbers = #tpu.dot_dimension_numbers<[1], [0], [0], [1], [0, 0, 1, 1], [], []>} : vector<16x32xbf16>, vector<32x31xbf16>, vector<16x31xf32> -> vector<16x31xf32>
    %546 = arith.addf %542, %545 : vector<16x31xf32>
    %cst_362 = arith.constant 0.000000e+00 : f32
    %547 = vector.broadcast %cst_362 : f32 to vector<16x31xf32>
    %548 = arith.maximumf %546, %547 : vector<16x31xf32>
    %549 = arith.truncf %548 : vector<16x31xf32> to vector<16x31xbf16>
    %c0_363 = arith.constant 0 : index
    %c0_364 = arith.constant 0 : index
    %550 = vector.load %arg8[%c0_363, %c0_364] : memref<31x121xbf16, #tpu.memory_space<vmem>>, vector<31x121xbf16>
    %cst_365 = arith.constant dense<0.000000e+00> : vector<16x121xf32>
    %551 = tpu.matmul %549, %550, %cst_365 {dimension_numbers = #tpu.dot_dimension_numbers<[1], [0], [0], [1], [0, 0, 1, 1], [], []>} : vector<16x31xbf16>, vector<31x121xbf16>, vector<16x121xf32> -> vector<16x121xf32>
    %552 = arith.truncf %551 : vector<16x121xf32> to vector<16x121xbf16>
    %c0_366 = arith.constant 0 : index
    %c8_367 = arith.constant 8 : index
    %553 = vector.load %arg11[%c0_366, %c8_367] : memref<48x640xbf16, #tpu.memory_space<vmem>>, vector<16x121xbf16>
    tpu.vector_store %arg11[%c0_366, %c8_367], %552 {strides = array<i32>} : memref<48x640xbf16, #tpu.memory_space<vmem>>, vector<16x121xbf16>,
    %cst_368 = arith.constant 0.000000e+00 : bf16
    %554 = vector.broadcast %cst_368 : bf16 to vector<16x8xbf16>
    %c0_369 = arith.constant 0 : index
    %c0_370 = arith.constant 0 : index
    %555 = vector.load %arg11[%c0_369, %c0_370] : memref<48x640xbf16, #tpu.memory_space<vmem>>, vector<16x8xbf16>
    tpu.vector_store %arg11[%c0_369, %c0_370], %554 {strides = array<i32>} : memref<48x640xbf16, #tpu.memory_space<vmem>>, vector<16x8xbf16>,
    %c0_371 = arith.constant 0 : index
    %c129 = arith.constant 129 : index
    %556 = vector.load %arg11[%c0_371, %c129] : memref<48x640xbf16, #tpu.memory_space<vmem>>, vector<16x8xbf16>
    tpu.vector_store %arg11[%c0_371, %c129], %554 {strides = array<i32>} : memref<48x640xbf16, #tpu.memory_space<vmem>>, vector<16x8xbf16>,
    %c0_372 = arith.constant 0 : index
    %c2_373 = arith.constant 2 : index
    %557 = vector.load %arg11[%c0_372, %c2_373] : memref<48x640xbf16, #tpu.memory_space<vmem>>, vector<16x133xbf16>
    %c1610 = arith.constant 1610 : index
    %c0_374 = arith.constant 0 : index
    %558 = vector.load %arg2[%c1610, %c0_374] : memref<1904x48xbf16, #tpu.memory_space<vmem>>, vector<11x16xbf16>
    %559 = vector.extract_strided_slice %557 {offsets = [0, 0], sizes = [16, 127], strides = [1, 1]} : vector<16x133xbf16> to vector<16x127xbf16>
    %cst_375 = arith.constant dense<0.000000e+00> : vector<11x127xf32>
    %560 = tpu.matmul %558, %559, %cst_375 {dimension_numbers = #tpu.dot_dimension_numbers<[1], [0], [0], [1], [0, 0, 1, 1], [], []>} : vector<11x16xbf16>, vector<16x127xbf16>, vector<11x127xf32> -> vector<11x127xf32>
    %c230 = arith.constant 230 : index
    %c0_376 = arith.constant 0 : index
    %561 = vector.load %arg3[%c230, %c0_376] : memref<272x1xf32, #tpu.memory_space<vmem>>, vector<11x1xf32>
    %562 = vector.broadcast %561 : vector<11x1xf32> to vector<11x127xf32>
    %563 = arith.addf %560, %562 : vector<11x127xf32>
    %c1621 = arith.constant 1621 : index
    %c0_377 = arith.constant 0 : index
    %564 = vector.load %arg2[%c1621, %c0_377] : memref<1904x48xbf16, #tpu.memory_space<vmem>>, vector<11x16xbf16>
    %565 = vector.extract_strided_slice %557 {offsets = [0, 1], sizes = [16, 127], strides = [1, 1]} : vector<16x133xbf16> to vector<16x127xbf16>
    %cst_378 = arith.constant dense<0.000000e+00> : vector<11x127xf32>
    %566 = tpu.matmul %564, %565, %cst_378 {dimension_numbers = #tpu.dot_dimension_numbers<[1], [0], [0], [1], [0, 0, 1, 1], [], []>} : vector<11x16xbf16>, vector<16x127xbf16>, vector<11x127xf32> -> vector<11x127xf32>
    %567 = arith.addf %563, %566 : vector<11x127xf32>
    %c1632 = arith.constant 1632 : index
    %c0_379 = arith.constant 0 : index
    %568 = vector.load %arg2[%c1632, %c0_379] : memref<1904x48xbf16, #tpu.memory_space<vmem>>, vector<11x16xbf16>
    %569 = vector.extract_strided_slice %557 {offsets = [0, 2], sizes = [16, 127], strides = [1, 1]} : vector<16x133xbf16> to vector<16x127xbf16>
    %cst_380 = arith.constant dense<0.000000e+00> : vector<11x127xf32>
    %570 = tpu.matmul %568, %569, %cst_380 {dimension_numbers = #tpu.dot_dimension_numbers<[1], [0], [0], [1], [0, 0, 1, 1], [], []>} : vector<11x16xbf16>, vector<16x127xbf16>, vector<11x127xf32> -> vector<11x127xf32>
    %571 = arith.addf %567, %570 : vector<11x127xf32>
    %c1643 = arith.constant 1643 : index
    %c0_381 = arith.constant 0 : index
    %572 = vector.load %arg2[%c1643, %c0_381] : memref<1904x48xbf16, #tpu.memory_space<vmem>>, vector<11x16xbf16>
    %573 = vector.extract_strided_slice %557 {offsets = [0, 3], sizes = [16, 127], strides = [1, 1]} : vector<16x133xbf16> to vector<16x127xbf16>
    %cst_382 = arith.constant dense<0.000000e+00> : vector<11x127xf32>
    %574 = tpu.matmul %572, %573, %cst_382 {dimension_numbers = #tpu.dot_dimension_numbers<[1], [0], [0], [1], [0, 0, 1, 1], [], []>} : vector<11x16xbf16>, vector<16x127xbf16>, vector<11x127xf32> -> vector<11x127xf32>
    %575 = arith.addf %571, %574 : vector<11x127xf32>
    %c1654 = arith.constant 1654 : index
    %c0_383 = arith.constant 0 : index
    %576 = vector.load %arg2[%c1654, %c0_383] : memref<1904x48xbf16, #tpu.memory_space<vmem>>, vector<11x16xbf16>
    %577 = vector.extract_strided_slice %557 {offsets = [0, 4], sizes = [16, 127], strides = [1, 1]} : vector<16x133xbf16> to vector<16x127xbf16>
    %cst_384 = arith.constant dense<0.000000e+00> : vector<11x127xf32>
    %578 = tpu.matmul %576, %577, %cst_384 {dimension_numbers = #tpu.dot_dimension_numbers<[1], [0], [0], [1], [0, 0, 1, 1], [], []>} : vector<11x16xbf16>, vector<16x127xbf16>, vector<11x127xf32> -> vector<11x127xf32>
    %579 = arith.addf %575, %578 : vector<11x127xf32>
    %c1665 = arith.constant 1665 : index
    %c0_385 = arith.constant 0 : index
    %580 = vector.load %arg2[%c1665, %c0_385] : memref<1904x48xbf16, #tpu.memory_space<vmem>>, vector<11x16xbf16>
    %581 = vector.extract_strided_slice %557 {offsets = [0, 5], sizes = [16, 127], strides = [1, 1]} : vector<16x133xbf16> to vector<16x127xbf16>
    %cst_386 = arith.constant dense<0.000000e+00> : vector<11x127xf32>
    %582 = tpu.matmul %580, %581, %cst_386 {dimension_numbers = #tpu.dot_dimension_numbers<[1], [0], [0], [1], [0, 0, 1, 1], [], []>} : vector<11x16xbf16>, vector<16x127xbf16>, vector<11x127xf32> -> vector<11x127xf32>
    %583 = arith.addf %579, %582 : vector<11x127xf32>
    %c1676 = arith.constant 1676 : index
    %c0_387 = arith.constant 0 : index
    %584 = vector.load %arg2[%c1676, %c0_387] : memref<1904x48xbf16, #tpu.memory_space<vmem>>, vector<11x16xbf16>
    %585 = vector.extract_strided_slice %557 {offsets = [0, 6], sizes = [16, 127], strides = [1, 1]} : vector<16x133xbf16> to vector<16x127xbf16>
    %cst_388 = arith.constant dense<0.000000e+00> : vector<11x127xf32>
    %586 = tpu.matmul %584, %585, %cst_388 {dimension_numbers = #tpu.dot_dimension_numbers<[1], [0], [0], [1], [0, 0, 1, 1], [], []>} : vector<11x16xbf16>, vector<16x127xbf16>, vector<11x127xf32> -> vector<11x127xf32>
    %587 = arith.addf %583, %586 : vector<11x127xf32>
    %cst_389 = arith.constant 0.000000e+00 : f32
    %588 = vector.broadcast %cst_389 : f32 to vector<11x127xf32>
    %589 = arith.maximumf %587, %588 : vector<11x127xf32>
    %590 = arith.truncf %589 : vector<11x127xf32> to vector<11x127xbf16>
    %c0_390 = arith.constant 0 : index
    %c8_391 = arith.constant 8 : index
    %591 = vector.load %arg11[%c0_390, %c8_391] : memref<48x640xbf16, #tpu.memory_space<vmem>>, vector<11x127xbf16>
    tpu.vector_store %arg11[%c0_390, %c8_391], %590 {strides = array<i32>} : memref<48x640xbf16, #tpu.memory_space<vmem>>, vector<11x127xbf16>,
    %592 = arith.truncf %157 : vector<11x127xf32> to vector<11x127xbf16>
    %c11 = arith.constant 11 : index
    %c8_392 = arith.constant 8 : index
    %593 = vector.load %arg11[%c11, %c8_392] : memref<48x640xbf16, #tpu.memory_space<vmem>>, vector<11x127xbf16>
    tpu.vector_store %arg11[%c11, %c8_392], %592 {strides = array<i32>} : memref<48x640xbf16, #tpu.memory_space<vmem>>, vector<11x127xbf16>,
    %cst_393 = arith.constant 0.000000e+00 : bf16
    %594 = vector.broadcast %cst_393 : bf16 to vector<22x8xbf16>
    %c0_394 = arith.constant 0 : index
    %c0_395 = arith.constant 0 : index
    %595 = vector.load %arg11[%c0_394, %c0_395] : memref<48x640xbf16, #tpu.memory_space<vmem>>, vector<22x8xbf16>
    tpu.vector_store %arg11[%c0_394, %c0_395], %594 {strides = array<i32>} : memref<48x640xbf16, #tpu.memory_space<vmem>>, vector<22x8xbf16>,
    %c0_396 = arith.constant 0 : index
    %c135_397 = arith.constant 135 : index
    %596 = vector.load %arg11[%c0_396, %c135_397] : memref<48x640xbf16, #tpu.memory_space<vmem>>, vector<22x8xbf16>
    tpu.vector_store %arg11[%c0_396, %c135_397], %594 {strides = array<i32>} : memref<48x640xbf16, #tpu.memory_space<vmem>>, vector<22x8xbf16>,
    %c0_398 = arith.constant 0 : index
    %c5_399 = arith.constant 5 : index
    %597 = vector.load %arg11[%c0_398, %c5_399] : memref<48x640xbf16, #tpu.memory_space<vmem>>, vector<22x133xbf16>
    %c1687 = arith.constant 1687 : index
    %c0_400 = arith.constant 0 : index
    %598 = vector.load %arg2[%c1687, %c0_400] : memref<1904x48xbf16, #tpu.memory_space<vmem>>, vector<11x22xbf16>
    %599 = vector.extract_strided_slice %597 {offsets = [0, 0], sizes = [22, 127], strides = [1, 1]} : vector<22x133xbf16> to vector<22x127xbf16>
    %cst_401 = arith.constant dense<0.000000e+00> : vector<11x127xf32>
    %600 = tpu.matmul %598, %599, %cst_401 {dimension_numbers = #tpu.dot_dimension_numbers<[1], [0], [0], [1], [0, 0, 1, 1], [], []>} : vector<11x22xbf16>, vector<22x127xbf16>, vector<11x127xf32> -> vector<11x127xf32>
    %c241 = arith.constant 241 : index
    %c0_402 = arith.constant 0 : index
    %601 = vector.load %arg3[%c241, %c0_402] : memref<272x1xf32, #tpu.memory_space<vmem>>, vector<11x1xf32>
    %602 = vector.broadcast %601 : vector<11x1xf32> to vector<11x127xf32>
    %603 = arith.addf %600, %602 : vector<11x127xf32>
    %c1698 = arith.constant 1698 : index
    %c0_403 = arith.constant 0 : index
    %604 = vector.load %arg2[%c1698, %c0_403] : memref<1904x48xbf16, #tpu.memory_space<vmem>>, vector<11x22xbf16>
    %605 = vector.extract_strided_slice %597 {offsets = [0, 1], sizes = [22, 127], strides = [1, 1]} : vector<22x133xbf16> to vector<22x127xbf16>
    %cst_404 = arith.constant dense<0.000000e+00> : vector<11x127xf32>
    %606 = tpu.matmul %604, %605, %cst_404 {dimension_numbers = #tpu.dot_dimension_numbers<[1], [0], [0], [1], [0, 0, 1, 1], [], []>} : vector<11x22xbf16>, vector<22x127xbf16>, vector<11x127xf32> -> vector<11x127xf32>
    %607 = arith.addf %603, %606 : vector<11x127xf32>
    %c1709 = arith.constant 1709 : index
    %c0_405 = arith.constant 0 : index
    %608 = vector.load %arg2[%c1709, %c0_405] : memref<1904x48xbf16, #tpu.memory_space<vmem>>, vector<11x22xbf16>
    %609 = vector.extract_strided_slice %597 {offsets = [0, 2], sizes = [22, 127], strides = [1, 1]} : vector<22x133xbf16> to vector<22x127xbf16>
    %cst_406 = arith.constant dense<0.000000e+00> : vector<11x127xf32>
    %610 = tpu.matmul %608, %609, %cst_406 {dimension_numbers = #tpu.dot_dimension_numbers<[1], [0], [0], [1], [0, 0, 1, 1], [], []>} : vector<11x22xbf16>, vector<22x127xbf16>, vector<11x127xf32> -> vector<11x127xf32>
    %611 = arith.addf %607, %610 : vector<11x127xf32>
    %c1720 = arith.constant 1720 : index
    %c0_407 = arith.constant 0 : index
    %612 = vector.load %arg2[%c1720, %c0_407] : memref<1904x48xbf16, #tpu.memory_space<vmem>>, vector<11x22xbf16>
    %613 = vector.extract_strided_slice %597 {offsets = [0, 3], sizes = [22, 127], strides = [1, 1]} : vector<22x133xbf16> to vector<22x127xbf16>
    %cst_408 = arith.constant dense<0.000000e+00> : vector<11x127xf32>
    %614 = tpu.matmul %612, %613, %cst_408 {dimension_numbers = #tpu.dot_dimension_numbers<[1], [0], [0], [1], [0, 0, 1, 1], [], []>} : vector<11x22xbf16>, vector<22x127xbf16>, vector<11x127xf32> -> vector<11x127xf32>
    %615 = arith.addf %611, %614 : vector<11x127xf32>
    %c1731 = arith.constant 1731 : index
    %c0_409 = arith.constant 0 : index
    %616 = vector.load %arg2[%c1731, %c0_409] : memref<1904x48xbf16, #tpu.memory_space<vmem>>, vector<11x22xbf16>
    %617 = vector.extract_strided_slice %597 {offsets = [0, 4], sizes = [22, 127], strides = [1, 1]} : vector<22x133xbf16> to vector<22x127xbf16>
    %cst_410 = arith.constant dense<0.000000e+00> : vector<11x127xf32>
    %618 = tpu.matmul %616, %617, %cst_410 {dimension_numbers = #tpu.dot_dimension_numbers<[1], [0], [0], [1], [0, 0, 1, 1], [], []>} : vector<11x22xbf16>, vector<22x127xbf16>, vector<11x127xf32> -> vector<11x127xf32>
    %619 = arith.addf %615, %618 : vector<11x127xf32>
    %c1742 = arith.constant 1742 : index
    %c0_411 = arith.constant 0 : index
    %620 = vector.load %arg2[%c1742, %c0_411] : memref<1904x48xbf16, #tpu.memory_space<vmem>>, vector<11x22xbf16>
    %621 = vector.extract_strided_slice %597 {offsets = [0, 5], sizes = [22, 127], strides = [1, 1]} : vector<22x133xbf16> to vector<22x127xbf16>
    %cst_412 = arith.constant dense<0.000000e+00> : vector<11x127xf32>
    %622 = tpu.matmul %620, %621, %cst_412 {dimension_numbers = #tpu.dot_dimension_numbers<[1], [0], [0], [1], [0, 0, 1, 1], [], []>} : vector<11x22xbf16>, vector<22x127xbf16>, vector<11x127xf32> -> vector<11x127xf32>
    %623 = arith.addf %619, %622 : vector<11x127xf32>
    %c1753 = arith.constant 1753 : index
    %c0_413 = arith.constant 0 : index
    %624 = vector.load %arg2[%c1753, %c0_413] : memref<1904x48xbf16, #tpu.memory_space<vmem>>, vector<11x22xbf16>
    %625 = vector.extract_strided_slice %597 {offsets = [0, 6], sizes = [22, 127], strides = [1, 1]} : vector<22x133xbf16> to vector<22x127xbf16>
    %cst_414 = arith.constant dense<0.000000e+00> : vector<11x127xf32>
    %626 = tpu.matmul %624, %625, %cst_414 {dimension_numbers = #tpu.dot_dimension_numbers<[1], [0], [0], [1], [0, 0, 1, 1], [], []>} : vector<11x22xbf16>, vector<22x127xbf16>, vector<11x127xf32> -> vector<11x127xf32>
    %627 = arith.addf %623, %626 : vector<11x127xf32>
    %cst_415 = arith.constant 0.000000e+00 : f32
    %628 = vector.broadcast %cst_415 : f32 to vector<11x127xf32>
    %629 = arith.maximumf %627, %628 : vector<11x127xf32>
    %630 = arith.truncf %629 : vector<11x127xf32> to vector<11x127xbf16>
    %c0_416 = arith.constant 0 : index
    %c0_417 = arith.constant 0 : index
    %631 = vector.load %arg9[%c0_416, %c0_417] : memref<127x505xbf16, #tpu.memory_space<vmem>>, vector<127x505xbf16>
    %cst_418 = arith.constant dense<0.000000e+00> : vector<11x505xf32>
    %632 = tpu.matmul %630, %631, %cst_418 {dimension_numbers = #tpu.dot_dimension_numbers<[1], [0], [0], [1], [0, 0, 1, 1], [], []>} : vector<11x127xbf16>, vector<127x505xbf16>, vector<11x505xf32> -> vector<11x505xf32>
    %633 = arith.truncf %632 : vector<11x505xf32> to vector<11x505xbf16>
    %c0_419 = arith.constant 0 : index
    %c8_420 = arith.constant 8 : index
    %634 = vector.load %arg11[%c0_419, %c8_420] : memref<48x640xbf16, #tpu.memory_space<vmem>>, vector<11x505xbf16>
    tpu.vector_store %arg11[%c0_419, %c8_420], %633 {strides = array<i32>} : memref<48x640xbf16, #tpu.memory_space<vmem>>, vector<11x505xbf16>,
    %cst_421 = arith.constant 0.000000e+00 : bf16
    %635 = vector.broadcast %cst_421 : bf16 to vector<11x8xbf16>
    %c0_422 = arith.constant 0 : index
    %c0_423 = arith.constant 0 : index
    %636 = vector.load %arg11[%c0_422, %c0_423] : memref<48x640xbf16, #tpu.memory_space<vmem>>, vector<11x8xbf16>
    tpu.vector_store %arg11[%c0_422, %c0_423], %635 {strides = array<i32>} : memref<48x640xbf16, #tpu.memory_space<vmem>>, vector<11x8xbf16>,
    %c0_424 = arith.constant 0 : index
    %c513 = arith.constant 513 : index
    %637 = vector.load %arg11[%c0_424, %c513] : memref<48x640xbf16, #tpu.memory_space<vmem>>, vector<11x8xbf16>
    tpu.vector_store %arg11[%c0_424, %c513], %635 {strides = array<i32>} : memref<48x640xbf16, #tpu.memory_space<vmem>>, vector<11x8xbf16>,
    %c0_425 = arith.constant 0 : index
    %c2_426 = arith.constant 2 : index
    %638 = vector.load %arg11[%c0_425, %c2_426] : memref<48x640xbf16, #tpu.memory_space<vmem>>, vector<11x517xbf16>
    %c1764 = arith.constant 1764 : index
    %c0_427 = arith.constant 0 : index
    %639 = vector.load %arg2[%c1764, %c0_427] : memref<1904x48xbf16, #tpu.memory_space<vmem>>, vector<8x11xbf16>
    %640 = vector.extract_strided_slice %638 {offsets = [0, 0], sizes = [11, 511], strides = [1, 1]} : vector<11x517xbf16> to vector<11x511xbf16>
    %cst_428 = arith.constant dense<0.000000e+00> : vector<8x511xf32>
    %641 = tpu.matmul %639, %640, %cst_428 {dimension_numbers = #tpu.dot_dimension_numbers<[1], [0], [0], [1], [0, 0, 1, 1], [], []>} : vector<8x11xbf16>, vector<11x511xbf16>, vector<8x511xf32> -> vector<8x511xf32>
    %c252 = arith.constant 252 : index
    %c0_429 = arith.constant 0 : index
    %642 = vector.load %arg3[%c252, %c0_429] : memref<272x1xf32, #tpu.memory_space<vmem>>, vector<8x1xf32>
    %643 = vector.broadcast %642 : vector<8x1xf32> to vector<8x511xf32>
    %644 = arith.addf %641, %643 : vector<8x511xf32>
    %c1772 = arith.constant 1772 : index
    %c0_430 = arith.constant 0 : index
    %645 = vector.load %arg2[%c1772, %c0_430] : memref<1904x48xbf16, #tpu.memory_space<vmem>>, vector<8x11xbf16>
    %646 = vector.extract_strided_slice %638 {offsets = [0, 1], sizes = [11, 511], strides = [1, 1]} : vector<11x517xbf16> to vector<11x511xbf16>
    %cst_431 = arith.constant dense<0.000000e+00> : vector<8x511xf32>
    %647 = tpu.matmul %645, %646, %cst_431 {dimension_numbers = #tpu.dot_dimension_numbers<[1], [0], [0], [1], [0, 0, 1, 1], [], []>} : vector<8x11xbf16>, vector<11x511xbf16>, vector<8x511xf32> -> vector<8x511xf32>
    %648 = arith.addf %644, %647 : vector<8x511xf32>
    %c1780 = arith.constant 1780 : index
    %c0_432 = arith.constant 0 : index
    %649 = vector.load %arg2[%c1780, %c0_432] : memref<1904x48xbf16, #tpu.memory_space<vmem>>, vector<8x11xbf16>
    %650 = vector.extract_strided_slice %638 {offsets = [0, 2], sizes = [11, 511], strides = [1, 1]} : vector<11x517xbf16> to vector<11x511xbf16>
    %cst_433 = arith.constant dense<0.000000e+00> : vector<8x511xf32>
    %651 = tpu.matmul %649, %650, %cst_433 {dimension_numbers = #tpu.dot_dimension_numbers<[1], [0], [0], [1], [0, 0, 1, 1], [], []>} : vector<8x11xbf16>, vector<11x511xbf16>, vector<8x511xf32> -> vector<8x511xf32>
    %652 = arith.addf %648, %651 : vector<8x511xf32>
    %c1788 = arith.constant 1788 : index
    %c0_434 = arith.constant 0 : index
    %653 = vector.load %arg2[%c1788, %c0_434] : memref<1904x48xbf16, #tpu.memory_space<vmem>>, vector<8x11xbf16>
    %654 = vector.extract_strided_slice %638 {offsets = [0, 3], sizes = [11, 511], strides = [1, 1]} : vector<11x517xbf16> to vector<11x511xbf16>
    %cst_435 = arith.constant dense<0.000000e+00> : vector<8x511xf32>
    %655 = tpu.matmul %653, %654, %cst_435 {dimension_numbers = #tpu.dot_dimension_numbers<[1], [0], [0], [1], [0, 0, 1, 1], [], []>} : vector<8x11xbf16>, vector<11x511xbf16>, vector<8x511xf32> -> vector<8x511xf32>
    %656 = arith.addf %652, %655 : vector<8x511xf32>
    %c1796 = arith.constant 1796 : index
    %c0_436 = arith.constant 0 : index
    %657 = vector.load %arg2[%c1796, %c0_436] : memref<1904x48xbf16, #tpu.memory_space<vmem>>, vector<8x11xbf16>
    %658 = vector.extract_strided_slice %638 {offsets = [0, 4], sizes = [11, 511], strides = [1, 1]} : vector<11x517xbf16> to vector<11x511xbf16>
    %cst_437 = arith.constant dense<0.000000e+00> : vector<8x511xf32>
    %659 = tpu.matmul %657, %658, %cst_437 {dimension_numbers = #tpu.dot_dimension_numbers<[1], [0], [0], [1], [0, 0, 1, 1], [], []>} : vector<8x11xbf16>, vector<11x511xbf16>, vector<8x511xf32> -> vector<8x511xf32>
    %660 = arith.addf %656, %659 : vector<8x511xf32>
    %c1804 = arith.constant 1804 : index
    %c0_438 = arith.constant 0 : index
    %661 = vector.load %arg2[%c1804, %c0_438] : memref<1904x48xbf16, #tpu.memory_space<vmem>>, vector<8x11xbf16>
    %662 = vector.extract_strided_slice %638 {offsets = [0, 5], sizes = [11, 511], strides = [1, 1]} : vector<11x517xbf16> to vector<11x511xbf16>
    %cst_439 = arith.constant dense<0.000000e+00> : vector<8x511xf32>
    %663 = tpu.matmul %661, %662, %cst_439 {dimension_numbers = #tpu.dot_dimension_numbers<[1], [0], [0], [1], [0, 0, 1, 1], [], []>} : vector<8x11xbf16>, vector<11x511xbf16>, vector<8x511xf32> -> vector<8x511xf32>
    %664 = arith.addf %660, %663 : vector<8x511xf32>
    %c1812 = arith.constant 1812 : index
    %c0_440 = arith.constant 0 : index
    %665 = vector.load %arg2[%c1812, %c0_440] : memref<1904x48xbf16, #tpu.memory_space<vmem>>, vector<8x11xbf16>
    %666 = vector.extract_strided_slice %638 {offsets = [0, 6], sizes = [11, 511], strides = [1, 1]} : vector<11x517xbf16> to vector<11x511xbf16>
    %cst_441 = arith.constant dense<0.000000e+00> : vector<8x511xf32>
    %667 = tpu.matmul %665, %666, %cst_441 {dimension_numbers = #tpu.dot_dimension_numbers<[1], [0], [0], [1], [0, 0, 1, 1], [], []>} : vector<8x11xbf16>, vector<11x511xbf16>, vector<8x511xf32> -> vector<8x511xf32>
    %668 = arith.addf %664, %667 : vector<8x511xf32>
    %cst_442 = arith.constant 0.000000e+00 : f32
    %669 = vector.broadcast %cst_442 : f32 to vector<8x511xf32>
    %670 = arith.maximumf %668, %669 : vector<8x511xf32>
    %671 = arith.truncf %670 : vector<8x511xf32> to vector<8x511xbf16>
    %c0_443 = arith.constant 0 : index
    %c8_444 = arith.constant 8 : index
    %672 = vector.load %arg11[%c0_443, %c8_444] : memref<48x640xbf16, #tpu.memory_space<vmem>>, vector<8x511xbf16>
    tpu.vector_store %arg11[%c0_443, %c8_444], %671 {strides = array<i32>} : memref<48x640xbf16, #tpu.memory_space<vmem>>, vector<8x511xbf16>,
    %673 = arith.truncf %78 : vector<8x511xf32> to vector<8x511xbf16>
    %c8_445 = arith.constant 8 : index
    %c8_446 = arith.constant 8 : index
    %674 = vector.load %arg11[%c8_445, %c8_446] : memref<48x640xbf16, #tpu.memory_space<vmem>>, vector<8x511xbf16>
    tpu.vector_store %arg11[%c8_445, %c8_446], %673 {strides = array<i32>} : memref<48x640xbf16, #tpu.memory_space<vmem>>, vector<8x511xbf16>,
    %cst_447 = arith.constant 0.000000e+00 : bf16
    %675 = vector.broadcast %cst_447 : bf16 to vector<16x8xbf16>
    %c0_448 = arith.constant 0 : index
    %c0_449 = arith.constant 0 : index
    %676 = vector.load %arg11[%c0_448, %c0_449] : memref<48x640xbf16, #tpu.memory_space<vmem>>, vector<16x8xbf16>
    tpu.vector_store %arg11[%c0_448, %c0_449], %675 {strides = array<i32>} : memref<48x640xbf16, #tpu.memory_space<vmem>>, vector<16x8xbf16>,
    %c0_450 = arith.constant 0 : index
    %c519_451 = arith.constant 519 : index
    %677 = vector.load %arg11[%c0_450, %c519_451] : memref<48x640xbf16, #tpu.memory_space<vmem>>, vector<16x8xbf16>
    tpu.vector_store %arg11[%c0_450, %c519_451], %675 {strides = array<i32>} : memref<48x640xbf16, #tpu.memory_space<vmem>>, vector<16x8xbf16>,
    %c0_452 = arith.constant 0 : index
    %c5_453 = arith.constant 5 : index
    %678 = vector.load %arg11[%c0_452, %c5_453] : memref<48x640xbf16, #tpu.memory_space<vmem>>, vector<16x517xbf16>
    %c1820 = arith.constant 1820 : index
    %c0_454 = arith.constant 0 : index
    %679 = vector.load %arg2[%c1820, %c0_454] : memref<1904x48xbf16, #tpu.memory_space<vmem>>, vector<8x16xbf16>
    %680 = vector.extract_strided_slice %678 {offsets = [0, 0], sizes = [16, 511], strides = [1, 1]} : vector<16x517xbf16> to vector<16x511xbf16>
    %cst_455 = arith.constant dense<0.000000e+00> : vector<8x511xf32>
    %681 = tpu.matmul %679, %680, %cst_455 {dimension_numbers = #tpu.dot_dimension_numbers<[1], [0], [0], [1], [0, 0, 1, 1], [], []>} : vector<8x16xbf16>, vector<16x511xbf16>, vector<8x511xf32> -> vector<8x511xf32>
    %c260 = arith.constant 260 : index
    %c0_456 = arith.constant 0 : index
    %682 = vector.load %arg3[%c260, %c0_456] : memref<272x1xf32, #tpu.memory_space<vmem>>, vector<8x1xf32>
    %683 = vector.broadcast %682 : vector<8x1xf32> to vector<8x511xf32>
    %684 = arith.addf %681, %683 : vector<8x511xf32>
    %c1828 = arith.constant 1828 : index
    %c0_457 = arith.constant 0 : index
    %685 = vector.load %arg2[%c1828, %c0_457] : memref<1904x48xbf16, #tpu.memory_space<vmem>>, vector<8x16xbf16>
    %686 = vector.extract_strided_slice %678 {offsets = [0, 1], sizes = [16, 511], strides = [1, 1]} : vector<16x517xbf16> to vector<16x511xbf16>
    %cst_458 = arith.constant dense<0.000000e+00> : vector<8x511xf32>
    %687 = tpu.matmul %685, %686, %cst_458 {dimension_numbers = #tpu.dot_dimension_numbers<[1], [0], [0], [1], [0, 0, 1, 1], [], []>} : vector<8x16xbf16>, vector<16x511xbf16>, vector<8x511xf32> -> vector<8x511xf32>
    %688 = arith.addf %684, %687 : vector<8x511xf32>
    %c1836 = arith.constant 1836 : index
    %c0_459 = arith.constant 0 : index
    %689 = vector.load %arg2[%c1836, %c0_459] : memref<1904x48xbf16, #tpu.memory_space<vmem>>, vector<8x16xbf16>
    %690 = vector.extract_strided_slice %678 {offsets = [0, 2], sizes = [16, 511], strides = [1, 1]} : vector<16x517xbf16> to vector<16x511xbf16>
    %cst_460 = arith.constant dense<0.000000e+00> : vector<8x511xf32>
    %691 = tpu.matmul %689, %690, %cst_460 {dimension_numbers = #tpu.dot_dimension_numbers<[1], [0], [0], [1], [0, 0, 1, 1], [], []>} : vector<8x16xbf16>, vector<16x511xbf16>, vector<8x511xf32> -> vector<8x511xf32>
    %692 = arith.addf %688, %691 : vector<8x511xf32>
    %c1844 = arith.constant 1844 : index
    %c0_461 = arith.constant 0 : index
    %693 = vector.load %arg2[%c1844, %c0_461] : memref<1904x48xbf16, #tpu.memory_space<vmem>>, vector<8x16xbf16>
    %694 = vector.extract_strided_slice %678 {offsets = [0, 3], sizes = [16, 511], strides = [1, 1]} : vector<16x517xbf16> to vector<16x511xbf16>
    %cst_462 = arith.constant dense<0.000000e+00> : vector<8x511xf32>
    %695 = tpu.matmul %693, %694, %cst_462 {dimension_numbers = #tpu.dot_dimension_numbers<[1], [0], [0], [1], [0, 0, 1, 1], [], []>} : vector<8x16xbf16>, vector<16x511xbf16>, vector<8x511xf32> -> vector<8x511xf32>
    %696 = arith.addf %692, %695 : vector<8x511xf32>
    %c1852 = arith.constant 1852 : index
    %c0_463 = arith.constant 0 : index
    %697 = vector.load %arg2[%c1852, %c0_463] : memref<1904x48xbf16, #tpu.memory_space<vmem>>, vector<8x16xbf16>
    %698 = vector.extract_strided_slice %678 {offsets = [0, 4], sizes = [16, 511], strides = [1, 1]} : vector<16x517xbf16> to vector<16x511xbf16>
    %cst_464 = arith.constant dense<0.000000e+00> : vector<8x511xf32>
    %699 = tpu.matmul %697, %698, %cst_464 {dimension_numbers = #tpu.dot_dimension_numbers<[1], [0], [0], [1], [0, 0, 1, 1], [], []>} : vector<8x16xbf16>, vector<16x511xbf16>, vector<8x511xf32> -> vector<8x511xf32>
    %700 = arith.addf %696, %699 : vector<8x511xf32>
    %c1860 = arith.constant 1860 : index
    %c0_465 = arith.constant 0 : index
    %701 = vector.load %arg2[%c1860, %c0_465] : memref<1904x48xbf16, #tpu.memory_space<vmem>>, vector<8x16xbf16>
    %702 = vector.extract_strided_slice %678 {offsets = [0, 5], sizes = [16, 511], strides = [1, 1]} : vector<16x517xbf16> to vector<16x511xbf16>
    %cst_466 = arith.constant dense<0.000000e+00> : vector<8x511xf32>
    %703 = tpu.matmul %701, %702, %cst_466 {dimension_numbers = #tpu.dot_dimension_numbers<[1], [0], [0], [1], [0, 0, 1, 1], [], []>} : vector<8x16xbf16>, vector<16x511xbf16>, vector<8x511xf32> -> vector<8x511xf32>
    %704 = arith.addf %700, %703 : vector<8x511xf32>
    %c1868 = arith.constant 1868 : index
    %c0_467 = arith.constant 0 : index
    %705 = vector.load %arg2[%c1868, %c0_467] : memref<1904x48xbf16, #tpu.memory_space<vmem>>, vector<8x16xbf16>
    %706 = vector.extract_strided_slice %678 {offsets = [0, 6], sizes = [16, 511], strides = [1, 1]} : vector<16x517xbf16> to vector<16x511xbf16>
    %cst_468 = arith.constant dense<0.000000e+00> : vector<8x511xf32>
    %707 = tpu.matmul %705, %706, %cst_468 {dimension_numbers = #tpu.dot_dimension_numbers<[1], [0], [0], [1], [0, 0, 1, 1], [], []>} : vector<8x16xbf16>, vector<16x511xbf16>, vector<8x511xf32> -> vector<8x511xf32>
    %708 = arith.addf %704, %707 : vector<8x511xf32>
    %cst_469 = arith.constant 0.000000e+00 : f32
    %709 = vector.broadcast %cst_469 : f32 to vector<8x511xf32>
    %710 = arith.maximumf %708, %709 : vector<8x511xf32>
    %711 = arith.truncf %710 : vector<8x511xf32> to vector<8x511xbf16>
    %c0_470 = arith.constant 0 : index
    %c8_471 = arith.constant 8 : index
    %712 = vector.load %arg11[%c0_470, %c8_471] : memref<48x640xbf16, #tpu.memory_space<vmem>>, vector<8x511xbf16>
    tpu.vector_store %arg11[%c0_470, %c8_471], %711 {strides = array<i32>} : memref<48x640xbf16, #tpu.memory_space<vmem>>, vector<8x511xbf16>,
    %cst_472 = arith.constant 0.000000e+00 : bf16
    %713 = vector.broadcast %cst_472 : bf16 to vector<8x8xbf16>
    %c0_473 = arith.constant 0 : index
    %c0_474 = arith.constant 0 : index
    %714 = vector.load %arg11[%c0_473, %c0_474] : memref<48x640xbf16, #tpu.memory_space<vmem>>, vector<8x8xbf16>
    tpu.vector_store %arg11[%c0_473, %c0_474], %713 {strides = array<i32>} : memref<48x640xbf16, #tpu.memory_space<vmem>>, vector<8x8xbf16>,
    %c0_475 = arith.constant 0 : index
    %c519_476 = arith.constant 519 : index
    %715 = vector.load %arg11[%c0_475, %c519_476] : memref<48x640xbf16, #tpu.memory_space<vmem>>, vector<8x8xbf16>
    tpu.vector_store %arg11[%c0_475, %c519_476], %713 {strides = array<i32>} : memref<48x640xbf16, #tpu.memory_space<vmem>>, vector<8x8xbf16>,
    %c0_477 = arith.constant 0 : index
    %c5_478 = arith.constant 5 : index
    %716 = vector.load %arg11[%c0_477, %c5_478] : memref<48x640xbf16, #tpu.memory_space<vmem>>, vector<8x518xbf16>
    %c1876 = arith.constant 1876 : index
    %c0_479 = arith.constant 0 : index
    %717 = vector.load %arg2[%c1876, %c0_479] : memref<1904x48xbf16, #tpu.memory_space<vmem>>, vector<3x8xbf16>
    %718 = vector.extract_strided_slice %716 {offsets = [0, 0], sizes = [8, 512], strides = [1, 1]} : vector<8x518xbf16> to vector<8x512xbf16>
    %cst_480 = arith.constant dense<0.000000e+00> : vector<3x512xf32>
    %719 = tpu.matmul %717, %718, %cst_480 {dimension_numbers = #tpu.dot_dimension_numbers<[1], [0], [0], [1], [0, 0, 1, 1], [], []>} : vector<3x8xbf16>, vector<8x512xbf16>, vector<3x512xf32> -> vector<3x512xf32>
    %c268 = arith.constant 268 : index
    %c0_481 = arith.constant 0 : index
    %720 = vector.load %arg3[%c268, %c0_481] : memref<272x1xf32, #tpu.memory_space<vmem>>, vector<3x1xf32>
    %721 = vector.broadcast %720 : vector<3x1xf32> to vector<3x512xf32>
    %722 = arith.addf %719, %721 : vector<3x512xf32>
    %c1879 = arith.constant 1879 : index
    %c0_482 = arith.constant 0 : index
    %723 = vector.load %arg2[%c1879, %c0_482] : memref<1904x48xbf16, #tpu.memory_space<vmem>>, vector<3x8xbf16>
    %724 = vector.extract_strided_slice %716 {offsets = [0, 1], sizes = [8, 512], strides = [1, 1]} : vector<8x518xbf16> to vector<8x512xbf16>
    %cst_483 = arith.constant dense<0.000000e+00> : vector<3x512xf32>
    %725 = tpu.matmul %723, %724, %cst_483 {dimension_numbers = #tpu.dot_dimension_numbers<[1], [0], [0], [1], [0, 0, 1, 1], [], []>} : vector<3x8xbf16>, vector<8x512xbf16>, vector<3x512xf32> -> vector<3x512xf32>
    %726 = arith.addf %722, %725 : vector<3x512xf32>
    %c1882 = arith.constant 1882 : index
    %c0_484 = arith.constant 0 : index
    %727 = vector.load %arg2[%c1882, %c0_484] : memref<1904x48xbf16, #tpu.memory_space<vmem>>, vector<3x8xbf16>
    %728 = vector.extract_strided_slice %716 {offsets = [0, 2], sizes = [8, 512], strides = [1, 1]} : vector<8x518xbf16> to vector<8x512xbf16>
    %cst_485 = arith.constant dense<0.000000e+00> : vector<3x512xf32>
    %729 = tpu.matmul %727, %728, %cst_485 {dimension_numbers = #tpu.dot_dimension_numbers<[1], [0], [0], [1], [0, 0, 1, 1], [], []>} : vector<3x8xbf16>, vector<8x512xbf16>, vector<3x512xf32> -> vector<3x512xf32>
    %730 = arith.addf %726, %729 : vector<3x512xf32>
    %c1885 = arith.constant 1885 : index
    %c0_486 = arith.constant 0 : index
    %731 = vector.load %arg2[%c1885, %c0_486] : memref<1904x48xbf16, #tpu.memory_space<vmem>>, vector<3x8xbf16>
    %732 = vector.extract_strided_slice %716 {offsets = [0, 3], sizes = [8, 512], strides = [1, 1]} : vector<8x518xbf16> to vector<8x512xbf16>
    %cst_487 = arith.constant dense<0.000000e+00> : vector<3x512xf32>
    %733 = tpu.matmul %731, %732, %cst_487 {dimension_numbers = #tpu.dot_dimension_numbers<[1], [0], [0], [1], [0, 0, 1, 1], [], []>} : vector<3x8xbf16>, vector<8x512xbf16>, vector<3x512xf32> -> vector<3x512xf32>
    %734 = arith.addf %730, %733 : vector<3x512xf32>
    %c1888 = arith.constant 1888 : index
    %c0_488 = arith.constant 0 : index
    %735 = vector.load %arg2[%c1888, %c0_488] : memref<1904x48xbf16, #tpu.memory_space<vmem>>, vector<3x8xbf16>
    %736 = vector.extract_strided_slice %716 {offsets = [0, 4], sizes = [8, 512], strides = [1, 1]} : vector<8x518xbf16> to vector<8x512xbf16>
    %cst_489 = arith.constant dense<0.000000e+00> : vector<3x512xf32>
    %737 = tpu.matmul %735, %736, %cst_489 {dimension_numbers = #tpu.dot_dimension_numbers<[1], [0], [0], [1], [0, 0, 1, 1], [], []>} : vector<3x8xbf16>, vector<8x512xbf16>, vector<3x512xf32> -> vector<3x512xf32>
    %738 = arith.addf %734, %737 : vector<3x512xf32>
    %c1891 = arith.constant 1891 : index
    %c0_490 = arith.constant 0 : index
    %739 = vector.load %arg2[%c1891, %c0_490] : memref<1904x48xbf16, #tpu.memory_space<vmem>>, vector<3x8xbf16>
    %740 = vector.extract_strided_slice %716 {offsets = [0, 5], sizes = [8, 512], strides = [1, 1]} : vector<8x518xbf16> to vector<8x512xbf16>
    %cst_491 = arith.constant dense<0.000000e+00> : vector<3x512xf32>
    %741 = tpu.matmul %739, %740, %cst_491 {dimension_numbers = #tpu.dot_dimension_numbers<[1], [0], [0], [1], [0, 0, 1, 1], [], []>} : vector<3x8xbf16>, vector<8x512xbf16>, vector<3x512xf32> -> vector<3x512xf32>
    %742 = arith.addf %738, %741 : vector<3x512xf32>
    %c1894 = arith.constant 1894 : index
    %c0_492 = arith.constant 0 : index
    %743 = vector.load %arg2[%c1894, %c0_492] : memref<1904x48xbf16, #tpu.memory_space<vmem>>, vector<3x8xbf16>
    %744 = vector.extract_strided_slice %716 {offsets = [0, 6], sizes = [8, 512], strides = [1, 1]} : vector<8x518xbf16> to vector<8x512xbf16>
    %cst_493 = arith.constant dense<0.000000e+00> : vector<3x512xf32>
    %745 = tpu.matmul %743, %744, %cst_493 {dimension_numbers = #tpu.dot_dimension_numbers<[1], [0], [0], [1], [0, 0, 1, 1], [], []>} : vector<3x8xbf16>, vector<8x512xbf16>, vector<3x512xf32> -> vector<3x512xf32>
    %746 = arith.addf %742, %745 : vector<3x512xf32>
    %cst_494 = arith.constant dense<0xFF800000> : vector<512xf32>
    %747 = vector.multi_reduction <maximumf>, %746, %cst_494 [0] : vector<3x512xf32> to vector<512xf32>
    %748 = vector.shape_cast %747 : vector<512xf32> to vector<1x512xf32>
    %749 = vector.broadcast %748 : vector<1x512xf32> to vector<3x512xf32>
    %750 = arith.subf %746, %749 : vector<3x512xf32>
    %751 = math.exp %750 : vector<3x512xf32>
    %cst_495 = arith.constant dense<0.000000e+00> : vector<512xf32>
    %752 = vector.multi_reduction <add>, %751, %cst_495 [0] : vector<3x512xf32> to vector<512xf32>
    %753 = vector.shape_cast %752 : vector<512xf32> to vector<1x512xf32>
    %754 = vector.broadcast %753 : vector<1x512xf32> to vector<3x512xf32>
    %755 = arith.divf %751, %754 : vector<3x512xf32>
    %c0_496 = arith.constant 0 : index
    %c0_497 = arith.constant 0 : index
    %c0_498 = arith.constant 0 : index
    %756 = vector.load %arg10[%c0_496, %c0_497, %c0_498] : memref<1x3x512xf32, #tpu.memory_space<vmem>>, vector<1x3x512xf32>
    %757 = vector.shape_cast %756 : vector<1x3x512xf32> to vector<3x512xf32>
    %758 = vector.shape_cast %755 : vector<3x512xf32> to vector<1x3x512xf32>
    tpu.vector_store %arg10[%c0_496, %c0_497, %c0_498], %758 {strides = array<i32>} : memref<1x3x512xf32, #tpu.memory_space<vmem>>, vector<1x3x512xf32>,
    return
  }
  func.func @transform_0(%arg0: i32) -> (i32, i32, i32) {
    %c0_i32 = arith.constant 0 : i32
    %c0_i32_0 = arith.constant 0 : i32
    %c0_i32_1 = arith.constant 0 : i32
    return %arg0, %c0_i32, %c0_i32_0 : i32, i32, i32
  }
  func.func @transform_1(%arg0: i32) -> (i32, i32) {
    %c0_i32 = arith.constant 0 : i32
    %c0_i32_0 = arith.constant 0 : i32
    %c0_i32_1 = arith.constant 0 : i32
    return %c0_i32, %c0_i32_0 : i32, i32
  }
  func.func @transform_2(%arg0: i32) -> (i32, i32) {
    %c0_i32 = arith.constant 0 : i32
    %c0_i32_0 = arith.constant 0 : i32
    %c0_i32_1 = arith.constant 0 : i32
    return %c0_i32, %c0_i32_0 : i32, i32
  }
  func.func @transform_3(%arg0: i32) -> (i32, i32) {
    %c0_i32 = arith.constant 0 : i32
    %c0_i32_0 = arith.constant 0 : i32
    %c0_i32_1 = arith.constant 0 : i32
    return %c0_i32, %c0_i32_0 : i32, i32
  }
  func.func @transform_4(%arg0: i32) -> (i32, i32) {
    %c0_i32 = arith.constant 0 : i32
    %c0_i32_0 = arith.constant 0 : i32
    %c0_i32_1 = arith.constant 0 : i32
    return %c0_i32, %c0_i32_0 : i32, i32
  }
  func.func @transform_5(%arg0: i32) -> (i32, i32) {
    %c0_i32 = arith.constant 0 : i32
    %c0_i32_0 = arith.constant 0 : i32
    %c0_i32_1 = arith.constant 0 : i32
    return %c0_i32, %c0_i32_0 : i32, i32
  }
  func.func @transform_6(%arg0: i32) -> (i32, i32) {
    %c0_i32 = arith.constant 0 : i32
    %c0_i32_0 = arith.constant 0 : i32
    %c0_i32_1 = arith.constant 0 : i32
    return %c0_i32, %c0_i32_0 : i32, i32
  }
  func.func @transform_7(%arg0: i32) -> (i32, i32) {
    %c0_i32 = arith.constant 0 : i32
    %c0_i32_0 = arith.constant 0 : i32
    %c0_i32_1 = arith.constant 0 : i32
    return %c0_i32, %c0_i32_0 : i32, i32
  }
  func.func @transform_8(%arg0: i32) -> (i32, i32) {
    %c0_i32 = arith.constant 0 : i32
    %c0_i32_0 = arith.constant 0 : i32
    %c0_i32_1 = arith.constant 0 : i32
    return %c0_i32, %c0_i32_0 : i32, i32
  }
  func.func @transform_9(%arg0: i32) -> (i32, i32, i32) {
    %c0_i32 = arith.constant 0 : i32
    %c0_i32_0 = arith.constant 0 : i32
    %c0_i32_1 = arith.constant 0 : i32
    return %arg0, %c0_i32, %c0_i32_0 : i32, i32, i32
  }
}

</mosaic_0001>

<bundles_post_ra>
// kernel: unet_forward.1
= control target key start
LH: loop header
LB: loop body
LE: loop exit
PB: predicated region body
PF: predicated region fallthrough
CT: control target
= control target key end

     0   :  { %s16474_s30 = smov 0   ;;  %s19195_s0 = inlined_call_operand.vmem [shape: f32[2,3,512], index: 0, kind: input, shape index: {}]   ;;  %s19196_s1 = inlined_call_operand.vmem [shape: bf16[1904,48], index: 1, kind: input, shape index: {}]   ;;  %s19197_s2 = inlined_call_operand.vmem [shape: f32[272,1], index: 2, kind: input, shape index: {}]   ;;  %s19198_s3 = inlined_call_operand.vmem [shape: bf16[505,127], index: 3, kind: input, shape index: {}]   ;;  %s19199_s4 = inlined_call_operand.vmem [shape: bf16[121,31], index: 4, kind: input, shape index: {}]   ;;  %s19200_s5 = inlined_call_operand.vmem [shape: bf16[25,7], index: 5, kind: input, shape index: {}]   ;;  %s19201_s6 = inlined_call_operand.vmem [shape: bf16[7,25], index: 6, kind: input, shape index: {}]   ;;  %s19202_s7 = inlined_call_operand.vmem [shape: bf16[31,121], index: 7, kind: input, shape index: {}]   ;;  %s19203_s8 = inlined_call_operand.vmem [shape: bf16[127,505], index: 8, kind: input, shape index: {}]   ;;  %s19204_s9 = inlined_call_operand.vmem [shape: f32[2,3,512], index: 9, kind: output, shape index: {}]  }
   0x1 LB: > { %s13824_s10 = sadd.s32 4294967295, %s16404_s30   ;;  %p13828_p0 = scmp.ge.s32.totalorder %s16404_s30, 1  ;;  %s16404_s30 = sphi %s16474_s30, %s19_s30  }
   0x2   : > { %p287_p1 = scmp.lt.s32.totalorder %s16404_s30, 3 }
   0x4   : > { %p288_p2 = pnand %p13828_p0, %p287_p1 }
   0x5   : > { %p323_p3 = scmp.lt.s32.totalorder (!%p288_p2), %s13824_s10, 1  ;;  %s16406_s15 = smov (!%p288_p2), 8   ;;  %vm367_vm0 = vcmask (!%p288_p2), 1041472   ;;  %vm368_vm1 = vsmask.f32 (!%p288_p2), 1280  ;;  %vm373_vm2 = vcmask (!%p288_p2), 1041408  }
   0x6   : > { %291 = sbr.rel (%p288_p2) target bundleno = 11806 (0x2e1e), region = 56  ;;  %vm384_vm3 = vcmask (!%p288_p2), 50176   ;;  %vm389_vm4 = vcmask (!%p288_p2), 58368   ;;  %vm369_vm5 = vmand (!%p288_p2), %vm367_vm0, %vm368_vm1  ;;  %vm19219_vm6 = vcmask (!%p288_p2), 64512   ;;  %v370_v10 = vld [vmem:[#allocation2] sm:$0x3] (!%p288_p2) }
   0x7   : > { %vm16497_vm7 = vmand (!%p288_p2), %vm373_vm2, %vm368_vm1  ;;  %v375_v12 = vld [vmem:[#allocation2 + $0x8] sm:$0x3] (!%p288_p2)  ;;  %v386_v14 = vld [vmem:[#allocation2 + $0x20] sm:$0x3] (!%p288_p2)  ;;  %vm394_vm10 = vcmask (!%p288_p2), 115768   ;;  %v16407_v30 = vmov (!%p288_p2), 0  }
   0x8   : > { %vm16502_vm8 = vmand (!%p288_p2), %vm384_vm3, %vm368_vm1  ;;  %v378_v18 = vld [vmem:[#allocation2 + $0x10] sm:$0x3] (!%p288_p2)  ;;  %v381_v19 = vld [vmem:[#allocation2 + $0x18] sm:$0x3] (!%p288_p2)  ;;  %483 = vmatprep.mubr.bf16.mxu0 (!%p288_p2), %v16407_v30  ;;  %524 = vmatprep.mubr.bf16.mxu1 (!%p288_p2), %v16407_v30  ;;  %s16408_s16 = smov (!%p288_p2), 123   ;;  %s16409_s17 = smov (!%p288_p2), 122  }
   0x9   : > { %vm16507_vm9 = vmand (!%p288_p2), %vm389_vm4, %vm368_vm1  ;;  %16098 = vset.pattern.permute.xlu1 (!%p288_p2), %v16407_v30  ;;  %16099 = vset.pattern.permute.xlu0 (!%p288_p2), %v16407_v30  ;;  %s16410_s18 = smov (!%p288_p2), 121   ;;  %s16411_s19 = smov (!%p288_p2), 120   ;;  %v405_v38 = vld [vmem:[%s19197_s2] sm:$0xff] (!%p288_p2)  ;;  %vm435_vm12 = vcmask (!%p288_p2), 1040384   ;;  %v16415_v39 = vmov (!%p288_p2), 65535   ;;  %vm19217_vm13 = vcmask (!%p288_p2), 1006592  }
   0xa   : > { %vm395_vm11 = vmand (!%p288_p2), %vm394_vm10, %vm368_vm1  ;;  %s16412_s20 = smov (!%p288_p2), 119   ;;  %s19241_s21 = smov (!%p288_p2), 118   ;;  %v437_v40 = vsel (!%p288_p2), %vm435_vm12, 4294967295, %v16415_v39  ;;  %v404_v51 = vld [vmem:[%s19196_s1] sm:$0xf] (!%p288_p2)  ;;  %vm431_vm14 = vcmask (!%p288_p2), 23552  }
   0xb   : > { %s19243_s22 = smov (!%p288_p2), 117   ;;  %v16569_v42 = vsel (!%p288_p2), %vm373_vm2, %v437_v40, 0  ;;  %vm19216_vm15 = vcmask (!%p288_p2), 998400   ;;  %vm19227_vm0 = vcmask (!%p288_p2), 990208   ;;  %vm19226_vm1 = vcmask (!%p288_p2), 982016   ;;  %s16416_s25 = smov (!%p288_p2), 116  }
   0xc   : > { %vm19222_vm2 = vcmask (!%p288_p2), 973824   ;;  %v767_v40 = vld [vmem:[%s19196_s1 + $0xc] sm:$0xf] (!%p288_p2)  ;;  %vm19221_vm3 = vcmask (!%p288_p2), 965632   ;;  %vm19220_vm4 = vcmask (!%p288_p2), 957440   ;;  %vm19218_vm10 = vcmask (!%p288_p2), 1043456  }
   0xd   : > { %s19496_s10 = smov (!%p323_p3, %s13824_s10), 1  ;;  %s19208_s26 = smov 115   ;;  %vm19211_vm12 = vcmask 941056  }
   0xe   : > { %s19205_s11 = sshll.u32 %s19496_s10, 4  ;;  %s19206_s27 = smov 114  }
   0xf   : > { %s327_s14 = scalar_lea.vmem %s19195_s0, %s19205_s11  ;;  %s16421_s24 = smov 126  }
  0x10   : > { %v334_v0 = vld [vmem:[%s327_s14] sm:$0x77]  ;;  %v335_v1 = vld [vmem:[%s327_s14 + $0x8] sm:$0x77]  ;;  %s19236_s11 = smov 125   ;;  %s19234_s28 = smov 124  }
  0x11   : > { %v342_v2 = vpack.c.bf16 %v334_v0, %v334_v0  ;;  %v338_v3 = vcombine.high %v334_v0, %v334_v0  ;;  %v339_v4 = vcombine.high %v335_v1, %v335_v1  ;;  %v344_v7 = vpack.c.bf16 %v335_v1, %v335_v1  ;;  %s19275_s23 = smov 125   ;;  %s19379_s13 = smov 118  }
  0x13   : > { %350 = vrot.lane.b32.xlu0 %v342_v2, %s16406_s15  ;;  %v343_v5 = vpack.c.bf16 %v338_v3, %v338_v3  ;;  %v345_v6 = vpack.c.bf16 %v339_v4, %v339_v4 }
  0x15   : > { %352 = vrot.lane.b32.xlu1 %v343_v5, %s16406_s15  ;;  %v533_v5 = vld [vmem:[%s19196_s1 + $0x4] sm:$0xf] }
  0x17   : > { %356 = vrot.lane.b32.xlu0 %v345_v6, %s16406_s15 }
  0x19   : > { %354 = vrot.lane.b32.xlu1 %v344_v7, %s16406_s15 }
  0x85   : > { %v351_v13 = vpop.permute.xlu0 %350 }
  0x86   : > { %v371_v15 = vsel %vm369_vm5, %v351_v13, %v370_v10  ;;  %vm19215_vm5 = vcmask 1043520  }
  0x87   : > { %372 = vst [vmem:[#allocation2] sm:$0x3] %v371_v15  ;;  %v353_v16 = vpop.permute.xlu1 %352 }
  0x88   : > { %v359_v17 = vsel %vm19219_vm6, %v351_v13, %v353_v16 }
  0x89   : > { %v376_v20 = vsel %vm16497_vm7, %v359_v17, %v375_v12  ;;  %v357_v21 = vpop.permute.xlu0 %356 }
  0x8a   : > { %377 = vst [vmem:[#allocation2 + $0x8] sm:$0x3] %v376_v20  ;;  %v387_v22 = vsel %vm16502_vm8, %v357_v21, %v386_v14  ;;  %vm19214_vm8 = vcmask 52224  }
  0x8b   : > { %388 = vst [vmem:[#allocation2 + $0x20] sm:$0x3] %v387_v22  ;;  %v355_v23 = vpop.permute.xlu1 %354 }
  0x8c   : > { %v360_v24 = vsel %vm19219_vm6, %v353_v16, %v355_v23  ;;  %v361_v25 = vsel %vm19219_vm6, %v355_v23, %v357_v21  ;;  %v650_v21 = vld [vmem:[%s19196_s1 + $0x8] sm:$0xf] }
  0x8d   : > { %v379_v26 = vsel %vm16497_vm7, %v360_v24, %v378_v18  ;;  %v382_v27 = vsel %vm16497_vm7, %v361_v25, %v381_v19  ;;  %vm19213_vm7 = vcmask 60416  }
  0x8e   : > { %v391_v28 = vld [vmem:[#allocation2] sm:$0x3]  ;;  %380 = vst [vmem:[#allocation2 + $0x10] sm:$0x3] %v379_v26  ;;  %383 = vst [vmem:[#allocation2 + $0x18] sm:$0x3] %v382_v27 }
  0x8f   : > { %v392_v29 = vsel %vm16507_vm9, 0, %v391_v28  ;;  %vm19212_vm9 = vcmask 117816  }
  0x90   : > { %393 = vst [vmem:[#allocation2] sm:$0x3] %v392_v29 }
  0x91   : > { %v400_v31 = vld [vmem:[#allocation2 + $0x8] sm:$0x3] }
  0x92   : > { %v396_v32 = vld [vmem:[#allocation2 + $0x20] sm:$0x3]  ;;  %418 = vrot.lane.b32.xlu0 %v400_v31, %s16408_s16 }
  0x93   : > { %v397_v33 = vsel %vm395_vm11, 0, %v396_v32  ;;  %vm2622_vm11 = vcmask 949248  }
  0x94   : > { %398 = vst [vmem:[#allocation2 + $0x20] sm:$0x3] %v397_v33 }
  0x95   : > { %v401_v34 = vld [vmem:[#allocation2 + $0x10] sm:$0x3]  ;;  %v402_v36 = vld [vmem:[#allocation2 + $0x18] sm:$0x3] }
  0x96   : > { %420 = vrot.lane.b32.xlu1 %v401_v34, %s16408_s16 }
  0x97   : > { %v399_v35 = vld [vmem:[#allocation2] sm:$0x3] }
  0x98   : > { %416 = vrot.lane.b32.xlu0 %v399_v35, %s16408_s16 }
  0x9a   : > { %422 = vrot.lane.b32.xlu1 %v402_v36, %s16408_s16 }
  0x9b   : > { %v403_v37 = vld [vmem:[#allocation2 + $0x20] sm:$0x3] }
  0x9c   : > { %424 = vrot.lane.b32.xlu0 %v403_v37, %s16408_s16 }
  0x9e   : > { %536 = vrot.lane.b32.xlu1 %v400_v31, %s16409_s17 }
  0xa0   : > { %538 = vrot.lane.b32.xlu0 %v401_v34, %s16409_s17 }
  0xa2   : > { %534 = vrot.lane.b32.xlu1 %v399_v35, %s16409_s17 }
  0xa4   : > { %540 = vrot.lane.b32.xlu0 %v402_v36, %s16409_s17 }
  0xa6   : > { %542 = vrot.lane.b32.xlu1 %v403_v37, %s16409_s17 }
  0xa8   : > { %653 = vrot.lane.b32.xlu0 %v400_v31, %s16410_s18 }
  0xaa   : > { %655 = vrot.lane.b32.xlu1 %v401_v34, %s16410_s18 }
  0xac   : > { %651 = vrot.lane.b32.xlu0 %v399_v35, %s16410_s18 }
  0xae   : > { %657 = vrot.lane.b32.xlu1 %v402_v36, %s16410_s18 }
  0xb0   : > { %659 = vrot.lane.b32.xlu0 %v403_v37, %s16410_s18 }
  0xb2   : > { %770 = vrot.lane.b32.xlu1 %v400_v31, %s16411_s19 }
  0xb4   : > { %772 = vrot.lane.b32.xlu0 %v401_v34, %s16411_s19 }
  0xb6   : > { %768 = vrot.lane.b32.xlu1 %v399_v35, %s16411_s19 }
  0xb8   : > { %774 = vrot.lane.b32.xlu0 %v402_v36, %s16411_s19 }
  0xba   : > { %776 = vrot.lane.b32.xlu1 %v403_v37, %s16411_s19 }
  0xbc   : > { %887 = vrot.lane.b32.xlu0 %v400_v31, %s16412_s20 }
  0xbe   : > { %889 = vrot.lane.b32.xlu1 %v401_v34, %s16412_s20 }
  0xc0   : > { %885 = vrot.lane.b32.xlu0 %v399_v35, %s16412_s20 }
  0xc2   : > { %891 = vrot.lane.b32.xlu1 %v402_v36, %s16412_s20 }
  0xc4   : > { %893 = vrot.lane.b32.xlu0 %v403_v37, %s16412_s20 }
  0xc6   : > { %1004 = vrot.lane.b32.xlu1 %v400_v31, %s19241_s21 }
  0xc8   : > { %1006 = vrot.lane.b32.xlu0 %v401_v34, %s19241_s21 }
  0xca   : > { %1002 = vrot.lane.b32.xlu1 %v399_v35, %s19241_s21 }
  0xcc   : > { %1008 = vrot.lane.b32.xlu0 %v402_v36, %s19241_s21 }
  0xce   : > { %1010 = vrot.lane.b32.xlu1 %v403_v37, %s19241_s21 }
  0xd0   : > { %1121 = vrot.lane.b32.xlu0 %v400_v31, %s19243_s22 }
  0xd2   : > { %1123 = vrot.lane.b32.xlu1 %v401_v34, %s19243_s22 }
  0xd4   : > { %1119 = vrot.lane.b32.xlu0 %v399_v35, %s19243_s22 }
  0xd6   : > { %1125 = vrot.lane.b32.xlu1 %v402_v36, %s19243_s22 }
  0xd8   : > { %1127 = vrot.lane.b32.xlu0 %v403_v37, %s19243_s22 }
  0xda   : > { %408 = vperm.xlu1 %16098, %v405_v38  }
 0x104   : > { %v419_v41 = vpop.permute.xlu0 %418 }
 0x108   : > { %v421_v43 = vpop.permute.xlu1 %420 }
 0x109   : > { %v428_v44 = vsel %vm19217_vm13, %v419_v41, %v421_v43 }
 0x10a   : > { %v417_v45 = vpop.permute.xlu0 %416  ;;  %v443_v46 = vand.u32 %v16569_v42, %v428_v44 }
 0x10b   : > { %v427_v47 = vsel %vm19217_vm13, %v417_v45, %v419_v41 }
 0x10c   : > { %451 = vmatprep.subr.bf16.mxu0 %v443_v46  ;;  %v423_v48 = vpop.permute.xlu1 %422  ;;  %v440_v49 = vand.u32 %v16569_v42, %v427_v47 }
 0x10d   : > { %v429_v52 = vsel %vm19217_vm13, %v421_v43, %v423_v48 }
 0x10e   : > { %v425_v50 = vpop.permute.xlu0 %424  ;;  %452 = vmatpush1.bf16.msra.mxu0 %v440_v49  ;;  %v446_v56 = vand.u32 %v16569_v42, %v429_v52 }
 0x10f   : > { %v430_v53 = vsel %vm19217_vm13, %v423_v48, %v425_v50 }
 0x110   : > { %v537_v54 = vpop.permute.xlu1 %536  ;;  %v449_v55 = vand.u32 %v16569_v42, %v430_v53 }
 0x111   : > { %13833 = vmatmul.mubr.msk.bf16.vlgmr.msra.gmra.mrb[0].mxu0 %vm431_vm14, %v404_v51 }
 0x112   : > { %v539_v57 = vpop.permute.xlu0 %538  ;;  %492 = vmatprep.subr.bf16.mxu1 %v449_v55  ;;  %596 = vmatprep.mubr.bf16.mxu0 %v16407_v30 }
 0x113   : > { %v546_v58 = vsel %vm19216_vm15, %v537_v54, %v539_v57  ;;  %493 = vmatpush1.bf16.msra.mxu1 %v446_v56 }
 0x114   : > { %v535_v59 = vpop.permute.xlu1 %534  ;;  %v556_v60 = vand.u32 %v546_v58, %v16569_v42  ;;  %v884_v58 = vld [vmem:[%s19196_s1 + $0x10] sm:$0xf] }
 0x115   : > { %v545_v61 = vsel %vm19216_vm15, %v535_v59, %v537_v54 }
 0x116   : > { %v553_v62 = vand.u32 %v545_v61, %v16569_v42  ;;  %v541_v63 = vpop.permute.xlu0 %540  ;;  %13834 = vmatmul.mubr.msk.bf16.vlgmr.msra.gmra.mrb[0].mxu1 %vm431_vm14, %v404_v51  ;;  %564 = vmatprep.subr.bf16.mxu0 %v556_v60 }
 0x117   : > { %637 = vmatprep.mubr.bf16.mxu1 %v16407_v30  ;;  %v547_v0 = vsel %vm19216_vm15, %v539_v57, %v541_v63 }
 0x118   : > { %565 = vmatpush1.bf16.msra.mxu0 %v553_v62  ;;  %v543_v1 = vpop.permute.xlu1 %542  ;;  %v559_v6 = vand.u32 %v547_v0, %v16569_v42 }
 0x119   : > { %v548_v2 = vsel %vm19216_vm15, %v541_v63, %v543_v1 }
 0x11a   : > { %v562_v3 = vand.u32 %v548_v2, %v16569_v42  ;;  %v654_v4 = vpop.permute.xlu0 %653 }
 0x11c   : > { %605 = vmatprep.subr.bf16.mxu1 %v562_v3  ;;  %v656_v7 = vpop.permute.xlu1 %655 }
 0x11d   : > { %v663_v8 = vsel %vm19227_vm0, %v654_v4, %v656_v7  ;;  %13835 = vmatmul.mubr.msk.bf16.vlgmr.msra.gmra.mrb[0].mxu0 %vm431_vm14, %v533_v5  ;;  %606 = vmatpush1.bf16.msra.mxu1 %v559_v6 }
 0x11e   : > { %v652_v9 = vpop.permute.xlu0 %651  ;;  %v673_v10 = vand.u32 %v663_v8, %v16569_v42  ;;  %713 = vmatprep.mubr.bf16.mxu0 %v16407_v30  ;;  %v1001_v8 = vld [vmem:[%s19196_s1 + $0x14] sm:$0xf] }
 0x11f   : > { %v662_v11 = vsel %vm19227_vm0, %v652_v9, %v654_v4 }
 0x120   : > { %v670_v12 = vand.u32 %v662_v11, %v16569_v42  ;;  %681 = vmatprep.subr.bf16.mxu0 %v673_v10  ;;  %v658_v13 = vpop.permute.xlu1 %657 }
 0x121   : > { %v664_v14 = vsel %vm19227_vm0, %v656_v7, %v658_v13 }
 0x122   : > { %v660_v15 = vpop.permute.xlu0 %659  ;;  %13836 = vmatmul.mubr.msk.bf16.vlgmr.msra.gmra.mrb[0].mxu1 %vm431_vm14, %v533_v5  ;;  %682 = vmatpush1.bf16.msra.mxu0 %v670_v12  ;;  %v676_v19 = vand.u32 %v664_v14, %v16569_v42  ;;  %v1118_v14 = vld [vmem:[%s19196_s1 + $0x18] sm:$0xf] }
 0x123   : > { %v665_v16 = vsel %vm19227_vm0, %v658_v13, %v660_v15  ;;  %754 = vmatprep.mubr.bf16.mxu1 %v16407_v30 }
 0x124   : > { %v679_v17 = vand.u32 %v665_v16, %v16569_v42  ;;  %v771_v18 = vpop.permute.xlu1 %770 }
 0x126   : > { %v773_v20 = vpop.permute.xlu0 %772  ;;  %722 = vmatprep.subr.bf16.mxu1 %v679_v17 }
 0x127   : > { %v780_v22 = vsel %vm19226_vm1, %v771_v18, %v773_v20  ;;  %723 = vmatpush1.bf16.msra.mxu1 %v676_v19 }
 0x128   : > { %v769_v23 = vpop.permute.xlu1 %768  ;;  %v790_v24 = vand.u32 %v780_v22, %v16569_v42 }
 0x129   : > { %v779_v25 = vsel %vm19226_vm1, %v769_v23, %v771_v18  ;;  %13837 = vmatmul.mubr.msk.bf16.vlgmr.msra.gmra.mrb[0].mxu0 %vm431_vm14, %v650_v21 }
 0x12a   : > { %v787_v26 = vand.u32 %v779_v25, %v16569_v42  ;;  %v775_v27 = vpop.permute.xlu0 %774  ;;  %798 = vmatprep.subr.bf16.mxu0 %v790_v24  ;;  %830 = vmatprep.mubr.bf16.mxu0 %v16407_v30 }
 0x12b   : > { %v781_v28 = vsel %vm19226_vm1, %v773_v20, %v775_v27 }
 0x12c   : > { %799 = vmatpush1.bf16.msra.mxu0 %v787_v26  ;;  %v777_v29 = vpop.permute.xlu1 %776  ;;  %v793_v34 = vand.u32 %v781_v28, %v16569_v42 }
 0x12d   : > { %v782_v31 = vsel %vm19226_vm1, %v775_v27, %v777_v29 }
 0x12e   : > { %v796_v32 = vand.u32 %v782_v31, %v16569_v42  ;;  %v888_v33 = vpop.permute.xlu0 %887  ;;  %13838 = vmatmul.mubr.msk.bf16.vlgmr.msra.gmra.mrb[0].mxu1 %vm431_vm14, %v650_v21 }
 0x12f   : > { %871 = vmatprep.mubr.bf16.mxu1 %v16407_v30 }
 0x130   : > { %839 = vmatprep.subr.bf16.mxu1 %v796_v32  ;;  %v890_v35 = vpop.permute.xlu1 %889 }
 0x131   : > { %v897_v36 = vsel %vm19222_vm2, %v888_v33, %v890_v35  ;;  %840 = vmatpush1.bf16.msra.mxu1 %v793_v34 }
 0x132   : > { %v886_v37 = vpop.permute.xlu0 %885  ;;  %v907_v38 = vand.u32 %v897_v36, %v16569_v42 }
 0x133   : > { %v896_v41 = vsel %vm19222_vm2, %v886_v37, %v888_v33 }
 0x134   : > { %v904_v43 = vand.u32 %v896_v41, %v16569_v42  ;;  %915 = vmatprep.subr.bf16.mxu0 %v907_v38  ;;  %v892_v44 = vpop.permute.xlu1 %891 }
 0x135   : > { %13839 = vmatmul.mubr.msk.bf16.vlgmr.msra.gmra.mrb[0].mxu0 %vm431_vm14, %v767_v40  ;;  %v898_v45 = vsel %vm19222_vm2, %v890_v35, %v892_v44 }
 0x136   : > { %v894_v46 = vpop.permute.xlu0 %893  ;;  %916 = vmatpush1.bf16.msra.mxu0 %v904_v43  ;;  %947 = vmatprep.mubr.bf16.mxu0 %v16407_v30  ;;  %v910_v50 = vand.u32 %v898_v45, %v16569_v42 }
 0x137   : > { %v899_v47 = vsel %vm19222_vm2, %v892_v44, %v894_v46 }
 0x138   : > { %v913_v48 = vand.u32 %v899_v47, %v16569_v42  ;;  %v1005_v49 = vpop.permute.xlu1 %1004 }
 0x13a   : > { %v1007_v51 = vpop.permute.xlu0 %1006  ;;  %13840 = vmatmul.mubr.msk.bf16.vlgmr.msra.gmra.mrb[0].mxu1 %vm431_vm14, %v767_v40  ;;  %956 = vmatprep.subr.bf16.mxu1 %v913_v48 }
 0x13b   : > { %v1014_v52 = vsel %vm19221_vm3, %v1005_v49, %v1007_v51  ;;  %957 = vmatpush1.bf16.msra.mxu1 %v910_v50  ;;  %988 = vmatprep.mubr.bf16.mxu1 %v16407_v30  ;;  %v1280_v50 = vld [vmem:[%s19197_s2 + $0x8] sm:$0xff] }
 0x13c   : > { %v1003_v53 = vpop.permute.xlu1 %1002  ;;  %v1024_v54 = vand.u32 %v1014_v52, %v16569_v42 }
 0x13d   : > { %v1013_v55 = vsel %vm19221_vm3, %v1003_v53, %v1005_v49 }
 0x13e   : > { %v1021_v56 = vand.u32 %v1013_v55, %v16569_v42  ;;  %v1009_v57 = vpop.permute.xlu0 %1008  ;;  %1032 = vmatprep.subr.bf16.mxu0 %v1024_v54 }
 0x13f   : > { %v1015_v61 = vsel %vm19221_vm3, %v1007_v51, %v1009_v57 }
 0x140   : > { %v1011_v59 = vpop.permute.xlu1 %1010  ;;  %v1027_v1 = vand.u32 %v1015_v61, %v16569_v42 }
 0x141   : > { %v1016_v60 = vsel %vm19221_vm3, %v1009_v57, %v1011_v59  ;;  %13841 = vmatmul.mubr.msk.bf16.vlgmr.msra.gmra.mrb[0].mxu0 %vm431_vm14, %v884_v58  ;;  %v1279_v59 = vld [vmem:[%s19196_s1 + $0x1c] sm:$0xf] }
 0x142   : > { %v1030_v62 = vand.u32 %v1016_v60, %v16569_v42  ;;  %1033 = vmatpush1.bf16.msra.mxu0 %v1021_v56  ;;  %v1122_v63 = vpop.permute.xlu0 %1121  ;;  %1064 = vmatprep.mubr.bf16.mxu0 %v16407_v30 }
 0x144   : > { %1073 = vmatprep.subr.bf16.mxu1 %v1030_v62  ;;  %v1124_v0 = vpop.permute.xlu1 %1123 }
 0x145   : > { %v1131_v2 = vsel %vm19220_vm4, %v1122_v63, %v1124_v0 }
 0x146   : > { %v1120_v3 = vpop.permute.xlu0 %1119  ;;  %13842 = vmatmul.mubr.msk.bf16.vlgmr.msra.gmra.mrb[0].mxu1 %vm431_vm14, %v884_v58  ;;  %v1141_v4 = vand.u32 %v1131_v2, %v16569_v42 }
 0x147   : > { %1074 = vmatpush1.bf16.msra.mxu1 %v1027_v1  ;;  %1105 = vmatprep.mubr.bf16.mxu1 %v16407_v30  ;;  %v1130_v5 = vsel %vm19220_vm4, %v1120_v3, %v1122_v63 }
 0x148   : > { %1149 = vmatprep.subr.bf16.mxu0 %v1141_v4  ;;  %v1126_v6 = vpop.permute.xlu1 %1125  ;;  %v1138_v10 = vand.u32 %v1130_v5, %v16569_v42 }
 0x149   : > { %v1132_v12 = vsel %vm19220_vm4, %v1124_v0, %v1126_v6 }
 0x14a   : > { %v1128_v7 = vpop.permute.xlu0 %1127  ;;  %v1144_v13 = vand.u32 %v1132_v12, %v16569_v42 }
 0x14b   : > { %v1133_v9 = vsel %vm19220_vm4, %v1126_v6, %v1128_v7 }
 0x14c   : > { %v1147_v11 = vand.u32 %v1133_v9, %v16569_v42 }
 0x14d   : > { %13843 = vmatmul.mubr.msk.bf16.vlgmr.msra.gmra.mrb[0].mxu0 %vm431_vm14, %v1001_v8 }
 0x14e   : > { %1150 = vmatpush1.bf16.msra.mxu0 %v1138_v10  ;;  %1190 = vmatprep.subr.bf16.mxu1 %v1147_v11  ;;  %v1404_v10 = vld [vmem:[%s19196_s1 + $0x20] sm:$0xf] }
 0x14f   : > { %1181 = vmatprep.mubr.bf16.mxu0 %v16407_v30 }
 0x152   : > { %13844 = vmatmul.mubr.msk.bf16.vlgmr.msra.gmra.mrb[0].mxu1 %vm431_vm14, %v1001_v8 }
 0x153   : > { %1191 = vmatpush1.bf16.msra.mxu1 %v1144_v13  ;;  %1222 = vmatprep.mubr.bf16.mxu1 %v16407_v30 }
 0x159   : > { %13845 = vmatmul.mubr.msk.bf16.vlgmr.msra.gmra.mrb[0].mxu0 %vm431_vm14, %v1118_v14  ;;  %v409_v15 = vpop.permute.xlu1 %408 }
 0x15a   : > { %1354 = vmatprep.mubr.bf16.mxu0 %v16407_v30 }
 0x15e   : > { %13846 = vmatmul.mubr.msk.bf16.vlgmr.msra.gmra.mrb[0].mxu1 %vm431_vm14, %v1118_v14  ;;  %vm19210_vm14 = vcmask 932864  }
 0x15f   : > { %1395 = vmatprep.mubr.bf16.mxu1 %v16407_v30 }
 0x22c   : > { %v1183_v16 = vpop.f32.mrb[0].mxu0 }
 0x22d   : > { %v1185_v42 = vpop.f32.mrb[1].mxu0  ;;  %v15396_v17 = vadd.f32 %v1183_v16, %v409_v15 }
 0x22e   : > { %v15397_v18 = vadd.f32 %v1185_v42, %v409_v15  ;;  %v1187_v19 = vpop.f32.mrb[2].mxu0 }
 0x22f   : > { %v1188_v20 = vpop.f32.mrb[3].mxu0  ;;  %v1235_v21 = vmax.f32 %v15396_v17, 0.0 }
 0x230   : > { %v1236_v22 = vmax.f32 %v15397_v18, 0.0 }
 0x231   : > { %v1224_v23 = vpop.f32.mrb[0].mxu1  ;;  %v1239_v24 = vpack.c.bf16 %v1235_v21, %v1235_v21 }
 0x232   : > { %v1240_v25 = vpack.c.bf16 %v1236_v22, %v1236_v22  ;;  %v15398_v26 = vadd.f32 %v1224_v23, %v409_v15  ;;  %v1226_v27 = vpop.f32.mrb[1].mxu1  ;;  %v1520_v22 = vld [vmem:[%s19196_s1 + $0x24] sm:$0xf] }
 0x233   : > { %v15399_v28 = vadd.f32 %v1226_v27, %v409_v15  ;;  %v1228_v29 = vpop.f32.mrb[2].mxu1  ;;  %1247 = vrot.lane.b32.xlu0 %v1239_v24, %s16406_s15 }
 0x234   : > { %v1237_v31 = vmax.f32 %v15398_v26, 0.0  ;;  %v1229_v32 = vpop.f32.mrb[3].mxu1  ;;  %1249 = vrot.lane.b32.xlu1 %v1240_v25, %s16406_s15 }
 0x235   : > { %v1238_v33 = vmax.f32 %v15399_v28, 0.0 }
 0x236   : > { %v1241_v34 = vpack.c.bf16 %v1237_v31, %v1237_v31 }
 0x237   : > { %v1242_v35 = vpack.c.bf16 %v1238_v33, %v1238_v33 }
 0x238   : > { %1251 = vrot.lane.b32.xlu0 %v1241_v34, %s16406_s15 }
 0x239   : > { %1253 = vrot.lane.b32.xlu1 %v1242_v35, %s16406_s15 }
 0x2a5   : > { %v1248_v36 = vpop.permute.xlu0 %1247 }
 0x2a6   : > { %1264 = vst.msk [vmem:[#allocation2] sm:$0xf] %vm19215_vm5, %v1248_v36  ;;  %v1250_v37 = vpop.permute.xlu1 %1249 }
 0x2a7   : > { %1271 = vst.msk [vmem:[#allocation2] sm:$0xf] %vm19213_vm7, %v16407_v30  ;;  %v1255_v38 = vsel %vm19219_vm6, %v1248_v36, %v1250_v37 }
 0x2a8   : > { %1265 = vst [vmem:[#allocation2 + $0x8] sm:$0xf] %v1255_v38 }
 0x2aa   : > { %v1252_v40 = vpop.permute.xlu0 %1251 }
 0x2ab   : > { %v1256_v41 = vsel %vm19219_vm6, %v1250_v37, %v1252_v40  ;;  %v1254_v43 = vpop.permute.xlu1 %1253  ;;  %v1636_v37 = vld [vmem:[%s19196_s1 + $0x28] sm:$0xf] }
 0x2ac   : > { %1266 = vst [vmem:[#allocation2 + $0x10] sm:$0xf] %v1256_v41  ;;  %v1257_v44 = vsel %vm19219_vm6, %v1252_v40, %v1254_v43  ;;  %1269 = vst.msk [vmem:[#allocation2 + $0x20] sm:$0xf] %vm19214_vm8, %v1254_v43 }
 0x2ad   : > { %1267 = vst [vmem:[#allocation2 + $0x18] sm:$0xf] %v1257_v44  ;;  %1273 = vst.msk [vmem:[#allocation2 + $0x20] sm:$0xf] %vm19212_vm9, %v16407_v30 }
 0x2ae   : > { %v1274_v45 = vld [vmem:[#allocation2] sm:$0xf] }
 0x2af   : > { %v1275_v46 = vld [vmem:[#allocation2 + $0x8] sm:$0xf]  ;;  %1291 = vrot.lane.b32.xlu0 %v1274_v45, %s16408_s16 }
 0x2b0   : > { %1293 = vrot.lane.b32.xlu1 %v1275_v46, %s16408_s16 }
 0x2b3   : > { %v1276_v47 = vld [vmem:[#allocation2 + $0x10] sm:$0xf] }
 0x2b4   : > { %1295 = vrot.lane.b32.xlu0 %v1276_v47, %s16408_s16  ;;  %v1277_v48 = vld [vmem:[#allocation2 + $0x18] sm:$0xf]  ;;  %v1278_v49 = vld [vmem:[#allocation2 + $0x20] sm:$0xf] }
 0x2b5   : > { %1297 = vrot.lane.b32.xlu1 %v1277_v48, %s16408_s16 }
 0x2b8   : > { %1299 = vrot.lane.b32.xlu0 %v1278_v49, %s16408_s16 }
 0x2b9   : > { %1405 = vrot.lane.b32.xlu1 %v1274_v45, %s16409_s17 }
 0x2bc   : > { %1407 = vrot.lane.b32.xlu0 %v1275_v46, %s16409_s17 }
 0x2bd   : > { %1409 = vrot.lane.b32.xlu1 %v1276_v47, %s16409_s17 }
 0x2c0   : > { %1411 = vrot.lane.b32.xlu0 %v1277_v48, %s16409_s17 }
 0x2c1   : > { %1413 = vrot.lane.b32.xlu1 %v1278_v49, %s16409_s17 }
 0x2c4   : > { %1521 = vrot.lane.b32.xlu0 %v1274_v45, %s16410_s18 }
 0x2c5   : > { %1523 = vrot.lane.b32.xlu1 %v1275_v46, %s16410_s18 }
 0x2c8   : > { %1525 = vrot.lane.b32.xlu0 %v1276_v47, %s16410_s18 }
 0x2c9   : > { %1527 = vrot.lane.b32.xlu1 %v1277_v48, %s16410_s18 }
 0x2cc   : > { %1529 = vrot.lane.b32.xlu0 %v1278_v49, %s16410_s18 }
 0x2cd   : > { %1637 = vrot.lane.b32.xlu1 %v1274_v45, %s16411_s19 }
 0x2d0   : > { %1639 = vrot.lane.b32.xlu0 %v1275_v46, %s16411_s19 }
 0x2d1   : > { %1641 = vrot.lane.b32.xlu1 %v1276_v47, %s16411_s19 }
 0x2d4   : > { %1643 = vrot.lane.b32.xlu0 %v1277_v48, %s16411_s19 }
 0x2d5   : > { %1645 = vrot.lane.b32.xlu1 %v1278_v49, %s16411_s19 }
 0x2d8   : > { %1753 = vrot.lane.b32.xlu0 %v1274_v45, %s16412_s20 }
 0x2d9   : > { %1755 = vrot.lane.b32.xlu1 %v1275_v46, %s16412_s20 }
 0x2dc   : > { %1757 = vrot.lane.b32.xlu0 %v1276_v47, %s16412_s20 }
 0x2dd   : > { %1759 = vrot.lane.b32.xlu1 %v1277_v48, %s16412_s20 }
 0x2e0   : > { %1761 = vrot.lane.b32.xlu0 %v1278_v49, %s16412_s20 }
 0x2e1   : > { %1869 = vrot.lane.b32.xlu1 %v1274_v45, %s19241_s21 }
 0x2e4   : > { %1871 = vrot.lane.b32.xlu0 %v1275_v46, %s19241_s21 }
 0x2e5   : > { %1873 = vrot.lane.b32.xlu1 %v1276_v47, %s19241_s21 }
 0x2e8   : > { %1875 = vrot.lane.b32.xlu0 %v1277_v48, %s19241_s21 }
 0x2e9   : > { %1877 = vrot.lane.b32.xlu1 %v1278_v49, %s19241_s21 }
 0x2ec   : > { %1985 = vrot.lane.b32.xlu0 %v1274_v45, %s19243_s22 }
 0x2ed   : > { %1987 = vrot.lane.b32.xlu1 %v1275_v46, %s19243_s22 }
 0x2f0   : > { %1989 = vrot.lane.b32.xlu0 %v1276_v47, %s19243_s22 }
 0x2f1   : > { %1991 = vrot.lane.b32.xlu1 %v1277_v48, %s19243_s22 }
 0x2f4   : > { %1993 = vrot.lane.b32.xlu0 %v1278_v49, %s19243_s22 }
 0x2f5   : > { %1283 = vperm.xlu1 %16098, %v1280_v50  }
 0x321   : > { %v1292_v51 = vpop.permute.xlu0 %1291 }
 0x322   : > { %v1294_v52 = vpop.permute.xlu1 %1293 }
 0x323   : > { %v1301_v53 = vsel %vm19217_vm13, %v1292_v51, %v1294_v52 }
 0x324   : > { %v1311_v57 = vsel %vm19218_vm10, %v1301_v53, 0  ;;  %v1752_v53 = vld [vmem:[%s19196_s1 + $0x2c] sm:$0xf] }
 0x326   : > { %v1296_v54 = vpop.permute.xlu0 %1295 }
 0x327   : > { %v1298_v55 = vpop.permute.xlu1 %1297  ;;  %v1302_v56 = vsel %vm19217_vm13, %v1294_v52, %v1296_v54 }
 0x328   : > { %13847 = vmatprep.subr.msk.bf16.mxu0 %vm19218_vm10, %v1302_v56  ;;  %v1303_v58 = vsel %vm19217_vm13, %v1296_v54, %v1298_v55 }
 0x329   : > { %1323 = vmatpush1.bf16.msra.mxu0 %v1311_v57  ;;  %v1317_v63 = vsel %vm19218_vm10, %v1303_v58, 0 }
 0x32a   : > { %v1300_v60 = vpop.permute.xlu0 %1299 }
 0x32b   : > { %v1304_v61 = vsel %vm19217_vm13, %v1298_v55, %v1300_v60  ;;  %v1406_v62 = vpop.permute.xlu1 %1405 }
 0x32c   : > { %13848 = vmatmul.mubr.msk.bf16.vlgmr.msra.gmra.mrb[4].mxu0 %vm19219_vm6, %v1279_v59  ;;  %13849 = vmatprep.subr.msk.bf16.mxu1 %vm19218_vm10, %v1304_v61 }
 0x32d   : > { %1364 = vmatpush1.bf16.msra.mxu1 %v1317_v63  ;;  %1466 = vmatprep.mubr.bf16.mxu0 %v16407_v30 }
 0x32e   : > { %v1408_v0 = vpop.permute.xlu0 %1407 }
 0x32f   : > { %v1415_v1 = vsel %vm19216_vm15, %v1406_v62, %v1408_v0  ;;  %v1410_v2 = vpop.permute.xlu1 %1409 }
 0x330   : > { %13850 = vmatmul.mubr.msk.bf16.vlgmr.msra.gmra.mrb[4].mxu1 %vm19219_vm6, %v1279_v59  ;;  %v1416_v3 = vsel %vm19216_vm15, %v1408_v0, %v1410_v2  ;;  %v1423_v4 = vsel %vm19218_vm10, %v1415_v1, 0  ;;  %v1868_v1 = vld [vmem:[%s19196_s1 + $0x30] sm:$0xf] }
 0x331   : > { %13851 = vmatprep.subr.msk.bf16.mxu0 %vm19218_vm10, %v1416_v3  ;;  %1507 = vmatprep.mubr.bf16.mxu1 %v16407_v30 }
 0x332   : > { %1435 = vmatpush1.bf16.msra.mxu0 %v1423_v4  ;;  %v1412_v5 = vpop.permute.xlu0 %1411 }
 0x333   : > { %v1417_v6 = vsel %vm19216_vm15, %v1410_v2, %v1412_v5  ;;  %v1414_v7 = vpop.permute.xlu1 %1413 }
 0x334   : > { %v1418_v8 = vsel %vm19216_vm15, %v1412_v5, %v1414_v7  ;;  %v1429_v9 = vsel %vm19218_vm10, %v1417_v6, 0 }
 0x335   : > { %13853 = vmatprep.subr.msk.bf16.mxu1 %vm19218_vm10, %v1418_v8  ;;  %v1984_v8 = vld [vmem:[%s19196_s1 + $0x34] sm:$0xf] }
 0x336   : > { %1476 = vmatpush1.bf16.msra.mxu1 %v1429_v9  ;;  %v1522_v11 = vpop.permute.xlu0 %1521 }
 0x337   : > { %v1524_v12 = vpop.permute.xlu1 %1523 }
 0x338   : > { %13852 = vmatmul.mubr.msk.bf16.vlgmr.msra.gmra.mrb[4].mxu0 %vm19219_vm6, %v1404_v10  ;;  %v1531_v13 = vsel %vm19227_vm0, %v1522_v11, %v1524_v12 }
 0x339   : > { %1582 = vmatprep.mubr.bf16.mxu0 %v16407_v30  ;;  %v1539_v42 = vsel %vm19218_vm10, %v1531_v13, 0 }
 0x33a   : > { %v1526_v14 = vpop.permute.xlu0 %1525 }
 0x33b   : > { %v1528_v15 = vpop.permute.xlu1 %1527  ;;  %v1532_v16 = vsel %vm19227_vm0, %v1524_v12, %v1526_v14 }
 0x33c   : > { %13854 = vmatmul.mubr.msk.bf16.vlgmr.msra.gmra.mrb[4].mxu1 %vm19219_vm6, %v1404_v10  ;;  %13855 = vmatprep.subr.msk.bf16.mxu0 %vm19218_vm10, %v1532_v16  ;;  %v1533_v17 = vsel %vm19227_vm0, %v1526_v14, %v1528_v15 }
 0x33d   : > { %1551 = vmatpush1.bf16.msra.mxu0 %v1539_v42  ;;  %1623 = vmatprep.mubr.bf16.mxu1 %v16407_v30  ;;  %v1545_v21 = vsel %vm19218_vm10, %v1533_v17, 0 }
 0x33e   : > { %v1530_v18 = vpop.permute.xlu0 %1529 }
 0x33f   : > { %v1534_v19 = vsel %vm19227_vm0, %v1528_v15, %v1530_v18  ;;  %v1638_v20 = vpop.permute.xlu1 %1637 }
 0x340   : > { %13857 = vmatprep.subr.msk.bf16.mxu1 %vm19218_vm10, %v1534_v19 }
 0x341   : > { %1592 = vmatpush1.bf16.msra.mxu1 %v1545_v21 }
 0x342   : > { %v1640_v23 = vpop.permute.xlu0 %1639 }
 0x343   : > { %v1647_v24 = vsel %vm19226_vm1, %v1638_v20, %v1640_v23  ;;  %v1642_v25 = vpop.permute.xlu1 %1641 }
 0x344   : > { %13856 = vmatmul.mubr.msk.bf16.vlgmr.msra.gmra.mrb[4].mxu0 %vm19219_vm6, %v1520_v22  ;;  %v1648_v26 = vsel %vm19226_vm1, %v1640_v23, %v1642_v25  ;;  %v1655_v27 = vsel %vm19218_vm10, %v1647_v24, 0 }
 0x345   : > { %13859 = vmatprep.subr.msk.bf16.mxu0 %vm19218_vm10, %v1648_v26  ;;  %1698 = vmatprep.mubr.bf16.mxu0 %v16407_v30 }
 0x346   : > { %1667 = vmatpush1.bf16.msra.mxu0 %v1655_v27  ;;  %v1644_v28 = vpop.permute.xlu0 %1643 }
 0x347   : > { %v1649_v29 = vsel %vm19226_vm1, %v1642_v25, %v1644_v28  ;;  %v1646_v31 = vpop.permute.xlu1 %1645 }
 0x348   : > { %v1650_v32 = vsel %vm19226_vm1, %v1644_v28, %v1646_v31  ;;  %13858 = vmatmul.mubr.msk.bf16.vlgmr.msra.gmra.mrb[4].mxu1 %vm19219_vm6, %v1520_v22  ;;  %v1661_v33 = vsel %vm19218_vm10, %v1649_v29, 0 }
 0x349   : > { %13861 = vmatprep.subr.msk.bf16.mxu1 %vm19218_vm10, %v1650_v32  ;;  %1739 = vmatprep.mubr.bf16.mxu1 %v16407_v30 }
 0x34a   : > { %1708 = vmatpush1.bf16.msra.mxu1 %v1661_v33  ;;  %v1754_v34 = vpop.permute.xlu0 %1753 }
 0x34b   : > { %v1756_v35 = vpop.permute.xlu1 %1755 }
 0x34c   : > { %v1763_v36 = vsel %vm19222_vm2, %v1754_v34, %v1756_v35 }
 0x34d   : > { %v1771_v43 = vsel %vm19218_vm10, %v1763_v36, 0 }
 0x34e   : > { %v1758_v38 = vpop.permute.xlu0 %1757 }
 0x34f   : > { %v1760_v40 = vpop.permute.xlu1 %1759  ;;  %v1764_v41 = vsel %vm19222_vm2, %v1756_v35, %v1758_v38 }
 0x350   : > { %13860 = vmatmul.mubr.msk.bf16.vlgmr.msra.gmra.mrb[4].mxu0 %vm19219_vm6, %v1636_v37  ;;  %13863 = vmatprep.subr.msk.bf16.mxu0 %vm19218_vm10, %v1764_v41  ;;  %v1765_v44 = vsel %vm19222_vm2, %v1758_v38, %v1760_v40 }
 0x351   : > { %1783 = vmatpush1.bf16.msra.mxu0 %v1771_v43  ;;  %1814 = vmatprep.mubr.bf16.mxu0 %v16407_v30  ;;  %v1777_v48 = vsel %vm19218_vm10, %v1765_v44, 0  ;;  %v2141_v44 = vld [vmem:[%s19197_s2 + $0x10] sm:$0xff] }
 0x352   : > { %v1762_v45 = vpop.permute.xlu0 %1761 }
 0x353   : > { %v1766_v46 = vsel %vm19222_vm2, %v1760_v40, %v1762_v45  ;;  %v1870_v47 = vpop.permute.xlu1 %1869 }
 0x354   : > { %13862 = vmatmul.mubr.msk.bf16.vlgmr.msra.gmra.mrb[4].mxu1 %vm19219_vm6, %v1636_v37  ;;  %13865 = vmatprep.subr.msk.bf16.mxu1 %vm19218_vm10, %v1766_v46 }
 0x355   : > { %1824 = vmatpush1.bf16.msra.mxu1 %v1777_v48  ;;  %1855 = vmatprep.mubr.bf16.mxu1 %v16407_v30 }
 0x356   : > { %v1872_v49 = vpop.permute.xlu0 %1871 }
 0x357   : > { %v1874_v50 = vpop.permute.xlu1 %1873  ;;  %v1879_v52 = vsel %vm19221_vm3, %v1870_v47, %v1872_v49 }
 0x358   : > { %v1880_v51 = vsel %vm19221_vm3, %v1872_v49, %v1874_v50  ;;  %v1887_v57 = vsel %vm19218_vm10, %v1879_v52, 0  ;;  %v2140_v52 = vld [vmem:[%s19196_s1 + $0x38] sm:$0xf] }
 0x359   : > { %13867 = vmatprep.subr.msk.bf16.mxu0 %vm19218_vm10, %v1880_v51 }
 0x35a   : > { %v1876_v54 = vpop.permute.xlu0 %1875 }
 0x35b   : > { %v1878_v55 = vpop.permute.xlu1 %1877  ;;  %v1881_v58 = vsel %vm19221_vm3, %v1874_v50, %v1876_v54 }
 0x35c   : > { %v1882_v56 = vsel %vm19221_vm3, %v1876_v54, %v1878_v55  ;;  %13864 = vmatmul.mubr.msk.bf16.vlgmr.msra.gmra.mrb[4].mxu0 %vm19219_vm6, %v1752_v53  ;;  %v1893_v61 = vsel %vm19218_vm10, %v1881_v58, 0 }
 0x35d   : > { %1899 = vmatpush1.bf16.msra.mxu0 %v1887_v57  ;;  %13869 = vmatprep.subr.msk.bf16.mxu1 %vm19218_vm10, %v1882_v56 }
 0x35e   : > { %v1986_v59 = vpop.permute.xlu0 %1985  ;;  %1930 = vmatprep.mubr.bf16.mxu0 %v16407_v30 }
 0x35f   : > { %v1988_v60 = vpop.permute.xlu1 %1987 }
 0x360   : > { %13866 = vmatmul.mubr.msk.bf16.vlgmr.msra.gmra.mrb[4].mxu1 %vm19219_vm6, %v1752_v53  ;;  %v1995_v0 = vsel %vm19220_vm4, %v1986_v59, %v1988_v60 }
 0x361   : > { %1940 = vmatpush1.bf16.msra.mxu1 %v1893_v61  ;;  %1971 = vmatprep.mubr.bf16.mxu1 %v16407_v30  ;;  %v2003_v5 = vsel %vm19218_vm10, %v1995_v0, 0 }
 0x362   : > { %v1990_v62 = vpop.permute.xlu0 %1989 }
 0x363   : > { %v1996_v63 = vsel %vm19220_vm4, %v1988_v60, %v1990_v62  ;;  %v1992_v2 = vpop.permute.xlu1 %1991 }
 0x364   : > { %13871 = vmatprep.subr.msk.bf16.mxu0 %vm19218_vm10, %v1996_v63  ;;  %v1997_v6 = vsel %vm19220_vm4, %v1990_v62, %v1992_v2 }
 0x365   : > { %v2009_v7 = vsel %vm19218_vm10, %v1997_v6, 0 }
 0x366   : > { %v1994_v3 = vpop.permute.xlu0 %1993 }
 0x367   : > { %v1998_v4 = vsel %vm19220_vm4, %v1992_v2, %v1994_v3 }
 0x368   : > { %13868 = vmatmul.mubr.msk.bf16.vlgmr.msra.gmra.mrb[4].mxu0 %vm19219_vm6, %v1868_v1  ;;  %13873 = vmatprep.subr.msk.bf16.mxu1 %vm19218_vm10, %v1998_v4 }
 0x369   : > { %2015 = vmatpush1.bf16.msra.mxu0 %v2003_v5  ;;  %2046 = vmatprep.mubr.bf16.mxu0 %v16407_v30 }
 0x36c   : > { %13870 = vmatmul.mubr.msk.bf16.vlgmr.msra.gmra.mrb[4].mxu1 %vm19219_vm6, %v1868_v1  ;;  %v2263_v1 = vld [vmem:[%s19196_s1 + $0x3c] sm:$0xf] }
 0x36d   : > { %2056 = vmatpush1.bf16.msra.mxu1 %v2009_v7  ;;  %2087 = vmatprep.mubr.bf16.mxu1 %v16407_v30 }
 0x374   : > { %13872 = vmatmul.mubr.msk.bf16.vlgmr.msra.gmra.mrb[4].mxu0 %vm19219_vm6, %v1984_v8  ;;  %v1284_v9 = vpop.permute.xlu1 %1283 }
 0x375   : > { %2213 = vmatprep.mubr.bf16.mxu0 %v16407_v30 }
 0x378   : > { %13874 = vmatmul.mubr.msk.bf16.vlgmr.msra.gmra.mrb[4].mxu1 %vm19219_vm6, %v1984_v8 }
 0x379   : > { %2254 = vmatprep.mubr.bf16.mxu1 %v16407_v30 }
 0x447   : > { %v2048_v10 = vpop.f32.mrb[4].mxu0 }
 0x448   : > { %v15400_v11 = vadd.f32 %v2048_v10, %v1284_v9  ;;  %v2050_v12 = vpop.f32.mrb[5].mxu0 }
 0x449   : > { %v15401_v13 = vadd.f32 %v2050_v12, %v1284_v9  ;;  %v2052_v14 = vpop.f32.mrb[6].mxu0 }
 0x44a   : > { %v2100_v15 = vmax.f32 %v15400_v11, 0.0  ;;  %v2053_v16 = vpop.f32.mrb[7].mxu0 }
 0x44b   : > { %v2101_v42 = vmax.f32 %v15401_v13, 0.0  ;;  %v2089_v17 = vpop.f32.mrb[4].mxu1  ;;  %v2379_v16 = vld [vmem:[%s19196_s1 + $0x40] sm:$0xf] }
 0x44c   : > { %v16832_v18 = vpack.c.bf16 %v2100_v15, %v2100_v15  ;;  %v15402_v19 = vadd.f32 %v2089_v17, %v1284_v9  ;;  %v2091_v20 = vpop.f32.mrb[5].mxu1 }
 0x44d   : > { %v16834_v21 = vpack.c.bf16 %v2101_v42, %v2101_v42  ;;  %v15403_v22 = vadd.f32 %v2091_v20, %v1284_v9  ;;  %v2093_v23 = vpop.f32.mrb[6].mxu1 }
 0x44e   : > { %v2102_v24 = vmax.f32 %v15402_v19, 0.0  ;;  %2112 = vrot.lane.b32.xlu0 %v16832_v18, %s16406_s15  ;;  %v2094_v25 = vpop.f32.mrb[7].mxu1 }
 0x44f   : > { %v2103_v26 = vmax.f32 %v15403_v22, 0.0  ;;  %2114 = vrot.lane.b32.xlu1 %v16834_v21, %s16406_s15 }
 0x450   : > { %v16840_v27 = vpack.c.bf16 %v2102_v24, %v2102_v24 }
 0x451   : > { %v16842_v28 = vpack.c.bf16 %v2103_v26, %v2103_v26 }
 0x452   : > { %2116 = vrot.lane.b32.xlu0 %v16840_v27, %s16406_s15 }
 0x453   : > { %2118 = vrot.lane.b32.xlu1 %v16842_v28, %s16406_s15 }
 0x4c0   : > { %v2113_v29 = vpop.permute.xlu0 %2112 }
 0x4c1   : > { %2128 = vst.msk [vmem:[#allocation2] sm:$0xf] %vm19215_vm5, %v2113_v29  ;;  %v2115_v31 = vpop.permute.xlu1 %2114 }
 0x4c2   : > { %2133 = vst.msk [vmem:[#allocation2] sm:$0xf] %vm19213_vm7, %v16407_v30  ;;  %v2120_v32 = vsel %vm19219_vm6, %v2113_v29, %v2115_v31 }
 0x4c3   : > { %2129 = vst [vmem:[#allocation2 + $0x8] sm:$0xf] %v2120_v32 }
 0x4c4   : > { %v2117_v33 = vpop.permute.xlu0 %2116 }
 0x4c5   : > { %v2121_v34 = vsel %vm19219_vm6, %v2115_v31, %v2117_v33  ;;  %v2119_v35 = vpop.permute.xlu1 %2118 }
 0x4c6   : > { %2130 = vst [vmem:[#allocation2 + $0x10] sm:$0xf] %v2121_v34  ;;  %v2122_v36 = vsel %vm19219_vm6, %v2117_v33, %v2119_v35  ;;  %2132 = vst.msk [vmem:[#allocation2 + $0x20] sm:$0xf] %vm19214_vm8, %v2119_v35  ;;  %v2495_v33 = vld [vmem:[%s19196_s1 + $0x44] sm:$0xf] }
 0x4c7   : > { %2131 = vst [vmem:[#allocation2 + $0x18] sm:$0xf] %v2122_v36  ;;  %2134 = vst.msk [vmem:[#allocation2 + $0x20] sm:$0xf] %vm19212_vm9, %v16407_v30 }
 0x4c9   : > { %v2135_v37 = vld [vmem:[#allocation2] sm:$0xf] }
 0x4ca   : > { %2152 = vrot.lane.b32.xlu0 %v2135_v37, %s16411_s19  ;;  %v2136_v38 = vld [vmem:[#allocation2 + $0x8] sm:$0xf] }
 0x4cb   : > { %2154 = vrot.lane.b32.xlu1 %v2136_v38, %s16411_s19 }
 0x4cd   : > { %v2137_v40 = vld [vmem:[#allocation2 + $0x10] sm:$0xf] }
 0x4ce   : > { %2156 = vrot.lane.b32.xlu0 %v2137_v40, %s16411_s19  ;;  %v2138_v41 = vld [vmem:[#allocation2 + $0x18] sm:$0xf]  ;;  %v2139_v43 = vld [vmem:[#allocation2 + $0x20] sm:$0xf] }
 0x4cf   : > { %2264 = vrot.lane.b32.xlu1 %v2135_v37, %s16412_s20 }
 0x4d2   : > { %2266 = vrot.lane.b32.xlu0 %v2136_v38, %s16412_s20 }
 0x4d3   : > { %2268 = vrot.lane.b32.xlu1 %v2137_v40, %s16412_s20 }
 0x4d6   : > { %2380 = vrot.lane.b32.xlu0 %v2135_v37, %s19241_s21 }
 0x4d7   : > { %2382 = vrot.lane.b32.xlu1 %v2136_v38, %s19241_s21 }
 0x4da   : > { %2384 = vrot.lane.b32.xlu0 %v2137_v40, %s19241_s21 }
 0x4db   : > { %2158 = vrot.lane.b32.xlu1 %v2138_v41, %s16411_s19 }
 0x4de   : > { %2160 = vrot.lane.b32.xlu0 %v2139_v43, %s16411_s19 }
 0x4df   : > { %2496 = vrot.lane.b32.xlu1 %v2135_v37, %s19243_s22 }
 0x4e2   : > { %2498 = vrot.lane.b32.xlu0 %v2136_v38, %s19243_s22 }
 0x4e3   : > { %2500 = vrot.lane.b32.xlu1 %v2137_v40, %s19243_s22 }
 0x4e6   : > { %2270 = vrot.lane.b32.xlu0 %v2138_v41, %s16412_s20 }
 0x4e7   : > { %2272 = vrot.lane.b32.xlu1 %v2139_v43, %s16412_s20 }
 0x4ea   : > { %2612 = vrot.lane.b32.xlu0 %v2135_v37, %s16416_s25 }
 0x4eb   : > { %2614 = vrot.lane.b32.xlu1 %v2136_v38, %s16416_s25 }
 0x4ee   : > { %2616 = vrot.lane.b32.xlu0 %v2137_v40, %s16416_s25 }
 0x4ef   : > { %2386 = vrot.lane.b32.xlu1 %v2138_v41, %s19241_s21 }
 0x4f2   : > { %2388 = vrot.lane.b32.xlu0 %v2139_v43, %s19241_s21 }
 0x4f3   : > { %2729 = vrot.lane.b32.xlu1 %v2135_v37, %s19208_s26 }
 0x4f6   : > { %2731 = vrot.lane.b32.xlu0 %v2136_v38, %s19208_s26 }
 0x4f7   : > { %2733 = vrot.lane.b32.xlu1 %v2137_v40, %s19208_s26 }
 0x4fa   : > { %2502 = vrot.lane.b32.xlu0 %v2138_v41, %s19243_s22 }
 0x4fb   : > { %2504 = vrot.lane.b32.xlu1 %v2139_v43, %s19243_s22 }
 0x4fe   : > { %2846 = vrot.lane.b32.xlu0 %v2135_v37, %s19206_s27 }
 0x4ff   : > { %2848 = vrot.lane.b32.xlu1 %v2136_v38, %s19206_s27 }
 0x502   : > { %2850 = vrot.lane.b32.xlu0 %v2137_v40, %s19206_s27 }
 0x503   : > { %2618 = vrot.lane.b32.xlu1 %v2138_v41, %s16416_s25 }
 0x506   : > { %2620 = vrot.lane.b32.xlu0 %v2139_v43, %s16416_s25 }
 0x507   : > { %2735 = vrot.lane.b32.xlu1 %v2138_v41, %s19208_s26 }
 0x50a   : > { %2737 = vrot.lane.b32.xlu0 %v2139_v43, %s19208_s26  ;;  %s19257_s26 = smov 115  }
 0x50b   : > { %2852 = vrot.lane.b32.xlu1 %v2138_v41, %s19206_s27 }
 0x50e   : > { %2854 = vrot.lane.b32.xlu0 %v2139_v43, %s19206_s27  ;;  %s19258_s27 = smov 114  }
 0x50f   : > { %2144 = vperm.xlu1 %16098, %v2141_v44  }
 0x53c   : > { %v2153_v45 = vpop.permute.xlu0 %2152 }
 0x53d   : > { %v2155_v46 = vpop.permute.xlu1 %2154 }
 0x53e   : > { %v2162_v47 = vsel %vm19226_vm1, %v2153_v45, %v2155_v46 }
 0x53f   : > { %v2170_v51 = vsel %vm19218_vm10, %v2162_v47, 0 }
 0x540   : > { %v2157_v48 = vpop.permute.xlu0 %2156 }
 0x541   : > { %v2265_v49 = vpop.permute.xlu1 %2264  ;;  %v2163_v50 = vsel %vm19226_vm1, %v2155_v46, %v2157_v48 }
 0x542   : > { %13875 = vmatprep.subr.msk.bf16.mxu0 %vm19218_vm10, %v2163_v50 }
 0x543   : > { %2182 = vmatpush1.bf16.msra.mxu0 %v2170_v51 }
 0x544   : > { %v2267_v53 = vpop.permute.xlu0 %2266 }
 0x545   : > { %v2274_v54 = vsel %vm19222_vm2, %v2265_v49, %v2267_v53  ;;  %v2269_v55 = vpop.permute.xlu1 %2268 }
 0x546   : > { %13876 = vmatmul.mubr.msk.bf16.vlgmr.msra.gmra.mrb[8].mxu0 %vm19219_vm6, %v2140_v52  ;;  %v2275_v56 = vsel %vm19222_vm2, %v2267_v53, %v2269_v55  ;;  %v2282_v57 = vsel %vm19218_vm10, %v2274_v54, 0 }
 0x547   : > { %13879 = vmatprep.subr.msk.bf16.mxu0 %vm19218_vm10, %v2275_v56  ;;  %2325 = vmatprep.mubr.bf16.mxu0 %v16407_v30 }
 0x548   : > { %2294 = vmatpush1.bf16.msra.mxu0 %v2282_v57  ;;  %v2381_v58 = vpop.permute.xlu0 %2380 }
 0x549   : > { %v2383_v59 = vpop.permute.xlu1 %2382 }
 0x54a   : > { %v2390_v63 = vsel %vm19221_vm3, %v2381_v58, %v2383_v59 }
 0x54b   : > { %v2398_v5 = vsel %vm19218_vm10, %v2390_v63, 0 }
 0x54c   : > { %v2385_v60 = vpop.permute.xlu0 %2384 }
 0x54d   : > { %v2159_v61 = vpop.permute.xlu1 %2158  ;;  %v2391_v62 = vsel %vm19221_vm3, %v2383_v59, %v2385_v60 }
 0x54e   : > { %13883 = vmatprep.subr.msk.bf16.mxu0 %vm19218_vm10, %v2391_v62  ;;  %v2164_v0 = vsel %vm19226_vm1, %v2157_v48, %v2159_v61  ;;  %v2611_v48 = vld [vmem:[%s19196_s1 + $0x48] sm:$0xf]  ;;  %v16102_v62 = vld [vmem:[%s19198_s3 + $0x40] sm:$0xff]  }
 0x54f   : > { %v2176_v6 = vsel %vm19218_vm10, %v2164_v0, 0 }
 0x550   : > { %v2161_v2 = vpop.permute.xlu0 %2160 }
 0x551   : > { %v2165_v3 = vsel %vm19226_vm1, %v2159_v61, %v2161_v2  ;;  %v2497_v4 = vpop.permute.xlu1 %2496  ;;  %v2728_v61 = vld [vmem:[%s19196_s1 + $0x4c] sm:$0xf] }
 0x552   : > { %13877 = vmatprep.subr.msk.bf16.mxu1 %vm19218_vm10, %v2165_v3  ;;  %13880 = vmatmul.mubr.msk.bf16.vlgmr.msra.gmra.mrb[8].mxu0 %vm19219_vm6, %v2263_v1 }
 0x553   : > { %2410 = vmatpush1.bf16.msra.mxu0 %v2398_v5  ;;  %2223 = vmatpush1.bf16.msra.mxu1 %v2176_v6  ;;  %v2845_v5 = vld [vmem:[%s19196_s1 + $0x50] sm:$0xf]  ;;  %v16103_v6 = vld [vmem:[%s19198_s3] sm:$0xff]  }
 0x554   : > { %v2499_v7 = vpop.permute.xlu0 %2498  ;;  %2441 = vmatprep.mubr.bf16.mxu0 %v16407_v30 }
 0x555   : > { %v2501_v8 = vpop.permute.xlu1 %2500  ;;  %v2506_v15 = vsel %vm19220_vm4, %v2497_v4, %v2499_v7 }
 0x556   : > { %13878 = vmatmul.mubr.msk.bf16.vlgmr.msra.gmra.mrb[8].mxu1 %vm19219_vm6, %v2140_v52  ;;  %v2507_v9 = vsel %vm19220_vm4, %v2499_v7, %v2501_v8  ;;  %v2514_v19 = vsel %vm19218_vm10, %v2506_v15, 0  ;;  %v16104_v7 = vld [vmem:[%s19198_s3 + $0x48] sm:$0xff]   ;;  %v16110_v15 = vld [vmem:[%s19198_s3 + $0x60] sm:$0xff]  }
 0x557   : > { %13887 = vmatprep.subr.msk.bf16.mxu0 %vm19218_vm10, %v2507_v9  ;;  %2366 = vmatprep.mubr.bf16.mxu1 %v16407_v30  ;;  %v16105_v9 = vld [vmem:[%s19198_s3 + $0x8] sm:$0xff]  }
 0x558   : > { %v2271_v10 = vpop.permute.xlu0 %2270 }
 0x559   : > { %v2276_v11 = vsel %vm19222_vm2, %v2269_v55, %v2271_v10  ;;  %v2273_v12 = vpop.permute.xlu1 %2272 }
 0x55a   : > { %v2277_v13 = vsel %vm19222_vm2, %v2271_v10, %v2273_v12  ;;  %v2288_v14 = vsel %vm19218_vm10, %v2276_v11, 0  ;;  %v16106_v10 = vld [vmem:[%s19198_s3 + $0x50] sm:$0xff]  }
 0x55b   : > { %13881 = vmatprep.subr.msk.bf16.mxu1 %vm19218_vm10, %v2277_v13  ;;  %v16107_v12 = vld [vmem:[%s19198_s3 + $0x10] sm:$0xff]   ;;  %v16108_v13 = vld [vmem:[%s19198_s3 + $0x58] sm:$0xff]  }
 0x55c   : > { %2335 = vmatpush1.bf16.msra.mxu1 %v2288_v14  ;;  %v2613_v42 = vpop.permute.xlu0 %2612  ;;  %v16109_v14 = vld [vmem:[%s19198_s3 + $0x18] sm:$0xff]  }
 0x55d   : > { %v2615_v17 = vpop.permute.xlu1 %2614 }
 0x55e   : > { %13884 = vmatmul.mubr.msk.bf16.vlgmr.msra.gmra.mrb[8].mxu0 %vm19219_vm6, %v2379_v16  ;;  %v2623_v32 = vsel %vm2622_vm11, %v2613_v42, %v2615_v17  ;;  %v16112_v42 = vld [vmem:[%s19198_s3 + $0x68] sm:$0xff]  }
 0x55f   : > { %2526 = vmatpush1.bf16.msra.mxu0 %v2514_v19  ;;  %2557 = vmatprep.mubr.bf16.mxu0 %v16407_v30  ;;  %v2631_v36 = vsel %vm19218_vm10, %v2623_v32, 0  ;;  %v16114_v19 = vld [vmem:[%s19198_s3 + $0x70] sm:$0xff]  }
 0x560   : > { %v2617_v20 = vpop.permute.xlu0 %2616 }
 0x561   : > { %v2387_v22 = vpop.permute.xlu1 %2386  ;;  %v2624_v23 = vsel %vm2622_vm11, %v2615_v17, %v2617_v20  ;;  %v16113_v17 = vld [vmem:[%s19198_s3 + $0x28] sm:$0xff]  }
 0x562   : > { %13882 = vmatmul.mubr.msk.bf16.vlgmr.msra.gmra.mrb[8].mxu1 %vm19219_vm6, %v2263_v1  ;;  %13891 = vmatprep.subr.msk.bf16.mxu0 %vm19218_vm10, %v2624_v23  ;;  %v2392_v24 = vsel %vm19221_vm3, %v2385_v60, %v2387_v22  ;;  %v16117_v23 = vld [vmem:[%s19198_s3 + $0x38] sm:$0xff]  }
 0x563   : > { %2482 = vmatprep.mubr.bf16.mxu1 %v16407_v30  ;;  %v2404_v31 = vsel %vm19218_vm10, %v2392_v24, 0  ;;  %v16118_v24 = vld [vmem:[%s19198_s3 + $0xc0] sm:$0xff]  }
 0x564   : > { %v2389_v25 = vpop.permute.xlu0 %2388 }
 0x565   : > { %v2393_v26 = vsel %vm19221_vm3, %v2387_v22, %v2389_v25  ;;  %v2730_v29 = vpop.permute.xlu1 %2729  ;;  %v16116_v22 = vld [vmem:[%s19198_s3 + $0x78] sm:$0xff]  }
 0x566   : > { %13885 = vmatprep.subr.msk.bf16.mxu1 %vm19218_vm10, %v2393_v26 }
 0x567   : > { %2451 = vmatpush1.bf16.msra.mxu1 %v2404_v31 }
 0x568   : > { %v2732_v34 = vpop.permute.xlu0 %2731 }
 0x569   : > { %v2734_v35 = vpop.permute.xlu1 %2733  ;;  %v2740_v47 = vsel %vm19211_vm12, %v2730_v29, %v2732_v34 }
 0x56a   : > { %13888 = vmatmul.mubr.msk.bf16.vlgmr.msra.gmra.mrb[8].mxu0 %vm19219_vm6, %v2495_v33  ;;  %v2741_v37 = vsel %vm19211_vm12, %v2732_v34, %v2734_v35  ;;  %v2748_v52 = vsel %vm19218_vm10, %v2740_v47, 0 }
 0x56b   : > { %2643 = vmatpush1.bf16.msra.mxu0 %v2631_v36  ;;  %2674 = vmatprep.mubr.bf16.mxu0 %v16407_v30 }
 0x56c   : > { %13895 = vmatprep.subr.msk.bf16.mxu0 %vm19218_vm10, %v2741_v37  ;;  %v2503_v38 = vpop.permute.xlu0 %2502 }
 0x56d   : > { %v2508_v40 = vsel %vm19220_vm4, %v2501_v8, %v2503_v38  ;;  %v2505_v41 = vpop.permute.xlu1 %2504 }
 0x56e   : > { %v2509_v43 = vsel %vm19220_vm4, %v2503_v38, %v2505_v41  ;;  %13886 = vmatmul.mubr.msk.bf16.vlgmr.msra.gmra.mrb[8].mxu1 %vm19219_vm6, %v2379_v16  ;;  %v2520_v44 = vsel %vm19218_vm10, %v2508_v40, 0  ;;  %v16111_v16 = vld [vmem:[%s19198_s3 + $0x20] sm:$0xff]   ;;  %v16120_v41 = vld [vmem:[%s19198_s3 + $0xc8] sm:$0xff]  }
 0x56f   : > { %13889 = vmatprep.subr.msk.bf16.mxu1 %vm19218_vm10, %v2509_v43  ;;  %2598 = vmatprep.mubr.bf16.mxu1 %v16407_v30  ;;  %v16119_v38 = vld [vmem:[%s19198_s3 + $0x80] sm:$0xff]   ;;  %v16121_v43 = vld [vmem:[%s19198_s3 + $0x88] sm:$0xff]  }
 0x570   : > { %2567 = vmatpush1.bf16.msra.mxu1 %v2520_v44  ;;  %v2847_v45 = vpop.permute.xlu0 %2846  ;;  %v16122_v44 = vld [vmem:[%s19198_s3 + $0xd0] sm:$0xff]  }
 0x571   : > { %v2849_v46 = vpop.permute.xlu1 %2848 }
 0x572   : > { %v2857_v60 = vsel %vm19210_vm14, %v2847_v45, %v2849_v46  ;;  %v16123_v45 = vld [vmem:[%s19198_s3 + $0x90] sm:$0xff]  }
 0x573   : > { %v2865_v63 = vsel %vm19218_vm10, %v2857_v60, 0  ;;  %v16130_v60 = vld [vmem:[%s19198_s3 + $0xf0] sm:$0xff]  }
 0x574   : > { %v2851_v49 = vpop.permute.xlu0 %2850 }
 0x575   : > { %v2619_v50 = vpop.permute.xlu1 %2618  ;;  %v2858_v51 = vsel %vm19210_vm14, %v2849_v46, %v2851_v49  ;;  %v16124_v46 = vld [vmem:[%s19198_s3 + $0xd8] sm:$0xff]  }
 0x576   : > { %13892 = vmatmul.mubr.msk.bf16.vlgmr.msra.gmra.mrb[8].mxu0 %vm19219_vm6, %v2611_v48  ;;  %v2625_v53 = vsel %vm2622_vm11, %v2617_v20, %v2619_v50  ;;  %v16115_v20 = vld [vmem:[%s19198_s3 + $0x30] sm:$0xff]  }
 0x577   : > { %2760 = vmatpush1.bf16.msra.mxu0 %v2748_v52  ;;  %2791 = vmatprep.mubr.bf16.mxu0 %v16407_v30  ;;  %v2637_v56 = vsel %vm19218_vm10, %v2625_v53, 0  ;;  %v16126_v53 = vld [vmem:[%s19198_s3 + $0xe0] sm:$0xff]  }
 0x578   : > { %13899 = vmatprep.subr.msk.bf16.mxu0 %vm19218_vm10, %v2858_v51  ;;  %v2621_v54 = vpop.permute.xlu0 %2620  ;;  %v16125_v51 = vld [vmem:[%s19198_s3 + $0x98] sm:$0xff]  }
 0x579   : > { %v2626_v55 = vsel %vm2622_vm11, %v2619_v50, %v2621_v54  ;;  %v2736_v57 = vpop.permute.xlu1 %2735 }
 0x57a   : > { %13890 = vmatmul.mubr.msk.bf16.vlgmr.msra.gmra.mrb[8].mxu1 %vm19219_vm6, %v2495_v33  ;;  %13893 = vmatprep.subr.msk.bf16.mxu1 %vm19218_vm10, %v2626_v55  ;;  %v2742_v0 = vsel %vm19211_vm12, %v2734_v35, %v2736_v57 }
 0x57b   : > { %2684 = vmatpush1.bf16.msra.mxu1 %v2637_v56  ;;  %2715 = vmatprep.mubr.bf16.mxu1 %v16407_v30  ;;  %v2754_v3 = vsel %vm19218_vm10, %v2742_v0, 0  ;;  %v16127_v56 = vld [vmem:[%s19198_s3 + $0xa0] sm:$0xff]  }
 0x57c   : > { %v2738_v58 = vpop.permute.xlu0 %2737 }
 0x57d   : > { %v2743_v59 = vsel %vm19211_vm12, %v2736_v57, %v2738_v58  ;;  %v2853_v2 = vpop.permute.xlu1 %2852  ;;  %v16128_v57 = vld [vmem:[%s19198_s3 + $0xe8] sm:$0xff]   ;;  %v3230_v58 = vsel %vm19218_vm10, 4294967295, %v16415_v39  ;;  %vm19231_vm12 = vmmov 0  }
 0x57e   : > { %13897 = vmatprep.subr.msk.bf16.mxu1 %vm19218_vm10, %v2743_v59  ;;  %v2859_v8 = vsel %vm19210_vm14, %v2851_v49, %v2853_v2  ;;  %v16129_v59 = vld [vmem:[%s19198_s3 + $0xa8] sm:$0xff]  }
 0x57f   : > { %v2871_v11 = vsel %vm19218_vm10, %v2859_v8, 0 }
 0x580   : > { %v2855_v1 = vpop.permute.xlu0 %2854 }
 0x581   : > { %v2860_v4 = vsel %vm19210_vm14, %v2853_v2, %v2855_v1  ;;  %vm3229_vm14 = vcmask 1044480   ;;  %v16133_v2 = vld [vmem:[%s19198_s3 + $0xb8] sm:$0xff]  }
 0x582   : > { %13896 = vmatmul.mubr.msk.bf16.vlgmr.msra.gmra.mrb[8].mxu0 %vm19219_vm6, %v2728_v61 }
 0x583   : > { %2877 = vmatpush1.bf16.msra.mxu0 %v2865_v63  ;;  %2908 = vmatprep.mubr.bf16.mxu0 %v16407_v30  ;;  %v16131_v63 = vld [vmem:[%s19198_s3 + $0xb0] sm:$0xff]  }
 0x584   : > { %14361 = vmatprep.subr.bf16.mxu0 %v16102_v62  ;;  %v17092_v62 = vsel %vm3229_vm14, %v3230_v58, 0 }
 0x586   : > { %13894 = vmatmul.mubr.msk.bf16.vlgmr.msra.gmra.mrb[8].mxu1 %vm19219_vm6, %v2611_v48 }
 0x587   : > { %2801 = vmatpush1.bf16.msra.mxu1 %v2754_v3  ;;  %2832 = vmatprep.mubr.bf16.mxu1 %v16407_v30 }
 0x588   : > { %13901 = vmatprep.subr.msk.bf16.mxu1 %vm19218_vm10, %v2860_v4 }
 0x58e   : > { %13900 = vmatmul.mubr.msk.bf16.vlgmr.msra.gmra.mrb[8].mxu0 %vm19219_vm6, %v2845_v5  ;;  %v2145_v25 = vpop.permute.xlu1 %2144 }
 0x58f   : > { %14362 = vmatpush3.bf16.msra.mxu0 %v16103_v6 }
 0x590   : > { %14363 = vmatprep.subr.bf16.mxu0 %v16104_v7 }
 0x592   : > { %13898 = vmatmul.mubr.msk.bf16.vlgmr.msra.gmra.mrb[8].mxu1 %vm19219_vm6, %v2728_v61  ;;  %v16132_v61 = vld [vmem:[%s19198_s3 + $0xf8] sm:$0x1f]  }
 0x593   : > { %2918 = vmatpush1.bf16.msra.mxu1 %v2871_v11  ;;  %2949 = vmatprep.mubr.bf16.mxu1 %v16407_v30  ;;  %v3233_v1 = vand.u32 %v16132_v61, %v17092_v62 }
 0x594   : > { %14364 = vmatpush3.bf16.msra.mxu0 %v16105_v9 }
 0x595   : > { %14365 = vmatprep.subr.bf16.mxu0 %v16106_v10 }
 0x598   : > { %14366 = vmatpush3.bf16.msra.mxu0 %v16107_v12 }
 0x599   : > { %14367 = vmatprep.subr.bf16.mxu0 %v16108_v13 }
 0x59c   : > { %14368 = vmatpush3.bf16.msra.mxu0 %v16109_v14 }
 0x59d   : > { %14369 = vmatprep.subr.bf16.mxu0 %v16110_v15 }
 0x59e   : > { %13902 = vmatmul.mubr.msk.bf16.vlgmr.msra.gmra.mrb[8].mxu1 %vm19219_vm6, %v2845_v5 }
 0x5a0   : > { %14370 = vmatpush3.bf16.msra.mxu0 %v16111_v16 }
 0x5a1   : > { %14371 = vmatprep.subr.bf16.mxu0 %v16112_v42  ;;  %v16419_v42 = vmov 0.0  }
 0x5a2   : > { %14738 = vmatprep.subr.bf16.mxu1 %v16419_v42  ;;  %14740 = vmatprep.mubr.msk.bf16.mxu1 %vm19231_vm12, %v16419_v42 }
 0x5a4   : > { %14372 = vmatpush3.bf16.msra.mxu0 %v16113_v17 }
 0x5a5   : > { %14373 = vmatprep.subr.bf16.mxu0 %v16114_v19 }
 0x5a8   : > { %14374 = vmatpush3.bf16.msra.mxu0 %v16115_v20 }
 0x5a9   : > { %14375 = vmatprep.subr.bf16.mxu0 %v16116_v22  ;;  %v3328_v22 = vld [vmem:[%s19197_s2 + $0x18] sm:$0xff] }
 0x5ac   : > { %14376 = vmatpush3.bf16.msra.mxu0 %v16117_v23  ;;  %v3329_v23 = vld [vmem:[%s19197_s2 + $0x20] sm:$0x7] }
 0x5ad   : > { %14383 = vmatprep.subr.bf16.mxu0 %v16118_v24 }
 0x661   : > { %v2910_v26 = vpop.f32.mrb[8].mxu0 }
 0x662   : > { %v15404_v29 = vadd.f32 %v2910_v26, %v2145_v25  ;;  %v2912_v31 = vpop.f32.mrb[9].mxu0 }
 0x663   : > { %v15405_v32 = vadd.f32 %v2912_v31, %v2145_v25  ;;  %v2914_v33 = vpop.f32.mrb[10].mxu0  ;;  %v16134_v31 = vld [vmem:[%s19196_s1 + $0x54] sm:$0x3f]  }
 0x664   : > { %v2962_v34 = vmax.f32 %v15404_v29, 0.0  ;;  %v2915_v35 = vpop.f32.mrb[11].mxu0 }
 0x665   : > { %v2963_v36 = vmax.f32 %v15405_v32, 0.0  ;;  %v16135_v32 = vld [vmem:[%s19196_s1 + $0x58] sm:$0x7e]  }
 0x666   : > { %v2966_v40 = vpack.c.bf16 %v2962_v34, %v2962_v34 }
 0x667   : > { %v2967_v37 = vpack.c.bf16 %v2963_v36, %v2963_v36 }
 0x669   : > { %3267 = vmatprep.mubr.bf16.mxu0 %v2967_v37  ;;  %v3407_v37 = vshrl.u32 %v16135_v32, 16 }
 0x66a   : > { %3268 = vmatmul.mubr.bf16.vlgmr.msra.gmra.mrb[12].mxu0 %v2966_v40 }
 0x66b   : > { %14384 = vmatpush3.bf16.msra.mxu0 %v16119_v38  ;;  %v3410_v38 = vshll.u32 %v16135_v32, 16  ;;  %v3409_v40 = vrot.slane %v3407_v37, 1 }
 0x66c   : > { %14385 = vmatprep.subr.bf16.mxu0 %v16120_v41 }
 0x66d   : > { %v3412_v41 = vrot.slane %v3410_v38, 2 }
 0x66f   : > { %14386 = vmatpush3.bf16.msra.mxu0 %v16121_v43 }
 0x670   : > { %14387 = vmatprep.subr.bf16.mxu0 %v16122_v44 }
 0x671   : > { %v2951_v47 = vpop.f32.mrb[8].mxu1 }
 0x672   : > { %v2953_v48 = vpop.f32.mrb[9].mxu1  ;;  %v15406_v0 = vadd.f32 %v2951_v47, %v2145_v25 }
 0x673   : > { %v15407_v49 = vadd.f32 %v2953_v48, %v2145_v25  ;;  %14388 = vmatpush3.bf16.msra.mxu0 %v16123_v45  ;;  %v2955_v50 = vpop.f32.mrb[10].mxu1  ;;  %v16136_v48 = vld [vmem:[%s19196_s1 + $0x5c] sm:$0xf8]  }
 0x674   : > { %v2956_v52 = vpop.f32.mrb[11].mxu1  ;;  %14389 = vmatprep.subr.bf16.mxu0 %v16124_v46  ;;  %v2964_v3 = vmax.f32 %v15406_v0, 0.0  ;;  %v3413_v46 = vor.u32 %v3412_v41, %v3409_v40 }
 0x675   : > { %v2965_v54 = vmax.f32 %v15407_v49, 0.0  ;;  %v16137_v49 = vld [vmem:[%s19196_s1 + $0x64] ss:$0 sps:$4 sm:$0x11]  }
 0x676   : > { %v2968_v4 = vpack.c.bf16 %v2964_v3, %v2964_v3  ;;  %v3481_v52 = vrot.slane %v16137_v49, 3  ;;  %v16139_v3 = vld [vmem:[%s19196_s1 + $0x68] sm:$0xfc]  }
 0x677   : > { %v2969_v55 = vpack.c.bf16 %v2965_v54, %v2965_v54  ;;  %14390 = vmatpush3.bf16.msra.mxu0 %v16125_v51  ;;  %v3480_v51 = vrot.slane %v16136_v48, 3 }
 0x678   : > { %14391 = vmatprep.subr.bf16.mxu0 %v16126_v53 }
 0x679   : > { %13935 = vmatprep.mubr.msk.bf16.mxu0 %vm19227_vm0, %v2969_v55  ;;  %v16138_v55 = vld [vmem:[%s19196_s1 + $0x64] sm:$0x3f]  }
 0x67a   : > { %v3547_v58 = vshll.u32 %v16138_v55, 16 }
 0x67b   : > { %14392 = vmatpush3.bf16.msra.mxu0 %v16127_v56  ;;  %v3482_v56 = vsel %vm3229_vm14, %v3480_v51, %v3481_v52 }
 0x67c   : > { %14393 = vmatprep.subr.bf16.mxu0 %v16128_v57 }
 0x67f   : > { %14394 = vmatpush3.bf16.msra.mxu0 %v16129_v59  ;;  %v3545_v59 = vshrl.u32 %v16138_v55, 16 }
 0x680   : > { %14395 = vmatprep.subr.bf16.mxu0 %v16130_v60  ;;  %v3549_v60 = vrot.slane %v3547_v58, 1 }
 0x683   : > { %14396 = vmatpush3.bf16.msra.mxu0 %v16131_v63 }
 0x684   : > { %14397 = vmatprep.subr.bf16.mxu0 %v3233_v1  ;;  %v3550_v1 = vor.u32 %v3549_v60, %v3545_v59  ;;  %v3845_v60 = vld [vmem:[%s19197_s2 + $0x2b] sm:$0x7] }
 0x687   : > { %14398 = vmatpush3.bf16.msra.mxu0 %v16133_v2 }
 0x688   : > { %14696 = vmatprep.subr.bf16.mxu0 %v16419_v42 }
 0x68a   : > { %3308 = vmatmul.mubr.bf16.vlgmr.msra.gmra.mrb[16].mxu0 %v2968_v4 }
 0x68b   : > { %14698 = vmatprep.mubr.msk.bf16.mxu0 %vm19231_vm12, %v16419_v42 }
 0x73d   : > { %v14377_v5 = vpop.f32.mrb[12].mxu0 }
 0x73e   : > { %v14378_v6 = vpop.f32.mrb[13].mxu0 }
 0x73f   : > { %v14379_v7 = vadd.f32 %v14378_v6, %v14377_v5  ;;  %v14380_v8 = vpop.f32.mrb[14].mxu0  ;;  %v16140_v5 = vld [vmem:[%s19196_s1 + $0x6c] sm:$0xf8]   ;;  %v16141_v6 = vld [vmem:[%s19196_s1 + $0x74] ss:$0 sps:$4 sm:$0x11]  }
 0x740   : > { %v14381_v9 = vpop.f32.mrb[15].mxu0 }
 0x741   : > { %v3612_v9 = vrot.slane %v16139_v3, 2  ;;  %v16156_v3 = vld [vmem:[%s19199_s4 + $0x20] sm:$0xff]  }
 0x75d   : > { %v14399_v10 = vpop.f32.mrb[16].mxu0 }
 0x75e   : > { %v14400_v11 = vpop.f32.mrb[17].mxu0 }
 0x75f   : > { %v14401_v12 = vadd.f32 %v14400_v11, %v14399_v10  ;;  %v14402_v13 = vpop.f32.mrb[18].mxu0  ;;  %v3680_v10 = vshrl.u32 %v16140_v5, 16  ;;  %v3683_v11 = vshll.u32 %v16140_v5, 16  ;;  %v16143_v5 = vld [vmem:[%s19196_s1 + $0x78] sm:$0xfc]  }
 0x760   : > { %v14403_v14 = vpop.f32.mrb[19].mxu0  ;;  %v3691_v13 = vshll.u32 %v16141_v6, 16 }
 0x761   : > { %v3310_v15 = vadd.f32 %v14401_v12, %v14379_v7  ;;  %v3688_v12 = vshrl.u32 %v16141_v6, 16  ;;  %v3862_v6 = vshrl.u32 %v16143_v5, 16 }
 0x763   : > { %v3315_v16 = vpack.c.bf16 %v3310_v15, %v3310_v15  ;;  %v3682_v15 = vrot.slane %v3680_v10, 3  ;;  %v3864_v10 = vrot.slane %v3862_v6, 2  ;;  %v16151_v6 = vld [vmem:[%s19196_s1 + $0xa0] ss:$0 sps:$4 sm:$0x11]  }
 0x765   : > { %3317 = vrot.lane.b32.xlu0 %v3315_v16, %s16406_s15  ;;  %v3685_v16 = vrot.slane %v3683_v11, 4 }
 0x7d7   : > { %v3318_v17 = vpop.permute.xlu0 %3317 }
 0x7d8   : > { %3320 = vst.msk [vmem:[#allocation2] sm:$0xf] %vm19215_vm5, %v3318_v17  ;;  %vm3825_vm5 = vcmask 54272  }
 0x7d9   : > { %3321 = vst.msk [vmem:[#allocation2 + $0x8] sm:$0xf] %vm19214_vm8, %v3318_v17  ;;  %v3690_v17 = vrot.slane %v3688_v12, 3  ;;  %vm19224_vm8 = vsmask.f32 5376 }
 0x7da   : > { %3322 = vst.msk [vmem:[#allocation2] sm:$0xf] %vm19213_vm7, %v16407_v30  ;;  %vm3819_vm7 = vcmask 1045568  }
 0x7db   : > { %3323 = vst.msk [vmem:[#allocation2 + $0x8] sm:$0xf] %vm19212_vm9, %v16407_v30  ;;  %vm19225_vm9 = vsmask.f32 4352 }
 0x7e1   : > { %v3324_v20 = vld [vmem:[#allocation2] sm:$0xf] }
 0x7e2   : > { %v3325_v19 = vld [vmem:[#allocation2 + $0x8] sm:$0xf]  ;;  %3347 = vrot.lane.b32.xlu1 %v3324_v20, %s16408_s16 }
 0x7e3   : > { %3349 = vrot.lane.b32.xlu0 %v3325_v19, %s16408_s16  ;;  %v3827_v49 = vld [vmem:[#allocation2 + $0x8] sm:$0x3f] }
 0x7e6   : > { %3414 = vrot.lane.b32.xlu1 %v3324_v20, %s16409_s17 }
 0x7e7   : > { %3416 = vrot.lane.b32.xlu0 %v3325_v19, %s16409_s17 }
 0x7ea   : > { %3483 = vrot.lane.b32.xlu1 %v3324_v20, %s16410_s18 }
 0x7eb   : > { %3485 = vrot.lane.b32.xlu0 %v3325_v19, %s16410_s18 }
 0x7ee   : > { %3551 = vrot.lane.b32.xlu1 %v3324_v20, %s16411_s19 }
 0x7ef   : > { %3553 = vrot.lane.b32.xlu0 %v3325_v19, %s16411_s19 }
 0x7f2   : > { %3613 = vrot.lane.b32.xlu1 %v3324_v20, %s16412_s20 }
 0x7f3   : > { %3615 = vrot.lane.b32.xlu0 %v3325_v19, %s16412_s20 }
 0x7f6   : > { %3696 = vrot.lane.b32.xlu1 %v3324_v20, %s19241_s21 }
 0x7f7   : > { %3698 = vrot.lane.b32.xlu0 %v3325_v19, %s19241_s21 }
 0x7fa   : > { %3758 = vrot.lane.b32.xlu1 %v3324_v20, %s19243_s22 }
 0x7fb   : > { %3760 = vrot.lane.b32.xlu0 %v3325_v19, %s19243_s22  ;;  %v3693_v19 = vrot.slane %v3691_v13, 4 }
 0x7fe   : > { %3332 = vperm.xlu1 %16098, %v3328_v22   ;;  %v3686_v22 = vor.u32 %v3685_v16, %v3682_v15 }
 0x7ff   : > { %3337 = vperm.xlu0 %16099, %v3329_v23   ;;  %v3694_v23 = vor.u32 %v3693_v19, %v3690_v17 }
 0x854   : > { %v3348_v25 = vpop.permute.xlu1 %3347 }
 0x855   : > { %v3350_v24 = vpop.permute.xlu0 %3349 }
 0x856   : > { %v3351_v26 = vsel %vm19217_vm13, %v3348_v25, %v3350_v24  ;;  %vm17215_vm13 = vmand %vm3825_vm5, %vm19224_vm8 }
 0x857   : > { %v3356_v29 = vsel %vm19218_vm10, %v3351_v26, 0  ;;  %v3695_v26 = vsel %vm19225_vm9, %v3686_v22, %v3694_v23 }
 0x858   : > { %14697 = vmatpush3.bf16.msra.mxu0 %v3356_v29  ;;  %v3415_v34 = vpop.permute.xlu1 %3414 }
 0x859   : > { %v3417_v33 = vpop.permute.xlu0 %3416  ;;  %14702 = vmatprep.subr.bf16.mxu0 %v16419_v42 }
 0x85a   : > { %v3418_v35 = vsel %vm19216_vm15, %v3415_v34, %v3417_v33  ;;  %vm17210_vm15 = vmand %vm3819_vm7, %vm19224_vm8  ;;  %vm19233_vm7 = vcmask 62464  }
 0x85b   : > { %14699 = vmatmul.mubr.msk.bf16.vlgmr.msra.gmra.mrb[20].mxu0 %vm19219_vm6, %v16134_v31  ;;  %v3423_v36 = vsel %vm19218_vm10, %v3418_v35, 0  ;;  %v16142_v31 = vld [vmem:[%s19196_s1 + $0x74] sm:$0x7e]  }
 0x85c   : > { %14703 = vmatpush3.bf16.msra.mxu0 %v3423_v36  ;;  %14704 = vmatprep.mubr.msk.bf16.mxu0 %vm19231_vm12, %v16419_v42  ;;  %v3484_v44 = vpop.permute.xlu1 %3483  ;;  %v3757_v32 = vrot.slane %v16142_v31, 1 }
 0x85d   : > { %14708 = vmatprep.subr.bf16.mxu0 %v16419_v42  ;;  %v3486_v43 = vpop.permute.xlu0 %3485 }
 0x85e   : > { %v3487_v45 = vsel %vm19227_vm0, %v3484_v44, %v3486_v43 }
 0x85f   : > { %v3492_v47 = vsel %vm19218_vm10, %v3487_v45, 0 }
 0x860   : > { %v3552_v53 = vpop.permute.xlu1 %3551 }
 0x861   : > { %v3554_v50 = vpop.permute.xlu0 %3553 }
 0x862   : > { %v3555_v54 = vsel %vm19226_vm1, %v3552_v53, %v3554_v50 }
 0x863   : > { %v3560_v57 = vsel %vm19218_vm10, %v3555_v54, 0 }
 0x864   : > { %v3614_v63 = vpop.permute.xlu1 %3613 }
 0x865   : > { %v3616_v61 = vpop.permute.xlu0 %3615 }
 0x866   : > { %v3617_v0 = vsel %vm19222_vm2, %v3614_v63, %v3616_v61  ;;  %v3844_v61 = vld [vmem:[%s19197_s2 + $0x23] sm:$0xff] }
 0x867   : > { %14705 = vmatmul.mubr.msk.bf16.vlgmr.msra.gmra.mrb[20].mxu0 %vm19219_vm6, %v3413_v46  ;;  %v3622_v2 = vsel %vm19218_vm10, %v3617_v0, 0  ;;  %v16152_v63 = vld [vmem:[%s19199_s4] sm:$0xff]   ;;  %v16153_v0 = vld [vmem:[%s19199_s4 + $0x8] sm:$0xff]  }
 0x868   : > { %14709 = vmatpush3.bf16.msra.mxu0 %v3492_v47  ;;  %14710 = vmatprep.mubr.msk.bf16.mxu0 %vm19231_vm12, %v16419_v42  ;;  %v3697_v7 = vpop.permute.xlu1 %3696  ;;  %v3822_v47 = vld [vmem:[#allocation2] sm:$0x3f] }
 0x869   : > { %14714 = vmatprep.subr.bf16.mxu0 %v16419_v42  ;;  %v3699_v4 = vpop.permute.xlu0 %3698  ;;  %v11010_v46 = vld [vmem:[#allocation2 + $0x20] sm:$0x3f] }
 0x86a   : > { %v3700_v8 = vsel %vm19221_vm3, %v3697_v7, %v3699_v4  ;;  %v16157_v4 = vld [vmem:[%s19199_s4 + $0x28] sm:$0xff]   ;;  %v3865_v7 = vshll.u32 %v16143_v5, 16  ;;  %v16150_v5 = vld [vmem:[%s19196_s1 + $0x98] sm:$0xf8]  }
 0x86b   : > { %v3705_v14 = vsel %vm19218_vm10, %v3700_v8, 0  ;;  %v3881_v8 = vsel %vm3229_vm14, 4294967295, %v16415_v39 }
 0x86c   : > { %v3759_v24 = vpop.permute.xlu1 %3758  ;;  %v3867_v11 = vrot.slane %v3865_v7, 3 }
 0x86d   : > { %v3761_v20 = vpop.permute.xlu0 %3760 }
 0x86e   : > { %v3762_v25 = vsel %vm19220_vm4, %v3759_v24, %v3761_v20  ;;  %v3868_v16 = vor.u32 %v3867_v11, %v3864_v10  ;;  %v4267_v10 = vshrl.u32 %v16150_v5, 16  ;;  %v4270_v11 = vshll.u32 %v16150_v5, 16 }
 0x86f   : > { %v3767_v29 = vsel %vm19218_vm10, %v3762_v25, 0  ;;  %vm3835_vm10 = vcmask 119864  }
 0x870   : > { %vm3836_vm5 = vmand %vm3835_vm10, %vm19224_vm8  ;;  %vm3880_vm10 = vcmask 1045504  }
 0x873   : > { %14711 = vmatmul.mubr.msk.bf16.vlgmr.msra.gmra.mrb[20].mxu0 %vm19219_vm6, %v3482_v56 }
 0x874   : > { %14715 = vmatpush3.bf16.msra.mxu0 %v3560_v57  ;;  %14716 = vmatprep.mubr.msk.bf16.mxu0 %vm19231_vm12, %v16419_v42 }
 0x875   : > { %14720 = vmatprep.subr.bf16.mxu0 %v16419_v42 }
 0x87d   : > { %v3333_v33 = vpop.permute.xlu1 %3332 }
 0x87e   : > { %v3338_v35 = vpop.permute.xlu0 %3337 }
 0x87f   : > { %14717 = vmatmul.mubr.msk.bf16.vlgmr.msra.gmra.mrb[20].mxu0 %vm19219_vm6, %v3550_v1  ;;  %v16154_v1 = vld [vmem:[%s19199_s4 + $0x10] sm:$0xff]  }
 0x880   : > { %14721 = vmatpush3.bf16.msra.mxu0 %v3622_v2  ;;  %14722 = vmatprep.mubr.msk.bf16.mxu0 %vm19231_vm12, %v16419_v42  ;;  %v16155_v2 = vld [vmem:[%s19199_s4 + $0x18] sm:$0xff]  }
 0x881   : > { %14726 = vmatprep.subr.bf16.mxu0 %v16419_v42 }
 0x88b   : > { %14723 = vmatmul.mubr.msk.bf16.vlgmr.msra.gmra.mrb[20].mxu0 %vm19219_vm6, %v3612_v9  ;;  %v17282_v9 = vsel %vm3880_vm10, %v3881_v8, 0 }
 0x88c   : > { %14727 = vmatpush3.bf16.msra.mxu0 %v3705_v14  ;;  %14728 = vmatprep.mubr.msk.bf16.mxu0 %vm19231_vm12, %v16419_v42 }
 0x88d   : > { %14732 = vmatprep.subr.bf16.mxu0 %v16419_v42 }
 0x897   : > { %14729 = vmatmul.mubr.msk.bf16.vlgmr.msra.gmra.mrb[20].mxu0 %vm19219_vm6, %v3695_v26  ;;  %v16144_v26 = vld [vmem:[%s19196_s1 + $0x80] sm:$0x3f]  }
 0x898   : > { %14733 = vmatpush3.bf16.msra.mxu0 %v3767_v29  ;;  %14734 = vmatprep.mubr.msk.bf16.mxu0 %vm19231_vm12, %v16419_v42  ;;  %v16145_v29 = vld [vmem:[%s19196_s1 + $0x84] sm:$0x7e]  }
 0x899   : > { %14780 = vmatprep.subr.bf16.mxu0 %v16419_v42 }
 0x8a3   : > { %14735 = vmatmul.mubr.msk.bf16.vlgmr.msra.gmra.mrb[20].mxu0 %vm19219_vm6, %v3757_v32  ;;  %vm17225_vm6 = vmand %vm19233_vm7, %vm19224_vm8  ;;  %v3996_v32 = vshrl.u32 %v16145_v29, 16  ;;  %vm6620_vm7 = vcmask 138312  }
 0x8a4   : > { %14796 = vmatprep.mubr.msk.bf16.mxu0 %vm19231_vm12, %v16419_v42  ;;  %14781 = vmatpush3.bf16.msra.mxu0 %v16152_v63 }
 0x8a5   : > { %14782 = vmatprep.subr.bf16.mxu0 %v16419_v42 }
 0x8a8   : > { %14783 = vmatpush3.bf16.msra.mxu0 %v16153_v0 }
 0x8a9   : > { %14784 = vmatprep.subr.bf16.mxu0 %v16419_v42 }
 0x8ac   : > { %14785 = vmatpush3.bf16.msra.mxu0 %v16154_v1 }
 0x8ad   : > { %14786 = vmatprep.subr.bf16.mxu0 %v16419_v42 }
 0x8b0   : > { %14787 = vmatpush3.bf16.msra.mxu0 %v16155_v2  ;;  %v16149_v2 = vld [vmem:[%s19196_s1 + $0x94] sm:$0xfc]  }
 0x8b1   : > { %14788 = vmatprep.subr.bf16.mxu0 %v16419_v42  ;;  %v4200_v8 = vrot.slane %v16149_v2, 2 }
 0x8b4   : > { %14789 = vmatpush3.bf16.msra.mxu0 %v16156_v3 }
 0x8b5   : > { %14790 = vmatprep.subr.bf16.mxu0 %v16419_v42 }
 0x8b8   : > { %14791 = vmatpush3.bf16.msra.mxu0 %v16157_v4 }
 0x8b9   : > { %14792 = vmatprep.subr.bf16.mxu0 %v16419_v42 }
 0x976   : > { %v3803_v34 = vpop.f32.mrb[20].mxu0 }
 0x977   : > { %v15408_v36 = vadd.f32 %v3803_v34, %v3333_v33  ;;  %v14736_v37 = vpop.f32.mrb[21].mxu0  ;;  %v3999_v33 = vshll.u32 %v16145_v29, 16  ;;  %v3998_v34 = vrot.slane %v3996_v32, 1 }
 0x978   : > { %v3806_v38 = vpop.f32.mrb[22].mxu0 }
 0x979   : > { %v15409_v40 = vadd.f32 %v3806_v38, %v3338_v35  ;;  %v14737_v41 = vpop.f32.mrb[23].mxu0  ;;  %v3812_v43 = vmax.f32 %v15408_v36, 0.0  ;;  %v4001_v35 = vrot.slane %v3999_v33, 2 }
 0x97b   : > { %v3813_v44 = vmax.f32 %v15409_v40, 0.0  ;;  %v4002_v40 = vor.u32 %v4001_v35, %v3998_v34 }
 0x97d   : > { %v17205_v45 = vpack.c.bf16 %v3813_v44, %v3812_v43  ;;  %v16146_v43 = vld [vmem:[%s19196_s1 + $0x88] sm:$0xf8]   ;;  %v16147_v44 = vld [vmem:[%s19196_s1 + $0x90] ss:$0 sps:$4 sm:$0x11]  }
 0x97f   : > { %3816 = vrot.lane.b32.xlu1 %v17205_v45, %s16406_s15 }
 0x9f1   : > { %v3817_v50 = vpop.permute.xlu1 %3816 }
 0x9f2   : > { %v3823_v51 = vsel %vm17210_vm15, %v3817_v50, %v3822_v47  ;;  %v3828_v52 = vsel %vm17215_vm13, %v3817_v50, %v3827_v49  ;;  %v4068_v50 = vrot.slane %v16146_v43, 3 }
 0x9f3   : > { %3824 = vst [vmem:[#allocation2] sm:$0x3f] %v3823_v51  ;;  %3829 = vst [vmem:[#allocation2 + $0x8] sm:$0x3f] %v3828_v52  ;;  %v4069_v51 = vrot.slane %v16147_v44, 3 }
 0x9fa   : > { %v3832_v54 = vld [vmem:[#allocation2] sm:$0x3f]  ;;  %v3837_v55 = vld [vmem:[#allocation2 + $0x8] sm:$0x3f] }
 0x9fb   : > { %v3833_v56 = vsel %vm17225_vm6, 0, %v3832_v54  ;;  %v3838_v57 = vsel %vm3836_vm5, 0, %v3837_v55  ;;  %vm19223_vm5 = vcmask 89088   ;;  %v16148_v54 = vld [vmem:[%s19196_s1 + $0x90] sm:$0x3f]   ;;  %v4070_v55 = vsel %vm3229_vm14, %v4068_v50, %v4069_v51 }
 0x9fc   : > { %3834 = vst [vmem:[#allocation2] sm:$0x3f] %v3833_v56  ;;  %3839 = vst [vmem:[#allocation2 + $0x8] sm:$0x3f] %v3838_v57  ;;  %v4135_v57 = vshll.u32 %v16148_v54, 16 }
 0xa03   : > { %v3841_v58 = vld [vmem:[#allocation2 + $0x8] sm:$0x3f]  ;;  %v3840_v59 = vld [vmem:[#allocation2] sm:$0x3f] }
 0xa04   : > { %3873 = vrot.lane.b32.xlu0 %v3841_v58, %s16411_s19  ;;  %3871 = vrot.lane.b32.xlu1 %v3840_v59, %s16411_s19  ;;  %v4457_v51 = vld [vmem:[#allocation2] sm:$0x3f] }
 0xa08   : > { %3936 = vrot.lane.b32.xlu0 %v3841_v58, %s16412_s20  ;;  %3934 = vrot.lane.b32.xlu1 %v3840_v59, %s16412_s20 }
 0xa0c   : > { %4005 = vrot.lane.b32.xlu0 %v3841_v58, %s19241_s21  ;;  %4003 = vrot.lane.b32.xlu1 %v3840_v59, %s19241_s21 }
 0xa10   : > { %4073 = vrot.lane.b32.xlu0 %v3841_v58, %s19243_s22  ;;  %4071 = vrot.lane.b32.xlu1 %v3840_v59, %s19243_s22 }
 0xa14   : > { %4141 = vrot.lane.b32.xlu0 %v3841_v58, %s16416_s25  ;;  %4139 = vrot.lane.b32.xlu1 %v3840_v59, %s16416_s25 }
 0xa18   : > { %4203 = vrot.lane.b32.xlu0 %v3841_v58, %s19257_s26  ;;  %4201 = vrot.lane.b32.xlu1 %v3840_v59, %s19257_s26 }
 0xa1c   : > { %4285 = vrot.lane.b32.xlu0 %v3841_v58, %s19258_s27  ;;  %4283 = vrot.lane.b32.xlu1 %v3840_v59, %s19258_s27  ;;  %v4133_v58 = vshrl.u32 %v16148_v54, 16  ;;  %v4137_v59 = vrot.slane %v4135_v57, 1 }
 0xa1e   : > { %v4138_v0 = vor.u32 %v4137_v59, %v4133_v58 }
 0xa20   : > { %3853 = vperm.xlu0 %16099, %v3845_v60   ;;  %3848 = vperm.xlu1 %16098, %v3844_v61  }
 0xa76   : > { %v3874_v12 = vpop.permute.xlu0 %3873  ;;  %v3872_v13 = vpop.permute.xlu1 %3871 }
 0xa77   : > { %v3875_v14 = vsel %vm19226_vm1, %v3872_v13, %v3874_v12  ;;  %v4275_v12 = vshrl.u32 %v16151_v6, 16  ;;  %v4278_v13 = vshll.u32 %v16151_v6, 16  ;;  %vm6031_vm1 = vcmask 116800  }
 0xa78   : > { %v3884_v15 = vand.u32 %v17282_v9, %v3875_v14 }
 0xa7a   : > { %v3937_v17 = vpop.permute.xlu0 %3936  ;;  %14739 = vmatpush3.bf16.msra.mxu1 %v3884_v15  ;;  %v3935_v19 = vpop.permute.xlu1 %3934  ;;  %v4269_v15 = vrot.slane %v4267_v10, 3  ;;  %v16163_v10 = vld [vmem:[%s19196_s1 + $0xb0] ss:$0 sps:$4 sm:$0x11]  }
 0xa7b   : > { %v3938_v20 = vsel %vm19222_vm2, %v3935_v19, %v3937_v17  ;;  %14744 = vmatprep.subr.bf16.mxu1 %v16419_v42  ;;  %v4277_v17 = vrot.slane %v4275_v12, 3  ;;  %v4280_v19 = vrot.slane %v4278_v13, 4  ;;  %v4558_v12 = vrot.slane %v16163_v10, 1 }
 0xa7c   : > { %v3943_v22 = vand.u32 %v3938_v20, %v17282_v9 }
 0xa7d   : > { %14741 = vmatmul.mubr.msk.bf16.vlgmr.msra.gmra.mrb[12].mxu1 %vm19223_vm5, %v3868_v16  ;;  %v4272_v16 = vrot.slane %v4270_v11, 4 }
 0xa7e   : > { %14745 = vmatpush3.bf16.msra.mxu1 %v3943_v22  ;;  %14746 = vmatprep.mubr.msk.bf16.mxu1 %vm19231_vm12, %v16419_v42  ;;  %v4006_v23 = vpop.permute.xlu0 %4005  ;;  %v4004_v24 = vpop.permute.xlu1 %4003  ;;  %v4281_v22 = vor.u32 %v4280_v19, %v4277_v17  ;;  %v16165_v17 = vld [vmem:[%s19196_s1 + $0xb8] ss:$0 sps:$4 sm:$0x11]  }
 0xa7f   : > { %14750 = vmatprep.subr.bf16.mxu1 %v16419_v42  ;;  %v4007_v25 = vsel %vm19221_vm3, %v4004_v24, %v4006_v23  ;;  %v4273_v20 = vor.u32 %v4272_v16, %v4269_v15  ;;  %v16158_v24 = vld [vmem:[%s19199_s4 + $0x30] sm:$0xff]   ;;  %vm4463_vm3 = vcmask 382264  }
 0xa80   : > { %v4012_v31 = vand.u32 %v4007_v25, %v17282_v9  ;;  %14793 = vmatpush3.bf16.msra.mxu0 %v16158_v24  ;;  %v16159_v25 = vld [vmem:[%s19199_s4 + $0x38] sm:$0x1f]   ;;  %vm4464_vm2 = vmand %vm4463_vm3, %vm19224_vm8  ;;  %v16164_v16 = vld [vmem:[%s19196_s1 + $0xb0] sm:$0xfe]   ;;  %vm19230_vm3 = vcmask 318528  }
 0xa81   : > { %v4282_v23 = vsel %vm19225_vm9, %v4273_v20, %v4281_v22  ;;  %14794 = vmatprep.subr.bf16.mxu0 %v16419_v42  ;;  %v4622_v19 = vrot.slane %v16164_v16, 1  ;;  %v4623_v20 = vrot.slane %v16165_v17, 1  ;;  %vm5476_vm9 = vcmask 187512  }
 0xa82   : > { %v4074_v36 = vpop.permute.xlu0 %4073  ;;  %v4072_v37 = vpop.permute.xlu1 %4071 }
 0xa83   : > { %v4075_v38 = vsel %vm19220_vm4, %v4072_v37, %v4074_v36 }
 0xa84   : > { %v4080_v41 = vand.u32 %v4075_v38, %v17282_v9 }
 0xa86   : > { %v4142_v47 = vpop.permute.xlu0 %4141  ;;  %v4140_v49 = vpop.permute.xlu1 %4139 }
 0xa87   : > { %v4143_v52 = vsel %vm2622_vm11, %v4140_v49, %v4142_v47  ;;  %vm19259_vm11 = vcmask 941056  }
 0xa88   : > { %v4148_v56 = vand.u32 %v4143_v52, %v17282_v9 }
 0xa89   : > { %14747 = vmatmul.mubr.msk.bf16.vlgmr.msra.gmra.mrb[12].mxu1 %vm19223_vm5, %v16144_v26  ;;  %v4407_v26 = vand.u32 %v16159_v25, %v17092_v62  ;;  %v16166_v25 = vld [vmem:[%s19196_s1 + $0xb8] sm:$0xfe]  }
 0xa8a   : > { %14751 = vmatpush3.bf16.msra.mxu1 %v4012_v31  ;;  %14752 = vmatprep.mubr.msk.bf16.mxu1 %vm19231_vm12, %v16419_v42  ;;  %v4204_v60 = vpop.permute.xlu0 %4203  ;;  %v4202_v61 = vpop.permute.xlu1 %4201 }
 0xa8b   : > { %14756 = vmatprep.subr.bf16.mxu1 %v16419_v42  ;;  %v4205_v63 = vsel %vm19259_vm11, %v4202_v61, %v4204_v60  ;;  %vm19260_vm11 = vcmask 932864   ;;  %14795 = vmatpush3.bf16.msra.mxu0 %v4407_v26  ;;  %v4472_v60 = vld [vmem:[%s19197_s2 + $0x2e] sm:$0xff]  ;;  %v4473_v61 = vld [vmem:[%s19197_s2 + $0x36] sm:$0xff]  ;;  %v16167_v26 = vld [vmem:[%s19196_s1 + $0xc0] ss:$0 sps:$4 sm:$0x11]  }
 0xa8c   : > { %v4210_v1 = vand.u32 %v4205_v63, %v17282_v9  ;;  %14842 = vmatprep.subr.bf16.mxu0 %v16419_v42  ;;  %v16160_v63 = vld [vmem:[%s19196_s1 + $0xa0] sm:$0xfe]  }
 0xa8e   : > { %v4286_v3 = vpop.permute.xlu0 %4285  ;;  %v4284_v4 = vpop.permute.xlu1 %4283 }
 0xa8f   : > { %v4287_v7 = vsel %vm19260_vm11, %v4284_v4, %v4286_v3  ;;  %vm4455_vm11 = vcmask 316480  }
 0xa90   : > { %v4292_v14 = vand.u32 %v4287_v7, %v17282_v9  ;;  %vm4456_vm4 = vmand %vm4455_vm11, %vm19224_vm8  ;;  %vm19261_vm11 = vcmask 64512   ;;  %vm5473_vm8 = vcmask 121920  }
 0xa95   : > { %14753 = vmatmul.mubr.msk.bf16.vlgmr.msra.gmra.mrb[12].mxu1 %vm19223_vm5, %v4002_v40 }
 0xa96   : > { %14757 = vmatpush3.bf16.msra.mxu1 %v4080_v41  ;;  %14758 = vmatprep.mubr.msk.bf16.mxu1 %vm19231_vm12, %v16419_v42 }
 0xa97   : > { %14762 = vmatprep.subr.bf16.mxu1 %v16419_v42 }
 0xa9f   : > { %v3849_v29 = vpop.permute.xlu1 %3848  ;;  %v3854_v34 = vpop.permute.xlu0 %3853 }
 0xaa1   : > { %14759 = vmatmul.mubr.msk.bf16.vlgmr.msra.gmra.mrb[12].mxu1 %vm19223_vm5, %v4070_v55 }
 0xaa2   : > { %14763 = vmatpush3.bf16.msra.mxu1 %v4148_v56  ;;  %14764 = vmatprep.mubr.msk.bf16.mxu1 %vm19231_vm12, %v16419_v42 }
 0xaa3   : > { %14768 = vmatprep.subr.bf16.mxu1 %v16419_v42 }
 0xaad   : > { %14765 = vmatmul.mubr.msk.bf16.vlgmr.msra.gmra.mrb[12].mxu1 %vm19223_vm5, %v4138_v0  ;;  %v16161_v0 = vld [vmem:[%s19196_s1 + $0xa8] ss:$0 sps:$4 sm:$0x11]  }
 0xaae   : > { %14769 = vmatpush3.bf16.msra.mxu1 %v4210_v1  ;;  %14770 = vmatprep.mubr.msk.bf16.mxu1 %vm19231_vm12, %v16419_v42  ;;  %v4493_v1 = vrot.slane %v16160_v63, 1  ;;  %v4494_v2 = vrot.slane %v16161_v0, 1 }
 0xaaf   : > { %14774 = vmatprep.subr.bf16.mxu1 %v16419_v42 }
 0xab9   : > { %14771 = vmatmul.mubr.msk.bf16.vlgmr.msra.gmra.mrb[12].mxu1 %vm19223_vm5, %v4200_v8  ;;  %v16162_v8 = vld [vmem:[%s19196_s1 + $0xa8] sm:$0xfe]  }
 0xaba   : > { %14775 = vmatpush3.bf16.msra.mxu1 %v4292_v14  ;;  %14776 = vmatprep.mubr.msk.bf16.mxu1 %vm19231_vm12, %v16419_v42  ;;  %v4557_v11 = vrot.slane %v16162_v8, 1 }
 0xabb   : > { %14800 = vmatprep.subr.bf16.mxu1 %v16419_v42 }
 0xac5   : > { %14777 = vmatmul.mubr.msk.bf16.vlgmr.msra.gmra.mrb[12].mxu1 %vm19223_vm5, %v4282_v23 }
 0xac6   : > { %14802 = vmatprep.mubr.msk.bf16.mxu1 %vm19231_vm12, %v16419_v42 }
 0xb98   : > { %v4328_v31 = vpop.f32.mrb[12].mxu1 }
 0xb99   : > { %v15410_v32 = vadd.f32 %v4328_v31, %v3849_v29  ;;  %v14778_v33 = vpop.f32.mrb[13].mxu1  ;;  %v4687_v29 = vrot.slane %v16166_v25, 1  ;;  %v4688_v31 = vrot.slane %v16167_v26, 1 }
 0xb9a   : > { %v4331_v35 = vpop.f32.mrb[14].mxu1 }
 0xb9b   : > { %v15411_v36 = vadd.f32 %v4331_v35, %v3854_v34  ;;  %v14779_v37 = vpop.f32.mrb[15].mxu1  ;;  %v4337_v38 = vmax.f32 %v15410_v32, 0.0  ;;  %v16168_v35 = vld [vmem:[%s19196_s1 + $0xc0] sm:$0xfe]  }
 0xb9c   : > { %v4752_v37 = vrot.slane %v16168_v35, 1 }
 0xb9d   : > { %v4338_v40 = vmax.f32 %v15411_v36, 0.0  ;;  %v16169_v36 = vld [vmem:[%s19196_s1 + $0xc8] ss:$0 sps:$4 sm:$0x11]  }
 0xb9f   : > { %v4339_v41 = vpack.c.bf16 %v4338_v40, %v4337_v38  ;;  %v4753_v38 = vrot.slane %v16169_v36, 1 }
 0xba1   : > { %14797 = vmatmul.mubr.msk.bf16.vlgmr.msra.gmra.mrb[24].mxu0 %vm19227_vm0, %v4339_v41  ;;  %vm6034_vm0 = vcmask 59392  }
 0xba2   : > { %14844 = vmatprep.mubr.msk.bf16.mxu0 %vm19231_vm12, %v16419_v42 }
 0xc74   : > { %v4443_v43 = vpop.f32.mrb[24].mxu0 }
 0xc75   : > { %v14798_v44 = vpop.f32.mrb[25].mxu0 }
 0xc76   : > { %v4446_v47 = vpop.f32.mrb[26].mxu0  ;;  %v16170_v44 = vld [vmem:[%s19196_s1 + $0xc8] sm:$0xfe]  }
 0xc77   : > { %v4450_v49 = vpack.c.bf16 %v4446_v47, %v4443_v43  ;;  %v14799_v50 = vpop.f32.mrb[27].mxu0  ;;  %v16171_v47 = vld [vmem:[%s19196_s1 + $0xd0] ss:$0 sps:$4 sm:$0x11]  }
 0xc78   : > { %v4818_v50 = vrot.slane %v16171_v47, 1  ;;  %v16182_v47 = vld [vmem:[%s19196_s1 + $0xf8] sm:$0xfe]  }
 0xc79   : > { %4452 = vrot.lane.b32.xlu1 %v4450_v49, %s16406_s15  ;;  %v4817_v49 = vrot.slane %v16170_v44, 1 }
 0xceb   : > { %v4453_v52 = vpop.permute.xlu1 %4452 }
 0xcec   : > { %v4458_v54 = vsel %vm4456_vm4, %v4453_v52, %v4457_v51  ;;  %vm19229_vm4 = vcmask 384312  }
 0xced   : > { %4459 = vst [vmem:[#allocation2] sm:$0x3f] %v4458_v54 }
 0xcf4   : > { %v4460_v55 = vld [vmem:[#allocation2] sm:$0x3f] }
 0xcf5   : > { %v4461_v56 = vsel %vm17225_vm6, 0, %v4460_v55  ;;  %v16172_v55 = vld [vmem:[%s19196_s1 + $0xd0] sm:$0xfe]  }
 0xcf6   : > { %4462 = vst [vmem:[#allocation2] sm:$0x3f] %v4461_v56  ;;  %v16173_v56 = vld [vmem:[%s19196_s1 + $0xd8] ss:$0 sps:$4 sm:$0x11]  }
 0xcfd   : > { %v4465_v57 = vld [vmem:[#allocation2] sm:$0x3f] }
 0xcfe   : > { %v4466_v58 = vsel %vm4464_vm2, 0, %v4465_v57  ;;  %vm4492_vm2 = vcmask 1046528   ;;  %v4882_v57 = vrot.slane %v16172_v55, 1  ;;  %v16184_v55 = vld [vmem:[%s19196_s1 + $0x100] sm:$0xfe]  }
 0xcff   : > { %4467 = vst [vmem:[#allocation2] sm:$0x3f] %v4466_v58  ;;  %v4495_v6 = vsel %vm4492_vm2, %v4493_v1, %v4494_v2  ;;  %v4559_v14 = vsel %vm4492_vm2, %v4557_v11, %v4558_v12  ;;  %v4624_v23 = vsel %vm4492_vm2, %v4622_v19, %v4623_v20  ;;  %v4689_v33 = vsel %vm4492_vm2, %v4687_v29, %v4688_v31  ;;  %v4952_v11 = vld [vmem:[%s19197_s2 + $0x3e] sm:$0xff]  ;;  %v4953_v12 = vld [vmem:[%s19197_s2 + $0x46] sm:$0xff] }
 0xd00   : > { %v4754_v41 = vsel %vm4492_vm2, %v4752_v37, %v4753_v38  ;;  %v4819_v52 = vsel %vm4492_vm2, %v4817_v49, %v4818_v50  ;;  %v4883_v58 = vrot.slane %v16173_v56, 1  ;;  %v16178_v31 = vld [vmem:[%s19196_s1 + $0xe8] sm:$0xfe]   ;;  %v16180_v37 = vld [vmem:[%s19196_s1 + $0xf0] sm:$0xfe]   ;;  %v5224_v50 = vrot.slane %v16182_v47, 1 }
 0xd01   : > { %v16181_v38 = vld [vmem:[%s19196_s1 + $0xf8] ss:$0 sps:$4 sm:$0x11]   ;;  %v16183_v49 = vld [vmem:[%s19196_s1 + $0x100] ss:$0 sps:$4 sm:$0x11]  }
 0xd02   : > { %v16185_v56 = vld [vmem:[%s19196_s1 + $0x108] ss:$0 sps:$4 sm:$0x11]   ;;  %v16195_v47 = vld [vmem:[%s19196_s1 + $0x12c] sm:$0x3f]  }
 0xd06   : > { %v4468_v59 = vld [vmem:[#allocation2] sm:$0x3f] }
 0xd07   : > { %4560 = vrot.lane.b32.xlu1 %v4468_v59, %s16409_s17  ;;  %4497 = vrot.lane.b32.xlu0 %v4468_v59, %s16408_s16 }
 0xd0b   : > { %4690 = vrot.lane.b32.xlu1 %v4468_v59, %s16411_s19  ;;  %4625 = vrot.lane.b32.xlu0 %v4468_v59, %s16410_s18 }
 0xd0f   : > { %4820 = vrot.lane.b32.xlu1 %v4468_v59, %s19241_s21  ;;  %4755 = vrot.lane.b32.xlu0 %v4468_v59, %s16412_s20 }
 0xd13   : > { %4476 = vperm.xlu1 %16098, %v4472_v60   ;;  %4885 = vrot.lane.b32.xlu0 %v4468_v59, %s19243_s22  ;;  %v4884_v59 = vsel %vm4492_vm2, %v4882_v57, %v4883_v58  ;;  %v5287_v57 = vrot.slane %v16184_v55, 1  ;;  %v5288_v58 = vrot.slane %v16185_v56, 1  ;;  %v16196_v55 = vld [vmem:[%s19196_s1 + $0x130] sm:$0xfc]   ;;  %v16197_v56 = vld [vmem:[%s19196_s1 + $0x138] sm:$0x1f]  }
 0xd17   : > { %4481 = vperm.xlu0 %16099, %v4473_v61  }
 0xd79   : > { %v4498_v3 = vpop.permute.xlu0 %4497  ;;  %v4561_v5 = vpop.permute.xlu1 %4560 }
 0xd7a   : > { %v4503_v4 = vand.u32 %v4498_v3, %v17282_v9  ;;  %v4566_v7 = vand.u32 %v4561_v5, %v17282_v9 }
 0xd7c   : > { %14801 = vmatpush3.bf16.msra.mxu1 %v4503_v4 }
 0xd7d   : > { %14806 = vmatprep.subr.bf16.mxu1 %v16419_v42  ;;  %v4626_v13 = vpop.permute.xlu0 %4625  ;;  %v4691_v22 = vpop.permute.xlu1 %4690 }
 0xd7e   : > { %v4631_v15 = vand.u32 %v4626_v13, %v17282_v9  ;;  %v4696_v24 = vand.u32 %v4691_v22, %v17282_v9  ;;  %v16174_v13 = vld [vmem:[%s19196_s1 + $0xd8] sm:$0xfe]   ;;  %v16176_v22 = vld [vmem:[%s19196_s1 + $0xe0] sm:$0xfe]  }
 0xd7f   : > { %14803 = vmatmul.mubr.msk.bf16.vlgmr.msra.gmra.mrb[16].mxu1 %vm19223_vm5, %v4495_v6 }
 0xd80   : > { %14807 = vmatpush3.bf16.msra.mxu1 %v4566_v7  ;;  %14808 = vmatprep.mubr.msk.bf16.mxu1 %vm19231_vm12, %v16419_v42 }
 0xd81   : > { %14812 = vmatprep.subr.bf16.mxu1 %v16419_v42  ;;  %v4756_v32 = vpop.permute.xlu0 %4755  ;;  %v4821_v40 = vpop.permute.xlu1 %4820 }
 0xd82   : > { %v4761_v34 = vand.u32 %v4756_v32, %v17282_v9  ;;  %v4826_v43 = vand.u32 %v4821_v40, %v17282_v9  ;;  %v16179_v32 = vld [vmem:[%s19196_s1 + $0xf0] ss:$0 sps:$4 sm:$0x11]   ;;  %v5161_v40 = vrot.slane %v16180_v37, 1  ;;  %v5483_v37 = vld [vmem:[%s19197_s2 + $0x56] sm:$0xff] }
 0xd85   : > { %v4886_v51 = vpop.permute.xlu0 %4885 }
 0xd86   : > { %v4891_v54 = vand.u32 %v4886_v51, %v17282_v9  ;;  %v5225_v51 = vrot.slane %v16183_v49, 1 }
 0xd8b   : > { %14809 = vmatmul.mubr.msk.bf16.vlgmr.msra.gmra.mrb[16].mxu1 %vm19223_vm5, %v4559_v14  ;;  %v16175_v14 = vld [vmem:[%s19196_s1 + $0xe0] ss:$0 sps:$4 sm:$0x11]  }
 0xd8c   : > { %14813 = vmatpush3.bf16.msra.mxu1 %v4631_v15  ;;  %14814 = vmatprep.mubr.msk.bf16.mxu1 %vm19231_vm12, %v16419_v42  ;;  %v4972_v15 = vrot.slane %v16174_v13, 1  ;;  %v4973_v16 = vrot.slane %v16175_v14, 1 }
 0xd8d   : > { %14818 = vmatprep.subr.bf16.mxu1 %v16419_v42 }
 0xd8e   : > { %v4974_v19 = vsel %vm4492_vm2, %v4972_v15, %v4973_v16 }
 0xd92   : > { %v4477_v60 = vpop.permute.xlu1 %4476 }
 0xd96   : > { %v4482_v1 = vpop.permute.xlu0 %4481 }
 0xd97   : > { %14815 = vmatmul.mubr.msk.bf16.vlgmr.msra.gmra.mrb[16].mxu1 %vm19223_vm5, %v4624_v23  ;;  %v16177_v23 = vld [vmem:[%s19196_s1 + $0xe8] ss:$0 sps:$4 sm:$0x11]  }
 0xd98   : > { %14819 = vmatpush3.bf16.msra.mxu1 %v4696_v24  ;;  %14820 = vmatprep.mubr.msk.bf16.mxu1 %vm19231_vm12, %v16419_v42  ;;  %v5035_v24 = vrot.slane %v16176_v22, 1  ;;  %v5036_v25 = vrot.slane %v16177_v23, 1 }
 0xd99   : > { %14824 = vmatprep.subr.bf16.mxu1 %v16419_v42 }
 0xd9a   : > { %v5037_v26 = vsel %vm4492_vm2, %v5035_v24, %v5036_v25 }
 0xda3   : > { %14821 = vmatmul.mubr.msk.bf16.vlgmr.msra.gmra.mrb[16].mxu1 %vm19223_vm5, %v4689_v33  ;;  %v5098_v33 = vrot.slane %v16178_v31, 1 }
 0xda4   : > { %14825 = vmatpush3.bf16.msra.mxu1 %v4761_v34  ;;  %14826 = vmatprep.mubr.msk.bf16.mxu1 %vm19231_vm12, %v16419_v42  ;;  %v5099_v34 = vrot.slane %v16179_v32, 1 }
 0xda5   : > { %14830 = vmatprep.subr.bf16.mxu1 %v16419_v42 }
 0xda6   : > { %v5100_v35 = vsel %vm4492_vm2, %v5098_v33, %v5099_v34 }
 0xdaf   : > { %14827 = vmatmul.mubr.msk.bf16.vlgmr.msra.gmra.mrb[16].mxu1 %vm19223_vm5, %v4754_v41  ;;  %v5162_v41 = vrot.slane %v16181_v38, 1 }
 0xdb0   : > { %14831 = vmatpush3.bf16.msra.mxu1 %v4826_v43  ;;  %14832 = vmatprep.mubr.msk.bf16.mxu1 %vm19231_vm12, %v16419_v42 }
 0xdb1   : > { %14836 = vmatprep.subr.bf16.mxu1 %v16419_v42  ;;  %v5163_v43 = vsel %vm4492_vm2, %v5161_v40, %v5162_v41  ;;  %v16192_v41 = vld [vmem:[%s19196_s1 + $0x11c] sm:$0xff]  }
 0xdbb   : > { %14833 = vmatmul.mubr.msk.bf16.vlgmr.msra.gmra.mrb[16].mxu1 %vm19223_vm5, %v4819_v52  ;;  %v5226_v52 = vsel %vm4492_vm2, %v5224_v50, %v5225_v51  ;;  %v5655_v50 = vrot.slane %v16195_v47, 3  ;;  %v16193_v51 = vld [vmem:[%s19196_s1 + $0x124] ss:$0 sps:$4 sm:$0x77]  }
 0xdbc   : > { %14837 = vmatpush3.bf16.msra.mxu1 %v4891_v54  ;;  %14838 = vmatprep.mubr.msk.bf16.mxu1 %vm19231_vm12, %v16419_v42 }
 0xdbd   : > { %14884 = vmatprep.subr.bf16.mxu1 %v16419_v42 }
 0xdc7   : > { %14839 = vmatmul.mubr.msk.bf16.vlgmr.msra.gmra.mrb[16].mxu1 %vm19223_vm5, %v4884_v59  ;;  %v5289_v59 = vsel %vm4492_vm2, %v5287_v57, %v5288_v58  ;;  %vm5420_vm5 = vcmask 203776   ;;  %v5732_v57 = vrot.slane %v16196_v55, 2  ;;  %v5733_v58 = vrot.slane %v16197_v56, 2 }
 0xdc8   : > { %14888 = vmatprep.mubr.msk.bf16.mxu1 %vm19231_vm12, %v16419_v42 }
 0xe9a   : > { %v4927_v61 = vpop.f32.mrb[16].mxu1 }
 0xe9b   : > { %v15412_v63 = vadd.f32 %v4927_v61, %v4477_v60  ;;  %v14840_v0 = vpop.f32.mrb[17].mxu1  ;;  %v16186_v61 = vld [vmem:[%s19196_s1 + $0x108] sm:$0xfe]  }
 0xe9c   : > { %v4930_v2 = vpop.f32.mrb[18].mxu1  ;;  %v5350_v0 = vrot.slane %v16186_v61, 1  ;;  %v16198_v61 = vld [vmem:[%s19196_s1 + $0x13c] sm:$0xfe]  }
 0xe9d   : > { %v15413_v3 = vadd.f32 %v4930_v2, %v4482_v1  ;;  %v14841_v4 = vpop.f32.mrb[19].mxu1  ;;  %v4936_v5 = vmax.f32 %v15412_v63, 0.0  ;;  %v16187_v63 = vld [vmem:[%s19196_s1 + $0x110] ss:$0 sps:$4 sm:$0x11]  }
 0xe9e   : > { %v5351_v1 = vrot.slane %v16187_v63, 1  ;;  %v16189_v4 = vld [vmem:[%s19200_s5 + $0x8] sm:$0x1f]   ;;  %v16199_v63 = vld [vmem:[%s19196_s1 + $0x144] ss:$0 sps:$4 sm:$0xff]  }
 0xe9f   : > { %v4937_v6 = vmax.f32 %v15413_v3, 0.0  ;;  %v16188_v3 = vld [vmem:[%s19200_s5] sm:$0xff]  }
 0xea0   : > { %v5352_v2 = vsel %vm4492_vm2, %v5350_v0, %v5351_v1  ;;  %14885 = vmatpush3.bf16.msra.mxu1 %v16188_v3  ;;  %v5806_v0 = vrot.slane %v16198_v61, 1  ;;  %v5807_v1 = vrot.slane %v16199_v63, 1 }
 0xea1   : > { %v4938_v7 = vpack.c.bf16 %v4937_v6, %v4936_v5  ;;  %14886 = vmatprep.subr.bf16.mxu1 %v16419_v42  ;;  %v5425_v5 = vand.u32 %v16189_v4, %v17092_v62  ;;  %v16190_v62 = vld [vmem:[%s19196_s1 + $0x110] sm:$0xfe]   ;;  %v16200_v4 = vld [vmem:[%s19196_s1 + $0x148] sm:$0xff]  }
 0xea3   : > { %4940 = vrot.lane.b32.xlu1 %v4938_v7, %s16406_s15 }
 0xea4   : > { %14887 = vmatpush3.bf16.msra.mxu1 %v5425_v5 }
 0xf15   : > { %v17467_v8 = vpop.permute.xlu1 %4940 }
 0xf16   : > { %4944 = vst.msk [vmem:[#allocation2] sm:$0xff] %vm19230_vm3, %v17467_v8  ;;  %vm6622_vm3 = vcmask 133192  }
 0xf17   : > { %4945 = vst.msk [vmem:[#allocation2] sm:$0xff] %vm19261_vm11, %v16407_v30  ;;  %vm19228_vm11 = vcmask 130048  }
 0xf18   : > { %4947 = vst.msk [vmem:[#allocation2] sm:$0xff] %vm19229_vm4, %v16407_v30  ;;  %vm19263_vm4 = vcmask 64512  }
 0xf1f   : > { %v4948_v10 = vld [vmem:[#allocation2] sm:$0xff] }
 0xf20   : > { %5038 = vrot.lane.b32.xlu1 %v4948_v10, %s16412_s20  ;;  %4976 = vrot.lane.b32.xlu0 %v4948_v10, %s16411_s19 }
 0xf24   : > { %5164 = vrot.lane.b32.xlu1 %v4948_v10, %s19243_s22  ;;  %5101 = vrot.lane.b32.xlu0 %v4948_v10, %s19241_s21 }
 0xf28   : > { %5290 = vrot.lane.b32.xlu1 %v4948_v10, %s19257_s26  ;;  %5227 = vrot.lane.b32.xlu0 %v4948_v10, %s16416_s25 }
 0xf2c   : > { %4956 = vperm.xlu1 %16098, %v4952_v11   ;;  %5353 = vrot.lane.b32.xlu0 %v4948_v10, %s19258_s27 }
 0xf30   : > { %4961 = vperm.xlu0 %16099, %v4953_v12  }
 0xf92   : > { %v4977_v17 = vpop.permute.xlu0 %4976  ;;  %v5039_v20 = vpop.permute.xlu1 %5038 }
 0xf93   : > { %14843 = vmatpush3.bf16.msra.mxu0 %v4977_v17 }
 0xf94   : > { %14848 = vmatprep.subr.bf16.mxu0 %v16419_v42 }
 0xf96   : > { %14845 = vmatmul.mubr.msk.bf16.vlgmr.msra.gmra.mrb[28].mxu0 %vm19228_vm11, %v4974_v19  ;;  %v5102_v29 = vpop.permute.xlu0 %5101  ;;  %v5165_v36 = vpop.permute.xlu1 %5164 }
 0xf97   : > { %14849 = vmatpush3.bf16.msra.mxu0 %v5039_v20  ;;  %14850 = vmatprep.mubr.msk.bf16.mxu0 %vm19231_vm12, %v16419_v42 }
 0xf98   : > { %14854 = vmatprep.subr.bf16.mxu0 %v16419_v42 }
 0xf9a   : > { %v5228_v44 = vpop.permute.xlu0 %5227  ;;  %v5291_v54 = vpop.permute.xlu1 %5290 }
 0xf9e   : > { %v5354_v60 = vpop.permute.xlu0 %5353 }
 0xfa2   : > { %14851 = vmatmul.mubr.msk.bf16.vlgmr.msra.gmra.mrb[28].mxu0 %vm19228_vm11, %v5037_v26  ;;  %v16191_v26 = vld [vmem:[%s19196_s1 + $0x118] ss:$0 sps:$4 sm:$0xff]  }
 0xfa3   : > { %14855 = vmatpush3.bf16.msra.mxu0 %v5102_v29  ;;  %14856 = vmatprep.mubr.msk.bf16.mxu0 %vm19231_vm12, %v16419_v42  ;;  %v5508_v29 = vrot.slane %v16190_v62, 1  ;;  %v5509_v31 = vrot.slane %v16191_v26, 1 }
 0xfa4   : > { %14860 = vmatprep.subr.bf16.mxu0 %v16419_v42 }
 0xfa5   : > { %v5510_v33 = vsel %vm4492_vm2, %v5508_v29, %v5509_v31 }
 0xfab   : > { %v4957_v6 = vpop.permute.xlu1 %4956 }
 0xfae   : > { %14857 = vmatmul.mubr.msk.bf16.vlgmr.msra.gmra.mrb[28].mxu0 %vm19228_vm11, %v5100_v35  ;;  %v5482_v35 = vld [vmem:[%s19197_s2 + $0x4e] sm:$0xff] }
 0xfaf   : > { %14861 = vmatpush3.bf16.msra.mxu0 %v5165_v36  ;;  %14862 = vmatprep.mubr.msk.bf16.mxu0 %vm19231_vm12, %v16419_v42  ;;  %v4962_v12 = vpop.permute.xlu0 %4961  ;;  %v5484_v36 = vld [vmem:[%s19197_s2 + $0x5e] sm:$0x3f] }
 0xfb0   : > { %14866 = vmatprep.subr.bf16.mxu0 %v16419_v42 }
 0xfba   : > { %14863 = vmatmul.mubr.msk.bf16.vlgmr.msra.gmra.mrb[28].mxu0 %vm19228_vm11, %v5163_v43 }
 0xfbb   : > { %14867 = vmatpush3.bf16.msra.mxu0 %v5228_v44  ;;  %14868 = vmatprep.mubr.msk.bf16.mxu0 %vm19231_vm12, %v16419_v42  ;;  %v16194_v44 = vld [vmem:[%s19196_s1 + $0x124] sm:$0xf8]  }
 0xfbc   : > { %14872 = vmatprep.subr.bf16.mxu0 %v16419_v42  ;;  %v5654_v49 = vrot.slane %v16194_v44, 3 }
 0xfc6   : > { %14869 = vmatmul.mubr.msk.bf16.vlgmr.msra.gmra.mrb[28].mxu0 %vm19228_vm11, %v5226_v52  ;;  %v5656_v52 = vsel %vm3229_vm14, %v5654_v49, %v5655_v50 }
 0xfc7   : > { %14873 = vmatpush3.bf16.msra.mxu0 %v5291_v54  ;;  %14874 = vmatprep.mubr.msk.bf16.mxu0 %vm19231_vm12, %v16419_v42 }
 0xfc8   : > { %14878 = vmatprep.subr.bf16.mxu0 %v16419_v42 }
 0xfd2   : > { %14875 = vmatmul.mubr.msk.bf16.vlgmr.msra.gmra.mrb[28].mxu0 %vm19228_vm11, %v5289_v59  ;;  %v5734_v59 = vsel %vm3880_vm10, %v5732_v57, %v5733_v58 }
 0xfd3   : > { %14879 = vmatpush3.bf16.msra.mxu0 %v5354_v60  ;;  %14880 = vmatprep.mubr.msk.bf16.mxu0 %vm19231_vm12, %v16419_v42  ;;  %vm6614_vm12 = vcmask 72768  }
 0xfde   : > { %14881 = vmatmul.mubr.msk.bf16.vlgmr.msra.gmra.mrb[28].mxu0 %vm19228_vm11, %v5352_v2  ;;  %v5808_v2 = vsel %vm4492_vm2, %v5806_v0, %v5807_v1  ;;  %v16208_v0 = vld [vmem:[%s19196_s1 + $0x174] sm:$0xff]  }
0x10b1   : > { %v5393_v7 = vpop.f32.mrb[28].mxu0 }
0x10b2   : > { %v15414_v10 = vadd.f32 %v5393_v7, %v4957_v6  ;;  %v14882_v11 = vpop.f32.mrb[29].mxu0  ;;  %v16202_v6 = vld [vmem:[%s19196_s1 + $0x150] sm:$0xf8]   ;;  %v16203_v7 = vld [vmem:[%s19196_s1 + $0x158] sm:$0x3f]  }
0x10b3   : > { %v5396_v13 = vpop.f32.mrb[30].mxu0  ;;  %v5955_v11 = vrot.slane %v16203_v7, 3 }
0x10b4   : > { %v15415_v14 = vadd.f32 %v5396_v13, %v4962_v12  ;;  %v14883_v15 = vpop.f32.mrb[31].mxu0  ;;  %v5402_v16 = vmax.f32 %v15414_v10, 0.0  ;;  %v5954_v10 = vrot.slane %v16202_v6, 3  ;;  %v16201_v12 = vld [vmem:[%s19196_s1 + $0x150] ss:$0 sps:$4 sm:$0x77]  }
0x10b6   : > { %v5403_v17 = vmax.f32 %v15415_v14, 0.0  ;;  %v5956_v13 = vsel %vm3229_vm14, %v5954_v10, %v5955_v11  ;;  %v16209_v10 = vld [vmem:[%s19196_s1 + $0x17c] ss:$0 sps:$4 sm:$0x77]  }
0x10b8   : > { %v5404_v19 = vpack.c.bf16 %v5403_v17, %v5402_v16 }
0x10ba   : > { %14889 = vmatmul.mubr.msk.bf16.vlgmr.msra.gmra.mrb[20].mxu1 %vm5420_vm5, %v5404_v19  ;;  %vm19262_vm5 = vcmask 64512  }
0x10bb   : > { %14894 = vmatprep.mubr.msk.bf16.mxu1 %vm19228_vm11, %v5510_v33 }
0x118d   : > { %v5461_v20 = vpop.f32.mrb[20].mxu1 }
0x118e   : > { %v14890_v22 = vpop.f32.mrb[21].mxu1 }
0x118f   : > { %v5464_v23 = vpop.f32.mrb[22].mxu1 }
0x1190   : > { %v5468_v24 = vpack.c.bf16 %v5464_v23, %v5461_v20  ;;  %v14891_v25 = vpop.f32.mrb[23].mxu1 }
0x1192   : > { %5470 = vrot.lane.b32.xlu1 %v5468_v24, %s16406_s15 }
0x1204   : > { %v5471_v32 = vpop.permute.xlu1 %5470 }
0x1205   : > { %5474 = vst.msk [vmem:[#allocation2] sm:$0xff] %vm5473_vm8, %v5471_v32 }
0x1206   : > { %5475 = vst.msk [vmem:[#allocation2] sm:$0xff] %vm19262_vm5, %v16407_v30  ;;  %vm6075_vm5 = vcmask 1042432  }
0x1207   : > { %5477 = vst.msk [vmem:[#allocation2] sm:$0xff] %vm5476_vm9, %v16407_v30 }
0x120e   : > { %v5478_v34 = vld [vmem:[#allocation2] sm:$0xff] }
0x120f   : > { %5580 = vrot.lane.b32.xlu1 %v5478_v34, %s16409_s17  ;;  %5512 = vrot.lane.b32.xlu0 %v5478_v34, %s16408_s16 }
0x1213   : > { %5735 = vrot.lane.b32.xlu1 %v5478_v34, %s16411_s19  ;;  %5657 = vrot.lane.b32.xlu0 %v5478_v34, %s16410_s18 }
0x1217   : > { %5880 = vrot.lane.b32.xlu1 %v5478_v34, %s19241_s21  ;;  %5809 = vrot.lane.b32.xlu0 %v5478_v34, %s16412_s20 }
0x121b   : > { %5487 = vperm.xlu1 %16098, %v5482_v35   ;;  %5957 = vrot.lane.b32.xlu0 %v5478_v34, %s19243_s22 }
0x121f   : > { %5497 = vperm.xlu1 %16098, %v5484_v36   ;;  %5492 = vperm.xlu0 %16099, %v5483_v37  }
0x1281   : > { %v5513_v38 = vpop.permute.xlu0 %5512  ;;  %v5581_v40 = vpop.permute.xlu1 %5580 }
0x1282   : > { %14892 = vmatprep.subr.bf16.mxu1 %v5513_v38 }
0x1283   : > { %14893 = vmatpush3.bf16.msra.mxu1 %v5513_v38  ;;  %v16204_v38 = vld [vmem:[%s19196_s1 + $0x15c] sm:$0xfc]  }
0x1284   : > { %14898 = vmatprep.subr.bf16.mxu1 %v5581_v40 }
0x1285   : > { %v5658_v43 = vpop.permute.xlu0 %5657  ;;  %v5736_v54 = vpop.permute.xlu1 %5735 }
0x1286   : > { %14895 = vmatmul.mubr.msk.bf16.vlgmr.msra.gmra.mrb[24].mxu1 %vm19228_vm11, %v5509_v31 }
0x1287   : > { %14899 = vmatpush3.bf16.msra.mxu1 %v5581_v40  ;;  %14900 = vmatprep.mubr.msk.bf16.mxu1 %vm19228_vm11, %v16192_v41  ;;  %v16205_v40 = vld [vmem:[%s19196_s1 + $0x164] sm:$0x1f]   ;;  %v6058_v41 = vrot.slane %v16204_v38, 2 }
0x1288   : > { %14904 = vmatprep.subr.bf16.mxu1 %v5658_v43  ;;  %v16216_v38 = vld [vmem:[%s19196_s1 + $0x1a0] sm:$0xff]  }
0x1289   : > { %v5810_v60 = vpop.permute.xlu0 %5809  ;;  %v5881_v3 = vpop.permute.xlu1 %5880 }
0x128d   : > { %v5958_v5 = vpop.permute.xlu0 %5957 }
0x1292   : > { %14901 = vmatmul.mubr.msk.bf16.vlgmr.msra.gmra.mrb[24].mxu1 %vm19228_vm11, %v16193_v51  ;;  %v16207_v51 = vld [vmem:[%s19196_s1 + $0x170] ss:$0 sps:$4 sm:$0xff]  }
0x1293   : > { %14905 = vmatpush3.bf16.msra.mxu1 %v5658_v43  ;;  %14906 = vmatprep.mubr.msk.bf16.mxu1 %vm19228_vm11, %v5656_v52  ;;  %v6059_v43 = vrot.slane %v16205_v40, 2  ;;  %v6139_v57 = vrot.slane %v16207_v51, 1 }
0x1294   : > { %14910 = vmatprep.subr.bf16.mxu1 %v5736_v54 }
0x1295   : > { %v6060_v44 = vsel %vm3880_vm10, %v6058_v41, %v6059_v43 }
0x129a   : > { %v5488_v14 = vpop.permute.xlu1 %5487 }
0x129e   : > { %14907 = vmatmul.mubr.msk.bf16.vlgmr.msra.gmra.mrb[24].mxu1 %vm19228_vm11, %v5655_v50  ;;  %v5498_v15 = vpop.permute.xlu1 %5497  ;;  %v5493_v23 = vpop.permute.xlu0 %5492  ;;  %v16206_v50 = vld [vmem:[%s19196_s1 + $0x168] sm:$0xfe]  }
0x129f   : > { %14911 = vmatpush3.bf16.msra.mxu1 %v5736_v54  ;;  %14912 = vmatprep.mubr.msk.bf16.mxu1 %vm19228_vm11, %v5734_v59  ;;  %v6138_v56 = vrot.slane %v16206_v50, 1 }
0x12a0   : > { %14916 = vmatprep.subr.bf16.mxu1 %v5810_v60 }
0x12a1   : > { %v6140_v59 = vsel %vm4492_vm2, %v6138_v56, %v6139_v57 }
0x12aa   : > { %14913 = vmatmul.mubr.msk.bf16.vlgmr.msra.gmra.mrb[24].mxu1 %vm19228_vm11, %v5733_v58 }
0x12ab   : > { %14917 = vmatpush3.bf16.msra.mxu1 %v5810_v60  ;;  %14918 = vmatprep.mubr.msk.bf16.mxu1 %vm19228_vm11, %v5808_v2 }
0x12ac   : > { %14922 = vmatprep.subr.bf16.mxu1 %v5881_v3 }
0x12b6   : > { %14919 = vmatmul.mubr.msk.bf16.vlgmr.msra.gmra.mrb[24].mxu1 %vm19228_vm11, %v5807_v1 }
0x12b7   : > { %14923 = vmatpush3.bf16.msra.mxu1 %v5881_v3  ;;  %14924 = vmatprep.mubr.msk.bf16.mxu1 %vm19228_vm11, %v16200_v4  ;;  %v16210_v3 = vld [vmem:[%s19196_s1 + $0x17c] sm:$0xf8]   ;;  %v16211_v4 = vld [vmem:[%s19196_s1 + $0x184] sm:$0x3f]  }
0x12b8   : > { %14928 = vmatprep.subr.bf16.mxu1 %v5958_v5  ;;  %v6296_v6 = vrot.slane %v16210_v3, 3  ;;  %v6297_v7 = vrot.slane %v16211_v4, 3  ;;  %v16219_v3 = vld [vmem:[%s19196_s1 + $0x1b0] sm:$0xff]  }
0x12c2   : > { %14925 = vmatmul.mubr.msk.bf16.vlgmr.msra.gmra.mrb[24].mxu1 %vm19228_vm11, %v16201_v12 }
0x12c3   : > { %14929 = vmatpush3.bf16.msra.mxu1 %v5958_v5  ;;  %14930 = vmatprep.mubr.msk.bf16.mxu1 %vm19228_vm11, %v5956_v13 }
0x12ce   : > { %14931 = vmatmul.mubr.msk.bf16.vlgmr.msra.gmra.mrb[24].mxu1 %vm19228_vm11, %v5955_v11  ;;  %vm6037_vm11 = vcmask 182392   ;;  %v6298_v11 = vsel %vm3229_vm14, %v6296_v6, %v6297_v7 }
0x13a1   : > { %v14932_v16 = vpop.f32.mrb[24].mxu1 }
0x13a2   : > { %v15416_v17 = vadd.f32 %v14932_v16, %v5498_v15  ;;  %v6000_v19 = vpop.f32.mrb[25].mxu1  ;;  %v16213_v15 = vld [vmem:[%s19196_s1 + $0x190] sm:$0x1f]  }
0x13a3   : > { %v15417_v20 = vadd.f32 %v6000_v19, %v5488_v14  ;;  %v14933_v22 = vpop.f32.mrb[26].mxu1  ;;  %v16212_v14 = vld [vmem:[%s19196_s1 + $0x188] sm:$0xfc]   ;;  %v6379_v19 = vrot.slane %v16213_v15, 2 }
0x13a4   : > { %v6019_v24 = vmax.f32 %v15416_v17, 0.0  ;;  %v6003_v25 = vpop.f32.mrb[27].mxu1  ;;  %v6378_v17 = vrot.slane %v16212_v14, 2 }
0x13a5   : > { %v15418_v62 = vadd.f32 %v6003_v25, %v5493_v23  ;;  %v6017_v29 = vmax.f32 %v15417_v20, 0.0  ;;  %v16215_v25 = vld [vmem:[%s19196_s1 + $0x19c] ss:$0 sps:$4 sm:$0xff]  }
0x13a6   : > { %v6021_v26 = vpack.c.bf16 %v6019_v24, %v6019_v24  ;;  %v6380_v20 = vsel %vm3880_vm10, %v6378_v17, %v6379_v19  ;;  %v16214_v24 = vld [vmem:[%s19196_s1 + $0x194] sm:$0xfe]  }
0x13a7   : > { %v6018_v31 = vmax.f32 %v15418_v62, 0.0 }
0x13a8   : > { %6026 = vrot.lane.b32.xlu1 %v6021_v26, %s16406_s15  ;;  %v7863_v33 = vrot.slane %v6021_v26, 5  ;;  %v6457_v26 = vrot.slane %v16214_v24, 1 }
0x13a9   : > { %v17654_v32 = vpack.c.bf16 %v6018_v31, %v6017_v29  ;;  %v6458_v29 = vrot.slane %v16215_v25, 1 }
0x13ab   : > { %v7862_v34 = vrot.slane %v17654_v32, 5  ;;  %6024 = vrot.lane.b32.xlu0 %v17654_v32, %s16406_s15  ;;  %v6459_v31 = vsel %vm4492_vm2, %v6457_v26, %v6458_v29 }
0x13ad   : > { %v17662_v35 = vsel %vm6075_vm5, %v7862_v34, %v7863_v33 }
0x141a   : > { %v6027_v36 = vpop.permute.xlu1 %6026 }
0x141b   : > { %6032 = vst.msk [vmem:[#allocation2 + $0x28] sm:$0x7] %vm6031_vm1, %v6027_v36 }
0x141c   : > { %6035 = vst.msk [vmem:[#allocation2 + $0x28] sm:$0x7] %vm6034_vm0, %v16407_v30 }
0x141d   : > { %6038 = vst.msk [vmem:[#allocation2 + $0x28] sm:$0x7] %vm6037_vm11, %v16407_v30  ;;  %v6025_v37 = vpop.permute.xlu0 %6024  ;;  %vm19239_vm11 = vcmask 179200  }
0x141e   : > { %6030 = vst.msk [vmem:[#allocation2] sm:$0xff] %vm5473_vm8, %v6025_v37  ;;  %14938 = vmatprep.mubr.msk.bf16.mxu0 %vm19239_vm11, %v6060_v44  ;;  %v6047_v44 = vld [vmem:[%s19197_s2 + $0x74] sm:$0x3f] }
0x141f   : > { %6033 = vst.msk [vmem:[#allocation2] sm:$0xff] %vm19263_vm4, %v16407_v30  ;;  %vm6616_vm4 = vcmask 67648  }
0x1420   : > { %6036 = vst.msk [vmem:[#allocation2] sm:$0xff] %vm5476_vm9, %v16407_v30 }
0x1424   : > { %v6040_v47 = vld [vmem:[#allocation2 + $0x28] sm:$0x7] }
0x1425   : > { %6065 = vrot.lane.b32.xlu1 %v6040_v47, %s16411_s19 }
0x1427   : > { %v6039_v49 = vld [vmem:[#allocation2] sm:$0xff] }
0x1428   : > { %6063 = vrot.lane.b32.xlu0 %v6039_v49, %s16411_s19 }
0x1429   : > { %6143 = vrot.lane.b32.xlu1 %v6040_v47, %s16412_s20 }
0x142c   : > { %6141 = vrot.lane.b32.xlu0 %v6039_v49, %s16412_s20 }
0x142d   : > { %6219 = vrot.lane.b32.xlu1 %v6040_v47, %s19241_s21 }
0x1430   : > { %6217 = vrot.lane.b32.xlu0 %v6039_v49, %s19241_s21 }
0x1431   : > { %6301 = vrot.lane.b32.xlu1 %v6040_v47, %s19243_s22 }
0x1434   : > { %6299 = vrot.lane.b32.xlu0 %v6039_v49, %s19243_s22 }
0x1435   : > { %6383 = vrot.lane.b32.xlu1 %v6040_v47, %s16416_s25 }
0x1438   : > { %6381 = vrot.lane.b32.xlu0 %v6039_v49, %s16416_s25  ;;  %s19276_s25 = smov 124  }
0x1439   : > { %6462 = vrot.lane.b32.xlu1 %v6040_v47, %s19257_s26 }
0x143c   : > { %6460 = vrot.lane.b32.xlu0 %v6039_v49, %s19257_s26  ;;  %s19494_s26 = sshll.u32 %s19496_s10, 4 }
0x143d   : > { %6538 = vrot.lane.b32.xlu1 %v6040_v47, %s19258_s27  ;;  %v6045_v47 = vld [vmem:[%s19197_s2 + $0x64] sm:$0xff] }
0x1440   : > { %6536 = vrot.lane.b32.xlu0 %v6039_v49, %s19258_s27 }
0x1497   : > { %v6066_v54 = vpop.permute.xlu1 %6065 }
0x1498   : > { %v6077_v55 = vsel %vm6075_vm5, %v6066_v54, 0 }
0x149a   : > { %v6064_v52 = vpop.permute.xlu0 %6063 }
0x149b   : > { %14934 = vmatprep.subr.bf16.mxu0 %v6064_v52  ;;  %v6144_v60 = vpop.permute.xlu1 %6143 }
0x149c   : > { %14935 = vmatpush3.bf16.msra.mxu0 %v6064_v52  ;;  %v6153_v61 = vsel %vm6075_vm5, %v6144_v60, 0  ;;  %v6046_v52 = vld [vmem:[%s19197_s2 + $0x6c] sm:$0xff] }
0x149d   : > { %16051 = vmatprep.subr.msk.bf16.mxu0 %vm6075_vm5, %v6066_v54 }
0x149e   : > { %v6142_v58 = vpop.permute.xlu0 %6141 }
0x149f   : > { %v6220_v1 = vpop.permute.xlu1 %6219 }
0x14a0   : > { %14937 = vmatpush3.bf16.msra.mxu0 %v6077_v55  ;;  %v6229_v2 = vsel %vm6075_vm5, %v6220_v1, 0 }
0x14a1   : > { %14942 = vmatprep.subr.bf16.mxu0 %v6142_v58 }
0x14a2   : > { %v6218_v63 = vpop.permute.xlu0 %6217 }
0x14a3   : > { %14939 = vmatmul.mubr.msk.bf16.vlgmr.msra.gmra.mrb[32].mxu0 %vm19239_vm11, %v6059_v43  ;;  %v6302_v12 = vpop.permute.xlu1 %6301  ;;  %v16217_v43 = vld [vmem:[%s19196_s1 + $0x1a8] ss:$0 sps:$4 sm:$0x77]  }
0x14a4   : > { %14943 = vmatpush3.bf16.msra.mxu0 %v6142_v58  ;;  %14946 = vmatprep.mubr.msk.bf16.mxu0 %vm19239_vm11, %v6140_v59  ;;  %v6311_v13 = vsel %vm6075_vm5, %v6302_v12, 0 }
0x14a5   : > { %16052 = vmatprep.subr.msk.bf16.mxu0 %vm6075_vm5, %v6144_v60 }
0x14a6   : > { %v6300_v5 = vpop.permute.xlu0 %6299 }
0x14a7   : > { %v6384_v22 = vpop.permute.xlu1 %6383 }
0x14a8   : > { %14945 = vmatpush3.bf16.msra.mxu0 %v6153_v61  ;;  %v6393_v23 = vsel %vm6075_vm5, %v6384_v22, 0 }
0x14a9   : > { %14950 = vmatprep.subr.bf16.mxu0 %v6218_v63 }
0x14aa   : > { %v6382_v16 = vpop.permute.xlu0 %6381 }
0x14ab   : > { %v6463_v33 = vpop.permute.xlu1 %6462 }
0x14ac   : > { %v6472_v36 = vsel %vm6075_vm5, %v6463_v33, 0 }
0x14ae   : > { %v6461_v62 = vpop.permute.xlu0 %6460 }
0x14af   : > { %14947 = vmatmul.mubr.msk.bf16.vlgmr.msra.gmra.mrb[32].mxu0 %vm19239_vm11, %v6139_v57  ;;  %v6539_v40 = vpop.permute.xlu1 %6538 }
0x14b0   : > { %14951 = vmatpush3.bf16.msra.mxu0 %v6218_v63  ;;  %14954 = vmatprep.mubr.msk.bf16.mxu0 %vm19239_vm11, %v16208_v0  ;;  %v6548_v41 = vsel %vm6075_vm5, %v6539_v40, 0 }
0x14b1   : > { %16053 = vmatprep.subr.msk.bf16.mxu0 %vm6075_vm5, %v6220_v1 }
0x14b2   : > { %v6537_v37 = vpop.permute.xlu0 %6536 }
0x14b4   : > { %14953 = vmatpush3.bf16.msra.mxu0 %v6229_v2  ;;  %v16218_v2 = vld [vmem:[%s19196_s1 + $0x1a8] sm:$0xf8]  }
0x14b5   : > { %14958 = vmatprep.subr.bf16.mxu0 %v6300_v5  ;;  %v6648_v4 = vrot.slane %v16218_v2, 3 }
0x14bb   : > { %14955 = vmatmul.mubr.msk.bf16.vlgmr.msra.gmra.mrb[32].mxu0 %vm19239_vm11, %v16209_v10 }
0x14bc   : > { %14959 = vmatpush3.bf16.msra.mxu0 %v6300_v5  ;;  %14962 = vmatprep.mubr.msk.bf16.mxu0 %vm19239_vm11, %v6298_v11  ;;  %v6649_v5 = vrot.slane %v16219_v3, 3  ;;  %v16220_v11 = vld [vmem:[%s19196_s1 + $0x1b8] ss:$0 sps:$4 sm:$0x77]  }
0x14bd   : > { %16054 = vmatprep.subr.msk.bf16.mxu0 %vm6075_vm5, %v6302_v12  ;;  %v16221_v12 = vld [vmem:[%s19196_s1 + $0x1b8] sm:$0xf8]  }
0x14be   : > { %v6650_v6 = vsel %vm3229_vm14, %v6648_v4, %v6649_v5 }
0x14bf   : > { %14994 = vmatprep.mubr.msk.bf16.mxu1 %vm19239_vm11, %v6650_v6 }
0x14c0   : > { %14961 = vmatpush3.bf16.msra.mxu0 %v6311_v13  ;;  %v16222_v13 = vld [vmem:[%s19196_s1 + $0x1c0] sm:$0xff]  }
0x14c1   : > { %14966 = vmatprep.subr.bf16.mxu0 %v6382_v16 }
0x14c7   : > { %14963 = vmatmul.mubr.msk.bf16.vlgmr.msra.gmra.mrb[32].mxu0 %vm19239_vm11, %v6297_v7 }
0x14c8   : > { %14967 = vmatpush3.bf16.msra.mxu0 %v6382_v16  ;;  %14970 = vmatprep.mubr.msk.bf16.mxu0 %vm19239_vm11, %v6380_v20  ;;  %v6651_v16 = vrot.slane %v16220_v11, 3  ;;  %v6737_v20 = vrot.slane %v16222_v13, 3  ;;  %v16233_v11 = vld [vmem:[%s19196_s1 + $0x1f8] sm:$0xf8]  }
0x14c9   : > { %16055 = vmatprep.subr.msk.bf16.mxu0 %vm6075_vm5, %v6384_v22 }
0x14cc   : > { %14969 = vmatpush3.bf16.msra.mxu0 %v6393_v23  ;;  %v6652_v23 = vsel %vm3229_vm14, %v6649_v5, %v6651_v16 }
0x14cd   : > { %14974 = vmatprep.subr.bf16.mxu0 %v6461_v62 }
0x14d3   : > { %14971 = vmatmul.mubr.msk.bf16.vlgmr.msra.gmra.mrb[32].mxu0 %vm19239_vm11, %v6379_v19  ;;  %v6736_v19 = vrot.slane %v16221_v12, 3  ;;  %v16234_v12 = vld [vmem:[%s19196_s1 + $0x200] sm:$0xff]  }
0x14d4   : > { %14975 = vmatpush3.bf16.msra.mxu0 %v6461_v62  ;;  %14978 = vmatprep.mubr.msk.bf16.mxu0 %vm19239_vm11, %v6459_v31  ;;  %v16223_v62 = vld [vmem:[%s19196_s1 + $0x1c8] ss:$0 sps:$4 sm:$0x77]   ;;  %v16225_v31 = vld [vmem:[%s19196_s1 + $0x1d0] sm:$0xff]   ;;  %v7097_v16 = vrot.slane %v16234_v12, 3 }
0x14d5   : > { %16056 = vmatprep.subr.msk.bf16.mxu0 %vm6075_vm5, %v6463_v33  ;;  %v6738_v24 = vsel %vm3229_vm14, %v6736_v19, %v6737_v20 }
0x14d8   : > { %14977 = vmatpush3.bf16.msra.mxu0 %v6472_v36  ;;  %v6739_v36 = vrot.slane %v16223_v62, 3 }
0x14d9   : > { %14982 = vmatprep.subr.bf16.mxu0 %v6537_v37 }
0x14df   : > { %14979 = vmatmul.mubr.msk.bf16.vlgmr.msra.gmra.mrb[32].mxu0 %vm19239_vm11, %v6458_v29  ;;  %v16224_v29 = vld [vmem:[%s19196_s1 + $0x1c8] sm:$0xf8]  }
0x14e0   : > { %14983 = vmatpush3.bf16.msra.mxu0 %v6537_v37  ;;  %14986 = vmatprep.mubr.msk.bf16.mxu0 %vm19239_vm11, %v16216_v38  ;;  %v6826_v37 = vrot.slane %v16224_v29, 3  ;;  %v6827_v38 = vrot.slane %v16225_v31, 3 }
0x14e1   : > { %16057 = vmatprep.subr.msk.bf16.mxu0 %vm6075_vm5, %v6539_v40  ;;  %v6740_v40 = vsel %vm3229_vm14, %v6737_v20, %v6739_v36 }
0x14e4   : > { %14985 = vmatpush3.bf16.msra.mxu0 %v6548_v41  ;;  %v6828_v41 = vsel %vm3229_vm14, %v6826_v37, %v6827_v38 }
0x14eb   : > { %14987 = vmatmul.mubr.msk.bf16.vlgmr.msra.gmra.mrb[32].mxu0 %vm19239_vm11, %v16217_v43 }
0x15be   : > { %v14988_v49 = vpop.f32.mrb[32].mxu0 }
0x15bf   : > { %v15419_v50 = vadd.f32 %v14988_v49, %v6047_v44  ;;  %v6584_v51 = vpop.f32.mrb[33].mxu0  ;;  %v16226_v44 = vld [vmem:[%s19196_s1 + $0x1d8] ss:$0 sps:$4 sm:$0x77]   ;;  %v16227_v49 = vld [vmem:[%s19196_s1 + $0x1d8] sm:$0xf8]  }
0x15c0   : > { %v15420_v54 = vadd.f32 %v6584_v51, %v6045_v47  ;;  %v14989_v55 = vpop.f32.mrb[34].mxu0 }
0x15c1   : > { %v6603_v56 = vmax.f32 %v15419_v50, 0.0  ;;  %v6587_v57 = vpop.f32.mrb[35].mxu0  ;;  %v16228_v50 = vld [vmem:[%s19196_s1 + $0x1e0] sm:$0xff]  }
0x15c2   : > { %v15421_v58 = vadd.f32 %v6587_v57, %v6046_v52  ;;  %v6601_v60 = vmax.f32 %v15420_v54, 0.0  ;;  %v6829_v52 = vrot.slane %v16226_v44, 3  ;;  %v6916_v54 = vrot.slane %v16227_v49, 3  ;;  %v6633_v44 = vld [vmem:[%s19197_s2 + $0x8a] sm:$0xff] }
0x15c3   : > { %v6605_v59 = vpack.c.bf16 %v6603_v56, %v6603_v56  ;;  %v6917_v55 = vrot.slane %v16228_v50, 3  ;;  %v6634_v50 = vld [vmem:[%s19197_s2 + $0x92] sm:$0xff] }
0x15c4   : > { %v6602_v61 = vmax.f32 %v15421_v58, 0.0  ;;  %v6830_v56 = vsel %vm3229_vm14, %v6827_v38, %v6829_v52  ;;  %v16238_v38 = vld [vmem:[%s19196_s1 + $0x218] ss:$0 sps:$4 sm:$0x77]  }
0x15c5   : > { %6610 = vrot.lane.b32.xlu1 %v6605_v59, %s16406_s15  ;;  %v6918_v57 = vsel %vm3229_vm14, %v6916_v54, %v6917_v55  ;;  %v16229_v59 = vld [vmem:[%s19196_s1 + $0x1e8] ss:$0 sps:$4 sm:$0x77]  }
0x15c6   : > { %v6604_v63 = vpack.c.bf16 %v6602_v61, %v6601_v60  ;;  %v16230_v61 = vld [vmem:[%s19196_s1 + $0x1e8] sm:$0xf8]   ;;  %v6632_v54 = vld [vmem:[%s19197_s2 + $0x82] sm:$0xff] }
0x15c7   : > { %v7006_v2 = vrot.slane %v16230_v61, 3 }
0x15c8   : > { %6608 = vrot.lane.b32.xlu0 %v6604_v63, %s16406_s15  ;;  %v16231_v63 = vld [vmem:[%s19196_s1 + $0x1f0] sm:$0xff]  }
0x15c9   : > { %v7007_v3 = vrot.slane %v16231_v63, 3 }
0x15cb   : > { %v7008_v5 = vsel %vm3229_vm14, %v7006_v2, %v7007_v3 }
0x1637   : > { %v6611_v0 = vpop.permute.xlu1 %6610 }
0x1638   : > { %6617 = vst.msk [vmem:[#allocation2 + $0x28] sm:$0x7] %vm6616_vm4, %v6611_v0  ;;  %vm19264_vm4 = vcmask 64512  }
0x1639   : > { %6619 = vst.msk [vmem:[#allocation2 + $0x28] sm:$0x7] %vm6034_vm0, %v16407_v30 }
0x163a   : > { %6623 = vst.msk [vmem:[#allocation2 + $0x28] sm:$0x7] %vm6622_vm3, %v16407_v30  ;;  %v6609_v1 = vpop.permute.xlu0 %6608  ;;  %vm19265_vm3 = vmmov %vm19264_vm4 }
0x163b   : > { %6615 = vst.msk [vmem:[#allocation2] sm:$0xff] %vm6614_vm12, %v6609_v1  ;;  %v6919_v1 = vrot.slane %v16229_v59, 3 }
0x163c   : > { %6618 = vst.msk [vmem:[#allocation2] sm:$0xff] %vm19264_vm4, %v16407_v30  ;;  %vm19266_vm4 = vmmov %vm19265_vm3 }
0x163d   : > { %6621 = vst.msk [vmem:[#allocation2] sm:$0xff] %vm6620_vm7, %v16407_v30  ;;  %v6920_v4 = vsel %vm3229_vm14, %v6917_v55, %v6919_v1 }
0x1641   : > { %v6625_v7 = vld [vmem:[#allocation2 + $0x28] sm:$0x7] }
0x1642   : > { %6657 = vrot.lane.b32.xlu1 %v6625_v7, %s16408_s16 }
0x1644   : > { %v6624_v10 = vld [vmem:[#allocation2] sm:$0xff] }
0x1645   : > { %6655 = vrot.lane.b32.xlu0 %v6624_v10, %s16408_s16 }
0x1646   : > { %6743 = vrot.lane.b32.xlu1 %v6625_v7, %s16409_s17 }
0x1649   : > { %6741 = vrot.lane.b32.xlu0 %v6624_v10, %s16409_s17 }
0x164a   : > { %6833 = vrot.lane.b32.xlu1 %v6625_v7, %s16410_s18 }
0x164d   : > { %6831 = vrot.lane.b32.xlu0 %v6624_v10, %s16410_s18 }
0x164e   : > { %6923 = vrot.lane.b32.xlu1 %v6625_v7, %s16411_s19 }
0x1651   : > { %6921 = vrot.lane.b32.xlu0 %v6624_v10, %s16411_s19 }
0x1652   : > { %7013 = vrot.lane.b32.xlu1 %v6625_v7, %s16412_s20 }
0x1655   : > { %7011 = vrot.lane.b32.xlu0 %v6624_v10, %s16412_s20 }
0x1656   : > { %7103 = vrot.lane.b32.xlu1 %v6625_v7, %s19241_s21 }
0x1659   : > { %7101 = vrot.lane.b32.xlu0 %v6624_v10, %s19241_s21 }
0x165a   : > { %7193 = vrot.lane.b32.xlu1 %v6625_v7, %s19243_s22  ;;  %v16232_v7 = vld [vmem:[%s19196_s1 + $0x1f8] ss:$0 sps:$4 sm:$0x77]  }
0x165d   : > { %7191 = vrot.lane.b32.xlu0 %v6624_v10, %s19243_s22 }
0x16b4   : > { %v6658_v15 = vpop.permute.xlu1 %6657 }
0x16b5   : > { %v6667_v17 = vsel %vm6075_vm5, %v6658_v15, 0 }
0x16b7   : > { %v6656_v14 = vpop.permute.xlu0 %6655 }
0x16b8   : > { %14990 = vmatprep.subr.bf16.mxu1 %v6656_v14  ;;  %v6744_v25 = vpop.permute.xlu1 %6743 }
0x16b9   : > { %14991 = vmatpush3.bf16.msra.mxu1 %v6656_v14  ;;  %v6753_v26 = vsel %vm6075_vm5, %v6744_v25, 0  ;;  %v7009_v14 = vrot.slane %v16232_v7, 3 }
0x16ba   : > { %16058 = vmatprep.subr.msk.bf16.mxu1 %vm6075_vm5, %v6658_v15  ;;  %v7096_v15 = vrot.slane %v16233_v11, 3 }
0x16bb   : > { %v6742_v22 = vpop.permute.xlu0 %6741 }
0x16bc   : > { %v6834_v43 = vpop.permute.xlu1 %6833  ;;  %v7098_v19 = vsel %vm3229_vm14, %v7096_v15, %v7097_v16  ;;  %v7284_v15 = vld [vmem:[%s19197_s2 + $0x9a] sm:$0xff] }
0x16bd   : > { %14993 = vmatpush3.bf16.msra.mxu1 %v6667_v17  ;;  %v6843_v47 = vsel %vm6075_vm5, %v6834_v43, 0  ;;  %v7010_v17 = vsel %vm3229_vm14, %v7007_v3, %v7009_v14  ;;  %v7285_v14 = vld [vmem:[%s19197_s2 + $0xa2] sm:$0xff] }
0x16be   : > { %14998 = vmatprep.subr.bf16.mxu1 %v6742_v22 }
0x16bf   : > { %v6832_v33 = vpop.permute.xlu0 %6831 }
0x16c0   : > { %14995 = vmatmul.mubr.msk.bf16.vlgmr.msra.gmra.mrb[28].mxu1 %vm19239_vm11, %v6652_v23  ;;  %v6924_v58 = vpop.permute.xlu1 %6923 }
0x16c1   : > { %14999 = vmatpush3.bf16.msra.mxu1 %v6742_v22  ;;  %15002 = vmatprep.mubr.msk.bf16.mxu1 %vm19239_vm11, %v6738_v24  ;;  %v6933_v60 = vsel %vm6075_vm5, %v6924_v58, 0  ;;  %v16235_v22 = vld [vmem:[%s19196_s1 + $0x208] ss:$0 sps:$4 sm:$0x77]   ;;  %v16236_v24 = vld [vmem:[%s19196_s1 + $0x208] sm:$0xf8]  }
0x16c2   : > { %16059 = vmatprep.subr.msk.bf16.mxu1 %vm6075_vm5, %v6744_v25  ;;  %v16237_v25 = vld [vmem:[%s19196_s1 + $0x210] sm:$0xff]   ;;  %v7186_v29 = vrot.slane %v16236_v24, 3 }
0x16c3   : > { %v6922_v51 = vpop.permute.xlu0 %6921  ;;  %v7187_v31 = vrot.slane %v16237_v25, 3 }
0x16c4   : > { %v7014_v6 = vpop.permute.xlu1 %7013 }
0x16c5   : > { %15001 = vmatpush3.bf16.msra.mxu1 %v6753_v26  ;;  %v7023_v10 = vsel %vm6075_vm5, %v7014_v6, 0  ;;  %v7099_v26 = vrot.slane %v16235_v22, 3  ;;  %v7188_v36 = vsel %vm3229_vm14, %v7186_v29, %v7187_v31  ;;  %v16243_v29 = vld [vmem:[%s19196_s1 + $0x230] sm:$0xfe]  }
0x16c6   : > { %15006 = vmatprep.subr.bf16.mxu1 %v6832_v33 }
0x16c7   : > { %v7012_v0 = vpop.permute.xlu0 %7011 }
0x16c8   : > { %v7104_v20 = vpop.permute.xlu1 %7103 }
0x16c9   : > { %v7113_v23 = vsel %vm6075_vm5, %v7104_v20, 0 }
0x16cb   : > { %v7102_v13 = vpop.permute.xlu0 %7101 }
0x16cc   : > { %15003 = vmatmul.mubr.msk.bf16.vlgmr.msra.gmra.mrb[28].mxu1 %vm19239_vm11, %v6740_v40  ;;  %v7194_v37 = vpop.permute.xlu1 %7193 }
0x16cd   : > { %15007 = vmatpush3.bf16.msra.mxu1 %v6832_v33  ;;  %15010 = vmatprep.mubr.msk.bf16.mxu1 %vm19239_vm11, %v6828_v41  ;;  %v7100_v33 = vsel %vm3229_vm14, %v7097_v16, %v7099_v26  ;;  %v7203_v40 = vsel %vm6075_vm5, %v7194_v37, 0  ;;  %v7189_v41 = vrot.slane %v16238_v38, 3  ;;  %v7286_v16 = vld [vmem:[%s19197_s2 + $0xaa] sm:$0x3f] }
0x16ce   : > { %16060 = vmatprep.subr.msk.bf16.mxu1 %vm6075_vm5, %v6834_v43 }
0x16cf   : > { %v7192_v62 = vpop.permute.xlu0 %7191  ;;  %v7190_v43 = vsel %vm3229_vm14, %v7187_v31, %v7189_v41  ;;  %v16244_v31 = vld [vmem:[%s19196_s1 + $0x238] ss:$0 sps:$4 sm:$0xff]  }
0x16d1   : > { %15009 = vmatpush3.bf16.msra.mxu1 %v6843_v47  ;;  %v6631_v47 = vld [vmem:[%s19197_s2 + $0x7a] sm:$0xff] }
0x16d2   : > { %15014 = vmatprep.subr.bf16.mxu1 %v6922_v51 }
0x16d8   : > { %15011 = vmatmul.mubr.msk.bf16.vlgmr.msra.gmra.mrb[28].mxu1 %vm19239_vm11, %v6830_v56 }
0x16d9   : > { %15015 = vmatpush3.bf16.msra.mxu1 %v6922_v51  ;;  %15018 = vmatprep.mubr.msk.bf16.mxu1 %vm19239_vm11, %v6918_v57 }
0x16da   : > { %16061 = vmatprep.subr.msk.bf16.mxu1 %vm6075_vm5, %v6924_v58 }
0x16dd   : > { %15017 = vmatpush3.bf16.msra.mxu1 %v6933_v60 }
0x16de   : > { %15022 = vmatprep.subr.bf16.mxu1 %v7012_v0 }
0x16e4   : > { %15019 = vmatmul.mubr.msk.bf16.vlgmr.msra.gmra.mrb[28].mxu1 %vm19239_vm11, %v6920_v4 }
0x16e5   : > { %15023 = vmatpush3.bf16.msra.mxu1 %v7012_v0  ;;  %15026 = vmatprep.mubr.msk.bf16.mxu1 %vm19239_vm11, %v7008_v5  ;;  %v16239_v5 = vld [vmem:[%s19196_s1 + $0x218] sm:$0xf8]  }
0x16e6   : > { %16062 = vmatprep.subr.msk.bf16.mxu1 %vm6075_vm5, %v7014_v6  ;;  %v16240_v6 = vld [vmem:[%s19196_s1 + $0x220] sm:$0x3f]   ;;  %v7312_v7 = vrot.slane %v16239_v5, 3 }
0x16e9   : > { %15025 = vmatpush3.bf16.msra.mxu1 %v7023_v10  ;;  %v7313_v10 = vrot.slane %v16240_v6, 3 }
0x16ea   : > { %15030 = vmatprep.subr.bf16.mxu1 %v7102_v13 }
0x16eb   : > { %v7314_v11 = vsel %vm3229_vm14, %v7312_v7, %v7313_v10 }
0x16f0   : > { %15027 = vmatmul.mubr.msk.bf16.vlgmr.msra.gmra.mrb[28].mxu1 %vm19239_vm11, %v7010_v17  ;;  %v16241_v17 = vld [vmem:[%s19196_s1 + $0x224] sm:$0xfc]  }
0x16f1   : > { %15031 = vmatpush3.bf16.msra.mxu1 %v7102_v13  ;;  %15034 = vmatprep.mubr.msk.bf16.mxu1 %vm19239_vm11, %v7098_v19  ;;  %v16242_v19 = vld [vmem:[%s19196_s1 + $0x22c] sm:$0x1f]  }
0x16f2   : > { %16063 = vmatprep.subr.msk.bf16.mxu1 %vm6075_vm5, %v7104_v20  ;;  %v7393_v24 = vrot.slane %v16242_v19, 2 }
0x16f5   : > { %15033 = vmatpush3.bf16.msra.mxu1 %v7113_v23  ;;  %v7392_v23 = vrot.slane %v16241_v17, 2 }
0x16f6   : > { %15038 = vmatprep.subr.bf16.mxu1 %v7192_v62 }
0x16fc   : > { %15035 = vmatmul.mubr.msk.bf16.vlgmr.msra.gmra.mrb[28].mxu1 %vm19239_vm11, %v7100_v33 }
0x16fd   : > { %15039 = vmatpush3.bf16.msra.mxu1 %v7192_v62  ;;  %15042 = vmatprep.mubr.msk.bf16.mxu1 %vm19239_vm11, %v7188_v36  ;;  %v7394_v62 = vsel %vm3880_vm10, %v7392_v23, %v7393_v24  ;;  %v7469_v36 = vrot.slane %v16243_v29, 1 }
0x16fe   : > { %16064 = vmatprep.subr.msk.bf16.mxu1 %vm6075_vm5, %v7194_v37  ;;  %v7470_v37 = vrot.slane %v16244_v31, 1 }
0x1700   : > { %v7471_v38 = vsel %vm4492_vm2, %v7469_v36, %v7470_v37 }
0x1701   : > { %15041 = vmatpush3.bf16.msra.mxu1 %v7203_v40 }
0x1708   : > { %15043 = vmatmul.mubr.msk.bf16.vlgmr.msra.gmra.mrb[28].mxu1 %vm19239_vm11, %v7190_v43  ;;  %v16245_v43 = vld [vmem:[%s19196_s1 + $0x23c] sm:$0xff]   ;;  %vm19267_vm11 = vcmask 62464  }
0x17db   : > { %v15044_v49 = vpop.f32.mrb[28].mxu1 }
0x17dc   : > { %v15422_v51 = vadd.f32 %v15044_v49, %v6633_v44  ;;  %v7239_v52 = vpop.f32.mrb[29].mxu1  ;;  %v16248_v49 = vld [vmem:[%s19196_s1 + $0x24c] sm:$0x3f]  }
0x17dd   : > { %v15423_v55 = vadd.f32 %v7239_v52, %v6631_v47  ;;  %v15045_v56 = vpop.f32.mrb[30].mxu1  ;;  %v16247_v47 = vld [vmem:[%s19196_s1 + $0x244] sm:$0xf8]   ;;  %v7624_v52 = vrot.slane %v16248_v49, 3  ;;  %v7891_v49 = vld [vmem:[%s19197_s2 + $0xc0] sm:$0x3f] }
0x17de   : > { %v15424_v57 = vadd.f32 %v15045_v56, %v6634_v50  ;;  %v7242_v58 = vpop.f32.mrb[31].mxu1  ;;  %v7260_v60 = vmax.f32 %v15422_v51, 0.0  ;;  %v7623_v51 = vrot.slane %v16247_v47, 3  ;;  %v7890_v47 = vld [vmem:[%s19197_s2 + $0xb8] sm:$0xff] }
0x17df   : > { %v15425_v59 = vadd.f32 %v7242_v58, %v6632_v54  ;;  %v7258_v63 = vmax.f32 %v15423_v55, 0.0  ;;  %v16246_v54 = vld [vmem:[%s19196_s1 + $0x244] ss:$0 sps:$4 sm:$0x77]   ;;  %v16250_v58 = vld [vmem:[%s19196_s1 + $0x258] sm:$0x1f]  }
0x17e0   : > { %v7261_v61 = vmax.f32 %v15424_v57, 0.0  ;;  %v7625_v55 = vsel %vm3229_vm14, %v7623_v51, %v7624_v52  ;;  %v16249_v57 = vld [vmem:[%s19196_s1 + $0x250] sm:$0xfc]   ;;  %v16255_v51 = vld [vmem:[%s19196_s1 + $0x27c] sm:$0xfc]  }
0x17e1   : > { %v7259_v0 = vmax.f32 %v15425_v59, 0.0 }
0x17e2   : > { %v7263_v1 = vpack.c.bf16 %v7261_v61, %v7260_v60  ;;  %v7703_v60 = vrot.slane %v16249_v57, 2  ;;  %v7704_v61 = vrot.slane %v16250_v58, 2  ;;  %v8083_v57 = vrot.slane %v16255_v51, 2  ;;  %v8490_v51 = vld [vmem:[%s19201_s6] sm:$0xf] }
0x17e3   : > { %v7262_v2 = vpack.c.bf16 %v7259_v0, %v7258_v63 }
0x17e4   : > { %7268 = vrot.lane.b32.xlu1 %v7263_v1, %s16406_s15  ;;  %v7705_v63 = vsel %vm3880_vm10, %v7703_v60, %v7704_v61  ;;  %v16251_v1 = vld [vmem:[%s19196_s1 + $0x25c] sm:$0xfe]  }
0x17e5   : > { %7266 = vrot.lane.b32.xlu0 %v7262_v2, %s16406_s15  ;;  %v16252_v2 = vld [vmem:[%s19196_s1 + $0x264] ss:$0 sps:$4 sm:$0xff]  }
0x17e6   : > { %v7781_v5 = vrot.slane %v16252_v2, 1 }
0x1856   : > { %v7269_v3 = vpop.permute.xlu1 %7268 }
0x1857   : > { %7273 = vst.msk [vmem:[#allocation2 + $0x28] sm:$0xff] %vm6614_vm12, %v7269_v3  ;;  %v7267_v4 = vpop.permute.xlu0 %7266 }
0x1858   : > { %7275 = vst.msk [vmem:[#allocation2 + $0x28] sm:$0xff] %vm19265_vm3, %v16407_v30  ;;  %vm7881_vm3 = vcmask 185464  }
0x1859   : > { %7272 = vst.msk [vmem:[#allocation2] sm:$0xff] %vm6614_vm12, %v7267_v4  ;;  %vm19238_vm12 = vcmask 261120   ;;  %v7780_v4 = vrot.slane %v16251_v1, 1  ;;  %v16258_v1 = vld [vmem:[%s19196_s1 + $0x290] ss:$0 sps:$4 sm:$0xff]  }
0x185a   : > { %7277 = vst.msk [vmem:[#allocation2 + $0x28] sm:$0xff] %vm6620_vm7, %v16407_v30  ;;  %15050 = vmatprep.mubr.msk.bf16.mxu0 %vm19238_vm12, %v7314_v11 }
0x185b   : > { %7274 = vst.msk [vmem:[#allocation2] sm:$0xff] %vm19266_vm4, %v16407_v30  ;;  %v7782_v6 = vsel %vm4492_vm2, %v7780_v4, %v7781_v5 }
0x185c   : > { %7276 = vst.msk [vmem:[#allocation2] sm:$0xff] %vm6620_vm7, %v16407_v30  ;;  %vm7873_vm7 = vcmask 119872  }
0x1861   : > { %v7279_v12 = vld [vmem:[#allocation2 + $0x28] sm:$0xff] }
0x1862   : > { %7319 = vrot.lane.b32.xlu1 %v7279_v12, %s16421_s24 }
0x1863   : > { %v7278_v13 = vld [vmem:[#allocation2] sm:$0xff] }
0x1864   : > { %7317 = vrot.lane.b32.xlu0 %v7278_v13, %s16421_s24 }
0x1866   : > { %7397 = vrot.lane.b32.xlu1 %v7279_v12, %s19236_s11 }
0x1868   : > { %7395 = vrot.lane.b32.xlu0 %v7278_v13, %s19236_s11 }
0x186a   : > { %7474 = vrot.lane.b32.xlu1 %v7279_v12, %s19234_s28 }
0x186c   : > { %7472 = vrot.lane.b32.xlu0 %v7278_v13, %s19234_s28 }
0x186e   : > { %7548 = vrot.lane.b32.xlu1 %v7279_v12, %s16408_s16 }
0x1870   : > { %7546 = vrot.lane.b32.xlu0 %v7278_v13, %s16408_s16 }
0x1872   : > { %7628 = vrot.lane.b32.xlu1 %v7279_v12, %s16409_s17 }
0x1874   : > { %7626 = vrot.lane.b32.xlu0 %v7278_v13, %s16409_s17 }
0x1876   : > { %7708 = vrot.lane.b32.xlu1 %v7279_v12, %s16410_s18 }
0x1878   : > { %7706 = vrot.lane.b32.xlu0 %v7278_v13, %s16410_s18 }
0x187a   : > { %7785 = vrot.lane.b32.xlu1 %v7279_v12, %s16411_s19 }
0x187c   : > { %7783 = vrot.lane.b32.xlu0 %v7278_v13, %s16411_s19 }
0x187e   : > { %7294 = vperm.xlu1 %16098, %v7285_v14  }
0x1880   : > { %7289 = vperm.xlu0 %16099, %v7284_v15  }
0x1884   : > { %7299 = vperm.xlu0 %16099, %v7286_v16  }
0x18d4   : > { %v7320_v22 = vpop.permute.xlu1 %7319 }
0x18d6   : > { %v7318_v20 = vpop.permute.xlu0 %7317 }
0x18d7   : > { %15046 = vmatprep.subr.bf16.mxu0 %v7318_v20 }
0x18d8   : > { %15047 = vmatpush3.bf16.msra.mxu0 %v7318_v20  ;;  %v7398_v26 = vpop.permute.xlu1 %7397 }
0x18d9   : > { %15048 = vmatprep.subr.bf16.mxu0 %v7320_v22 }
0x18da   : > { %v7396_v25 = vpop.permute.xlu0 %7395 }
0x18dc   : > { %15049 = vmatpush3.bf16.msra.mxu0 %v7320_v22  ;;  %v7475_v40 = vpop.permute.xlu1 %7474 }
0x18dd   : > { %15054 = vmatprep.subr.bf16.mxu0 %v7396_v25 }
0x18de   : > { %v7473_v33 = vpop.permute.xlu0 %7472 }
0x18df   : > { %15051 = vmatmul.mubr.msk.bf16.vlgmr.msra.gmra.mrb[36].mxu0 %vm19238_vm12, %v7313_v10 }
0x18e0   : > { %15055 = vmatpush3.bf16.msra.mxu0 %v7396_v25  ;;  %15058 = vmatprep.mubr.msk.bf16.mxu0 %vm19238_vm12, %v7394_v62  ;;  %v7549_v44 = vpop.permute.xlu1 %7548 }
0x18e1   : > { %15056 = vmatprep.subr.bf16.mxu0 %v7398_v26 }
0x18e2   : > { %v7547_v41 = vpop.permute.xlu0 %7546 }
0x18e4   : > { %15057 = vmatpush3.bf16.msra.mxu0 %v7398_v26  ;;  %v7629_v56 = vpop.permute.xlu1 %7628 }
0x18e5   : > { %15062 = vmatprep.subr.bf16.mxu0 %v7473_v33 }
0x18e6   : > { %v7627_v50 = vpop.permute.xlu0 %7626 }
0x18e8   : > { %v7709_v0 = vpop.permute.xlu1 %7708 }
0x18ea   : > { %v7707_v59 = vpop.permute.xlu0 %7706 }
0x18eb   : > { %15059 = vmatmul.mubr.msk.bf16.vlgmr.msra.gmra.mrb[36].mxu0 %vm19238_vm12, %v7393_v24 }
0x18ec   : > { %15063 = vmatpush3.bf16.msra.mxu0 %v7473_v33  ;;  %15066 = vmatprep.mubr.msk.bf16.mxu0 %vm19238_vm12, %v7471_v38  ;;  %v7786_v7 = vpop.permute.xlu1 %7785 }
0x18ed   : > { %15064 = vmatprep.subr.bf16.mxu0 %v7475_v40 }
0x18ee   : > { %v7784_v3 = vpop.permute.xlu0 %7783 }
0x18f0   : > { %15065 = vmatpush3.bf16.msra.mxu0 %v7475_v40 }
0x18f1   : > { %15070 = vmatprep.subr.bf16.mxu0 %v7547_v41 }
0x18f7   : > { %15067 = vmatmul.mubr.msk.bf16.vlgmr.msra.gmra.mrb[36].mxu0 %vm19238_vm12, %v7470_v37 }
0x18f8   : > { %15071 = vmatpush3.bf16.msra.mxu0 %v7547_v41  ;;  %15074 = vmatprep.mubr.msk.bf16.mxu0 %vm19238_vm12, %v16245_v43  ;;  %v16259_v43 = vld [vmem:[%s19196_s1 + $0x268] sm:$0xff]  }
0x18f9   : > { %15072 = vmatprep.subr.bf16.mxu0 %v7549_v44 }
0x18fc   : > { %15073 = vmatpush3.bf16.msra.mxu0 %v7549_v44  ;;  %v7889_v44 = vld [vmem:[%s19197_s2 + $0xb0] sm:$0xff] }
0x18fd   : > { %15078 = vmatprep.subr.bf16.mxu0 %v7627_v50  ;;  %v7295_v17 = vpop.permute.xlu1 %7294 }
0x18ff   : > { %v7290_v10 = vpop.permute.xlu0 %7289 }
0x1903   : > { %15075 = vmatmul.mubr.msk.bf16.vlgmr.msra.gmra.mrb[36].mxu0 %vm19238_vm12, %v16246_v54  ;;  %v7300_v11 = vpop.permute.xlu0 %7299 }
0x1904   : > { %15079 = vmatpush3.bf16.msra.mxu0 %v7627_v50  ;;  %15082 = vmatprep.mubr.msk.bf16.mxu0 %vm19238_vm12, %v7625_v55 }
0x1905   : > { %15080 = vmatprep.subr.bf16.mxu0 %v7629_v56 }
0x1908   : > { %15081 = vmatpush3.bf16.msra.mxu0 %v7629_v56 }
0x1909   : > { %15086 = vmatprep.subr.bf16.mxu0 %v7707_v59 }
0x190f   : > { %15083 = vmatmul.mubr.msk.bf16.vlgmr.msra.gmra.mrb[36].mxu0 %vm19238_vm12, %v7624_v52  ;;  %v16256_v52 = vld [vmem:[%s19196_s1 + $0x284] sm:$0x1f]  }
0x1910   : > { %15087 = vmatpush3.bf16.msra.mxu0 %v7707_v59  ;;  %15090 = vmatprep.mubr.msk.bf16.mxu0 %vm19238_vm12, %v7705_v63  ;;  %v8084_v58 = vrot.slane %v16256_v52, 2 }
0x1911   : > { %15088 = vmatprep.subr.bf16.mxu0 %v7709_v0 }
0x1912   : > { %v8085_v60 = vsel %vm3880_vm10, %v8083_v57, %v8084_v58 }
0x1914   : > { %15089 = vmatpush3.bf16.msra.mxu0 %v7709_v0  ;;  %v16257_v0 = vld [vmem:[%s19196_s1 + $0x288] sm:$0xfe]  }
0x1915   : > { %15094 = vmatprep.subr.bf16.mxu0 %v7784_v3  ;;  %v8165_v4 = vrot.slane %v16257_v0, 1 }
0x191b   : > { %15091 = vmatmul.mubr.msk.bf16.vlgmr.msra.gmra.mrb[36].mxu0 %vm19238_vm12, %v7704_v61 }
0x191c   : > { %15095 = vmatpush3.bf16.msra.mxu0 %v7784_v3  ;;  %15098 = vmatprep.mubr.msk.bf16.mxu0 %vm19238_vm12, %v7782_v6 }
0x191d   : > { %15096 = vmatprep.subr.bf16.mxu0 %v7786_v7 }
0x1920   : > { %15097 = vmatpush3.bf16.msra.mxu0 %v7786_v7 }
0x1927   : > { %15099 = vmatmul.mubr.msk.bf16.vlgmr.msra.gmra.mrb[36].mxu0 %vm19238_vm12, %v7781_v5  ;;  %vm7871_vm12 = vcmask 121923   ;;  %v8166_v5 = vrot.slane %v16258_v1, 1 }
0x19fa   : > { %v15100_v12 = vpop.f32.mrb[36].mxu0 }
0x19fb   : > { %v15426_v13 = vadd.f32 %v15100_v12, %v7300_v11  ;;  %v7829_v14 = vpop.f32.mrb[37].mxu0 }
0x19fc   : > { %v15427_v15 = vadd.f32 %v7829_v14, %v7290_v10  ;;  %v15101_v16 = vpop.f32.mrb[38].mxu0  ;;  %v8167_v10 = vsel %vm4492_vm2, %v8165_v4, %v8166_v5 }
0x19fd   : > { %v7848_v19 = vmax.f32 %v15426_v13, 0.0  ;;  %v7832_v20 = vpop.f32.mrb[39].mxu0  ;;  %v16261_v16 = vld [vmem:[%s19196_s1 + $0x294] sm:$0xff]  }
0x19fe   : > { %v15428_v22 = vadd.f32 %v7832_v20, %v7295_v17  ;;  %v7846_v24 = vmax.f32 %v15427_v15, 0.0  ;;  %v16263_v20 = vld [vmem:[%s19196_s1 + $0x29c] sm:$0xf8]  }
0x19ff   : > { %v7850_v23 = vpack.c.bf16 %v7848_v19, %v7848_v19 }
0x1a00   : > { %v7847_v25 = vmax.f32 %v15428_v22, 0.0  ;;  %v16264_v22 = vld [vmem:[%s19196_s1 + $0x2a4] sm:$0x3f]  }
0x1a01   : > { %7855 = vrot.lane.b32.xlu0 %v7850_v23, %s16406_s15 }
0x1a02   : > { %v7849_v62 = vpack.c.bf16 %v7847_v25, %v7846_v24  ;;  %v16260_v25 = vld [vmem:[%s19196_s1 + $0x270] ss:$0 sps:$4 sm:$0x77]  }
0x1a04   : > { %7853 = vrot.lane.b32.xlu1 %v7849_v62, %s16406_s15 }
0x1a05   : > { %7867 = vrot.lane.b32.xlu0 %v17662_v35, %s16406_s15  ;;  %v16254_v35 = vld [vmem:[%s19196_s1 + $0x278] sm:$0x3f]  }
0x1a06   : > { %v7999_v36 = vrot.slane %v16254_v35, 3 }
0x1a08   : > { %7865 = vrot.lane.b32.xlu1 %v7862_v34, %s16406_s15  ;;  %v16253_v34 = vld [vmem:[%s19196_s1 + $0x270] sm:$0xf8]  }
0x1a09   : > { %v7998_v33 = vrot.slane %v16253_v34, 3 }
0x1a0b   : > { %v8000_v37 = vsel %vm3229_vm14, %v7998_v33, %v7999_v36  ;;  %v16265_v33 = vld [vmem:[%s19196_s1 + $0x2a8] sm:$0xfc]  }
0x1a73   : > { %v7856_v26 = vpop.permute.xlu0 %7855 }
0x1a74   : > { %7860 = vst.msk [vmem:[#allocation2 + $0x28] sm:$0x7] %vm6031_vm1, %v7856_v26  ;;  %vm19268_vm1 = vmmov %vm19266_vm4 }
0x1a76   : > { %v7854_v29 = vpop.permute.xlu1 %7853 }
0x1a77   : > { %7859 = vst.msk [vmem:[#allocation2] sm:$0xff] %vm5473_vm8, %v7854_v29  ;;  %v7868_v31 = vpop.permute.xlu0 %7867  ;;  %vm7926_vm8 = vcmask 359424   ;;  %v8329_v29 = vrot.slane %v16263_v20, 3 }
0x1a78   : > { %7875 = vst.msk [vmem:[#allocation2] sm:$0xff] %vm19266_vm4, %v16407_v30  ;;  %15118 = vmatprep.mubr.msk.bf16.mxu1 %vm7926_vm8, %v8000_v37  ;;  %15108 = vmatprep.mubr.msk.bf16.mxu0 %vm7926_vm8, %v16259_v43  ;;  %vm8561_vm4 = vcmask 269376  }
0x1a79   : > { %7874 = vst.msk [vmem:[#allocation2 + $0x50] sm:$0x3f] %vm7873_vm7, %v7868_v31  ;;  %v8330_v31 = vrot.slane %v16264_v22, 3  ;;  %vm8563_vm7 = vcmask 264256  }
0x1a7a   : > { %7879 = vst.msk [vmem:[#allocation2] sm:$0xff] %vm5476_vm9, %v16407_v30  ;;  %v7866_v32 = vpop.permute.xlu1 %7865 }
0x1a7b   : > { %7878 = vst.msk [vmem:[#allocation2 + $0x50] sm:$0x3f] %vm19267_vm11, %v16407_v30  ;;  %v8331_v34 = vsel %vm3229_vm14, %v8329_v29, %v8330_v31  ;;  %vm19270_vm11 = vcmask 1043456   ;;  %v8576_v29 = vld [vmem:[%s19197_s2 + $0xc6] sm:$0xff] }
0x1a7c   : > { %7882 = vst.msk [vmem:[#allocation2 + $0x50] sm:$0x3f] %vm7881_vm3, %v16407_v30  ;;  %vm8569_vm3 = vcmask 329992  }
0x1a7d   : > { %7872 = vst.msk [vmem:[#allocation2 + $0x28] sm:$0xf8] %vm7871_vm12, %v7866_v32  ;;  %v16262_v32 = vld [vmem:[%s19196_s1 + $0x29c] ss:$0 sps:$4 sm:$0x77]   ;;  %vm8491_vm12 = vcmask 56320  }
0x1a7e   : > { %7876 = vst.msk [vmem:[#allocation2 + $0x28] sm:$0xff] %vm19268_vm1, %v16407_v30  ;;  %vm8567_vm1 = vcmask 335112  }
0x1a7f   : > { %7880 = vst.msk [vmem:[#allocation2 + $0x28] sm:$0xff] %vm5476_vm9, %v16407_v30  ;;  %vm19269_vm9 = vmmov 0  }
0x1a81   : > { %v7883_v38 = vld [vmem:[#allocation2] sm:$0xff] }
0x1a82   : > { %8001 = vrot.lane.b32.xlu1 %v7883_v38, %s16409_s17 }
0x1a83   : > { %v7885_v40 = vld [vmem:[#allocation2 + $0x50] sm:$0x3f] }
0x1a86   : > { %v7884_v41 = vld [vmem:[#allocation2 + $0x28] sm:$0xff]  ;;  %8005 = vrot.lane.b32.xlu1 %v7885_v40, %s16409_s17 }
0x1a87   : > { %8003 = vrot.lane.b32.xlu0 %v7884_v41, %s16409_s17 }
0x1a8a   : > { %8088 = vrot.lane.b32.xlu1 %v7884_v41, %s16410_s18 }
0x1a8b   : > { %8086 = vrot.lane.b32.xlu0 %v7883_v38, %s16410_s18 }
0x1a8e   : > { %8168 = vrot.lane.b32.xlu1 %v7883_v38, %s16411_s19 }
0x1a8f   : > { %8090 = vrot.lane.b32.xlu0 %v7885_v40, %s16410_s18 }
0x1a92   : > { %8172 = vrot.lane.b32.xlu1 %v7885_v40, %s16411_s19 }
0x1a93   : > { %8170 = vrot.lane.b32.xlu0 %v7884_v41, %s16411_s19 }
0x1a96   : > { %8249 = vrot.lane.b32.xlu1 %v7884_v41, %s16412_s20 }
0x1a97   : > { %8247 = vrot.lane.b32.xlu0 %v7883_v38, %s16412_s20 }
0x1a9a   : > { %8332 = vrot.lane.b32.xlu1 %v7883_v38, %s19241_s21 }
0x1a9b   : > { %8251 = vrot.lane.b32.xlu0 %v7885_v40, %s16412_s20 }
0x1a9e   : > { %8336 = vrot.lane.b32.xlu1 %v7885_v40, %s19241_s21 }
0x1a9f   : > { %8334 = vrot.lane.b32.xlu0 %v7884_v41, %s19241_s21 }
0x1aa2   : > { %8417 = vrot.lane.b32.xlu1 %v7883_v38, %s19243_s22 }
0x1aa3   : > { %7918 = vrot.lane.b32.xlu0 %v7883_v38, %s16408_s16 }
0x1aa6   : > { %8419 = vrot.lane.b32.xlu1 %v7884_v41, %s19243_s22 }
0x1aa7   : > { %7920 = vrot.lane.b32.xlu0 %v7884_v41, %s16408_s16 }
0x1aaa   : > { %8421 = vrot.lane.b32.xlu1 %v7885_v40, %s19243_s22 }
0x1aab   : > { %7922 = vrot.lane.b32.xlu0 %v7885_v40, %s16408_s16  ;;  %v8414_v40 = vrot.slane %v16265_v33, 2 }
0x1aae   : > { %7899 = vperm.xlu1 %16098, %v7890_v47  }
0x1aaf   : > { %7894 = vperm.xlu0 %16099, %v7889_v44  }
0x1ab3   : > { %7904 = vperm.xlu0 %16099, %v7891_v49  }
0x1af4   : > { %v8002_v50 = vpop.permute.xlu1 %8001 }
0x1af5   : > { %15112 = vmatprep.subr.bf16.mxu1 %v8002_v50 }
0x1af6   : > { %15113 = vmatpush3.bf16.msra.mxu1 %v8002_v50  ;;  %v8498_v50 = vsel %vm6075_vm5, 4294967295, %v16415_v39 }
0x1af7   : > { %v8499_v52 = vsel %vm19270_vm11, %v8498_v50, 0  ;;  %vm19272_vm11 = vcmask 318528  }
0x1af8   : > { %v8006_v55 = vpop.permute.xlu1 %8005 }
0x1af9   : > { %v8004_v54 = vpop.permute.xlu0 %8003  ;;  %v8016_v56 = vsel %vm3880_vm10, %v8006_v55, 0 }
0x1afa   : > { %15114 = vmatprep.subr.bf16.mxu1 %v8004_v54 }
0x1afb   : > { %15115 = vmatpush3.bf16.msra.mxu1 %v8004_v54  ;;  %v8501_v54 = vand.u32 %v8499_v52, %v8490_v51 }
0x1afc   : > { %16066 = vmatprep.subr.msk.bf16.mxu1 %vm3880_vm10, %v8006_v55  ;;  %v8089_v63 = vpop.permute.xlu1 %8088 }
0x1afd   : > { %v8087_v59 = vpop.permute.xlu0 %8086 }
0x1aff   : > { %15117 = vmatpush3.bf16.msra.mxu1 %v8016_v56 }
0x1b00   : > { %15122 = vmatprep.subr.bf16.mxu1 %v8087_v59  ;;  %v8169_v7 = vpop.permute.xlu1 %8168 }
0x1b01   : > { %v8091_v61 = vpop.permute.xlu0 %8090 }
0x1b02   : > { %15119 = vmatmul.mubr.msk.bf16.vlgmr.msra.gmra.mrb[32].mxu1 %vm7926_vm8, %v7999_v36  ;;  %v8101_v3 = vsel %vm3880_vm10, %v8091_v61, 0  ;;  %v16266_v36 = vld [vmem:[%s19196_s1 + $0x2b0] sm:$0x1f]  }
0x1b03   : > { %15123 = vmatpush3.bf16.msra.mxu1 %v8087_v59  ;;  %15128 = vmatprep.mubr.msk.bf16.mxu1 %vm7926_vm8, %v8085_v60  ;;  %v8415_v41 = vrot.slane %v16266_v36, 2 }
0x1b04   : > { %15124 = vmatprep.subr.bf16.mxu1 %v8089_v63  ;;  %v8173_v13 = vpop.permute.xlu1 %8172 }
0x1b05   : > { %v8171_v2 = vpop.permute.xlu0 %8170  ;;  %v8183_v14 = vsel %vm3880_vm10, %v8173_v13, 0  ;;  %v8416_v43 = vsel %vm3880_vm10, %v8414_v40, %v8415_v41 }
0x1b07   : > { %15125 = vmatpush3.bf16.msra.mxu1 %v8089_v63 }
0x1b08   : > { %16067 = vmatprep.subr.msk.bf16.mxu1 %vm3880_vm10, %v8091_v61  ;;  %v8250_v17 = vpop.permute.xlu1 %8249 }
0x1b09   : > { %v8248_v6 = vpop.permute.xlu0 %8247 }
0x1b0b   : > { %15127 = vmatpush3.bf16.msra.mxu1 %v8101_v3 }
0x1b0c   : > { %15132 = vmatprep.subr.bf16.mxu1 %v8169_v7  ;;  %v8333_v62 = vpop.permute.xlu1 %8332 }
0x1b0d   : > { %v8252_v11 = vpop.permute.xlu0 %8251 }
0x1b0e   : > { %15129 = vmatmul.mubr.msk.bf16.vlgmr.msra.gmra.mrb[32].mxu1 %vm7926_vm8, %v8084_v58  ;;  %v8262_v26 = vsel %vm3880_vm10, %v8252_v11, 0 }
0x1b0f   : > { %15133 = vmatpush3.bf16.msra.mxu1 %v8169_v7  ;;  %15138 = vmatprep.mubr.msk.bf16.mxu1 %vm7926_vm8, %v8167_v10 }
0x1b10   : > { %15134 = vmatprep.subr.bf16.mxu1 %v8171_v2  ;;  %v8337_v35 = vpop.permute.xlu1 %8336 }
0x1b11   : > { %v8335_v12 = vpop.permute.xlu0 %8334  ;;  %v8347_v38 = vsel %vm3880_vm10, %v8337_v35, 0 }
0x1b13   : > { %15135 = vmatpush3.bf16.msra.mxu1 %v8171_v2 }
0x1b14   : > { %16068 = vmatprep.subr.msk.bf16.mxu1 %vm3880_vm10, %v8173_v13  ;;  %v8418_v37 = vpop.permute.xlu1 %8417 }
0x1b15   : > { %v7919_v15 = vpop.permute.xlu0 %7918 }
0x1b16   : > { %15102 = vmatprep.subr.bf16.mxu0 %v7919_v15 }
0x1b17   : > { %15103 = vmatpush3.bf16.msra.mxu0 %v7919_v15  ;;  %15137 = vmatpush3.bf16.msra.mxu1 %v8183_v14 }
0x1b18   : > { %15142 = vmatprep.subr.bf16.mxu1 %v8248_v6  ;;  %v8420_v44 = vpop.permute.xlu1 %8419 }
0x1b19   : > { %v7921_v19 = vpop.permute.xlu0 %7920 }
0x1b1a   : > { %15104 = vmatprep.subr.bf16.mxu0 %v7921_v19  ;;  %15139 = vmatmul.mubr.msk.bf16.vlgmr.msra.gmra.mrb[32].mxu1 %vm7926_vm8, %v8166_v5 }
0x1b1b   : > { %15105 = vmatpush3.bf16.msra.mxu0 %v7921_v19  ;;  %15143 = vmatpush3.bf16.msra.mxu1 %v8248_v6 }
0x1b1c   : > { %15144 = vmatprep.subr.bf16.mxu1 %v8250_v17  ;;  %15148 = vmatprep.mubr.msk.bf16.mxu1 %vm7926_vm8, %v16261_v16  ;;  %v8422_v47 = vpop.permute.xlu1 %8421 }
0x1b1d   : > { %v7923_v23 = vpop.permute.xlu0 %7922  ;;  %v8432_v49 = vsel %vm3880_vm10, %v8422_v47, 0 }
0x1b1e   : > { %16065 = vmatprep.subr.msk.bf16.mxu0 %vm3880_vm10, %v7923_v23  ;;  %v7934_v24 = vsel %vm3880_vm10, %v7923_v23, 0 }
0x1b1f   : > { %15107 = vmatpush3.bf16.msra.mxu0 %v7934_v24  ;;  %15145 = vmatpush3.bf16.msra.mxu1 %v8250_v17 }
0x1b20   : > { %16069 = vmatprep.subr.msk.bf16.mxu1 %vm3880_vm10, %v8252_v11  ;;  %15172 = vmatprep.subr.bf16.mxu0 %v8501_v54 }
0x1b22   : > { %15109 = vmatmul.mubr.msk.bf16.vlgmr.msra.gmra.mrb[40].mxu0 %vm7926_vm8, %v16260_v25 }
0x1b23   : > { %15147 = vmatpush3.bf16.msra.mxu1 %v8262_v26  ;;  %15173 = vmatpush3.bf16.msra.mxu0 %v8501_v54 }
0x1b24   : > { %15152 = vmatprep.subr.bf16.mxu1 %v8333_v62  ;;  %15178 = vmatprep.subr.bf16.mxu0 %v16419_v42 }
0x1b26   : > { %15149 = vmatmul.mubr.msk.bf16.vlgmr.msra.gmra.mrb[32].mxu1 %vm7926_vm8, %v16262_v32  ;;  %v16268_v32 = vld [vmem:[%s19196_s1 + $0x2bc] ss:$0 sps:$4 sm:$0x11]  }
0x1b27   : > { %15153 = vmatpush3.bf16.msra.mxu1 %v8333_v62  ;;  %15158 = vmatprep.mubr.msk.bf16.mxu1 %vm7926_vm8, %v8331_v34  ;;  %v8597_v36 = vrot.slane %v16268_v32, 1 }
0x1b28   : > { %15154 = vmatprep.subr.bf16.mxu1 %v8335_v12 }
0x1b2b   : > { %15155 = vmatpush3.bf16.msra.mxu1 %v8335_v12 }
0x1b2c   : > { %16070 = vmatprep.subr.msk.bf16.mxu1 %vm3880_vm10, %v8337_v35 }
0x1b2d   : > { %v7900_v1 = vpop.permute.xlu1 %7899 }
0x1b2e   : > { %v7895_v59 = vpop.permute.xlu0 %7894 }
0x1b2f   : > { %15157 = vmatpush3.bf16.msra.mxu1 %v8347_v38 }
0x1b30   : > { %15162 = vmatprep.subr.bf16.mxu1 %v8418_v37 }
0x1b32   : > { %15159 = vmatmul.mubr.msk.bf16.vlgmr.msra.gmra.mrb[32].mxu1 %vm7926_vm8, %v8330_v31  ;;  %v7905_v60 = vpop.permute.xlu0 %7904  ;;  %v16267_v31 = vld [vmem:[%s19196_s1 + $0x2b4] sm:$0xfe]  }
0x1b33   : > { %15163 = vmatpush3.bf16.msra.mxu1 %v8418_v37  ;;  %15168 = vmatprep.mubr.msk.bf16.mxu1 %vm7926_vm8, %v8416_v43  ;;  %v8596_v33 = vrot.slane %v16267_v31, 1  ;;  %v16269_v43 = vld [vmem:[%s19196_s1 + $0x2bc] sm:$0xfe]  }
0x1b34   : > { %15164 = vmatprep.subr.bf16.mxu1 %v8420_v44 }
0x1b35   : > { %v8598_v38 = vsel %vm4492_vm2, %v8596_v33, %v8597_v36 }
0x1b37   : > { %15165 = vmatpush3.bf16.msra.mxu1 %v8420_v44  ;;  %v16270_v44 = vld [vmem:[%s19196_s1 + $0x2c4] ss:$0 sps:$4 sm:$0x11]  }
0x1b38   : > { %16071 = vmatprep.subr.msk.bf16.mxu1 %vm3880_vm10, %v8422_v47  ;;  %v8665_v50 = vrot.slane %v16270_v44, 1 }
0x1b3b   : > { %15167 = vmatpush3.bf16.msra.mxu1 %v8432_v49  ;;  %v8664_v49 = vrot.slane %v16269_v43, 1 }
0x1b3c   : > { %15234 = vmatprep.subr.bf16.mxu1 %v16419_v42 }
0x1b3d   : > { %v8666_v51 = vsel %vm4492_vm2, %v8664_v49, %v8665_v50 }
0x1b3e   : > { %15169 = vmatmul.mubr.msk.bf16.vlgmr.msra.gmra.mrb[32].mxu1 %vm7926_vm8, %v8415_v41  ;;  %vm19271_vm8 = vcmask 64512  }
0x1b3f   : > { %15238 = vmatprep.mubr.msk.bf16.mxu1 %vm19269_vm9, %v16419_v42 }
0x1bf5   : > { %v15110_v55 = vpop.f32.mrb[40].mxu0 }
0x1bf6   : > { %v7970_v56 = vpop.f32.mrb[41].mxu0  ;;  %v7979_v61 = vadd.f32 %v15110_v55, %v7905_v60  ;;  %v16271_v55 = vld [vmem:[%s19196_s1 + $0x2c4] sm:$0xfe]  }
0x1bf7   : > { %v15111_v57 = vpop.f32.mrb[42].mxu0  ;;  %v7971_v63 = vadd.f32 %v7970_v56, %v7895_v59  ;;  %v16272_v56 = vld [vmem:[%s19196_s1 + $0x2cc] ss:$0 sps:$4 sm:$0x11]  }
0x1bf8   : > { %v7973_v58 = vpop.f32.mrb[43].mxu0  ;;  %v8733_v59 = vrot.slane %v16272_v56, 1  ;;  %v9079_v56 = vld [vmem:[%s19197_s2 + $0xd6] sm:$0xff] }
0x1bf9   : > { %v7974_v4 = vadd.f32 %v7973_v58, %v7900_v1  ;;  %v8732_v58 = vrot.slane %v16271_v55, 1  ;;  %v16274_v1 = vld [vmem:[%s19196_s1 + $0x2d4] ss:$0 sps:$4 sm:$0x11]  }
0x1bfb   : > { %v8734_v60 = vsel %vm4492_vm2, %v8732_v58, %v8733_v59  ;;  %v16282_v58 = vld [vmem:[%s19196_s1 + $0x2f4] ss:$0 sps:$4 sm:$0x11]  }
0x1c11   : > { %v15170_v0 = vpop.f32.mrb[32].mxu1 }
0x1c12   : > { %v15430_v2 = vadd.f32 %v15170_v0, %v7979_v61  ;;  %v8468_v3 = vpop.f32.mrb[33].mxu1  ;;  %v16273_v0 = vld [vmem:[%s19196_s1 + $0x2cc] sm:$0xfe]  }
0x1c13   : > { %v15432_v5 = vadd.f32 %v8468_v3, %v7971_v63  ;;  %v15171_v6 = vpop.f32.mrb[34].mxu1  ;;  %v8800_v3 = vrot.slane %v16273_v0, 1 }
0x1c14   : > { %v8471_v7 = vpop.f32.mrb[35].mxu1  ;;  %v8487_v11 = vmax.f32 %v15430_v2, 0.0 }
0x1c15   : > { %v15434_v10 = vadd.f32 %v8471_v7, %v7974_v4  ;;  %v8485_v12 = vmax.f32 %v15432_v5, 0.0  ;;  %v8801_v4 = vrot.slane %v16274_v1, 1 }
0x1c16   : > { %v8489_v15 = vpack.c.bf16 %v8487_v11, %v8487_v11  ;;  %v16276_v11 = vld [vmem:[%s19196_s1 + $0x2dc] ss:$0 sps:$4 sm:$0x11]  }
0x1c17   : > { %v8486_v13 = vmax.f32 %v15434_v10, 0.0  ;;  %v8802_v5 = vsel %vm4492_vm2, %v8800_v3, %v8801_v4  ;;  %v16275_v10 = vld [vmem:[%s19196_s1 + $0x2d4] sm:$0xfe]   ;;  %v16284_v3 = vld [vmem:[%s19196_s1 + $0x2fc] ss:$0 sps:$4 sm:$0x11]  }
0x1c19   : > { %v8488_v14 = vpack.c.bf16 %v8486_v13, %v8485_v12  ;;  %v8868_v13 = vrot.slane %v16275_v10, 1 }
0x1c1b   : > { %15174 = vmatprep.mubr.msk.bf16.mxu0 %vm8491_vm12, %v8488_v14  ;;  %v8869_v14 = vrot.slane %v16276_v11, 1  ;;  %v16285_v11 = vld [vmem:[%s19196_s1 + $0x2fc] sm:$0xfe]  }
0x1c1c   : > { %15175 = vmatmul.mubr.msk.bf16.vlgmr.msra.gmra.mrb[44].mxu0 %vm8491_vm12, %v8489_v15  ;;  %vm19273_vm12 = vmmov %vm19271_vm8 }
0x1c1d   : > { %15182 = vmatprep.mubr.msk.bf16.mxu0 %vm19269_vm9, %v16419_v42  ;;  %v8870_v15 = vsel %vm4492_vm2, %v8868_v13, %v8869_v14  ;;  %v9231_v14 = vrot.slane %v16285_v11, 1 }
0x1cef   : > { %v15176_v16 = vpop.f32.mrb[44].mxu0 }
0x1cf0   : > { %v8552_v17 = vpack.c.bf16 %v15176_v16, %v15176_v16  ;;  %v8537_v19 = vpop.f32.mrb[45].mxu0 }
0x1cf1   : > { %v15177_v20 = vpop.f32.mrb[46].mxu0 }
0x1cf2   : > { %8557 = vrot.lane.b32.xlu0 %v8552_v17, %s16406_s15  ;;  %v8540_v22 = vpop.f32.mrb[47].mxu0  ;;  %v16278_v20 = vld [vmem:[%s19196_s1 + $0x2e4] ss:$0 sps:$4 sm:$0x11]  }
0x1cf3   : > { %v8551_v23 = vpack.c.bf16 %v8540_v22, %v8537_v19  ;;  %v16277_v19 = vld [vmem:[%s19196_s1 + $0x2dc] sm:$0xfe]  }
0x1cf5   : > { %8555 = vrot.lane.b32.xlu1 %v8551_v23, %s16406_s15  ;;  %v8936_v23 = vrot.slane %v16277_v19, 1  ;;  %v16287_v19 = vld [vmem:[%s19196_s1 + $0x304] sm:$0xfe]  }
0x1d64   : > { %v8558_v24 = vpop.permute.xlu0 %8557 }
0x1d65   : > { %8564 = vst.msk [vmem:[#allocation2 + $0x28] sm:$0x7] %vm8563_vm7, %v8558_v24  ;;  %vm19274_vm7 = vcmask 384312   ;;  %v8937_v24 = vrot.slane %v16278_v20, 1 }
0x1d66   : > { %8566 = vst.msk [vmem:[#allocation2 + $0x28] sm:$0x7] %vm6034_vm0, %v16407_v30  ;;  %v16288_v20 = vld [vmem:[%s19196_s1 + $0x30c] ss:$0 sps:$4 sm:$0x11]  }
0x1d67   : > { %8570 = vst.msk [vmem:[#allocation2 + $0x28] sm:$0x7] %vm8569_vm3, %v16407_v30  ;;  %v8556_v25 = vpop.permute.xlu1 %8555  ;;  %vm19277_vm3 = vcmask 179200  }
0x1d68   : > { %8562 = vst.msk [vmem:[#allocation2] sm:$0xff] %vm8561_vm4, %v8556_v25  ;;  %vm19278_vm4 = vmmov %vm19277_vm3  ;;  %v8938_v25 = vsel %vm4492_vm2, %v8936_v23, %v8937_v24  ;;  %v9297_v23 = vrot.slane %v16287_v19, 1  ;;  %v9298_v24 = vrot.slane %v16288_v20, 1  ;;  %v9637_v19 = vld [vmem:[%s19197_s2 + $0xee] sm:$0x7]  ;;  %v9636_v20 = vld [vmem:[%s19197_s2 + $0xe6] sm:$0xff] }
0x1d69   : > { %8565 = vst.msk [vmem:[#allocation2] sm:$0xff] %vm19271_vm8, %v16407_v30 }
0x1d6a   : > { %8568 = vst.msk [vmem:[#allocation2] sm:$0xff] %vm8567_vm1, %v16407_v30  ;;  %vm19279_vm1 = vmmov %vm19277_vm3 }
0x1d6b   : > { %vm19280_vm8 = vmmov %vm19279_vm1 }
0x1d6e   : > { %v8572_v62 = vld [vmem:[#allocation2 + $0x28] sm:$0x7] }
0x1d6f   : > { %8603 = vrot.lane.b32.xlu0 %v8572_v62, %s16421_s24  ;;  %9069 = vst.msk [vmem:[#allocation2 + $0x28] sm:$0xff] %vm19272_vm11, %v17467_v8  ;;  %v8577_v8 = vld [vmem:[%s19197_s2 + $0xce] sm:$0xff]  ;;  %vm19281_vm11 = vmmov %vm19279_vm1 }
0x1d70   : > { %9071 = vst.msk [vmem:[#allocation2 + $0x28] sm:$0xff] %vm19273_vm12, %v16407_v30  ;;  %vm19282_vm12 = vmmov %vm19279_vm1 }
0x1d71   : > { %9073 = vst.msk [vmem:[#allocation2 + $0x28] sm:$0xff] %vm19274_vm7, %v16407_v30  ;;  %v8571_v26 = vld [vmem:[#allocation2] sm:$0xff]  ;;  %vm19283_vm7 = vmmov %vm19279_vm1 }
0x1d72   : > { %8601 = vrot.lane.b32.xlu1 %v8571_v26, %s16421_s24 }
0x1d73   : > { %8669 = vrot.lane.b32.xlu0 %v8572_v62, %s19275_s23 }
0x1d76   : > { %8667 = vrot.lane.b32.xlu1 %v8571_v26, %s19275_s23 }
0x1d77   : > { %8737 = vrot.lane.b32.xlu0 %v8572_v62, %s19276_s25 }
0x1d7a   : > { %8735 = vrot.lane.b32.xlu1 %v8571_v26, %s19276_s25 }
0x1d7b   : > { %8805 = vrot.lane.b32.xlu0 %v8572_v62, %s16408_s16 }
0x1d7e   : > { %8803 = vrot.lane.b32.xlu1 %v8571_v26, %s16408_s16 }
0x1d7f   : > { %8873 = vrot.lane.b32.xlu0 %v8572_v62, %s16409_s17 }
0x1d82   : > { %8871 = vrot.lane.b32.xlu1 %v8571_v26, %s16409_s17 }
0x1d83   : > { %8941 = vrot.lane.b32.xlu0 %v8572_v62, %s16410_s18 }
0x1d86   : > { %8939 = vrot.lane.b32.xlu1 %v8571_v26, %s16410_s18 }
0x1d87   : > { %9009 = vrot.lane.b32.xlu0 %v8572_v62, %s16411_s19 }
0x1d8a   : > { %9007 = vrot.lane.b32.xlu1 %v8571_v26, %s16411_s19 }
0x1d8b   : > { %8585 = vperm.xlu0 %16099, %v8577_v8   ;;  %v16279_v8 = vld [vmem:[%s19196_s1 + $0x2e4] sm:$0xfe]  }
0x1d8c   : > { %v9004_v32 = vrot.slane %v16279_v8, 1  ;;  %v16290_v8 = vld [vmem:[%s19196_s1 + $0x314] ss:$0 sps:$4 sm:$0x11]  }
0x1d8e   : > { %8580 = vperm.xlu1 %16098, %v8576_v29   ;;  %v16280_v29 = vld [vmem:[%s19196_s1 + $0x2ec] ss:$0 sps:$4 sm:$0x11]  }
0x1de1   : > { %v8604_v34 = vpop.permute.xlu0 %8603 }
0x1de2   : > { %v8610_v37 = vsel %vm6075_vm5, %v8604_v34, 0  ;;  %v9005_v34 = vrot.slane %v16280_v29, 1 }
0x1de4   : > { %v8602_v35 = vpop.permute.xlu1 %8601 }
0x1de5   : > { %15179 = vmatpush3.bf16.msra.mxu0 %v8602_v35  ;;  %v8670_v41 = vpop.permute.xlu0 %8669  ;;  %v9006_v35 = vsel %vm4492_vm2, %v9004_v32, %v9005_v34  ;;  %v9364_v32 = vrot.slane %v16290_v8, 1 }
0x1de6   : > { %15180 = vmatprep.subr.bf16.mxu0 %v16419_v42  ;;  %v8676_v47 = vsel %vm6075_vm5, %v8670_v41, 0 }
0x1de8   : > { %v8668_v40 = vpop.permute.xlu1 %8667 }
0x1de9   : > { %15181 = vmatpush3.bf16.msra.mxu0 %v8610_v37  ;;  %v8738_v54 = vpop.permute.xlu0 %8737 }
0x1dea   : > { %15186 = vmatprep.subr.bf16.mxu0 %v16419_v42  ;;  %v8744_v57 = vsel %vm6075_vm5, %v8738_v54, 0 }
0x1dec   : > { %15183 = vmatmul.mubr.msk.bf16.vlgmr.msra.gmra.mrb[48].mxu0 %vm19277_vm3, %v8598_v38  ;;  %v8736_v52 = vpop.permute.xlu1 %8735  ;;  %vm19284_vm3 = vcmask 318528  }
0x1ded   : > { %15187 = vmatpush3.bf16.msra.mxu0 %v8668_v40  ;;  %15190 = vmatprep.mubr.msk.bf16.mxu0 %vm19269_vm9, %v16419_v42  ;;  %v8806_v63 = vpop.permute.xlu0 %8805 }
0x1dee   : > { %15188 = vmatprep.subr.bf16.mxu0 %v16419_v42  ;;  %v8812_v2 = vsel %vm6075_vm5, %v8806_v63, 0 }
0x1df0   : > { %v8804_v61 = vpop.permute.xlu1 %8803 }
0x1df1   : > { %15189 = vmatpush3.bf16.msra.mxu0 %v8676_v47  ;;  %v8874_v7 = vpop.permute.xlu0 %8873 }
0x1df2   : > { %15194 = vmatprep.subr.bf16.mxu0 %v16419_v42  ;;  %v8880_v12 = vsel %vm6075_vm5, %v8874_v7, 0 }
0x1df4   : > { %v8872_v6 = vpop.permute.xlu1 %8871 }
0x1df5   : > { %v8942_v17 = vpop.permute.xlu0 %8941 }
0x1df6   : > { %v8948_v22 = vsel %vm6075_vm5, %v8942_v17, 0 }
0x1df8   : > { %15191 = vmatmul.mubr.msk.bf16.vlgmr.msra.gmra.mrb[48].mxu0 %vm19278_vm4, %v8666_v51  ;;  %v8940_v16 = vpop.permute.xlu1 %8939  ;;  %v9075_v51 = vld [vmem:[#allocation2 + $0x28] sm:$0xff]  ;;  %vm19285_vm4 = vcmask 64512  }
0x1df9   : > { %15195 = vmatpush3.bf16.msra.mxu0 %v8736_v52  ;;  %15198 = vmatprep.mubr.msk.bf16.mxu0 %vm19269_vm9, %v16419_v42  ;;  %v9010_v26 = vpop.permute.xlu0 %9009  ;;  %v9080_v52 = vld [vmem:[%s19197_s2 + $0xde] sm:$0xff] }
0x1dfa   : > { %15196 = vmatprep.subr.bf16.mxu0 %v16419_v42  ;;  %v9016_v31 = vsel %vm6075_vm5, %v9010_v26, 0  ;;  %v16289_v26 = vld [vmem:[%s19196_s1 + $0x30c] sm:$0xfe]  }
0x1dfc   : > { %v9008_v62 = vpop.permute.xlu1 %9007 }
0x1dfd   : > { %15197 = vmatpush3.bf16.msra.mxu0 %v8744_v57  ;;  %v16281_v57 = vld [vmem:[%s19196_s1 + $0x2ec] sm:$0xfe]  }
0x1dfe   : > { %15202 = vmatprep.subr.bf16.mxu0 %v16419_v42 }
0x1e04   : > { %15199 = vmatmul.mubr.msk.bf16.vlgmr.msra.gmra.mrb[48].mxu0 %vm19279_vm1, %v8734_v60  ;;  %vm19286_vm1 = vcmask 384312   ;;  %v9099_v60 = vrot.slane %v16281_v57, 1 }
0x1e05   : > { %15203 = vmatpush3.bf16.msra.mxu0 %v8804_v61  ;;  %15206 = vmatprep.mubr.msk.bf16.mxu0 %vm19269_vm9, %v16419_v42  ;;  %v9100_v61 = vrot.slane %v16282_v58, 1 }
0x1e06   : > { %15204 = vmatprep.subr.bf16.mxu0 %v16419_v42 }
0x1e07   : > { %v9101_v0 = vsel %vm4492_vm2, %v9099_v60, %v9100_v61 }
0x1e09   : > { %15205 = vmatpush3.bf16.msra.mxu0 %v8812_v2  ;;  %v16283_v2 = vld [vmem:[%s19196_s1 + $0x2f4] sm:$0xfe]  }
0x1e0a   : > { %15210 = vmatprep.subr.bf16.mxu0 %v16419_v42  ;;  %v8586_v40 = vpop.permute.xlu0 %8585 }
0x1e0d   : > { %v8581_v33 = vpop.permute.xlu1 %8580 }
0x1e10   : > { %15207 = vmatmul.mubr.msk.bf16.vlgmr.msra.gmra.mrb[48].mxu0 %vm19280_vm8, %v8802_v5  ;;  %vm19287_vm8 = vcmask 261120   ;;  %v9165_v5 = vrot.slane %v16283_v2, 1 }
0x1e11   : > { %15211 = vmatpush3.bf16.msra.mxu0 %v8872_v6  ;;  %15214 = vmatprep.mubr.msk.bf16.mxu0 %vm19269_vm9, %v16419_v42  ;;  %v9166_v6 = vrot.slane %v16284_v3, 1 }
0x1e12   : > { %15212 = vmatprep.subr.bf16.mxu0 %v16419_v42 }
0x1e13   : > { %v9167_v7 = vsel %vm4492_vm2, %v9165_v5, %v9166_v6 }
0x1e15   : > { %15213 = vmatpush3.bf16.msra.mxu0 %v8880_v12  ;;  %v16286_v12 = vld [vmem:[%s19196_s1 + $0x304] ss:$0 sps:$4 sm:$0x11]  }
0x1e16   : > { %15218 = vmatprep.subr.bf16.mxu0 %v16419_v42 }
0x1e1c   : > { %15215 = vmatmul.mubr.msk.bf16.vlgmr.msra.gmra.mrb[48].mxu0 %vm19281_vm11, %v8870_v15  ;;  %vm19288_vm11 = vmmov %vm19287_vm8  ;;  %v9232_v15 = vrot.slane %v16286_v12, 1 }
0x1e1d   : > { %15219 = vmatpush3.bf16.msra.mxu0 %v8940_v16  ;;  %15222 = vmatprep.mubr.msk.bf16.mxu0 %vm19269_vm9, %v16419_v42 }
0x1e1e   : > { %15220 = vmatprep.subr.bf16.mxu0 %v16419_v42  ;;  %v9233_v16 = vsel %vm4492_vm2, %v9231_v14, %v9232_v15 }
0x1e21   : > { %15221 = vmatpush3.bf16.msra.mxu0 %v8948_v22 }
0x1e22   : > { %15226 = vmatprep.subr.bf16.mxu0 %v16419_v42 }
0x1e28   : > { %15223 = vmatmul.mubr.msk.bf16.vlgmr.msra.gmra.mrb[48].mxu0 %vm19282_vm12, %v8938_v25  ;;  %vm19289_vm12 = vmmov %vm19287_vm8  ;;  %v9299_v25 = vsel %vm4492_vm2, %v9297_v23, %v9298_v24 }
0x1e29   : > { %15227 = vmatpush3.bf16.msra.mxu0 %v9008_v62  ;;  %15230 = vmatprep.mubr.msk.bf16.mxu0 %vm19269_vm9, %v16419_v42 }
0x1e2a   : > { %15228 = vmatprep.subr.bf16.mxu0 %v16419_v42 }
0x1e2d   : > { %15229 = vmatpush3.bf16.msra.mxu0 %v9016_v31  ;;  %v9363_v31 = vrot.slane %v16289_v26, 1 }
0x1e2e   : > { %15290 = vmatprep.subr.bf16.mxu0 %v16419_v42 }
0x1e2f   : > { %v9365_v34 = vsel %vm4492_vm2, %v9363_v31, %v9364_v32 }
0x1e34   : > { %15231 = vmatmul.mubr.msk.bf16.vlgmr.msra.gmra.mrb[48].mxu0 %vm19283_vm7, %v9006_v35  ;;  %vm19290_vm7 = vmmov %vm19287_vm8 }
0x1e35   : > { %15294 = vmatprep.mubr.msk.bf16.mxu0 %vm19269_vm9, %v16419_v42 }
0x1f07   : > { %v9052_v36 = vpop.f32.mrb[48].mxu0 }
0x1f08   : > { %v15435_v37 = vadd.f32 %v9052_v36, %v8581_v33  ;;  %v15232_v38 = vpop.f32.mrb[49].mxu0  ;;  %v16291_v33 = vld [vmem:[%s19196_s1 + $0x314] sm:$0xfe]   ;;  %v16292_v36 = vld [vmem:[%s19196_s1 + $0x31c] ss:$0 sps:$4 sm:$0x11]  }
0x1f09   : > { %v9055_v41 = vpop.f32.mrb[50].mxu0  ;;  %v9429_v38 = vrot.slane %v16291_v33, 1 }
0x1f0a   : > { %v15436_v43 = vadd.f32 %v9055_v41, %v8586_v40  ;;  %v15233_v44 = vpop.f32.mrb[51].mxu0  ;;  %v9061_v47 = vmax.f32 %v15435_v37, 0.0  ;;  %v9430_v40 = vrot.slane %v16292_v36, 1 }
0x1f0b   : > { %v16293_v44 = vld [vmem:[%s19196_s1 + $0x31c] sm:$0xfe]  }
0x1f0c   : > { %v9062_v49 = vmax.f32 %v15436_v43, 0.0  ;;  %v9431_v41 = vsel %vm4492_vm2, %v9429_v38, %v9430_v40 }
0x1f0e   : > { %v9063_v50 = vpack.c.bf16 %v9062_v49, %v9061_v47  ;;  %v16294_v47 = vld [vmem:[%s19196_s1 + $0x324] ss:$0 sps:$4 sm:$0x11]  }
0x1f10   : > { %9065 = vrot.lane.b32.xlu1 %v9063_v50, %s16406_s15  ;;  %v9495_v50 = vrot.slane %v16293_v44, 1 }
0x1f14   : > { %9106 = vrot.lane.b32.xlu1 %v9075_v51, %s16408_s16 }
0x1f18   : > { %9170 = vrot.lane.b32.xlu1 %v9075_v51, %s16409_s17 }
0x1f1c   : > { %9236 = vrot.lane.b32.xlu1 %v9075_v51, %s16410_s18 }
0x1f20   : > { %9302 = vrot.lane.b32.xlu1 %v9075_v51, %s16411_s19 }
0x1f24   : > { %9368 = vrot.lane.b32.xlu1 %v9075_v51, %s16412_s20 }
0x1f28   : > { %9434 = vrot.lane.b32.xlu1 %v9075_v51, %s19241_s21 }
0x1f2c   : > { %9500 = vrot.lane.b32.xlu1 %v9075_v51, %s19243_s22  ;;  %v9496_v51 = vrot.slane %v16294_v47, 1 }
0x1f30   : > { %9088 = vperm.xlu1 %16098, %v9080_v52   ;;  %v9497_v52 = vsel %vm4492_vm2, %v9495_v50, %v9496_v51  ;;  %v16300_v50 = vld [vmem:[%s19196_s1 + $0x334] sm:$0x7e]  }
0x1f82   : > { %v9066_v54 = vpop.permute.xlu1 %9065 }
0x1f83   : > { %9068 = vst.msk [vmem:[#allocation2] sm:$0xff] %vm19284_vm3, %v9066_v54  ;;  %vm19291_vm3 = vmmov %vm19290_vm7  ;;  %v16295_v54 = vld [vmem:[%s19202_s7] sm:$0xff]  }
0x1f84   : > { %9070 = vst.msk [vmem:[#allocation2] sm:$0xff] %vm19285_vm4, %v16407_v30  ;;  %vm19292_vm4 = vmmov %vm19291_vm3  ;;  %15291 = vmatpush3.bf16.msra.mxu0 %v16295_v54 }
0x1f85   : > { %9072 = vst.msk [vmem:[#allocation2] sm:$0xff] %vm19286_vm1, %v16407_v30  ;;  %vm19293_vm1 = vmmov %vm19291_vm3  ;;  %15292 = vmatprep.subr.bf16.mxu0 %v16419_v42 }
0x1f86   : > { %v9107_v63 = vpop.permute.xlu1 %9106 }
0x1f8a   : > { %v9171_v4 = vpop.permute.xlu1 %9170 }
0x1f8c   : > { %v9074_v55 = vld [vmem:[#allocation2] sm:$0xff] }
0x1f8d   : > { %9104 = vrot.lane.b32.xlu0 %v9074_v55, %s16408_s16 }
0x1f8e   : > { %v9237_v13 = vpop.permute.xlu1 %9236 }
0x1f91   : > { %9168 = vrot.lane.b32.xlu0 %v9074_v55, %s16409_s17 }
0x1f92   : > { %v9303_v22 = vpop.permute.xlu1 %9302 }
0x1f95   : > { %9234 = vrot.lane.b32.xlu0 %v9074_v55, %s16410_s18 }
0x1f96   : > { %v9369_v29 = vpop.permute.xlu1 %9368 }
0x1f99   : > { %9300 = vrot.lane.b32.xlu0 %v9074_v55, %s16411_s19 }
0x1f9a   : > { %v9435_v37 = vpop.permute.xlu1 %9434 }
0x1f9d   : > { %9366 = vrot.lane.b32.xlu0 %v9074_v55, %s16412_s20 }
0x1f9e   : > { %v9501_v49 = vpop.permute.xlu1 %9500 }
0x1fa1   : > { %9432 = vrot.lane.b32.xlu0 %v9074_v55, %s19241_s21 }
0x1fa5   : > { %9498 = vrot.lane.b32.xlu0 %v9074_v55, %s19243_s22  ;;  %v16296_v55 = vld [vmem:[%s19202_s7 + $0x8] sm:$0xff]  }
0x1fa9   : > { %9083 = vperm.xlu0 %16099, %v9079_v56   ;;  %v9574_v56 = vsel %vm4492_vm2, 4294967295, %v16415_v39  ;;  %vm9568_vm2 = vcmask 252928  }
0x1fff   : > { %v9105_v59 = vpop.permute.xlu0 %9104 }
0x2000   : > { %15235 = vmatpush3.bf16.msra.mxu1 %v9105_v59 }
0x2001   : > { %15236 = vmatprep.subr.bf16.mxu1 %v16419_v42 }
0x2003   : > { %v9169_v1 = vpop.permute.xlu0 %9168 }
0x2004   : > { %15237 = vmatpush3.bf16.msra.mxu1 %v9107_v63 }
0x2005   : > { %15242 = vmatprep.subr.bf16.mxu1 %v16419_v42 }
0x2007   : > { %15239 = vmatmul.mubr.msk.bf16.vlgmr.msra.gmra.mrb[36].mxu1 %vm19287_vm8, %v9101_v0  ;;  %v9235_v10 = vpop.permute.xlu0 %9234  ;;  %vm9573_vm8 = vcmask 1047552   ;;  %v9089_v0 = vpop.permute.xlu1 %9088 }
0x2008   : > { %15243 = vmatpush3.bf16.msra.mxu1 %v9169_v1  ;;  %15246 = vmatprep.mubr.msk.bf16.mxu1 %vm19269_vm9, %v16419_v42  ;;  %v18390_v57 = vsel %vm9573_vm8, %v9574_v56, 0  ;;  %vm19295_vm8 = vcmask 130048   ;;  %v9846_v56 = vshll.u32 %v16300_v50, 16 }
0x2009   : > { %15244 = vmatprep.subr.bf16.mxu1 %v16419_v42  ;;  %v9577_v58 = vand.u32 %v16296_v55, %v18390_v57  ;;  %v9843_v55 = vshrl.u32 %v16300_v50, 16  ;;  %v10146_v50 = vld [vmem:[%s19197_s2 + $0xf1] sm:$0xff] }
0x200b   : > { %v9301_v17 = vpop.permute.xlu0 %9300  ;;  %15293 = vmatpush3.bf16.msra.mxu0 %v9577_v58  ;;  %v9845_v58 = vrot.slane %v9843_v55, 1  ;;  %v16317_v55 = vld [vmem:[%s19203_s8 + $0x20] ss:$16 sps:$4 sm:$0xff]  }
0x200c   : > { %15245 = vmatpush3.bf16.msra.mxu1 %v9171_v4  ;;  %15298 = vmatprep.subr.bf16.mxu0 %v16419_v42 }
0x200d   : > { %15250 = vmatprep.subr.bf16.mxu1 %v16419_v42 }
0x200f   : > { %v9367_v62 = vpop.permute.xlu0 %9366 }
0x2013   : > { %15247 = vmatmul.mubr.msk.bf16.vlgmr.msra.gmra.mrb[36].mxu1 %vm19288_vm11, %v9167_v7  ;;  %v9433_v35 = vpop.permute.xlu0 %9432  ;;  %vm9625_vm11 = vcmask 1047616  }
0x2014   : > { %15251 = vmatpush3.bf16.msra.mxu1 %v9235_v10  ;;  %15254 = vmatprep.mubr.msk.bf16.mxu1 %vm19269_vm9, %v16419_v42 }
0x2015   : > { %15252 = vmatprep.subr.bf16.mxu1 %v16419_v42 }
0x2017   : > { %v9499_v43 = vpop.permute.xlu0 %9498 }
0x2018   : > { %15253 = vmatpush3.bf16.msra.mxu1 %v9237_v13 }
0x2019   : > { %15258 = vmatprep.subr.bf16.mxu1 %v16419_v42 }
0x201f   : > { %15255 = vmatmul.mubr.msk.bf16.vlgmr.msra.gmra.mrb[36].mxu1 %vm19289_vm12, %v9233_v16  ;;  %vm9627_vm12 = vcmask 7168   ;;  %v10108_v16 = vshrl.u32 %v17205_v45, 16 }
0x2020   : > { %15259 = vmatpush3.bf16.msra.mxu1 %v9301_v17  ;;  %15262 = vmatprep.mubr.msk.bf16.mxu1 %vm19269_vm9, %v16419_v42  ;;  %v10111_v17 = vshll.u32 %v17205_v45, 16  ;;  %v16297_v45 = vld [vmem:[%s19196_s1 + $0x324] sm:$0x7e]  }
0x2021   : > { %15260 = vmatprep.subr.bf16.mxu1 %v16419_v42  ;;  %v9653_v8 = vrot.slane %v16297_v45, 1 }
0x2022   : > { %v10113_v23 = vrot.slane %v10111_v17, 3 }
0x2024   : > { %15261 = vmatpush3.bf16.msra.mxu1 %v9303_v22  ;;  %v10110_v22 = vrot.slane %v10108_v16, 2 }
0x2025   : > { %15266 = vmatprep.subr.bf16.mxu1 %v16419_v42 }
0x2026   : > { %v10114_v24 = vor.u32 %v10113_v23, %v10110_v22 }
0x2028   : > { %v9084_v59 = vpop.permute.xlu0 %9083 }
0x202b   : > { %15263 = vmatmul.mubr.msk.bf16.vlgmr.msra.gmra.mrb[36].mxu1 %vm19290_vm7, %v9299_v25  ;;  %vm9630_vm7 = vcmask 72712  }
0x202c   : > { %15267 = vmatpush3.bf16.msra.mxu1 %v9367_v62  ;;  %15270 = vmatprep.mubr.msk.bf16.mxu1 %vm19269_vm9, %v16419_v42 }
0x202d   : > { %15268 = vmatprep.subr.bf16.mxu1 %v16419_v42 }
0x2030   : > { %15269 = vmatpush3.bf16.msra.mxu1 %v9369_v29  ;;  %v16298_v29 = vld [vmem:[%s19196_s1 + $0x328] sm:$0xfc]  }
0x2031   : > { %15274 = vmatprep.subr.bf16.mxu1 %v16419_v42  ;;  %v9718_v33 = vshll.u32 %v16298_v29, 16 }
0x2037   : > { %15271 = vmatmul.mubr.msk.bf16.vlgmr.msra.gmra.mrb[36].mxu1 %vm19291_vm3, %v9365_v34  ;;  %vm19294_vm3 = vcmask 64512  }
0x2038   : > { %15275 = vmatpush3.bf16.msra.mxu1 %v9433_v35  ;;  %15278 = vmatprep.mubr.msk.bf16.mxu1 %vm19269_vm9, %v16419_v42  ;;  %v9715_v35 = vshrl.u32 %v16298_v29, 16 }
0x2039   : > { %15276 = vmatprep.subr.bf16.mxu1 %v16419_v42 }
0x203a   : > { %v9717_v36 = vrot.slane %v9715_v35, 2 }
0x203c   : > { %15277 = vmatpush3.bf16.msra.mxu1 %v9435_v37  ;;  %v9720_v37 = vrot.slane %v9718_v33, 3 }
0x203d   : > { %15282 = vmatprep.subr.bf16.mxu1 %v16419_v42 }
0x203e   : > { %v9721_v40 = vor.u32 %v9720_v37, %v9717_v36 }
0x2043   : > { %15279 = vmatmul.mubr.msk.bf16.vlgmr.msra.gmra.mrb[36].mxu1 %vm19292_vm4, %v9431_v41  ;;  %vm9660_vm4 = vcmask 1031168  }
0x2044   : > { %15283 = vmatpush3.bf16.msra.mxu1 %v9499_v43  ;;  %15286 = vmatprep.mubr.msk.bf16.mxu1 %vm19269_vm9, %v16419_v42 }
0x2045   : > { %15284 = vmatprep.subr.bf16.mxu1 %v16419_v42 }
0x2048   : > { %15285 = vmatpush3.bf16.msra.mxu1 %v9501_v49  ;;  %v16299_v49 = vld [vmem:[%s19196_s1 + $0x330] sm:$0x3f]  }
0x2049   : > { %15340 = vmatprep.subr.bf16.mxu1 %v16419_v42 }
0x204f   : > { %15287 = vmatmul.mubr.msk.bf16.vlgmr.msra.gmra.mrb[36].mxu1 %vm19293_vm1, %v9497_v52  ;;  %vm9726_vm1 = vcmask 1022976  }
0x2050   : > { %15344 = vmatprep.mubr.msk.bf16.mxu1 %vm19269_vm9, %v16419_v42 }
0x2122   : > { %v9541_v60 = vpop.f32.mrb[36].mxu1 }
0x2123   : > { %v15437_v61 = vadd.f32 %v9541_v60, %v9084_v59  ;;  %v15288_v63 = vpop.f32.mrb[37].mxu1  ;;  %v9848_v59 = vrot.slane %v9846_v56, 2  ;;  %v16322_v56 = vld [vmem:[%s19203_s8 + $0x44] ss:$16 sps:$4 sm:$0xff]  }
0x2124   : > { %v9544_v1 = vpop.f32.mrb[38].mxu1 }
0x2125   : > { %v15438_v2 = vadd.f32 %v9544_v1, %v9089_v0  ;;  %v15289_v3 = vpop.f32.mrb[39].mxu1  ;;  %v9550_v4 = vmax.f32 %v15437_v61, 0.0  ;;  %v9849_v61 = vor.u32 %v9848_v59, %v9845_v58  ;;  %v16320_v58 = vld [vmem:[%s19203_s8 + $0x40] ss:$16 sps:$4 sm:$0xff]   ;;  %v16325_v59 = vld [vmem:[%s19203_s8 + $0x64] ss:$16 sps:$4 sm:$0xff]  }
0x2126   : > { %v16302_v3 = vld [vmem:[%s19196_s1 + $0x340] ss:$0 sps:$4 sm:$0x11]  }
0x2127   : > { %v9551_v5 = vmax.f32 %v15438_v2, 0.0  ;;  %v16301_v2 = vld [vmem:[%s19196_s1 + $0x338] sm:$0xf8]  }
0x2129   : > { %v9552_v39 = vpack.c.bf16 %v9551_v5, %v9550_v4  ;;  %v9913_v5 = vrot.slane %v16301_v2, 3  ;;  %v16305_v2 = vld [vmem:[%s19196_s1 + $0x348] sm:$0xf8]  }
0x212b   : > { %15295 = vmatmul.mubr.msk.bf16.vlgmr.msra.gmra.mrb[52].mxu0 %vm9568_vm2, %v9552_v39  ;;  %vm19240_vm2 = vcmask 1014784   ;;  %v9914_v39 = vrot.slane %v16302_v3, 3  ;;  %v16306_v3 = vld [vmem:[%s19196_s1 + $0x350] ss:$0 sps:$4 sm:$0x11]  }
0x212c   : > { %15300 = vmatprep.mubr.msk.bf16.mxu0 %vm19269_vm9, %v16419_v42 }
0x21fe   : > { %v9613_v6 = vpop.f32.mrb[52].mxu0 }
0x21ff   : > { %v15296_v7 = vpop.f32.mrb[53].mxu0 }
0x2200   : > { %v9616_v10 = vpop.f32.mrb[54].mxu0 }
0x2201   : > { %v9620_v11 = vpack.c.bf16 %v9616_v10, %v9613_v6  ;;  %v15297_v12 = vpop.f32.mrb[55].mxu0  ;;  %v16303_v6 = vld [vmem:[%s19196_s1 + $0x340] sm:$0x3f]   ;;  %v9915_v10 = vsel %vm3229_vm14, %v9913_v5, %v9914_v39  ;;  %v10170_v5 = vshll.u32 %v16305_v2, 16  ;;  %v10175_v39 = vshrl.u32 %v16306_v3, 16 }
0x2202   : > { %v9978_v12 = vshll.u32 %v16303_v6, 16 }
0x2203   : > { %9622 = vrot.lane.b32.xlu0 %v9620_v11, %s16406_s15 }
0x2275   : > { %v9623_v13 = vpop.permute.xlu0 %9622 }
0x2276   : > { %9626 = vst.msk [vmem:[#allocation2] sm:$0xff] %vm9625_vm11, %v9623_v13  ;;  %vm19296_vm11 = vmmov %vm19295_vm8 }
0x2277   : > { %9628 = vst.msk [vmem:[#allocation2 + $0x8] sm:$0xff] %vm9627_vm12, %v9623_v13  ;;  %vm19297_vm12 = vcmask 1006592   ;;  %v9976_v13 = vshrl.u32 %v16303_v6, 16  ;;  %v10178_v6 = vshll.u32 %v16306_v3, 16 }
0x2278   : > { %9629 = vst.msk [vmem:[#allocation2] sm:$0xff] %vm19294_vm3, %v16407_v30  ;;  %vm19299_vm3 = vcmask 998400  }
0x2279   : > { %9631 = vst.msk [vmem:[#allocation2 + $0x8] sm:$0xff] %vm9630_vm7, %v16407_v30  ;;  %vm19298_vm7 = vmmov %vm19295_vm8 }
0x227f   : > { %v9632_v15 = vld [vmem:[#allocation2] sm:$0xff] }
0x2280   : > { %v9633_v14 = vld [vmem:[#allocation2 + $0x8] sm:$0xff]  ;;  %9656 = vrot.lane.b32.xlu1 %v9632_v15, %s16421_s24 }
0x2281   : > { %9658 = vrot.lane.b32.xlu0 %v9633_v14, %s16421_s24 }
0x2284   : > { %9722 = vrot.lane.b32.xlu1 %v9632_v15, %s19275_s23 }
0x2285   : > { %9724 = vrot.lane.b32.xlu0 %v9633_v14, %s19275_s23 }
0x2288   : > { %9782 = vrot.lane.b32.xlu1 %v9632_v15, %s19276_s25 }
0x2289   : > { %9784 = vrot.lane.b32.xlu0 %v9633_v14, %s19276_s25 }
0x228c   : > { %9850 = vrot.lane.b32.xlu1 %v9632_v15, %s16408_s16 }
0x228d   : > { %9852 = vrot.lane.b32.xlu0 %v9633_v14, %s16408_s16 }
0x2290   : > { %9916 = vrot.lane.b32.xlu1 %v9632_v15, %s16409_s17 }
0x2291   : > { %9918 = vrot.lane.b32.xlu0 %v9633_v14, %s16409_s17 }
0x2294   : > { %9982 = vrot.lane.b32.xlu1 %v9632_v15, %s16410_s18 }
0x2295   : > { %9984 = vrot.lane.b32.xlu0 %v9633_v14, %s16410_s18 }
0x2298   : > { %10042 = vrot.lane.b32.xlu1 %v9632_v15, %s16411_s19 }
0x2299   : > { %10044 = vrot.lane.b32.xlu0 %v9633_v14, %s16411_s19  ;;  %v9980_v14 = vrot.slane %v9978_v12, 1  ;;  %v10180_v12 = vrot.slane %v10178_v6, 4 }
0x229b   : > { %v9981_v15 = vor.u32 %v9980_v14, %v9976_v13 }
0x229c   : > { %9640 = vperm.xlu1 %16098, %v9636_v20  }
0x229d   : > { %9645 = vperm.xlu0 %16099, %v9637_v19   ;;  %v16304_v19 = vld [vmem:[%s19196_s1 + $0x344] sm:$0xfc]  }
0x229e   : > { %v10041_v20 = vrot.slane %v16304_v19, 2 }
0x22a1   : > { %10115 = vrot.lane.b32.xlu0 %v10114_v24, %s16406_s15 }
0x22f2   : > { %v9657_v62 = vpop.permute.xlu1 %9656 }
0x22f3   : > { %v9659_v25 = vpop.permute.xlu0 %9658 }
0x22f4   : > { %v9661_v26 = vsel %vm9660_vm4, %v9657_v62, %v9659_v25 }
0x22f5   : > { %15299 = vmatpush3.bf16.msra.mxu0 %v9661_v26 }
0x22f6   : > { %15304 = vmatprep.subr.bf16.mxu0 %v16419_v42  ;;  %v9723_v32 = vpop.permute.xlu1 %9722 }
0x22f7   : > { %v9725_v31 = vpop.permute.xlu0 %9724 }
0x22f8   : > { %15301 = vmatmul.mubr.msk.bf16.vlgmr.msra.gmra.mrb[56].mxu0 %vm19295_vm8, %v9653_v8  ;;  %v9727_v34 = vsel %vm9726_vm1, %v9723_v32, %v9725_v31  ;;  %vm19300_vm8 = vmmov %vm19298_vm7  ;;  %v10101_v32 = vld [vmem:[#allocation2] sm:$0x3f] }
0x22f9   : > { %15305 = vmatpush3.bf16.msra.mxu0 %v9727_v34  ;;  %15306 = vmatprep.mubr.msk.bf16.mxu0 %vm19269_vm9, %v16419_v42  ;;  %v10104_v34 = vld [vmem:[#allocation2 + $0x8] sm:$0x3f] }
0x22fa   : > { %15310 = vmatprep.subr.bf16.mxu0 %v16419_v42  ;;  %v9783_v41 = vpop.permute.xlu1 %9782 }
0x22fb   : > { %v9785_v38 = vpop.permute.xlu0 %9784 }
0x22fc   : > { %v9787_v43 = vsel %vm19240_vm2, %v9783_v41, %v9785_v38  ;;  %vm19305_vm2 = vcmask 64512  }
0x22fe   : > { %v9851_v51 = vpop.permute.xlu1 %9850 }
0x22ff   : > { %v9853_v44 = vpop.permute.xlu0 %9852 }
0x2300   : > { %v9854_v52 = vsel %vm19297_vm12, %v9851_v51, %v9853_v44  ;;  %vm10131_vm12 = vcmask 51200   ;;  %v16314_v51 = vld [vmem:[%s19203_s8] ss:$16 sps:$4 sm:$0xff]  }
0x2302   : > { %v9917_v63 = vpop.permute.xlu1 %9916 }
0x2303   : > { %v9919_v47 = vpop.permute.xlu0 %9918 }
0x2304   : > { %15307 = vmatmul.mubr.msk.bf16.vlgmr.msra.gmra.mrb[56].mxu0 %vm19296_vm11, %v9721_v40  ;;  %v9920_v0 = vsel %vm19299_vm3, %v9917_v63, %v9919_v47  ;;  %vm10129_vm11 = vcmask 1042496   ;;  %vm19301_vm3 = vcmask 990208   ;;  %v16326_v63 = vld [vmem:[%s19203_s8 + $0x80] ss:$16 sps:$4 sm:$0xff]  }
0x2305   : > { %15311 = vmatpush3.bf16.msra.mxu0 %v9787_v43  ;;  %15312 = vmatprep.mubr.msk.bf16.mxu0 %vm19269_vm9, %v16419_v42 }
0x2306   : > { %15316 = vmatprep.subr.bf16.mxu0 %v16419_v42  ;;  %v9983_v7 = vpop.permute.xlu1 %9982 }
0x2307   : > { %v9985_v54 = vpop.permute.xlu0 %9984 }
0x2308   : > { %v9986_v11 = vsel %vm19301_vm3, %v9983_v7, %v9985_v54  ;;  %vm10119_vm3 = vsmask.f32 7958  ;;  %v16319_v54 = vld [vmem:[%s19203_s8 + $0x24] ss:$16 sps:$4 sm:$0xff]  }
0x230a   : > { %v10043_v16 = vpop.permute.xlu1 %10042 }
0x230b   : > { %v10045_v60 = vpop.permute.xlu0 %10044 }
0x2310   : > { %15313 = vmatmul.mubr.msk.bf16.vlgmr.msra.gmra.mrb[56].mxu0 %vm19298_vm7, %v16299_v49  ;;  %vm10137_vm7 = vcmask 116792   ;;  %v10147_v49 = vld [vmem:[%s19197_s2 + $0xf9] sm:$0x7] }
0x2311   : > { %15317 = vmatpush3.bf16.msra.mxu0 %v9854_v52  ;;  %15318 = vmatprep.mubr.msk.bf16.mxu0 %vm19269_vm9, %v16419_v42  ;;  %v16316_v52 = vld [vmem:[%s19203_s8 + $0x4] ss:$16 sps:$4 sm:$0xff]  }
0x2312   : > { %15322 = vmatprep.subr.bf16.mxu0 %v16419_v42 }
0x231b   : > { %v9641_v22 = vpop.permute.xlu1 %9640 }
0x231c   : > { %v9646_v1 = vpop.permute.xlu0 %9645  ;;  %15319 = vmatmul.mubr.msk.bf16.vlgmr.msra.gmra.mrb[56].mxu0 %vm19300_vm8, %v9849_v61  ;;  %v16328_v61 = vld [vmem:[%s19203_s8 + $0x84] ss:$16 sps:$4 sm:$0xff]  }
0x231d   : > { %15323 = vmatpush3.bf16.msra.mxu0 %v9920_v0  ;;  %15324 = vmatprep.mubr.msk.bf16.mxu0 %vm19269_vm9, %v16419_v42  ;;  %v16331_v0 = vld [vmem:[%s19203_s8 + $0xa4] ss:$16 sps:$4 sm:$0xff]  }
0x231e   : > { %15328 = vmatprep.subr.bf16.mxu0 %v16419_v42 }
0x2320   : > { %v10116_v4 = vpop.permute.xlu0 %10115 }
0x2321   : > { %10130 = vst.msk [vmem:[#allocation2 + $0x28] sm:$0x7] %vm10129_vm11, %v10116_v4  ;;  %vm19303_vm11 = vmmov %vm19300_vm8 }
0x2322   : > { %10132 = vst.msk [vmem:[#allocation2 + $0x30] sm:$0x7] %vm10131_vm12, %v10116_v4  ;;  %vm19304_vm12 = vmmov %vm19300_vm8 }
0x2323   : > { %10134 = vst.msk [vmem:[#allocation2 + $0x28] sm:$0x7] %vm6034_vm0, %v16407_v30  ;;  %vm19302_vm0 = vcmask 982016  }
0x2324   : > { %10138 = vst.msk [vmem:[#allocation2 + $0x30] sm:$0x7] %vm10137_vm7, %v16407_v30  ;;  %v10046_v17 = vsel %vm19302_vm0, %v10043_v16, %v10045_v60  ;;  %vm10118_vm7 = vcmask 1047621   ;;  %v16323_v60 = vld [vmem:[%s19203_s8 + $0x60] ss:$16 sps:$4 sm:$0xff]  }
0x2325   : > { %vm10120_vm0 = vmand %vm10118_vm7, %vm10119_vm3  ;;  %vm19308_vm7 = vsmask.f32 4352 }
0x2328   : > { %15325 = vmatmul.mubr.msk.bf16.vlgmr.msra.gmra.mrb[56].mxu0 %vm19300_vm8, %v9915_v10  ;;  %vm10124_vm8 = vcmask 56325   ;;  %v10172_v10 = vrot.slane %v10170_v5, 4 }
0x2329   : > { %15329 = vmatpush3.bf16.msra.mxu0 %v9986_v11  ;;  %15330 = vmatprep.mubr.msk.bf16.mxu0 %vm19269_vm9, %v16419_v42  ;;  %v10177_v11 = vrot.slane %v10175_v39, 3 }
0x232a   : > { %15334 = vmatprep.subr.bf16.mxu0 %v16419_v42  ;;  %v10141_v47 = vld [vmem:[#allocation2 + $0x28] sm:$0x7] }
0x232b   : > { %v10142_v44 = vld [vmem:[#allocation2 + $0x30] sm:$0x7] }
0x2334   : > { %15331 = vmatmul.mubr.msk.bf16.vlgmr.msra.gmra.mrb[56].mxu0 %vm19303_vm11, %v9981_v15  ;;  %vm10125_vm11 = vmand %vm10124_vm8, %vm10119_vm3  ;;  %vm19309_vm3 = vcmask 998400   ;;  %vm19310_vm8 = vcmask 179200  }
0x2335   : > { %15335 = vmatpush3.bf16.msra.mxu0 %v10046_v17  ;;  %15336 = vmatprep.mubr.msk.bf16.mxu0 %vm19269_vm9, %v16419_v42  ;;  %v10181_v17 = vor.u32 %v10180_v12, %v10177_v11 }
0x2336   : > { %10885 = vmatprep.subr.bf16.mxu0 %v16316_v52 }
0x2340   : > { %15337 = vmatmul.mubr.msk.bf16.vlgmr.msra.gmra.mrb[56].mxu0 %vm19304_vm12, %v10041_v20  ;;  %vm10135_vm12 = vcmask 121912  }
0x2341   : > { %10917 = vmatprep.mubr.bf16.mxu0 %v16407_v30  ;;  %10886 = vmatpush1.bf16.msra.mxu0 %v16314_v51 }
0x2342   : > { %10887 = vmatprep.subr.bf16.mxu0 %v16319_v54 }
0x2345   : > { %10888 = vmatpush1.bf16.msra.mxu0 %v16317_v55 }
0x2346   : > { %10889 = vmatprep.subr.bf16.mxu0 %v16322_v56 }
0x2349   : > { %10890 = vmatpush1.bf16.msra.mxu0 %v16320_v58 }
0x234a   : > { %10891 = vmatprep.subr.bf16.mxu0 %v16325_v59 }
0x234d   : > { %10892 = vmatpush1.bf16.msra.mxu0 %v16323_v60 }
0x234e   : > { %10893 = vmatprep.subr.bf16.mxu0 %v16328_v61 }
0x2351   : > { %10894 = vmatpush1.bf16.msra.mxu0 %v16326_v63  ;;  %v16309_v63 = vld [vmem:[%s19196_s1 + $0x35c] sm:$0x3f]  }
0x2352   : > { %10895 = vmatprep.subr.bf16.mxu0 %v16331_v0  ;;  %v16310_v0 = vld [vmem:[%s19196_s1 + $0x360] sm:$0x7e]  }
0x2353   : > { %v10463_v5 = vshrl.u32 %v16310_v0, 16  ;;  %v10466_v39 = vshll.u32 %v16310_v0, 16  ;;  %v16341_v0 = vld [vmem:[%s19203_s8 + $0x28] ss:$16 sps:$4 sm:$0xff]  }
0x2355   : > { %v10465_v11 = vrot.slane %v10463_v5, 1  ;;  %v10468_v12 = vrot.slane %v10466_v39, 2  ;;  %v16352_v5 = vld [vmem:[%s19203_s8 + $0x8c] ss:$16 sps:$4 sm:$0xff]   ;;  %v16350_v39 = vld [vmem:[%s19203_s8 + $0x88] ss:$16 sps:$4 sm:$0xff]  }
0x2413   : > { %v10085_v23 = vpop.f32.mrb[56].mxu0 }
0x2414   : > { %v15439_v24 = vadd.f32 %v10085_v23, %v9641_v22  ;;  %v15338_v45 = vpop.f32.mrb[57].mxu0 }
0x2415   : > { %v10088_v25 = vpop.f32.mrb[58].mxu0 }
0x2416   : > { %v15440_v62 = vadd.f32 %v10088_v25, %v9646_v1  ;;  %v15339_v26 = vpop.f32.mrb[59].mxu0  ;;  %v10094_v8 = vmax.f32 %v15439_v24, 0.0  ;;  %v16329_v1 = vld [vmem:[%s19203_s8 + $0xa0] ss:$16 sps:$4 sm:$0xff]  }
0x2417   : > { %10896 = vmatpush1.bf16.msra.mxu0 %v16329_v1 }
0x2418   : > { %v10095_v29 = vmax.f32 %v15440_v62, 0.0 }
0x241a   : > { %v10096_v31 = vpack.c.bf16 %v10095_v29, %v10094_v8 }
0x241c   : > { %10098 = vrot.lane.b32.xlu1 %v10096_v31, %s16406_s15 }
0x248e   : > { %v10099_v35 = vpop.permute.xlu1 %10098 }
0x248f   : > { %v10102_v33 = vsel %vm17210_vm15, %v10099_v35, %v10101_v32  ;;  %v10105_v36 = vsel %vm17215_vm13, %v10099_v35, %v10104_v34  ;;  %vm19306_vm13 = vcmask 1006592   ;;  %v16307_v32 = vld [vmem:[%s19196_s1 + $0x350] sm:$0x7e]  }
0x2490   : > { %10103 = vst [vmem:[#allocation2] sm:$0x3f] %v10102_v33  ;;  %10106 = vst [vmem:[#allocation2 + $0x8] sm:$0x3f] %v10105_v36  ;;  %v10252_v33 = vrot.slane %v16307_v32, 1 }
0x2491   : > { %v16308_v36 = vld [vmem:[%s19196_s1 + $0x354] sm:$0xfc]  }
0x2497   : > { %v10121_v37 = vld [vmem:[#allocation2] sm:$0xe0]  ;;  %v10126_v38 = vld [vmem:[#allocation2 + $0x8] sm:$0xe0] }
0x2498   : > { %v10122_v40 = vsel %vm10120_vm0, %v10116_v4, %v10121_v37  ;;  %v10127_v41 = vsel %vm10125_vm11, %v10116_v4, %v10126_v38  ;;  %v10167_v4 = vshrl.u32 %v16305_v2, 16  ;;  %vm19311_vm0 = vmmov %vm19309_vm3  ;;  %vm19312_vm11 = vcmask 990208  }
0x2499   : > { %10123 = vst [vmem:[#allocation2] sm:$0xe0] %v10122_v40  ;;  %10128 = vst [vmem:[#allocation2 + $0x8] sm:$0xe0] %v10127_v41 }
0x249a   : > { %10133 = vst.msk [vmem:[#allocation2] sm:$0xff] %vm19305_vm2, %v16407_v30  ;;  %v10169_v7 = vrot.slane %v10167_v4, 3  ;;  %vm19307_vm2 = vmmov %vm19306_vm13 }
0x249b   : > { %10136 = vst.msk [vmem:[#allocation2 + $0x8] sm:$0xff] %vm10135_vm12, %v16407_v30 }
0x249c   : > { %v10173_v16 = vor.u32 %v10172_v10, %v10169_v7 }
0x249e   : > { %v10182_v24 = vsel %vm19308_vm7, %v10173_v16, %v10181_v17  ;;  %vm19315_vm7 = vcmask 982016  }
0x24a1   : > { %v10139_v43 = vld [vmem:[#allocation2] sm:$0xff] }
0x24a2   : > { %v10140_v48 = vld [vmem:[#allocation2 + $0x8] sm:$0xff]  ;;  %10187 = vrot.lane.b32.xlu1 %v10139_v43, %s16408_s16 }
0x24a3   : > { %10189 = vrot.lane.b32.xlu0 %v10140_v48, %s16408_s16 }
0x24a6   : > { %10191 = vrot.lane.b32.xlu1 %v10141_v47, %s16408_s16 }
0x24a7   : > { %10193 = vrot.lane.b32.xlu0 %v10142_v44, %s16408_s16 }
0x24aa   : > { %10253 = vrot.lane.b32.xlu1 %v10139_v43, %s16409_s17 }
0x24ab   : > { %10255 = vrot.lane.b32.xlu0 %v10140_v48, %s16409_s17 }
0x24ae   : > { %10257 = vrot.lane.b32.xlu1 %v10141_v47, %s16409_s17 }
0x24af   : > { %10259 = vrot.lane.b32.xlu0 %v10142_v44, %s16409_s17 }
0x24b2   : > { %10328 = vrot.lane.b32.xlu1 %v10139_v43, %s16410_s18 }
0x24b3   : > { %10330 = vrot.lane.b32.xlu0 %v10140_v48, %s16410_s18 }
0x24b6   : > { %10332 = vrot.lane.b32.xlu1 %v10141_v47, %s16410_s18 }
0x24b7   : > { %10334 = vrot.lane.b32.xlu0 %v10142_v44, %s16410_s18 }
0x24ba   : > { %10395 = vrot.lane.b32.xlu1 %v10139_v43, %s16411_s19 }
0x24bb   : > { %10397 = vrot.lane.b32.xlu0 %v10140_v48, %s16411_s19 }
0x24be   : > { %10399 = vrot.lane.b32.xlu1 %v10141_v47, %s16411_s19 }
0x24bf   : > { %10401 = vrot.lane.b32.xlu0 %v10142_v44, %s16411_s19 }
0x24c2   : > { %10470 = vrot.lane.b32.xlu1 %v10139_v43, %s16412_s20 }
0x24c3   : > { %10472 = vrot.lane.b32.xlu0 %v10140_v48, %s16412_s20 }
0x24c6   : > { %10474 = vrot.lane.b32.xlu1 %v10141_v47, %s16412_s20 }
0x24c7   : > { %10476 = vrot.lane.b32.xlu0 %v10142_v44, %s16412_s20 }
0x24ca   : > { %10544 = vrot.lane.b32.xlu1 %v10139_v43, %s19241_s21 }
0x24cb   : > { %10546 = vrot.lane.b32.xlu0 %v10140_v48, %s19241_s21 }
0x24ce   : > { %10548 = vrot.lane.b32.xlu1 %v10141_v47, %s19241_s21 }
0x24cf   : > { %10550 = vrot.lane.b32.xlu0 %v10142_v44, %s19241_s21  ;;  %s19380_s21 = smov 117  }
0x24d2   : > { %10618 = vrot.lane.b32.xlu1 %v10139_v43, %s19243_s22  ;;  %v10324_v43 = vshll.u32 %v16308_v36, 16 }
0x24d3   : > { %10620 = vrot.lane.b32.xlu0 %v10140_v48, %s19243_s22  ;;  %v10321_v48 = vshrl.u32 %v16308_v36, 16 }
0x24d4   : > { %v10326_v51 = vrot.slane %v10324_v43, 3 }
0x24d6   : > { %10622 = vrot.lane.b32.xlu1 %v10141_v47, %s19243_s22 }
0x24d7   : > { %10624 = vrot.lane.b32.xlu0 %v10142_v44, %s19243_s22 }
0x24da   : > { %10150 = vperm.xlu1 %16098, %v10146_v50   ;;  %v10323_v50 = vrot.slane %v10321_v48, 2 }
0x24db   : > { %10155 = vperm.xlu0 %16099, %v10147_v49  }
0x24dc   : > { %v10327_v52 = vor.u32 %v10326_v51, %v10323_v50 }
0x2514   : > { %v10188_v14 = vpop.permute.xlu1 %10187 }
0x2515   : > { %v10190_v13 = vpop.permute.xlu0 %10189 }
0x2516   : > { %v10195_v15 = vsel %vm19306_vm13, %v10188_v14, %v10190_v13  ;;  %vm19313_vm13 = vmmov %vm19312_vm11  ;;  %v10469_v13 = vor.u32 %v10468_v12, %v10465_v11  ;;  %v16361_v11 = vld [vmem:[%s19203_s8 + $0xec] ss:$16 sps:$4 sm:$0xff]   ;;  %v16356_v12 = vld [vmem:[%s19203_s8 + $0xc8] ss:$16 sps:$4 sm:$0xff]  }
0x2517   : > { %15341 = vmatpush3.bf16.msra.mxu1 %v10195_v15 }
0x2518   : > { %15342 = vmatprep.subr.bf16.mxu1 %v16419_v42  ;;  %v10192_v20 = vpop.permute.xlu1 %10191 }
0x2519   : > { %v10194_v19 = vpop.permute.xlu0 %10193 }
0x251a   : > { %v10196_v22 = vsel %vm19307_vm2, %v10192_v20, %v10194_v19  ;;  %vm19314_vm2 = vmmov %vm19310_vm8  ;;  %v16311_v19 = vld [vmem:[%s19196_s1 + $0x364] sm:$0xf8]   ;;  %v16312_v20 = vld [vmem:[%s19196_s1 + $0x36c] ss:$0 sps:$4 sm:$0x11]  }
0x251b   : > { %v10202_v23 = vsel %vm6075_vm5, %v10196_v22, 0 }
0x251c   : > { %15343 = vmatpush3.bf16.msra.mxu1 %v10202_v23  ;;  %v10254_v25 = vpop.permute.xlu1 %10253 }
0x251d   : > { %v10256_v45 = vpop.permute.xlu0 %10255  ;;  %15348 = vmatprep.subr.bf16.mxu1 %v16419_v42 }
0x251e   : > { %v10261_v62 = vsel %vm19309_vm3, %v10254_v25, %v10256_v45  ;;  %vm19316_vm3 = vmmov %vm19315_vm7  ;;  %v10541_v45 = vrot.slane %v16311_v19, 3  ;;  %v10542_v25 = vrot.slane %v16312_v20, 3 }
0x251f   : > { %15345 = vmatmul.mubr.msk.bf16.vlgmr.msra.gmra.mrb[40].mxu1 %vm19310_vm8, %v10182_v24  ;;  %vm19317_vm8 = vmmov %vm19314_vm2 }
0x2520   : > { %15349 = vmatpush3.bf16.msra.mxu1 %v10261_v62  ;;  %15352 = vmatprep.mubr.msk.bf16.mxu1 %vm19269_vm9, %v16419_v42  ;;  %v10258_v8 = vpop.permute.xlu1 %10257  ;;  %v16313_v62 = vld [vmem:[%s19196_s1 + $0x36c] sm:$0x3f]  }
0x2521   : > { %v10260_v26 = vpop.permute.xlu0 %10259  ;;  %15350 = vmatprep.subr.bf16.mxu1 %v16419_v42 }
0x2522   : > { %v10262_v29 = vsel %vm19311_vm0, %v10258_v8, %v10260_v26  ;;  %vm19318_vm0 = vcmask 973824   ;;  %v10543_v26 = vsel %vm3229_vm14, %v10541_v45, %v10542_v25 }
0x2523   : > { %v10268_v31 = vsel %vm6075_vm5, %v10262_v29, 0 }
0x2524   : > { %15351 = vmatpush3.bf16.msra.mxu1 %v10268_v31  ;;  %v10329_v35 = vpop.permute.xlu1 %10328 }
0x2525   : > { %v10331_v34 = vpop.permute.xlu0 %10330  ;;  %15356 = vmatprep.subr.bf16.mxu1 %v16419_v42 }
0x2526   : > { %v10336_v37 = vsel %vm19312_vm11, %v10329_v35, %v10331_v34  ;;  %vm19319_vm11 = vmmov %vm19318_vm0  ;;  %v10614_v34 = vshll.u32 %v16313_v62, 16 }
0x2528   : > { %v10333_v40 = vpop.permute.xlu1 %10332  ;;  %v10616_v36 = vrot.slane %v10614_v34, 1 }
0x2529   : > { %v10335_v38 = vpop.permute.xlu0 %10334 }
0x252a   : > { %v10337_v41 = vsel %vm19313_vm13, %v10333_v40, %v10335_v38  ;;  %vm19320_vm13 = vmmov %vm19314_vm2  ;;  %v16334_v38 = vld [vmem:[%s19203_s8 + $0xc4] ss:$16 sps:$4 sm:$0xff]   ;;  %v16332_v40 = vld [vmem:[%s19203_s8 + $0xc0] ss:$16 sps:$4 sm:$0xff]  }
0x252b   : > { %15353 = vmatmul.mubr.msk.bf16.vlgmr.msra.gmra.mrb[40].mxu1 %vm19314_vm2, %v10252_v33  ;;  %v10343_v44 = vsel %vm6075_vm5, %v10337_v41, 0  ;;  %vm19321_vm2 = vcmask 965632   ;;  %v10612_v33 = vshrl.u32 %v16313_v62, 16  ;;  %10897 = vmatprep.subr.bf16.mxu0 %v16334_v38  ;;  %v16335_v41 = vld [vmem:[%s19203_s8 + $0xe0] ss:$16 sps:$4 sm:$0xff]  }
0x252c   : > { %15357 = vmatpush3.bf16.msra.mxu1 %v10336_v37  ;;  %15360 = vmatprep.mubr.msk.bf16.mxu1 %vm19269_vm9, %v16419_v42  ;;  %v10396_v49 = vpop.permute.xlu1 %10395  ;;  %v10874_v43 = vand.u32 %v16335_v41, %v18390_v57 }
0x252d   : > { %15358 = vmatprep.subr.bf16.mxu1 %v16419_v42  ;;  %v10398_v47 = vpop.permute.xlu0 %10397  ;;  %v10617_v37 = vor.u32 %v10616_v36, %v10612_v33  ;;  %10898 = vmatpush1.bf16.msra.mxu0 %v16332_v40 }
0x252e   : > { %v10403_v56 = vsel %vm19315_vm7, %v10396_v49, %v10398_v47  ;;  %vm19322_vm7 = vmmov %vm19321_vm2 }
0x2530   : > { %15359 = vmatpush3.bf16.msra.mxu1 %v10343_v44  ;;  %v10400_v55 = vpop.permute.xlu1 %10399  ;;  %v16340_v44 = vld [vmem:[%s19203_s8 + $0xc] ss:$16 sps:$4 sm:$0xff]  }
0x2531   : > { %15364 = vmatprep.subr.bf16.mxu1 %v16419_v42  ;;  %v10402_v54 = vpop.permute.xlu0 %10401 }
0x2532   : > { %v10404_v58 = vsel %vm19316_vm3, %v10400_v55, %v10402_v54  ;;  %vm19323_vm3 = vmmov %vm19317_vm8 }
0x2533   : > { %v10410_v59 = vsel %vm6075_vm5, %v10404_v58, 0  ;;  %vm19327_vm14 = vmmov %vm19323_vm3 }
0x2534   : > { %v10471_v61 = vpop.permute.xlu1 %10470 }
0x2535   : > { %v10473_v60 = vpop.permute.xlu0 %10472 }
0x2536   : > { %v10478_v1 = vsel %vm19318_vm0, %v10471_v61, %v10473_v60  ;;  %v16338_v60 = vld [vmem:[%s19203_s8 + $0x8] ss:$16 sps:$4 sm:$0xff]  }
0x2537   : > { %15361 = vmatmul.mubr.msk.bf16.vlgmr.msra.gmra.mrb[40].mxu1 %vm19317_vm8, %v10327_v52  ;;  %vm19324_vm8 = vcmask 957440  }
0x2538   : > { %15365 = vmatpush3.bf16.msra.mxu1 %v10403_v56  ;;  %15368 = vmatprep.mubr.msk.bf16.mxu1 %vm19269_vm9, %v16419_v42  ;;  %v10475_v3 = vpop.permute.xlu1 %10474  ;;  %vm19325_vm0 = vmmov %vm19324_vm8 }
0x2539   : > { %15366 = vmatprep.subr.bf16.mxu1 %v16419_v42  ;;  %v10477_v2 = vpop.permute.xlu0 %10476 }
0x253a   : > { %v10479_v4 = vsel %vm19319_vm11, %v10475_v3, %v10477_v2  ;;  %vm19326_vm11 = vmmov %vm19323_vm3  ;;  %v16344_v2 = vld [vmem:[%s19203_s8 + $0x48] ss:$16 sps:$4 sm:$0xff]   ;;  %v16349_v3 = vld [vmem:[%s19203_s8 + $0x6c] ss:$16 sps:$4 sm:$0xff]  }
0x253b   : > { %v10485_v6 = vsel %vm6075_vm5, %v10479_v4, 0  ;;  %v16347_v4 = vld [vmem:[%s19203_s8 + $0x68] ss:$16 sps:$4 sm:$0xff]  }
0x253c   : > { %15367 = vmatpush3.bf16.msra.mxu1 %v10410_v59  ;;  %v10545_v10 = vpop.permute.xlu1 %10544 }
0x253d   : > { %15372 = vmatprep.subr.bf16.mxu1 %v16419_v42  ;;  %v10547_v7 = vpop.permute.xlu0 %10546 }
0x253e   : > { %v10552_v14 = vsel %vm19321_vm2, %v10545_v10, %v10547_v7  ;;  %v16353_v7 = vld [vmem:[%s19203_s8 + $0xa8] ss:$16 sps:$4 sm:$0xff]   ;;  %v16358_v10 = vld [vmem:[%s19203_s8 + $0xcc] ss:$16 sps:$4 sm:$0xff]  }
0x2540   : > { %v10549_v16 = vpop.permute.xlu1 %10548 }
0x2541   : > { %v10551_v15 = vpop.permute.xlu0 %10550 }
0x2542   : > { %v10553_v17 = vsel %vm19322_vm7, %v10549_v16, %v10551_v15  ;;  %vm19331_vm7 = vcmask 64512  }
0x2543   : > { %15369 = vmatmul.mubr.msk.bf16.vlgmr.msra.gmra.mrb[40].mxu1 %vm19320_vm13, %v16309_v63  ;;  %v10559_v22 = vsel %vm6075_vm5, %v10553_v17, 0  ;;  %v16343_v63 = vld [vmem:[%s19203_s8 + $0x2c] ss:$16 sps:$4 sm:$0xff]   ;;  %vm19328_vm13 = vsmask.f32 5376 }
0x2544   : > { %15373 = vmatpush3.bf16.msra.mxu1 %v10478_v1  ;;  %15376 = vmatprep.mubr.msk.bf16.mxu1 %vm19269_vm9, %v16419_v42  ;;  %v10619_v24 = vpop.permute.xlu1 %10618  ;;  %v16346_v1 = vld [vmem:[%s19203_s8 + $0x4c] ss:$16 sps:$4 sm:$0xff]   ;;  %vm18720_vm2 = vmand %vm3880_vm10, %vm19328_vm13 }
0x2545   : > { %15374 = vmatprep.subr.bf16.mxu1 %v16419_v42  ;;  %v10621_v23 = vpop.permute.xlu0 %10620  ;;  %vm19332_vm10 = vmmov %vm19328_vm13 }
0x2546   : > { %v10626_v8 = vsel %vm19324_vm8, %v10619_v24, %v10621_v23  ;;  %vm19333_vm8 = vmmov %vm19331_vm7 }
0x2548   : > { %15375 = vmatpush3.bf16.msra.mxu1 %v10485_v6  ;;  %v10623_v31 = vpop.permute.xlu1 %10622  ;;  %v16355_v6 = vld [vmem:[%s19203_s8 + $0xac] ss:$16 sps:$4 sm:$0xff]  }
0x2549   : > { %15380 = vmatprep.subr.bf16.mxu1 %v16419_v42  ;;  %v10625_v29 = vpop.permute.xlu0 %10624 }
0x254a   : > { %v10627_v32 = vsel %vm19325_vm0, %v10623_v31, %v10625_v29  ;;  %vm11016_vm0 = vcmask 70664  }
0x254b   : > { %v10633_v35 = vsel %vm6075_vm5, %v10627_v32, 0  ;;  %v10999_v32 = vld [vmem:[#allocation2 + $0x8] sm:$0x3f] }
0x254f   : > { %15377 = vmatmul.mubr.msk.bf16.vlgmr.msra.gmra.mrb[40].mxu1 %vm19323_vm3, %v10469_v13  ;;  %v16359_v13 = vld [vmem:[%s19203_s8 + $0xe8] ss:$16 sps:$4 sm:$0xff]  }
0x2550   : > { %15381 = vmatpush3.bf16.msra.mxu1 %v10552_v14  ;;  %15384 = vmatprep.mubr.msk.bf16.mxu1 %vm19269_vm9, %v16419_v42  ;;  %v10883_v14 = vand.u32 %v16361_v11, %v18390_v57  ;;  %v10880_v15 = vand.u32 %v16359_v13, %v18390_v57 }
0x2551   : > { %15382 = vmatprep.subr.bf16.mxu1 %v16419_v42 }
0x2554   : > { %15383 = vmatpush3.bf16.msra.mxu1 %v10559_v22 }
0x2555   : > { %15388 = vmatprep.subr.bf16.mxu1 %v16419_v42 }
0x2559   : > { %v10151_v47 = vpop.permute.xlu1 %10150 }
0x255a   : > { %v10156_v52 = vpop.permute.xlu0 %10155 }
0x255b   : > { %15385 = vmatmul.mubr.msk.bf16.vlgmr.msra.gmra.mrb[40].mxu1 %vm19326_vm11, %v10543_v26  ;;  %vm19335_vm11 = vmmov %vm19332_vm10 }
0x255c   : > { %15389 = vmatpush3.bf16.msra.mxu1 %v10626_v8  ;;  %15392 = vmatprep.mubr.msk.bf16.mxu1 %vm19269_vm9, %v16419_v42  ;;  %vm10869_vm9 = vcmask 1039360   ;;  %v10995_v8 = vld [vmem:[#allocation2] sm:$0x3f] }
0x255d   : > { %15390 = vmatprep.subr.bf16.mxu1 %v16419_v42  ;;  %v16337_v42 = vld [vmem:[%s19203_s8 + $0xe4] ss:$16 sps:$4 sm:$0xff]  }
0x255e   : > { %v10877_v48 = vand.u32 %v16337_v42, %v18390_v57 }
0x2560   : > { %15391 = vmatpush3.bf16.msra.mxu1 %v10633_v35  ;;  %10899 = vmatprep.subr.bf16.mxu0 %v10877_v48  ;;  %v11002_v48 = vld [vmem:[#allocation2 + $0x10] sm:$0x3f] }
0x2561   : > { %10900 = vmatpush1.bf16.msra.mxu0 %v10874_v43 }
0x2562   : > { %10928 = vmatprep.subr.bf16.mxu0 %v16340_v44 }
0x2567   : > { %15393 = vmatmul.mubr.msk.bf16.vlgmr.msra.gmra.mrb[40].mxu1 %vm19327_vm14, %v10617_v37  ;;  %vm11017_vm14 = vmand %vm11016_vm0, %vm19335_vm11 }
0x2568   : > { %11106 = vmatprep.mubr.bf16.mxu1 %v16407_v30 }
0x263a   : > { %v10669_v49 = vpop.f32.mrb[40].mxu1 }
0x263b   : > { %v15441_v50 = vadd.f32 %v10669_v49, %v10151_v47  ;;  %v15394_v51 = vpop.f32.mrb[41].mxu1  ;;  %v11005_v47 = vld [vmem:[#allocation2 + $0x18] sm:$0x3f] }
0x263c   : > { %v10672_v54 = vpop.f32.mrb[42].mxu1 }
0x263d   : > { %v15442_v55 = vadd.f32 %v10672_v54, %v10156_v52  ;;  %v15395_v56 = vpop.f32.mrb[43].mxu1  ;;  %v10678_v58 = vmax.f32 %v15441_v50, 0.0 }
0x263f   : > { %v10679_v59 = vmax.f32 %v15442_v55, 0.0 }
0x2641   : > { %v10680_v61 = vpack.c.bf16 %v10679_v59, %v10678_v58  ;;  %v11028_v59 = vld [vmem:[%s19197_s2 + $0xfc] sm:$0xff] }
0x2643   : > { %14279 = vmatmul.mubr.msk.bf16.vlgmr.msra.gmra.mrb[60].mxu0 %vm10869_vm9, %v10680_v61 }
0x2644   : > { %10929 = vmatpush1.bf16.msra.mxu0 %v16338_v60  ;;  %10960 = vmatprep.mubr.bf16.mxu0 %v16407_v30  ;;  %v11927_v60 = vrot.slane %v16832_v18, 4 }
0x2645   : > { %10930 = vmatprep.subr.bf16.mxu0 %v16343_v63 }
0x2648   : > { %10931 = vmatpush1.bf16.msra.mxu0 %v16341_v0 }
0x2649   : > { %10932 = vmatprep.subr.bf16.mxu0 %v16346_v1 }
0x264c   : > { %10933 = vmatpush1.bf16.msra.mxu0 %v16344_v2  ;;  %v16362_v2 = vld [vmem:[%s19196_s1 + $0x370] sm:$0x3c]  }
0x264d   : > { %10934 = vmatprep.subr.bf16.mxu0 %v16349_v3  ;;  %v11039_v18 = vrot.slane %v16362_v2, 2 }
0x2650   : > { %10935 = vmatpush1.bf16.msra.mxu0 %v16347_v4 }
0x2651   : > { %10936 = vmatprep.subr.bf16.mxu0 %v16352_v5 }
0x2654   : > { %10937 = vmatpush1.bf16.msra.mxu0 %v16350_v39 }
0x2655   : > { %10938 = vmatprep.subr.bf16.mxu0 %v16355_v6 }
0x2658   : > { %10939 = vmatpush1.bf16.msra.mxu0 %v16353_v7 }
0x2659   : > { %10940 = vmatprep.subr.bf16.mxu0 %v16358_v10 }
0x265c   : > { %10941 = vmatpush1.bf16.msra.mxu0 %v16356_v12 }
0x265d   : > { %10942 = vmatprep.subr.bf16.mxu0 %v10883_v14 }
0x2660   : > { %10943 = vmatpush1.bf16.msra.mxu0 %v10880_v15 }
0x2663   : > { %14280 = vmatmul.mubr.msk.bf16.vlgmr.msra.gmra.mrb[64].mxu0 %vm10869_vm9, %v10680_v61  ;;  %vm19336_vm9 = vcmask 89088  }
0x2664   : > { %12033 = vmatprep.mubr.bf16.mxu0 %v16407_v30  ;;  %vm19337_vm13 = vmmov %vm19336_vm9 }
0x2716   : > { %v10919_v16 = vpop.f32.mrb[60].mxu0 }
0x2717   : > { %v10921_v17 = vpop.f32.mrb[61].mxu0 }
0x2718   : > { %v10923_v19 = vpop.f32.mrb[62].mxu0 }
0x2719   : > { %v10971_v20 = vpack.c.bf16 %v10923_v19, %v10919_v16  ;;  %v10925_v22 = vpop.f32.mrb[63].mxu0 }
0x271a   : > { %v10972_v23 = vpack.c.bf16 %v10925_v22, %v10921_v17 }
0x271b   : > { %10979 = vrot.lane.b32.xlu1 %v10971_v20, %s16406_s15 }
0x271c   : > { %10981 = vrot.lane.b32.xlu0 %v10972_v23, %s16406_s15 }
0x2736   : > { %v10962_v24 = vpop.f32.mrb[64].mxu0 }
0x2737   : > { %v10964_v45 = vpop.f32.mrb[65].mxu0 }
0x2738   : > { %v10966_v25 = vpop.f32.mrb[66].mxu0 }
0x2739   : > { %v10973_v57 = vpack.c.bf16 %v10966_v25, %v10962_v24  ;;  %v10968_v62 = vpop.f32.mrb[67].mxu0  ;;  %v16363_v24 = vld [vmem:[%s19196_s1 + $0x374] sm:$0x3c]  }
0x273a   : > { %v10974_v26 = vpack.c.bf16 %v10968_v62, %v10964_v45 }
0x273b   : > { %10983 = vrot.lane.b32.xlu1 %v10973_v57, %s16406_s15 }
0x273c   : > { %10985 = vrot.lane.b32.xlu0 %v10974_v26, %s16406_s15 }
0x278d   : > { %v10980_v29 = vpop.permute.xlu1 %10979 }
0x278e   : > { %v10996_v34 = vsel %vm17210_vm15, %v10980_v29, %v10995_v8  ;;  %v10982_v35 = vpop.permute.xlu0 %10981  ;;  %vm11008_vm15 = vcmask 5120   ;;  %v11163_v8 = vrot.slane %v16363_v24, 2 }
0x278f   : > { %10997 = vst [vmem:[#allocation2] sm:$0x3f] %v10996_v34  ;;  %v10987_v33 = vsel %vm19331_vm7, %v10980_v29, %v10982_v35  ;;  %vm11009_vm3 = vmand %vm11008_vm15, %vm19332_vm10 }
0x2790   : > { %v11000_v36 = vsel %vm18720_vm2, %v10987_v33, %v10999_v32 }
0x2791   : > { %11001 = vst [vmem:[#allocation2 + $0x8] sm:$0x3f] %v11000_v36 }
0x2796   : > { %v11013_v37 = vld [vmem:[#allocation2] sm:$0x3f] }
0x2797   : > { %v11014_v38 = vsel %vm17225_vm6, 0, %v11013_v37  ;;  %vm19334_vm6 = vmmov %vm19331_vm7 }
0x2798   : > { %11015 = vst [vmem:[#allocation2] sm:$0x3f] %v11014_v38  ;;  %v11022_v40 = vld [vmem:[#allocation2 + $0x8] sm:$0x3f] }
0x2799   : > { %11047 = vrot.lane.b32.xlu1 %v11022_v40, %s16421_s24 }
0x279f   : > { %v11021_v42 = vld [vmem:[#allocation2] sm:$0x3f] }
0x27a0   : > { %11045 = vrot.lane.b32.xlu1 %v11021_v42, %s16421_s24 }
0x27ad   : > { %v10984_v41 = vpop.permute.xlu1 %10983 }
0x27ae   : > { %v10988_v43 = vsel %vm19333_vm8, %v10982_v35, %v10984_v41  ;;  %v10986_v44 = vpop.permute.xlu0 %10985 }
0x27af   : > { %v11003_v53 = vsel %vm18720_vm2, %v10988_v43, %v11002_v48  ;;  %v10989_v49 = vsel %vm19334_vm6, %v10984_v41, %v10986_v44  ;;  %v11011_v50 = vsel %vm11009_vm3, %v10986_v44, %v11010_v46  ;;  %v16364_v41 = vld [vmem:[%s19196_s1 + $0x378] sm:$0x3c]   ;;  %vm19344_vm3 = vcmask 1006592  }
0x27b0   : > { %11004 = vst [vmem:[#allocation2 + $0x10] sm:$0x3f] %v11003_v53  ;;  %v11006_v51 = vsel %vm18720_vm2, %v10989_v49, %v11005_v47  ;;  %11012 = vst [vmem:[#allocation2 + $0x20] sm:$0x3f] %v11011_v50  ;;  %v11286_v53 = vrot.slane %v16364_v41, 2 }
0x27b1   : > { %11007 = vst [vmem:[#allocation2 + $0x18] sm:$0x3f] %v11006_v51  ;;  %vm19339_vm2 = vmmov %vm19336_vm9 }
0x27b2   : > { %vm19342_vm15 = vmmov %vm19339_vm2 }
0x27b3   : > { %vm19345_vm8 = vmmov %vm19339_vm2 }
0x27b4   : > { %vm19346_vm6 = vmmov %vm19344_vm3 }
0x27b5   : > { %vm19347_vm0 = vmmov %vm19344_vm3 }
0x27b6   : > { %vm19348_vm11 = vmmov %vm19339_vm2 }
0x27b7   : > { %v11018_v52 = vld [vmem:[#allocation2 + $0x20] sm:$0x3f]  ;;  %v11023_v54 = vld [vmem:[#allocation2 + $0x10] sm:$0x3f] }
0x27b8   : > { %v11019_v55 = vsel %vm11017_vm14, 0, %v11018_v52  ;;  %11049 = vrot.lane.b32.xlu0 %v11023_v54, %s16421_s24  ;;  %v11024_v56 = vld [vmem:[#allocation2 + $0x18] sm:$0x3f]  ;;  %vm19349_vm14 = vmmov %vm19347_vm0 }
0x27b9   : > { %11020 = vst [vmem:[#allocation2 + $0x20] sm:$0x3f] %v11019_v55 }
0x27bc   : > { %11051 = vrot.lane.b32.xlu0 %v11024_v56, %s16421_s24 }
0x27c0   : > { %11166 = vrot.lane.b32.xlu0 %v11022_v40, %s19275_s23  ;;  %v11025_v58 = vld [vmem:[#allocation2 + $0x20] sm:$0x3f] }
0x27c1   : > { %11053 = vrot.lane.b32.xlu1 %v11025_v58, %s16421_s24 }
0x27c4   : > { %11164 = vrot.lane.b32.xlu0 %v11021_v42, %s19275_s23 }
0x27c5   : > { %11168 = vrot.lane.b32.xlu1 %v11023_v54, %s19275_s23 }
0x27c8   : > { %11172 = vrot.lane.b32.xlu0 %v11025_v58, %s19275_s23 }
0x27c9   : > { %11170 = vrot.lane.b32.xlu1 %v11024_v56, %s19275_s23 }
0x27cc   : > { %11291 = vrot.lane.b32.xlu0 %v11023_v54, %s19276_s25 }
0x27cd   : > { %11289 = vrot.lane.b32.xlu1 %v11022_v40, %s19276_s25 }
0x27d0   : > { %11293 = vrot.lane.b32.xlu0 %v11024_v56, %s19276_s25 }
0x27d1   : > { %11287 = vrot.lane.b32.xlu1 %v11021_v42, %s19276_s25 }
0x27d4   : > { %11412 = vrot.lane.b32.xlu0 %v11022_v40, %s16408_s16 }
0x27d5   : > { %11295 = vrot.lane.b32.xlu1 %v11025_v58, %s19276_s25 }
0x27d8   : > { %11410 = vrot.lane.b32.xlu0 %v11021_v42, %s16408_s16 }
0x27d9   : > { %11414 = vrot.lane.b32.xlu1 %v11023_v54, %s16408_s16 }
0x27dc   : > { %11418 = vrot.lane.b32.xlu0 %v11025_v58, %s16408_s16 }
0x27dd   : > { %11416 = vrot.lane.b32.xlu1 %v11024_v56, %s16408_s16 }
0x27e0   : > { %11537 = vrot.lane.b32.xlu0 %v11023_v54, %s16409_s17 }
0x27e1   : > { %11535 = vrot.lane.b32.xlu1 %v11022_v40, %s16409_s17 }
0x27e4   : > { %11539 = vrot.lane.b32.xlu0 %v11024_v56, %s16409_s17 }
0x27e5   : > { %11533 = vrot.lane.b32.xlu1 %v11021_v42, %s16409_s17 }
0x27e8   : > { %11658 = vrot.lane.b32.xlu0 %v11022_v40, %s16410_s18 }
0x27e9   : > { %11541 = vrot.lane.b32.xlu1 %v11025_v58, %s16409_s17 }
0x27ec   : > { %11656 = vrot.lane.b32.xlu0 %v11021_v42, %s16410_s18 }
0x27ed   : > { %11660 = vrot.lane.b32.xlu1 %v11023_v54, %s16410_s18 }
0x27f0   : > { %11664 = vrot.lane.b32.xlu0 %v11025_v58, %s16410_s18 }
0x27f1   : > { %11662 = vrot.lane.b32.xlu1 %v11024_v56, %s16410_s18 }
0x27f4   : > { %11783 = vrot.lane.b32.xlu0 %v11023_v54, %s16411_s19 }
0x27f5   : > { %11781 = vrot.lane.b32.xlu1 %v11022_v40, %s16411_s19 }
0x27f8   : > { %11785 = vrot.lane.b32.xlu0 %v11024_v56, %s16411_s19 }
0x27f9   : > { %11779 = vrot.lane.b32.xlu1 %v11021_v42, %s16411_s19 }
0x27fc   : > { %11031 = vperm.xlu0 %16099, %v11028_v59  }
0x27fd   : > { %11787 = vrot.lane.b32.xlu1 %v11025_v58, %s16411_s19 }
0x2800   : > { %11931 = vrot.lane.b32.xlu0 %v11927_v60, %s16406_s15 }
0x280b   : > { %v11048_v61 = vpop.permute.xlu1 %11047 }
0x2812   : > { %v11046_v63 = vpop.permute.xlu1 %11045 }
0x2813   : > { %v11055_v0 = vsel %vm9660_vm4, %v11046_v63, %v11048_v61 }
0x2814   : > { %v11063_v5 = vand.u32 %v11055_v0, %v17282_v9 }
0x282a   : > { %v11050_v1 = vpop.permute.xlu0 %11049 }
0x282b   : > { %v11056_v3 = vsel %vm9660_vm4, %v11048_v61, %v11050_v1  ;;  %v16365_v61 = vld [vmem:[%s19196_s1 + $0x37c] sm:$0x3c]  }
0x282c   : > { %v11066_v4 = vand.u32 %v11056_v3, %v17282_v9  ;;  %v11409_v2 = vrot.slane %v16365_v61, 2 }
0x282e   : > { %11074 = vmatprep.subr.bf16.mxu1 %v11066_v4  ;;  %v11052_v39 = vpop.permute.xlu0 %11051 }
0x282f   : > { %11075 = vmatpush1.bf16.msra.mxu1 %v11063_v5  ;;  %v11057_v7 = vsel %vm9660_vm4, %v11050_v1, %v11052_v39 }
0x2830   : > { %v11069_v13 = vand.u32 %v11057_v7, %v17282_v9 }
0x2832   : > { %v11167_v6 = vpop.permute.xlu0 %11166  ;;  %14282 = vmatmul.mubr.msk.bf16.vlgmr.msra.gmra.mrb[44].mxu1 %vm19336_vm9, %v11039_v18  ;;  %vm19350_vm9 = vcmask 998400  }
0x2833   : > { %v11054_v10 = vpop.permute.xlu1 %11053  ;;  %11147 = vmatprep.mubr.bf16.mxu1 %v16407_v30 }
0x2834   : > { %v11058_v11 = vsel %vm9660_vm4, %v11052_v39, %v11054_v10  ;;  %vm19338_vm4 = vcmask 1014784  }
0x2835   : > { %v11072_v12 = vand.u32 %v11058_v11, %v17282_v9  ;;  %vm19340_vm7 = vmmov %vm19338_vm4 }
0x2836   : > { %v11165_v14 = vpop.permute.xlu0 %11164 }
0x2837   : > { %v11174_v15 = vsel %vm9726_vm1, %v11165_v14, %v11167_v6  ;;  %v11169_v16 = vpop.permute.xlu1 %11168  ;;  %11115 = vmatprep.subr.bf16.mxu1 %v11072_v12 }
0x2838   : > { %v11175_v17 = vsel %vm9726_vm1, %v11167_v6, %v11169_v16  ;;  %11116 = vmatpush1.bf16.msra.mxu1 %v11069_v13  ;;  %v11182_v20 = vand.u32 %v11174_v15, %v17282_v9  ;;  %v16366_v13 = vld [vmem:[%s19196_s1 + $0x380] sm:$0x3c]  }
0x2839   : > { %v11185_v19 = vand.u32 %v11175_v17, %v17282_v9 }
0x283a   : > { %v11173_v22 = vpop.permute.xlu0 %11172 }
0x283b   : > { %v11171_v23 = vpop.permute.xlu1 %11170  ;;  %14283 = vmatmul.mubr.msk.bf16.vlgmr.msra.gmra.mrb[48].mxu1 %vm19337_vm13, %v11039_v18  ;;  %11193 = vmatprep.subr.bf16.mxu1 %v11185_v19  ;;  %vm19351_vm13 = vmmov %vm19339_vm2 }
0x283c   : > { %v11177_v45 = vsel %vm9726_vm1, %v11171_v23, %v11173_v22  ;;  %11194 = vmatpush1.bf16.msra.mxu1 %v11182_v20  ;;  %11225 = vmatprep.mubr.bf16.mxu1 %v16407_v30  ;;  %v11176_v62 = vsel %vm9726_vm1, %v11169_v16, %v11171_v23  ;;  %vm19341_vm1 = vmmov %vm19338_vm4  ;;  %v11532_v16 = vrot.slane %v16366_v13, 2 }
0x283d   : > { %v11191_v25 = vand.u32 %v11177_v45, %v17282_v9  ;;  %v11188_v32 = vand.u32 %v11176_v62, %v17282_v9  ;;  %vm19343_vm10 = vmmov %vm19341_vm1 }
0x283e   : > { %v11292_v57 = vpop.permute.xlu0 %11291 }
0x283f   : > { %v11290_v26 = vpop.permute.xlu1 %11289  ;;  %11234 = vmatprep.subr.bf16.mxu1 %v11191_v25 }
0x2840   : > { %v11298_v29 = vsel %vm19338_vm4, %v11290_v26, %v11292_v57  ;;  %vm19352_vm4 = vmmov %vm19350_vm9 }
0x2841   : > { %v11308_v31 = vand.u32 %v11298_v29, %v17282_v9  ;;  %v16367_v29 = vld [vmem:[%s19196_s1 + $0x384] sm:$0x3c]  }
0x2842   : > { %v11294_v34 = vpop.permute.xlu0 %11293 }
0x2843   : > { %v11288_v35 = vpop.permute.xlu1 %11287  ;;  %14285 = vmatmul.mubr.msk.bf16.vlgmr.msra.gmra.mrb[44].mxu1 %vm19339_vm2, %v11163_v8  ;;  %v11299_v44 = vsel %vm19343_vm10, %v11292_v57, %v11294_v34  ;;  %vm19353_vm2 = vmmov %vm19352_vm4 }
0x2844   : > { %11235 = vmatpush1.bf16.msra.mxu1 %v11188_v32  ;;  %11266 = vmatprep.mubr.bf16.mxu1 %v16407_v30  ;;  %v11297_v36 = vsel %vm19340_vm7, %v11288_v35, %v11290_v26  ;;  %v11311_v49 = vand.u32 %v11299_v44, %v17282_v9  ;;  %vm19354_vm7 = vmmov %vm19345_vm8  ;;  %v11655_v35 = vrot.slane %v16367_v29, 2 }
0x2845   : > { %11316 = vmatprep.subr.bf16.mxu1 %v11308_v31  ;;  %v11305_v42 = vand.u32 %v11297_v36, %v17282_v9  ;;  %vm19357_vm10 = vmmov %vm19354_vm7 }
0x2846   : > { %v11413_v33 = vpop.permute.xlu0 %11412 }
0x2847   : > { %v11296_v37 = vpop.permute.xlu1 %11295 }
0x2848   : > { %v11300_v38 = vsel %vm19341_vm1, %v11294_v34, %v11296_v37  ;;  %vm19355_vm1 = vmmov %vm19353_vm2 }
0x2849   : > { %v11314_v40 = vand.u32 %v11300_v38, %v17282_v9 }
0x284a   : > { %v11411_v46 = vpop.permute.xlu0 %11410 }
0x284b   : > { %14286 = vmatmul.mubr.msk.bf16.vlgmr.msra.gmra.mrb[48].mxu1 %vm19342_vm15, %v11163_v8  ;;  %v11415_v48 = vpop.permute.xlu1 %11414  ;;  %v11420_v54 = vsel %vm19346_vm6, %v11411_v46, %v11413_v33  ;;  %vm19356_vm15 = vcmask 990208   ;;  %vm19360_vm6 = vmmov %vm19354_vm7 }
0x284c   : > { %11317 = vmatpush1.bf16.msra.mxu1 %v11305_v42  ;;  %11348 = vmatprep.mubr.bf16.mxu1 %v16407_v30  ;;  %v11421_v47 = vsel %vm19344_vm3, %v11413_v33, %v11415_v48  ;;  %v11428_v59 = vand.u32 %v11420_v54, %v17282_v9  ;;  %vm19358_vm3 = vmmov %vm19356_vm15 }
0x284d   : > { %11357 = vmatprep.subr.bf16.mxu1 %v11314_v40  ;;  %v11431_v52 = vand.u32 %v11421_v47, %v17282_v9 }
0x284e   : > { %v11419_v43 = vpop.permute.xlu0 %11418 }
0x284f   : > { %v11417_v50 = vpop.permute.xlu1 %11416 }
0x2850   : > { %v11423_v55 = vsel %vm19347_vm0, %v11417_v50, %v11419_v43  ;;  %v11422_v63 = vsel %vm19349_vm14, %v11415_v48, %v11417_v50  ;;  %vm11947_vm0 = vcmask 1047620   ;;  %vm19362_vm14 = vcmask 982016   ;;  %v16368_v48 = vld [vmem:[%s19196_s1 + $0x388] sm:$0x3c]  }
0x2851   : > { %v11437_v60 = vand.u32 %v11423_v55, %v17282_v9  ;;  %v11434_v4 = vand.u32 %v11422_v63, %v17282_v9  ;;  %v11778_v44 = vrot.slane %v16368_v48, 2  ;;  %v11929_v63 = vrot.slane %v16840_v27, 4 }
0x2852   : > { %v11538_v51 = vpop.permute.xlu0 %11537 }
0x2853   : > { %14288 = vmatmul.mubr.msk.bf16.vlgmr.msra.gmra.mrb[44].mxu1 %vm19345_vm8, %v11286_v53  ;;  %v11536_v56 = vpop.permute.xlu1 %11535  ;;  %vm19359_vm8 = vmmov %vm19358_vm3 }
0x2854   : > { %11358 = vmatpush1.bf16.msra.mxu1 %v11311_v49  ;;  %11389 = vmatprep.mubr.bf16.mxu1 %v16407_v30  ;;  %v11544_v3 = vsel %vm19350_vm9, %v11536_v56, %v11538_v51  ;;  %vm19363_vm9 = vmmov %vm19360_vm6 }
0x2855   : > { %11439 = vmatprep.subr.bf16.mxu1 %v11431_v52  ;;  %v11554_v5 = vand.u32 %v11544_v3, %v17282_v9 }
0x2856   : > { %v11540_v58 = vpop.permute.xlu0 %11539 }
0x2857   : > { %v11534_v0 = vpop.permute.xlu1 %11533  ;;  %v11545_v15 = vsel %vm19355_vm1, %v11538_v51, %v11540_v58 }
0x2858   : > { %v11543_v6 = vsel %vm19352_vm4, %v11534_v0, %v11536_v56  ;;  %v11557_v20 = vand.u32 %v11545_v15, %v17282_v9 }
0x2859   : > { %v11551_v10 = vand.u32 %v11543_v6, %v17282_v9 }
0x285a   : > { %v11659_v1 = vpop.permute.xlu0 %11658 }
0x285b   : > { %14289 = vmatmul.mubr.msk.bf16.vlgmr.msra.gmra.mrb[48].mxu1 %vm19348_vm11, %v11286_v53  ;;  %v11542_v39 = vpop.permute.xlu1 %11541  ;;  %vm19361_vm11 = vmmov %vm19358_vm3 }
0x285c   : > { %11440 = vmatpush1.bf16.msra.mxu1 %v11428_v59  ;;  %11471 = vmatprep.mubr.bf16.mxu1 %v16407_v30  ;;  %v11546_v7 = vsel %vm19353_vm2, %v11540_v58, %v11542_v39  ;;  %vm19366_vm2 = vmmov %vm19360_vm6  ;;  %v11928_v39 = vrot.slane %v16834_v21, 4 }
0x285d   : > { %11480 = vmatprep.subr.bf16.mxu1 %v11437_v60  ;;  %v11560_v11 = vand.u32 %v11546_v7, %v17282_v9  ;;  %vm19368_vm1 = vmmov %vm19366_vm2 }
0x285e   : > { %v11657_v18 = vpop.permute.xlu0 %11656 }
0x285f   : > { %v11661_v14 = vpop.permute.xlu1 %11660  ;;  %v11666_v24 = vsel %vm19358_vm3, %v11657_v18, %v11659_v1  ;;  %vm19371_vm3 = vcmask 64512  }
0x2860   : > { %v11667_v17 = vsel %vm19356_vm15, %v11659_v1, %v11661_v14  ;;  %v11674_v62 = vand.u32 %v11666_v24, %v17282_v9  ;;  %vm19369_vm15 = vmmov %vm19368_vm1 }
0x2861   : > { %v11677_v22 = vand.u32 %v11667_v17, %v17282_v9 }
0x2862   : > { %v11665_v12 = vpop.permute.xlu0 %11664 }
0x2863   : > { %14291 = vmatmul.mubr.msk.bf16.vlgmr.msra.gmra.mrb[44].mxu1 %vm19351_vm13, %v11409_v2  ;;  %v11663_v23 = vpop.permute.xlu1 %11662  ;;  %vm19364_vm13 = vmmov %vm19362_vm14 }
0x2864   : > { %11481 = vmatpush1.bf16.msra.mxu1 %v11434_v4  ;;  %11512 = vmatprep.mubr.bf16.mxu1 %v16407_v30  ;;  %v11669_v25 = vsel %vm19359_vm8, %v11663_v23, %v11665_v12  ;;  %v11668_v31 = vsel %vm19361_vm11, %v11661_v14, %v11663_v23  ;;  %vm19365_vm4 = vmmov %vm19364_vm13 }
0x2865   : > { %11562 = vmatprep.subr.bf16.mxu1 %v11554_v5  ;;  %v11683_v26 = vand.u32 %v11669_v25, %v17282_v9  ;;  %v11680_v36 = vand.u32 %v11668_v31, %v17282_v9  ;;  %v11930_v5 = vrot.slane %v16842_v28, 4  ;;  %vm19372_vm8 = vmmov %vm19371_vm3  ;;  %v11963_v25 = vld [vmem:[%s19197_s2 + $0x104] sm:$0xff] }
0x2866   : > { %v11784_v19 = vpop.permute.xlu0 %11783 }
0x2867   : > { %v11782_v57 = vpop.permute.xlu1 %11781 }
0x2868   : > { %v11790_v33 = vsel %vm19362_vm14, %v11782_v57, %v11784_v19 }
0x2869   : > { %v11800_v37 = vand.u32 %v11790_v33, %v17282_v9 }
0x286a   : > { %v11786_v45 = vpop.permute.xlu0 %11785 }
0x286b   : > { %14292 = vmatmul.mubr.msk.bf16.vlgmr.msra.gmra.mrb[48].mxu1 %vm19354_vm7, %v11409_v2  ;;  %v11780_v32 = vpop.permute.xlu1 %11779  ;;  %vm19367_vm7 = vmmov %vm19365_vm4 }
0x286c   : > { %11563 = vmatpush1.bf16.msra.mxu1 %v11551_v10  ;;  %11594 = vmatprep.mubr.bf16.mxu1 %v16407_v30  ;;  %v11789_v40 = vsel %vm19364_vm13, %v11780_v32, %v11782_v57  ;;  %v11791_v43 = vsel %vm19367_vm7, %v11784_v19, %v11786_v45  ;;  %vm19383_vm7 = vcmask 130048  }
0x286d   : > { %11603 = vmatprep.subr.bf16.mxu1 %v11560_v11  ;;  %v11797_v46 = vand.u32 %v11789_v40, %v17282_v9  ;;  %v11803_v53 = vand.u32 %v11791_v43, %v17282_v9 }
0x286f   : > { %v11788_v38 = vpop.permute.xlu1 %11787 }
0x2870   : > { %v11792_v42 = vsel %vm19365_vm4, %v11786_v45, %v11788_v38  ;;  %vm19378_vm4 = vcmask 52224  }
0x2871   : > { %v11806_v41 = vand.u32 %v11792_v42, %v17282_v9 }
0x2873   : > { %14294 = vmatmul.mubr.msk.bf16.vlgmr.msra.gmra.mrb[44].mxu1 %vm19357_vm10, %v11532_v16  ;;  %vm19370_vm10 = vcmask 1043520  }
0x2874   : > { %11604 = vmatpush1.bf16.msra.mxu1 %v11557_v20  ;;  %11635 = vmatprep.mubr.bf16.mxu1 %v16407_v30 }
0x2875   : > { %11685 = vmatprep.subr.bf16.mxu1 %v11677_v22 }
0x287b   : > { %14295 = vmatmul.mubr.msk.bf16.vlgmr.msra.gmra.mrb[48].mxu1 %vm19360_vm6, %v11532_v16  ;;  %v11032_v8 = vpop.permute.xlu0 %11031  ;;  %vm11952_vm6 = vcmask 56324  }
0x287c   : > { %11686 = vmatpush1.bf16.msra.mxu1 %v11674_v62  ;;  %11717 = vmatprep.mubr.bf16.mxu1 %v16407_v30 }
0x287d   : > { %11726 = vmatprep.subr.bf16.mxu1 %v11683_v26 }
0x287f   : > { %v18864_v34 = vpop.permute.xlu0 %11931 }
0x2880   : > { %11948 = vst.msk [vmem:[#allocation2] sm:$0xf0] %vm11947_vm0, %v18864_v34  ;;  %vm19373_vm0 = vmmov %vm19371_vm3 }
0x2881   : > { %vm19374_vm11 = vmmov %vm19373_vm0 }
0x2882   : > { %vm19375_vm14 = vmmov %vm19373_vm0 }
0x2883   : > { %14297 = vmatmul.mubr.msk.bf16.vlgmr.msra.gmra.mrb[44].mxu1 %vm19363_vm9, %v11655_v35  ;;  %vm19376_vm9 = vmmov %vm19373_vm0 }
0x2884   : > { %11727 = vmatpush1.bf16.msra.mxu1 %v11680_v36  ;;  %11758 = vmatprep.mubr.bf16.mxu1 %v16407_v30  ;;  %vm19377_vm13 = vmmov %vm19373_vm0 }
0x2885   : > { %11808 = vmatprep.subr.bf16.mxu1 %v11800_v37 }
0x288b   : > { %14298 = vmatmul.mubr.msk.bf16.vlgmr.msra.gmra.mrb[48].mxu1 %vm19366_vm2, %v11655_v35 }
0x288c   : > { %11809 = vmatpush1.bf16.msra.mxu1 %v11797_v46  ;;  %11840 = vmatprep.mubr.bf16.mxu1 %v16407_v30 }
0x288d   : > { %11849 = vmatprep.subr.bf16.mxu1 %v11806_v41 }
0x2893   : > { %14300 = vmatmul.mubr.msk.bf16.vlgmr.msra.gmra.mrb[44].mxu1 %vm19368_vm1, %v11778_v44 }
0x2894   : > { %11850 = vmatpush1.bf16.msra.mxu1 %v11803_v53  ;;  %11881 = vmatprep.mubr.bf16.mxu1 %v16407_v30 }
0x289b   : > { %14301 = vmatmul.mubr.msk.bf16.vlgmr.msra.gmra.mrb[48].mxu1 %vm19369_vm15, %v11778_v44  ;;  %v16370_v44 = vld [vmem:[%s19196_s1 + $0x390] sm:$0x3c]  }
0x289c   : > { %12890 = vmatprep.mubr.bf16.mxu1 %v16407_v30 }
0x2966   : > { %v11842_v47 = vpop.f32.mrb[44].mxu1 }
0x2967   : > { %v15443_v49 = vadd.f32 %v11842_v47, %v11032_v8  ;;  %v11844_v50 = vpop.f32.mrb[45].mxu1  ;;  %v12090_v47 = vrot.slane %v16370_v44, 2 }
0x2968   : > { %v15444_v51 = vadd.f32 %v11844_v50, %v11032_v8  ;;  %v11846_v52 = vpop.f32.mrb[46].mxu1 }
0x2969   : > { %v11894_v54 = vmax.f32 %v15443_v49, 0.0  ;;  %v11847_v55 = vpop.f32.mrb[47].mxu1 }
0x296a   : > { %v11895_v56 = vmax.f32 %v15444_v51, 0.0 }
0x296b   : > { %v11898_v58 = vpack.c.bf16 %v11894_v54, %v11894_v54 }
0x296c   : > { %v11899_v59 = vpack.c.bf16 %v11895_v56, %v11895_v56 }
0x296d   : > { %11906 = vrot.lane.b32.xlu1 %v11898_v58, %s16406_s15  ;;  %v16371_v58 = vld [vmem:[%s19196_s1 + $0x394] sm:$0x3c]  }
0x296e   : > { %v11883_v9 = vpop.f32.mrb[48].mxu1  ;;  %11908 = vrot.lane.b32.xlu0 %v11899_v59, %s16406_s15 }
0x296f   : > { %v15445_v60 = vadd.f32 %v11883_v9, %v11032_v8  ;;  %v11885_v61 = vpop.f32.mrb[49].mxu1 }
0x2970   : > { %v11887_v0 = vpop.f32.mrb[50].mxu1  ;;  %v15446_v4 = vadd.f32 %v11885_v61, %v11032_v8  ;;  %v16369_v8 = vld [vmem:[%s19196_s1 + $0x38c] sm:$0x3c]  }
0x2971   : > { %v11896_v1 = vmax.f32 %v15445_v60, 0.0  ;;  %v11888_v2 = vpop.f32.mrb[51].mxu1  ;;  %v12205_v60 = vrot.slane %v16371_v58, 2 }
0x2972   : > { %11935 = vrot.lane.b32.xlu0 %v11929_v63, %s16406_s15  ;;  %v11897_v18 = vmax.f32 %v15446_v4, 0.0 }
0x2973   : > { %v11900_v3 = vpack.c.bf16 %v11896_v1, %v11896_v1 }
0x2974   : > { %v11901_v6 = vpack.c.bf16 %v11897_v18, %v11897_v18 }
0x2975   : > { %11910 = vrot.lane.b32.xlu1 %v11900_v3, %s16406_s15 }
0x2976   : > { %11937 = vrot.lane.b32.xlu0 %v11930_v5, %s16406_s15  ;;  %v16372_v5 = vld [vmem:[%s19196_s1 + $0x398] sm:$0x3c]  }
0x2979   : > { %11933 = vrot.lane.b32.xlu1 %v11928_v39, %s16406_s15 }
0x297d   : > { %11912 = vrot.lane.b32.xlu1 %v11901_v6, %s16406_s15  ;;  %v12320_v6 = vrot.slane %v16372_v5, 2 }
0x29df   : > { %v11907_v27 = vpop.permute.xlu1 %11906 }
0x29e0   : > { %11922 = vst.msk [vmem:[#allocation2] sm:$0xf] %vm19370_vm10, %v11907_v27  ;;  %v11909_v7 = vpop.permute.xlu0 %11908  ;;  %vm19386_vm10 = vcmask 998400  }
0x29e1   : > { %11954 = vst.msk [vmem:[#allocation2] sm:$0xff] %vm19371_vm3, %v16407_v30  ;;  %v11914_v28 = vsel %vm19372_vm8, %v11907_v27, %v11909_v7  ;;  %vm19387_vm3 = vmmov %vm19386_vm10 }
0x29e2   : > { %11923 = vst [vmem:[#allocation2 + $0x8] sm:$0xf] %v11914_v28  ;;  %vm19388_vm8 = vmmov %vm19383_vm7 }
0x29e4   : > { %v11936_v10 = vpop.permute.xlu0 %11935 }
0x29e7   : > { %v11911_v11 = vpop.permute.xlu1 %11910 }
0x29e8   : > { %v11915_v21 = vsel %vm19373_vm0, %v11909_v7, %v11911_v11  ;;  %v11938_v12 = vpop.permute.xlu0 %11937  ;;  %v11956_v23 = vld [vmem:[#allocation2] sm:$0xff]  ;;  %vm19390_vm0 = vmmov %vm19387_vm3 }
0x29e9   : > { %11924 = vst [vmem:[#allocation2 + $0x10] sm:$0xf] %v11915_v21  ;;  %v11941_v13 = vsel %vm19374_vm11, %v11936_v10, %v11938_v12  ;;  %11953 = vst.msk [vmem:[#allocation2 + $0x20] sm:$0xf0] %vm11952_vm6, %v11938_v12 }
0x29ea   : > { %11951 = vst [vmem:[#allocation2 + $0x18] sm:$0xf0] %v11941_v13  ;;  %vm19389_vm6 = vmmov %vm19387_vm3  ;;  %v16373_v13 = vld [vmem:[%s19196_s1 + $0x39c] sm:$0x3c]  }
0x29eb   : > { %v11934_v14 = vpop.permute.xlu1 %11933  ;;  %vm19391_vm11 = vmmov %vm19383_vm7 }
0x29ec   : > { %v11939_v15 = vsel %vm19375_vm14, %v18864_v34, %v11934_v14  ;;  %v11940_v16 = vsel %vm19376_vm9, %v11934_v14, %v11936_v10  ;;  %v11974_v34 = vrot.slane %v16369_v8, 2  ;;  %vm19392_vm14 = vcmask 990208  }
0x29ed   : > { %11949 = vst [vmem:[#allocation2 + $0x8] sm:$0xf0] %v11939_v15  ;;  %11950 = vst [vmem:[#allocation2 + $0x10] sm:$0xf0] %v11940_v16  ;;  %v12435_v16 = vrot.slane %v16373_v13, 2 }
0x29ee   : > { %vm19393_vm9 = vmmov %vm19392_vm14 }
0x29ef   : > { %v11913_v17 = vpop.permute.xlu1 %11912 }
0x29f0   : > { %v11916_v19 = vsel %vm19377_vm13, %v11911_v11, %v11913_v17  ;;  %11926 = vst.msk [vmem:[#allocation2 + $0x20] sm:$0xf] %vm19378_vm4, %v11913_v17  ;;  %vm19394_vm13 = vmmov %vm19383_vm7 }
0x29f1   : > { %11925 = vst [vmem:[#allocation2 + $0x18] sm:$0xf] %v11916_v19  ;;  %11955 = vst.msk [vmem:[#allocation2 + $0x20] sm:$0xff] %vm10135_vm12, %v16407_v30  ;;  %vm19381_vm12 = vcmask 1006592  }
0x29f2   : > { %vm19382_vm2 = vmmov %vm19381_vm12 }
0x29f3   : > { %vm19384_vm1 = vmmov %vm19382_vm2 }
0x29f4   : > { %v11957_v20 = vld [vmem:[#allocation2 + $0x8] sm:$0xff]  ;;  %v11958_v22 = vld [vmem:[#allocation2 + $0x10] sm:$0xff]  ;;  %vm19385_vm15 = vmmov %vm19384_vm1 }
0x29f5   : > { %11982 = vrot.lane.b32.xlu1 %v11957_v20, %s16408_s16  ;;  %11984 = vrot.lane.b32.xlu0 %v11958_v22, %s16408_s16  ;;  %vm19395_vm4 = vmmov %vm19393_vm9 }
0x29f8   : > { %v11959_v24 = vld [vmem:[#allocation2 + $0x18] sm:$0xff]  ;;  %v11960_v45 = vld [vmem:[#allocation2 + $0x20] sm:$0xff] }
0x29f9   : > { %11980 = vrot.lane.b32.xlu1 %v11956_v23, %s16408_s16  ;;  %11986 = vrot.lane.b32.xlu0 %v11959_v24, %s16408_s16 }
0x29fd   : > { %11988 = vrot.lane.b32.xlu1 %v11960_v45, %s16408_s16  ;;  %12093 = vrot.lane.b32.xlu0 %v11957_v20, %s16409_s17 }
0x2a01   : > { %12095 = vrot.lane.b32.xlu1 %v11958_v22, %s16409_s17  ;;  %12091 = vrot.lane.b32.xlu0 %v11956_v23, %s16409_s17 }
0x2a05   : > { %12097 = vrot.lane.b32.xlu1 %v11959_v24, %s16409_s17  ;;  %12099 = vrot.lane.b32.xlu0 %v11960_v45, %s16409_s17 }
0x2a09   : > { %12208 = vrot.lane.b32.xlu1 %v11957_v20, %s16410_s18  ;;  %12210 = vrot.lane.b32.xlu0 %v11958_v22, %s16410_s18 }
0x2a0d   : > { %12206 = vrot.lane.b32.xlu1 %v11956_v23, %s16410_s18  ;;  %12212 = vrot.lane.b32.xlu0 %v11959_v24, %s16410_s18 }
0x2a11   : > { %12214 = vrot.lane.b32.xlu1 %v11960_v45, %s16410_s18  ;;  %12323 = vrot.lane.b32.xlu0 %v11957_v20, %s16411_s19 }
0x2a15   : > { %12325 = vrot.lane.b32.xlu1 %v11958_v22, %s16411_s19  ;;  %12321 = vrot.lane.b32.xlu0 %v11956_v23, %s16411_s19 }
0x2a19   : > { %12327 = vrot.lane.b32.xlu1 %v11959_v24, %s16411_s19  ;;  %12329 = vrot.lane.b32.xlu0 %v11960_v45, %s16411_s19 }
0x2a1d   : > { %12438 = vrot.lane.b32.xlu1 %v11957_v20, %s16412_s20  ;;  %12440 = vrot.lane.b32.xlu0 %v11958_v22, %s16412_s20 }
0x2a21   : > { %12436 = vrot.lane.b32.xlu1 %v11956_v23, %s16412_s20  ;;  %12442 = vrot.lane.b32.xlu0 %v11959_v24, %s16412_s20 }
0x2a25   : > { %12444 = vrot.lane.b32.xlu1 %v11960_v45, %s16412_s20  ;;  %12553 = vrot.lane.b32.xlu0 %v11957_v20, %s19379_s13 }
0x2a29   : > { %12555 = vrot.lane.b32.xlu1 %v11958_v22, %s19379_s13  ;;  %12551 = vrot.lane.b32.xlu0 %v11956_v23, %s19379_s13 }
0x2a2d   : > { %12557 = vrot.lane.b32.xlu1 %v11959_v24, %s19379_s13  ;;  %12559 = vrot.lane.b32.xlu0 %v11960_v45, %s19379_s13 }
0x2a31   : > { %12668 = vrot.lane.b32.xlu1 %v11957_v20, %s19380_s21  ;;  %12670 = vrot.lane.b32.xlu0 %v11958_v22, %s19380_s21 }
0x2a35   : > { %12666 = vrot.lane.b32.xlu1 %v11956_v23, %s19380_s21  ;;  %12672 = vrot.lane.b32.xlu0 %v11959_v24, %s19380_s21 }
0x2a39   : > { %12674 = vrot.lane.b32.xlu1 %v11960_v45, %s19380_s21  ;;  %11966 = vperm.xlu0 %16099, %v11963_v25   ;;  %v16374_v25 = vld [vmem:[%s19196_s1 + $0x3a0] sm:$0x3c]  }
0x2a67   : > { %v11983_v57 = vpop.permute.xlu1 %11982  ;;  %v11985_v62 = vpop.permute.xlu0 %11984 }
0x2a68   : > { %v11991_v26 = vsel %vm19381_vm12, %v11983_v57, %v11985_v62  ;;  %vm19396_vm12 = vmmov %vm19395_vm4 }
0x2a69   : > { %12001 = vmatprep.subr.bf16.mxu0 %v11991_v26  ;;  %v12550_v26 = vrot.slane %v16374_v25, 2  ;;  %v16377_v25 = vld [vmem:[%s19196_s1 + $0x3a8] sm:$0x18]  }
0x2a6b   : > { %v11981_v29 = vpop.permute.xlu1 %11980  ;;  %v11987_v31 = vpop.permute.xlu0 %11986 }
0x2a6c   : > { %v11990_v32 = vsel %vm19382_vm2, %v11981_v29, %v11983_v57  ;;  %v11992_v37 = vsel %vm19385_vm15, %v11985_v62, %v11987_v31  ;;  %vm19397_vm2 = vmmov %vm19383_vm7 }
0x2a6d   : > { %12002 = vmatpush1.bf16.msra.mxu0 %v11990_v32  ;;  %vm19400_vm15 = vmmov %vm19397_vm2 }
0x2a6f   : > { %v11989_v35 = vpop.permute.xlu1 %11988  ;;  %v12094_v33 = vpop.permute.xlu0 %12093 }
0x2a70   : > { %14303 = vmatmul.mubr.msk.bf16.vlgmr.msra.gmra.mrb[68].mxu0 %vm19383_vm7, %v11974_v34  ;;  %v11993_v36 = vsel %vm19384_vm1, %v11987_v31, %v11989_v35  ;;  %vm19398_vm7 = vcmask 982016  }
0x2a71   : > { %12042 = vmatprep.subr.bf16.mxu0 %v11993_v36  ;;  %12074 = vmatprep.mubr.bf16.mxu0 %v16407_v30  ;;  %vm19399_vm1 = vmmov %vm19398_vm7  ;;  %v16375_v36 = vld [vmem:[%s19196_s1 + $0x3a4] sm:$0x3c]  }
0x2a72   : > { %12043 = vmatpush1.bf16.msra.mxu0 %v11992_v37 }
0x2a73   : > { %v12096_v38 = vpop.permute.xlu1 %12095  ;;  %v12092_v40 = vpop.permute.xlu0 %12091 }
0x2a74   : > { %v12102_v42 = vsel %vm19386_vm10, %v12094_v33, %v12096_v38  ;;  %v12101_v48 = vsel %vm19387_vm3, %v12092_v40, %v12094_v33  ;;  %vm19401_vm10 = vmmov %vm19399_vm1 }
0x2a75   : > { %12112 = vmatprep.subr.bf16.mxu0 %v12102_v42  ;;  %vm19402_vm3 = vmmov %vm19399_vm1 }
0x2a77   : > { %v12098_v46 = vpop.permute.xlu1 %12097  ;;  %v12100_v41 = vpop.permute.xlu0 %12099 }
0x2a78   : > { %14304 = vmatmul.mubr.msk.bf16.vlgmr.msra.gmra.mrb[72].mxu0 %vm19388_vm8, %v11974_v34  ;;  %v12104_v43 = vsel %vm19389_vm6, %v12098_v46, %v12100_v41  ;;  %v12103_v50 = vsel %vm19390_vm0, %v12096_v38, %v12098_v46  ;;  %vm19403_vm8 = vmmov %vm19397_vm2  ;;  %vm19404_vm6 = vcmask 973824   ;;  %v12665_v38 = vrot.slane %v16375_v36, 2 }
0x2a79   : > { %12113 = vmatpush1.bf16.msra.mxu0 %v12101_v48  ;;  %12144 = vmatprep.mubr.bf16.mxu0 %v16407_v30  ;;  %vm19405_vm0 = vmmov %vm19404_vm6 }
0x2a7a   : > { %12153 = vmatprep.subr.bf16.mxu0 %v12104_v43 }
0x2a7b   : > { %v12209_v53 = vpop.permute.xlu1 %12208  ;;  %v12211_v49 = vpop.permute.xlu0 %12210 }
0x2a7c   : > { %v12217_v52 = vsel %vm19392_vm14, %v12209_v53, %v12211_v49  ;;  %vm19407_vm14 = vmmov %vm19405_vm0 }
0x2a7f   : > { %v12207_v51 = vpop.permute.xlu1 %12206  ;;  %v12213_v54 = vpop.permute.xlu0 %12212 }
0x2a80   : > { %14306 = vmatmul.mubr.msk.bf16.vlgmr.msra.gmra.mrb[68].mxu0 %vm19391_vm11, %v12090_v47  ;;  %v12216_v56 = vsel %vm19393_vm9, %v12207_v51, %v12209_v53  ;;  %v12218_v63 = vsel %vm19396_vm12, %v12211_v49, %v12213_v54  ;;  %vm19406_vm11 = vmmov %vm19397_vm2 }
0x2a81   : > { %12154 = vmatpush1.bf16.msra.mxu0 %v12103_v50  ;;  %12185 = vmatprep.mubr.bf16.mxu0 %v16407_v30  ;;  %vm19408_vm9 = vmmov %vm19405_vm0 }
0x2a82   : > { %12227 = vmatprep.subr.bf16.mxu0 %v12217_v52 }
0x2a83   : > { %v12215_v55 = vpop.permute.xlu1 %12214  ;;  %v12324_v9 = vpop.permute.xlu0 %12323 }
0x2a84   : > { %v12219_v59 = vsel %vm19395_vm4, %v12213_v54, %v12215_v55  ;;  %vm19410_vm4 = vcmask 965632  }
0x2a85   : > { %vm19411_vm12 = vmmov %vm19410_vm4 }
0x2a87   : > { %v12326_v61 = vpop.permute.xlu1 %12325  ;;  %v12322_v0 = vpop.permute.xlu0 %12321 }
0x2a88   : > { %14307 = vmatmul.mubr.msk.bf16.vlgmr.msra.gmra.mrb[72].mxu0 %vm19394_vm13, %v12090_v47  ;;  %v12332_v1 = vsel %vm19398_vm7, %v12324_v9, %v12326_v61  ;;  %v12331_v4 = vsel %vm19399_vm1, %v12322_v0, %v12324_v9  ;;  %vm19409_vm13 = vmmov %vm19397_vm2 }
0x2a89   : > { %12228 = vmatpush1.bf16.msra.mxu0 %v12216_v56  ;;  %12259 = vmatprep.mubr.bf16.mxu0 %v16407_v30  ;;  %vm19412_vm7 = vmmov %vm19410_vm4 }
0x2a8a   : > { %12268 = vmatprep.subr.bf16.mxu0 %v12219_v59  ;;  %vm19413_vm1 = vmmov %vm19410_vm4 }
0x2a8b   : > { %v12328_v2 = vpop.permute.xlu1 %12327  ;;  %v12330_v3 = vpop.permute.xlu0 %12329 }
0x2a8c   : > { %v12334_v39 = vsel %vm19401_vm10, %v12328_v2, %v12330_v3  ;;  %v12333_v7 = vsel %vm19402_vm3, %v12326_v61, %v12328_v2  ;;  %vm19415_vm10 = vcmask 957440  }
0x2a8d   : > { %vm19416_vm3 = vmmov %vm19415_vm10 }
0x2a8f   : > { %v12439_v18 = vpop.permute.xlu1 %12438  ;;  %v12441_v27 = vpop.permute.xlu0 %12440 }
0x2a90   : > { %14309 = vmatmul.mubr.msk.bf16.vlgmr.msra.gmra.mrb[68].mxu0 %vm19397_vm2, %v12205_v60  ;;  %v12447_v10 = vsel %vm19404_vm6, %v12439_v18, %v12441_v27  ;;  %vm19418_vm6 = vmmov %vm19416_vm3 }
0x2a91   : > { %12269 = vmatpush1.bf16.msra.mxu0 %v12218_v63  ;;  %12300 = vmatprep.mubr.bf16.mxu0 %v16407_v30 }
0x2a92   : > { %12342 = vmatprep.subr.bf16.mxu0 %v12332_v1 }
0x2a93   : > { %v12437_v28 = vpop.permute.xlu1 %12436  ;;  %v12443_v11 = vpop.permute.xlu0 %12442 }
0x2a94   : > { %v12446_v12 = vsel %vm19405_vm0, %v12437_v28, %v12439_v18  ;;  %v12448_v19 = vsel %vm19408_vm9, %v12441_v27, %v12443_v11  ;;  %vm19419_vm0 = vmmov %vm19416_vm3  ;;  %vm19422_vm9 = vcmask 1043520  }
0x2a97   : > { %v12445_v21 = vpop.permute.xlu1 %12444  ;;  %v12554_v15 = vpop.permute.xlu0 %12553 }
0x2a98   : > { %14310 = vmatmul.mubr.msk.bf16.vlgmr.msra.gmra.mrb[72].mxu0 %vm19400_vm15, %v12205_v60  ;;  %v12449_v14 = vsel %vm19407_vm14, %v12443_v11, %v12445_v21  ;;  %vm19414_vm15 = vmmov %vm19397_vm2 }
0x2a99   : > { %12343 = vmatpush1.bf16.msra.mxu0 %v12331_v4  ;;  %12374 = vmatprep.mubr.bf16.mxu0 %v16407_v30  ;;  %vm19421_vm14 = vmmov %vm19397_vm2 }
0x2a9a   : > { %12383 = vmatprep.subr.bf16.mxu0 %v12334_v39 }
0x2a9b   : > { %v12556_v17 = vpop.permute.xlu1 %12555  ;;  %v12552_v20 = vpop.permute.xlu0 %12551 }
0x2a9c   : > { %v12562_v22 = vsel %vm19410_vm4, %v12554_v15, %v12556_v17  ;;  %v12561_v45 = vsel %vm19411_vm12, %v12552_v20, %v12554_v15  ;;  %vm19424_vm4 = vcmask 64512  }
0x2a9d   : > { %vm19425_vm12 = vmmov %vm19424_vm4 }
0x2a9f   : > { %v12558_v23 = vpop.permute.xlu1 %12557  ;;  %v12560_v24 = vpop.permute.xlu0 %12559 }
0x2aa0   : > { %14312 = vmatmul.mubr.msk.bf16.vlgmr.msra.gmra.mrb[68].mxu0 %vm19403_vm8, %v12320_v6  ;;  %v12564_v57 = vsel %vm19412_vm7, %v12558_v23, %v12560_v24  ;;  %v12563_v29 = vsel %vm19413_vm1, %v12556_v17, %v12558_v23  ;;  %vm19417_vm8 = vmmov %vm19397_vm2  ;;  %vm19427_vm7 = vcmask 52224   ;;  %vm19428_vm1 = vcmask 117816  }
0x2aa1   : > { %12384 = vmatpush1.bf16.msra.mxu0 %v12333_v7  ;;  %12415 = vmatprep.mubr.bf16.mxu0 %v16407_v30 }
0x2aa2   : > { %12457 = vmatprep.subr.bf16.mxu0 %v12447_v10  ;;  %v12814_v10 = vld [vmem:[%s19197_s2 + $0x10c] sm:$0x7] }
0x2aa3   : > { %v12669_v62 = vpop.permute.xlu1 %12668  ;;  %v12671_v8 = vpop.permute.xlu0 %12670 }
0x2aa4   : > { %v12677_v32 = vsel %vm19415_vm10, %v12669_v62, %v12671_v8 }
0x2aa7   : > { %v12667_v31 = vpop.permute.xlu1 %12666  ;;  %v12673_v33 = vpop.permute.xlu0 %12672 }
0x2aa8   : > { %14313 = vmatmul.mubr.msk.bf16.vlgmr.msra.gmra.mrb[72].mxu0 %vm19406_vm11, %v12320_v6  ;;  %v12676_v35 = vsel %vm19416_vm3, %v12667_v31, %v12669_v62  ;;  %v12678_v40 = vsel %vm19419_vm0, %v12671_v8, %v12673_v33  ;;  %vm19420_vm11 = vmmov %vm19397_vm2  ;;  %vm19431_vm3 = vcmask 1043456   ;;  %v12948_v8 = vshrl.u32 %v16377_v25, 16 }
0x2aa9   : > { %12458 = vmatpush1.bf16.msra.mxu0 %v12446_v12  ;;  %12489 = vmatprep.mubr.bf16.mxu0 %v16407_v30  ;;  %v16376_v12 = vld [vmem:[%s19196_s1 + $0x3a8] ss:$0 sps:$4 sm:$0xcc]  }
0x2aaa   : > { %12498 = vmatprep.subr.bf16.mxu0 %v12449_v14  ;;  %v12950_v36 = vrot.slane %v12948_v8, 3 }
0x2aab   : > { %v12675_v34 = vpop.permute.xlu1 %12674 }
0x2aac   : > { %v12679_v37 = vsel %vm19418_vm6, %v12673_v33, %v12675_v34 }
0x2ab0   : > { %14315 = vmatmul.mubr.msk.bf16.vlgmr.msra.gmra.mrb[68].mxu0 %vm19409_vm13, %v12435_v16  ;;  %vm19423_vm13 = vcmask 60416  }
0x2ab1   : > { %12499 = vmatpush1.bf16.msra.mxu0 %v12448_v19  ;;  %12530 = vmatprep.mubr.bf16.mxu0 %v16407_v30  ;;  %v12823_v19 = vrot.slane %v16376_v12, 2 }
0x2ab2   : > { %12572 = vmatprep.subr.bf16.mxu0 %v12562_v22 }
0x2ab8   : > { %14316 = vmatmul.mubr.msk.bf16.vlgmr.msra.gmra.mrb[72].mxu0 %vm19397_vm2, %v12435_v16  ;;  %v11967_v42 = vpop.permute.xlu0 %11966  ;;  %vm19426_vm2 = vmmov %vm19424_vm4 }
0x2ab9   : > { %12573 = vmatpush1.bf16.msra.mxu0 %v12561_v45  ;;  %12604 = vmatprep.mubr.bf16.mxu0 %v16407_v30 }
0x2aba   : > { %12613 = vmatprep.subr.bf16.mxu0 %v12564_v57 }
0x2ac0   : > { %14318 = vmatmul.mubr.msk.bf16.vlgmr.msra.gmra.mrb[68].mxu0 %vm19414_vm15, %v12550_v26  ;;  %vm19429_vm15 = vcmask 1006592  }
0x2ac1   : > { %12614 = vmatpush1.bf16.msra.mxu0 %v12563_v29  ;;  %12645 = vmatprep.mubr.bf16.mxu0 %v16407_v30  ;;  %vm19430_vm10 = vmmov %vm19429_vm15  ;;  %v12951_v29 = vshll.u32 %v16377_v25, 16 }
0x2ac2   : > { %12687 = vmatprep.subr.bf16.mxu0 %v12677_v32  ;;  %vm19433_vm6 = vmmov %vm19430_vm10 }
0x2ac3   : > { %vm19434_vm0 = vmmov %vm19433_vm6 }
0x2ac8   : > { %14319 = vmatmul.mubr.msk.bf16.vlgmr.msra.gmra.mrb[72].mxu0 %vm19417_vm8, %v12550_v26  ;;  %vm19432_vm8 = vmmov %vm19431_vm3 }
0x2ac9   : > { %12688 = vmatpush1.bf16.msra.mxu0 %v12676_v35  ;;  %12719 = vmatprep.mubr.bf16.mxu0 %v16407_v30 }
0x2aca   : > { %12728 = vmatprep.subr.bf16.mxu0 %v12679_v37  ;;  %v12953_v37 = vrot.slane %v12951_v29, 4 }
0x2ad0   : > { %14321 = vmatmul.mubr.msk.bf16.vlgmr.msra.gmra.mrb[68].mxu0 %vm19420_vm11, %v12665_v38  ;;  %vm19435_vm11 = vmmov %vm19431_vm3 }
0x2ad1   : > { %12729 = vmatpush1.bf16.msra.mxu0 %v12678_v40  ;;  %12760 = vmatprep.mubr.bf16.mxu0 %v16407_v30 }
0x2ad8   : > { %14322 = vmatmul.mubr.msk.bf16.vlgmr.msra.gmra.mrb[72].mxu0 %vm19421_vm14, %v12665_v38  ;;  %vm19436_vm14 = vmmov %vm19426_vm2 }
0x2ba3   : > { %v12721_v46 = vpop.f32.mrb[68].mxu0 }
0x2ba4   : > { %v15447_v41 = vadd.f32 %v12721_v46, %v11967_v42  ;;  %v12723_v48 = vpop.f32.mrb[69].mxu0 }
0x2ba5   : > { %v15448_v43 = vadd.f32 %v12723_v48, %v11967_v42  ;;  %v12725_v44 = vpop.f32.mrb[70].mxu0 }
0x2ba6   : > { %v12773_v53 = vmax.f32 %v15447_v41, 0.0  ;;  %v12726_v47 = vpop.f32.mrb[71].mxu0 }
0x2ba7   : > { %v12774_v49 = vmax.f32 %v15448_v43, 0.0 }
0x2ba8   : > { %v12777_v50 = vpack.c.bf16 %v12773_v53, %v12773_v53 }
0x2ba9   : > { %v12778_v51 = vpack.c.bf16 %v12774_v49, %v12774_v49 }
0x2baa   : > { %12785 = vrot.lane.b32.xlu1 %v12777_v50, %s16406_s15 }
0x2bab   : > { %v12762_v52 = vpop.f32.mrb[72].mxu0  ;;  %12787 = vrot.lane.b32.xlu0 %v12778_v51, %s16406_s15  ;;  %v16378_v51 = vld [vmem:[%s19196_s1 + $0x3ac] ss:$0 sps:$4 sm:$0x66]  }
0x2bac   : > { %v15449_v54 = vadd.f32 %v12762_v52, %v11967_v42  ;;  %v12764_v55 = vpop.f32.mrb[73].mxu0 }
0x2bad   : > { %v15450_v56 = vadd.f32 %v12764_v55, %v11967_v42  ;;  %v12766_v58 = vpop.f32.mrb[74].mxu0  ;;  %v12954_v42 = vor.u32 %v12953_v37, %v12950_v36  ;;  %v13074_v55 = vrot.slane %v16378_v51, 1 }
0x2bae   : > { %v12775_v59 = vmax.f32 %v15449_v54, 0.0  ;;  %v12767_v9 = vpop.f32.mrb[75].mxu0 }
0x2baf   : > { %v12776_v60 = vmax.f32 %v15450_v56, 0.0  ;;  %v16379_v9 = vld [vmem:[%s19196_s1 + $0x3ac] ss:$0 sps:$4 sm:$0xcc]  }
0x2bb0   : > { %v12779_v61 = vpack.c.bf16 %v12775_v59, %v12775_v59 }
0x2bb1   : > { %v12780_v63 = vpack.c.bf16 %v12776_v60, %v12776_v60 }
0x2bb2   : > { %12789 = vrot.lane.b32.xlu1 %v12779_v61, %s16406_s15 }
0x2bb3   : > { %12791 = vrot.lane.b32.xlu0 %v12780_v63, %s16406_s15  ;;  %v13195_v63 = vshrl.u32 %v16379_v9, 16  ;;  %s332_s15 = scalar_lea.vmem %s19204_s9, %s19494_s26 }
0x2c1c   : > { %v12786_v0 = vpop.permute.xlu1 %12785 }
0x2c1d   : > { %12801 = vst.msk [vmem:[#allocation2] sm:$0xf] %vm19422_vm9, %v12786_v0  ;;  %v12788_v1 = vpop.permute.xlu0 %12787  ;;  %vm19437_vm9 = vmmov %vm19431_vm3 }
0x2c1e   : > { %12806 = vst.msk [vmem:[#allocation2] sm:$0xf] %vm19423_vm13, %v16407_v30  ;;  %v12793_v2 = vsel %vm19424_vm4, %v12786_v0, %v12788_v1  ;;  %vm19438_vm13 = vcmask 998400   ;;  %v13198_v0 = vshll.u32 %v16379_v9, 16 }
0x2c1f   : > { %12802 = vst [vmem:[#allocation2 + $0x8] sm:$0xf] %v12793_v2  ;;  %vm19439_vm4 = vmmov %vm19438_vm13 }
0x2c24   : > { %v12790_v3 = vpop.permute.xlu1 %12789 }
0x2c25   : > { %v12794_v4 = vsel %vm19425_vm12, %v12788_v1, %v12790_v3  ;;  %v12792_v5 = vpop.permute.xlu0 %12791  ;;  %v12808_v39 = vld [vmem:[#allocation2] sm:$0xf]  ;;  %vm19440_vm12 = vmmov %vm19431_vm3 }
0x2c26   : > { %12803 = vst [vmem:[#allocation2 + $0x10] sm:$0xf] %v12794_v4  ;;  %v12795_v18 = vsel %vm19426_vm2, %v12790_v3, %v12792_v5  ;;  %12805 = vst.msk [vmem:[#allocation2 + $0x20] sm:$0xf] %vm19427_vm7, %v12792_v5  ;;  %12829 = vrot.lane.b32.xlu1 %v12808_v39, %s16408_s16  ;;  %v12809_v6 = vld [vmem:[#allocation2 + $0x8] sm:$0xf] }
0x2c27   : > { %12804 = vst [vmem:[#allocation2 + $0x18] sm:$0xf] %v12795_v18  ;;  %12807 = vst.msk [vmem:[#allocation2 + $0x20] sm:$0xf] %vm19428_vm1, %v16407_v30  ;;  %12831 = vrot.lane.b32.xlu0 %v12809_v6, %s16408_s16  ;;  %v13197_v5 = vrot.slane %v13195_v63, 2 }
0x2c28   : > { %vm19441_vm2 = vmmov %vm19431_vm3 }
0x2c29   : > { %vm19442_vm7 = vmmov %vm19439_vm4 }
0x2c2a   : > { %vm19443_vm1 = vmmov %vm19436_vm14 }
0x2c2d   : > { %v12810_v27 = vld [vmem:[#allocation2 + $0x10] sm:$0xf] }
0x2c2e   : > { %12833 = vrot.lane.b32.xlu1 %v12810_v27, %s16408_s16  ;;  %v12811_v7 = vld [vmem:[#allocation2 + $0x18] sm:$0xf]  ;;  %v12812_v28 = vld [vmem:[#allocation2 + $0x20] sm:$0xf] }
0x2c2f   : > { %12835 = vrot.lane.b32.xlu0 %v12811_v7, %s16408_s16 }
0x2c32   : > { %12837 = vrot.lane.b32.xlu1 %v12812_v28, %s16408_s16 }
0x2c33   : > { %12955 = vrot.lane.b32.xlu0 %v12808_v39, %s16409_s17 }
0x2c36   : > { %12957 = vrot.lane.b32.xlu1 %v12809_v6, %s16409_s17 }
0x2c37   : > { %12959 = vrot.lane.b32.xlu0 %v12810_v27, %s16409_s17 }
0x2c3a   : > { %12961 = vrot.lane.b32.xlu1 %v12811_v7, %s16409_s17 }
0x2c3b   : > { %12963 = vrot.lane.b32.xlu0 %v12812_v28, %s16409_s17 }
0x2c3e   : > { %13075 = vrot.lane.b32.xlu1 %v12808_v39, %s16410_s18 }
0x2c3f   : > { %13077 = vrot.lane.b32.xlu0 %v12809_v6, %s16410_s18 }
0x2c42   : > { %13079 = vrot.lane.b32.xlu1 %v12810_v27, %s16410_s18 }
0x2c43   : > { %13081 = vrot.lane.b32.xlu0 %v12811_v7, %s16410_s18 }
0x2c46   : > { %13083 = vrot.lane.b32.xlu1 %v12812_v28, %s16410_s18 }
0x2c47   : > { %13202 = vrot.lane.b32.xlu0 %v12808_v39, %s16411_s19 }
0x2c4a   : > { %13204 = vrot.lane.b32.xlu1 %v12809_v6, %s16411_s19 }
0x2c4b   : > { %13206 = vrot.lane.b32.xlu0 %v12810_v27, %s16411_s19 }
0x2c4e   : > { %13208 = vrot.lane.b32.xlu1 %v12811_v7, %s16411_s19 }
0x2c4f   : > { %13210 = vrot.lane.b32.xlu0 %v12812_v28, %s16411_s19 }
0x2c52   : > { %13318 = vrot.lane.b32.xlu1 %v12808_v39, %s16412_s20 }
0x2c53   : > { %13320 = vrot.lane.b32.xlu0 %v12809_v6, %s16412_s20 }
0x2c56   : > { %13322 = vrot.lane.b32.xlu1 %v12810_v27, %s16412_s20 }
0x2c57   : > { %13324 = vrot.lane.b32.xlu0 %v12811_v7, %s16412_s20 }
0x2c5a   : > { %13326 = vrot.lane.b32.xlu1 %v12812_v28, %s16412_s20 }
0x2c5b   : > { %13445 = vrot.lane.b32.xlu0 %v12808_v39, %s19379_s13 }
0x2c5e   : > { %13447 = vrot.lane.b32.xlu1 %v12809_v6, %s19379_s13 }
0x2c5f   : > { %13449 = vrot.lane.b32.xlu0 %v12810_v27, %s19379_s13 }
0x2c62   : > { %13451 = vrot.lane.b32.xlu1 %v12811_v7, %s19379_s13 }
0x2c63   : > { %13453 = vrot.lane.b32.xlu0 %v12812_v28, %s19379_s13 }
0x2c66   : > { %13568 = vrot.lane.b32.xlu1 %v12808_v39, %s19380_s21  ;;  %v13200_v39 = vrot.slane %v13198_v0, 3 }
0x2c67   : > { %13570 = vrot.lane.b32.xlu0 %v12809_v6, %s19380_s21 }
0x2c6a   : > { %13572 = vrot.lane.b32.xlu1 %v12810_v27, %s19380_s21  ;;  %v13201_v27 = vor.u32 %v13200_v39, %v13197_v5 }
0x2c6b   : > { %13574 = vrot.lane.b32.xlu0 %v12811_v7, %s19380_s21 }
0x2c6e   : > { %13576 = vrot.lane.b32.xlu1 %v12812_v28, %s19380_s21 }
0x2c6f   : > { %12817 = vperm.xlu0 %16099, %v12814_v10  }
0x2c98   : > { %v12830_v21 = vpop.permute.xlu1 %12829 }
0x2c99   : > { %v12832_v11 = vpop.permute.xlu0 %12831 }
0x2c9a   : > { %v12839_v13 = vsel %vm19429_vm15, %v12830_v21, %v12832_v11  ;;  %vm19444_vm15 = vmmov %vm19441_vm2 }
0x2c9b   : > { %v12847_v17 = vsel %vm19431_vm3, %v12839_v13, 0  ;;  %vm19446_vm3 = vcmask 990208  }
0x2ca0   : > { %v12834_v14 = vpop.permute.xlu1 %12833 }
0x2ca1   : > { %v12840_v15 = vsel %vm19430_vm10, %v12832_v11, %v12834_v14  ;;  %v12836_v16 = vpop.permute.xlu0 %12835  ;;  %vm19445_vm10 = vmmov %vm19439_vm4 }
0x2ca2   : > { %14324 = vmatprep.subr.msk.bf16.mxu1 %vm19432_vm8, %v12840_v15  ;;  %v12841_v20 = vsel %vm19433_vm6, %v12834_v14, %v12836_v16  ;;  %vm19447_vm8 = vmmov %vm19441_vm2 }
0x2ca3   : > { %12859 = vmatpush1.bf16.msra.mxu1 %v12847_v17  ;;  %v12853_v45 = vsel %vm19435_vm11, %v12841_v20, 0  ;;  %vm19448_vm6 = vmmov %vm19443_vm1  ;;  %v13317_v20 = vld [vmem:[%s19196_s1 + $0x3b0] sm:$0x3] }
0x2ca4   : > { %v12838_v22 = vpop.permute.xlu1 %12837  ;;  %vm19450_vm11 = vmmov %vm19446_vm3 }
0x2ca5   : > { %v12842_v23 = vsel %vm19434_vm0, %v12836_v16, %v12838_v22  ;;  %v12956_v24 = vpop.permute.xlu0 %12955  ;;  %vm19449_vm0 = vmmov %vm19441_vm2 }
0x2ca6   : > { %14325 = vmatmul.mubr.msk.bf16.vlgmr.msra.gmra.mrb[52].mxu1 %vm19436_vm14, %v12823_v19  ;;  %14326 = vmatprep.subr.msk.bf16.mxu1 %vm19437_vm9, %v12842_v23  ;;  %vm19451_vm14 = vmmov %vm19449_vm0 }
0x2ca7   : > { %12900 = vmatpush1.bf16.msra.mxu1 %v12853_v45  ;;  %12931 = vmatprep.mubr.bf16.mxu1 %v16407_v30  ;;  %vm19452_vm9 = vmmov %vm19443_vm1 }
0x2ca8   : > { %v12958_v57 = vpop.permute.xlu1 %12957 }
0x2ca9   : > { %v12960_v62 = vpop.permute.xlu0 %12959  ;;  %v12965_v31 = vsel %vm19439_vm4, %v12956_v24, %v12958_v57  ;;  %vm19454_vm4 = vmmov %vm19449_vm0  ;;  %v16380_v24 = vld [vmem:[%s19196_s1 + $0x3b0] ss:$0 sps:$4 sm:$0x66]  }
0x2caa   : > { %v12966_v26 = vsel %vm19438_vm13, %v12958_v57, %v12960_v62  ;;  %v12973_v35 = vsel %vm19441_vm2, %v12965_v31, 0  ;;  %vm19453_vm13 = vmmov %vm19446_vm3  ;;  %v13438_v57 = vshrl.u32 %v16380_v24, 16 }
0x2cab   : > { %14329 = vmatprep.subr.msk.bf16.mxu1 %vm19440_vm12, %v12966_v26  ;;  %vm19455_vm12 = vmmov %vm19446_vm3 }
0x2cac   : > { %v12962_v32 = vpop.permute.xlu1 %12961  ;;  %vm19456_vm2 = vmmov %vm19449_vm0 }
0x2cad   : > { %v12964_v34 = vpop.permute.xlu0 %12963  ;;  %v12967_v46 = vsel %vm19445_vm10, %v12960_v62, %v12962_v32  ;;  %v13441_v62 = vshll.u32 %v16380_v24, 16 }
0x2cae   : > { %v12968_v33 = vsel %vm19442_vm7, %v12962_v32, %v12964_v34  ;;  %14327 = vmatmul.mubr.msk.bf16.vlgmr.msra.gmra.mrb[56].mxu1 %vm19443_vm1, %v12823_v19  ;;  %v12979_v43 = vsel %vm19447_vm8, %v12967_v46, 0  ;;  %vm19457_vm7 = vmmov %vm19443_vm1  ;;  %vm19458_vm1 = vcmask 982016   ;;  %v13440_v32 = vrot.slane %v13438_v57, 1 }
0x2caf   : > { %12985 = vmatpush1.bf16.msra.mxu1 %v12973_v35  ;;  %13016 = vmatprep.mubr.bf16.mxu1 %v16407_v30  ;;  %vm19460_vm10 = vmmov %vm19458_vm1  ;;  %v13443_v34 = vrot.slane %v13441_v62, 2 }
0x2cb0   : > { %14331 = vmatprep.subr.msk.bf16.mxu1 %vm19444_vm15, %v12968_v33  ;;  %v13076_v38 = vpop.permute.xlu1 %13075  ;;  %vm19459_vm15 = vmmov %vm19449_vm0 }
0x2cb1   : > { %v13078_v40 = vpop.permute.xlu0 %13077  ;;  %vm19462_vm8 = vmmov %vm19448_vm6  ;;  %v13444_v33 = vor.u32 %v13443_v34, %v13440_v32 }
0x2cb2   : > { %v13085_v53 = vsel %vm19450_vm11, %v13076_v38, %v13078_v40  ;;  %vm19464_vm11 = vmmov %vm19458_vm1 }
0x2cb3   : > { %v13093_v49 = vsel %vm19451_vm14, %v13085_v53, 0  ;;  %vm19465_vm14 = vmmov %vm19449_vm0 }
0x2cb4   : > { %v13080_v41 = vpop.permute.xlu1 %13079 }
0x2cb5   : > { %v13086_v48 = vsel %vm19446_vm3, %v13078_v40, %v13080_v41  ;;  %v13082_v44 = vpop.permute.xlu0 %13081  ;;  %vm19461_vm3 = vmmov %vm19449_vm0 }
0x2cb6   : > { %14330 = vmatmul.mubr.msk.bf16.vlgmr.msra.gmra.mrb[52].mxu1 %vm19448_vm6, %v12954_v42  ;;  %v13087_v56 = vsel %vm19455_vm12, %v13080_v41, %v13082_v44  ;;  %vm19463_vm6 = vmmov %vm19458_vm1 }
0x2cb7   : > { %13026 = vmatpush1.bf16.msra.mxu1 %v12979_v43  ;;  %13057 = vmatprep.mubr.bf16.mxu1 %v16407_v30  ;;  %v13099_v59 = vsel %vm19456_vm2, %v13087_v56, 0  ;;  %vm19470_vm2 = vmmov %vm19449_vm0 }
0x2cb8   : > { %14334 = vmatprep.subr.msk.bf16.mxu1 %vm19449_vm0, %v13086_v48  ;;  %v13084_v47 = vpop.permute.xlu1 %13083 }
0x2cb9   : > { %v13203_v50 = vpop.permute.xlu0 %13202  ;;  %v13088_v52 = vsel %vm19453_vm13, %v13082_v44, %v13084_v47  ;;  %vm19467_vm13 = vcmask 973824   ;;  %v16381_v44 = vld [vmem:[%s19196_s1 + $0x3b0] sm:$0x18]  }
0x2cba   : > { %vm19469_vm12 = vmmov %vm19467_vm13  ;;  %v13567_v47 = vrot.slane %v16381_v44, 3 }
0x2cbc   : > { %v13205_v54 = vpop.permute.xlu1 %13204 }
0x2cbd   : > { %v13207_v58 = vpop.permute.xlu0 %13206  ;;  %v13212_v1 = vsel %vm19460_vm10, %v13203_v50, %v13205_v54 }
0x2cbe   : > { %14332 = vmatmul.mubr.msk.bf16.vlgmr.msra.gmra.mrb[56].mxu1 %vm19452_vm9, %v12954_v42  ;;  %v13213_v60 = vsel %vm19458_vm1, %v13205_v54, %v13207_v58  ;;  %v13220_v3 = vsel %vm19461_vm3, %v13212_v1, 0  ;;  %vm19466_vm9 = vmmov %vm19457_vm7 }
0x2cbf   : > { %13105 = vmatpush1.bf16.msra.mxu1 %v13093_v49  ;;  %13136 = vmatprep.mubr.bf16.mxu1 %v16407_v30  ;;  %vm19471_vm1 = vmmov %vm19469_vm12 }
0x2cc0   : > { %14336 = vmatprep.subr.msk.bf16.mxu1 %vm19454_vm4, %v13088_v52  ;;  %v13209_v61 = vpop.permute.xlu1 %13208  ;;  %vm19468_vm4 = vmmov %vm19449_vm0 }
0x2cc1   : > { %v13211_v2 = vpop.permute.xlu0 %13210  ;;  %v13214_v7 = vsel %vm19464_vm11, %v13207_v58, %v13209_v61  ;;  %vm19473_vm10 = vmmov %vm19471_vm1 }
0x2cc2   : > { %v13215_v18 = vsel %vm19463_vm6, %v13209_v61, %v13211_v2  ;;  %v13226_v10 = vsel %vm19465_vm14, %v13214_v7, 0  ;;  %vm19474_vm3 = vmmov %vm19449_vm0  ;;  %vm19476_vm6 = vcmask 965632  }
0x2cc3   : > { %vm19477_vm11 = vmmov %vm19476_vm6 }
0x2cc4   : > { %v13319_v4 = vpop.permute.xlu1 %13318  ;;  %vm19478_vm14 = vmmov %vm19449_vm0 }
0x2cc5   : > { %v13321_v6 = vpop.permute.xlu0 %13320 }
0x2cc6   : > { %14335 = vmatmul.mubr.msk.bf16.vlgmr.msra.gmra.mrb[52].mxu1 %vm19457_vm7, %v13074_v55  ;;  %v13328_v12 = vsel %vm19469_vm12, %v13319_v4, %v13321_v6  ;;  %vm19482_vm12 = vmmov %vm19476_vm6 }
0x2cc7   : > { %13146 = vmatpush1.bf16.msra.mxu1 %v13099_v59  ;;  %13177 = vmatprep.mubr.bf16.mxu1 %v16407_v30  ;;  %v13336_v14 = vsel %vm19470_vm2, %v13328_v12, 0  ;;  %vm19483_vm2 = vmmov %vm19449_vm0 }
0x2cc8   : > { %14339 = vmatprep.subr.msk.bf16.mxu1 %vm19459_vm15, %v13213_v60  ;;  %v13323_v28 = vpop.permute.xlu1 %13322  ;;  %vm19472_vm15 = vmmov %vm19449_vm0 }
0x2cc9   : > { %v13329_v11 = vsel %vm19467_vm13, %v13321_v6, %v13323_v28  ;;  %v13325_v21 = vpop.permute.xlu0 %13324  ;;  %vm19480_vm13 = vmmov %vm19476_vm6 }
0x2cca   : > { %v13330_v19 = vsel %vm19473_vm10, %v13323_v28, %v13325_v21 }
0x2ccb   : > { %v13342_v23 = vsel %vm19474_vm3, %v13330_v19, 0  ;;  %vm19487_vm3 = vmmov %vm19449_vm0 }
0x2ccc   : > { %v13327_v13 = vpop.permute.xlu1 %13326 }
0x2ccd   : > { %v13446_v15 = vpop.permute.xlu0 %13445  ;;  %v13331_v16 = vsel %vm19471_vm1, %v13325_v21, %v13327_v13  ;;  %vm19484_vm1 = vcmask 957440  }
0x2cce   : > { %14337 = vmatmul.mubr.msk.bf16.vlgmr.msra.gmra.mrb[56].mxu1 %vm19462_vm8, %v13074_v55  ;;  %vm19475_vm8 = vmmov %vm19457_vm7 }
0x2ccf   : > { %13232 = vmatpush1.bf16.msra.mxu1 %v13220_v3  ;;  %13263 = vmatprep.mubr.bf16.mxu1 %v16407_v30  ;;  %vm19486_vm10 = vmmov %vm19484_vm1 }
0x2cd0   : > { %14341 = vmatprep.subr.msk.bf16.mxu1 %vm19449_vm0, %v13215_v18  ;;  %v13448_v17 = vpop.permute.xlu1 %13447 }
0x2cd1   : > { %v13450_v22 = vpop.permute.xlu0 %13449  ;;  %v13455_v26 = vsel %vm19477_vm11, %v13446_v15, %v13448_v17  ;;  %vm19490_vm11 = vmmov %vm19484_vm1 }
0x2cd2   : > { %v13456_v45 = vsel %vm19476_vm6, %v13448_v17, %v13450_v22  ;;  %v13463_v29 = vsel %vm19478_vm14, %v13455_v26, 0  ;;  %vm19489_vm6 = vmmov %vm19484_vm1 }
0x2cd3   : > { %vm19491_vm14 = vmmov %vm19449_vm0 }
0x2cd4   : > { %v13452_v25 = vpop.permute.xlu1 %13451 }
0x2cd5   : > { %v13454_v8 = vpop.permute.xlu0 %13453  ;;  %v13457_v36 = vsel %vm19482_vm12, %v13450_v22, %v13452_v25 }
0x2cd6   : > { %14340 = vmatmul.mubr.msk.bf16.vlgmr.msra.gmra.mrb[52].mxu1 %vm19466_vm9, %v13201_v27  ;;  %vm19479_vm9 = vmmov %vm19457_vm7  ;;  %v13458_v35 = vsel %vm19480_vm13, %v13452_v25, %v13454_v8  ;;  %v13469_v38 = vsel %vm19483_vm2, %v13457_v36, 0 }
0x2cd7   : > { %13273 = vmatpush1.bf16.msra.mxu1 %v13226_v10  ;;  %13304 = vmatprep.mubr.bf16.mxu1 %v16407_v30  ;;  %vm19493_vm13 = vmmov %vm19457_vm7 }
0x2cd8   : > { %14343 = vmatprep.subr.msk.bf16.mxu1 %vm19468_vm4, %v13329_v11  ;;  %v13569_v31 = vpop.permute.xlu1 %13568  ;;  %vm19481_vm4 = vmmov %vm19449_vm0 }
0x2cd9   : > { %v13571_v40 = vpop.permute.xlu0 %13570 }
0x2cda   : > { %v13578_v46 = vsel %vm19486_vm10, %v13569_v31, %v13571_v40 }
0x2cdb   : > { %v13586_v48 = vsel %vm19487_vm3, %v13578_v46, 0 }
0x2cdc   : > { %v13573_v37 = vpop.permute.xlu1 %13572 }
0x2cdd   : > { %v13579_v42 = vsel %vm19484_vm1, %v13571_v40, %v13573_v37  ;;  %v13575_v43 = vpop.permute.xlu0 %13574 }
0x2cde   : > { %14342 = vmatmul.mubr.msk.bf16.vlgmr.msra.gmra.mrb[56].mxu1 %vm19457_vm7, %v13201_v27  ;;  %v13580_v49 = vsel %vm19490_vm11, %v13573_v37, %v13575_v43 }
0x2cdf   : > { %13348 = vmatpush1.bf16.msra.mxu1 %v13336_v14  ;;  %13379 = vmatprep.mubr.bf16.mxu1 %v16407_v30  ;;  %v13592_v50 = vsel %vm19491_vm14, %v13580_v49, 0 }
0x2ce0   : > { %14345 = vmatprep.subr.msk.bf16.mxu1 %vm19472_vm15, %v13331_v16  ;;  %vm19485_vm15 = vmmov %vm19449_vm0  ;;  %v13577_v41 = vpop.permute.xlu1 %13576 }
0x2ce1   : > { %v13581_v53 = vsel %vm19489_vm6, %v13575_v43, %v13577_v41 }
0x2ce6   : > { %14344 = vmatmul.mubr.msk.bf16.vlgmr.msra.gmra.mrb[52].mxu1 %vm19475_vm8, %v13317_v20  ;;  %vm19488_vm8 = vmmov %vm19457_vm7 }
0x2ce7   : > { %13389 = vmatpush1.bf16.msra.mxu1 %v13342_v23  ;;  %13420 = vmatprep.mubr.bf16.mxu1 %v16407_v30 }
0x2ce8   : > { %14348 = vmatprep.subr.msk.bf16.mxu1 %vm19449_vm0, %v13456_v45 }
0x2cee   : > { %14346 = vmatmul.mubr.msk.bf16.vlgmr.msra.gmra.mrb[56].mxu1 %vm19479_vm9, %v13317_v20  ;;  %vm19492_vm9 = vmmov %vm19457_vm7  ;;  %v12818_v51 = vpop.permute.xlu0 %12817 }
0x2cef   : > { %13475 = vmatpush1.bf16.msra.mxu1 %v13463_v29  ;;  %13506 = vmatprep.mubr.bf16.mxu1 %v16407_v30 }
0x2cf0   : > { %14350 = vmatprep.subr.msk.bf16.mxu1 %vm19481_vm4, %v13458_v35 }
0x2cf6   : > { %14349 = vmatmul.mubr.msk.bf16.vlgmr.msra.gmra.mrb[52].mxu1 %vm19457_vm7, %v13444_v33 }
0x2cf7   : > { %13516 = vmatpush1.bf16.msra.mxu1 %v13469_v38  ;;  %13547 = vmatprep.mubr.bf16.mxu1 %v16407_v30 }
0x2cf8   : > { %14353 = vmatprep.subr.msk.bf16.mxu1 %vm19485_vm15, %v13579_v42 }
0x2cfe   : > { %14351 = vmatmul.mubr.msk.bf16.vlgmr.msra.gmra.mrb[56].mxu1 %vm19488_vm8, %v13444_v33 }
0x2cff   : > { %13598 = vmatpush1.bf16.msra.mxu1 %v13586_v48  ;;  %13629 = vmatprep.mubr.bf16.mxu1 %v16407_v30 }
0x2d00   : > { %14355 = vmatprep.subr.msk.bf16.mxu1 %vm19449_vm0, %v13581_v53 }
0x2d06   : > { %14354 = vmatmul.mubr.msk.bf16.vlgmr.msra.gmra.mrb[52].mxu1 %vm19492_vm9, %v13567_v47 }
0x2d07   : > { %13639 = vmatpush1.bf16.msra.mxu1 %v13592_v50  ;;  %13670 = vmatprep.mubr.bf16.mxu1 %v16407_v30 }
0x2d0e   : > { %14356 = vmatmul.mubr.msk.bf16.vlgmr.msra.gmra.mrb[56].mxu1 %vm19493_vm13, %v13567_v47 }
0x2dd9   : > { %v13631_v52 = vpop.f32.mrb[52].mxu1 }
0x2dda   : > { %v15451_v54 = vadd.f32 %v13631_v52, %v12818_v51  ;;  %v13633_v55 = vpop.f32.mrb[53].mxu1 }
0x2ddb   : > { %v15452_v56 = vadd.f32 %v13633_v55, %v12818_v51  ;;  %v13635_v58 = vpop.f32.mrb[54].mxu1 }
0x2ddc   : > { %v13683_v59 = vsel %vm6075_vm5, %v15451_v54, -inf  ;;  %v13636_v9 = vpop.f32.mrb[55].mxu1 }
0x2ddd   : > { %v13684_v60 = vrot.slane %v13683_v59, 4  ;;  %v13690_v61 = vsel %vm6075_vm5, %v15452_v56, -inf }
0x2dde   : > { %v13691_v63 = vrot.slane %v13690_v61, 4 }
0x2ddf   : > { %v13685_v0 = vmax.f32 %v13683_v59, %v13684_v60 }
0x2de0   : > { %v13692_v1 = vmax.f32 %v13690_v61, %v13691_v63 }
0x2de1   : > { %v13686_v2 = vrot.slane %v13685_v0, 2  ;;  %v13672_v3 = vpop.f32.mrb[56].mxu1 }
0x2de2   : > { %v13693_v30 = vrot.slane %v13692_v1, 2  ;;  %v15453_v4 = vadd.f32 %v13672_v3, %v12818_v51  ;;  %v13674_v5 = vpop.f32.mrb[57].mxu1 }
0x2de3   : > { %v13687_v39 = vmax.f32 %v13685_v0, %v13686_v2  ;;  %v15454_v18 = vadd.f32 %v13674_v5, %v12818_v51  ;;  %v13676_v6 = vpop.f32.mrb[58].mxu1 }
0x2de4   : > { %v13694_v27 = vmax.f32 %v13692_v1, %v13693_v30  ;;  %v13697_v7 = vsel %vm6075_vm5, %v15453_v4, -inf  ;;  %v13677_v28 = vpop.f32.mrb[59].mxu1 }
0x2de5   : > { %v13688_v10 = vrot.slane %v13687_v39, 1  ;;  %v13698_v11 = vrot.slane %v13697_v7, 4  ;;  %v13704_v21 = vsel %vm6075_vm5, %v15454_v18, -inf }
0x2de6   : > { %v13695_v12 = vrot.slane %v13694_v27, 1  ;;  %v13705_v13 = vrot.slane %v13704_v21, 4 }
0x2de7   : > { %v13689_v14 = vmax.f32 %v13687_v39, %v13688_v10  ;;  %v13699_v15 = vmax.f32 %v13697_v7, %v13698_v11 }
0x2de8   : > { %v13696_v16 = vmax.f32 %v13694_v27, %v13695_v12  ;;  %v13706_v17 = vmax.f32 %v13704_v21, %v13705_v13 }
0x2de9   : > { %v13711_v19 = vsub.f32 %v15451_v54, %v13689_v14  ;;  %v13700_v20 = vrot.slane %v13699_v15, 2 }
0x2dea   : > { %v13712_v22 = vsub.f32 %v15452_v56, %v13696_v16  ;;  %v13707_v23 = vrot.slane %v13706_v17, 2 }
0x2deb   : > { %v13715_v24 = vmul.f32 1.442695, %v13711_v19  ;;  %v13701_v45 = vmax.f32 %v13699_v15, %v13700_v20 }
0x2dec   : > { %v13717_v25 = vmul.f32 1.442695, %v13712_v22  ;;  %v13708_v57 = vmax.f32 %v13706_v17, %v13707_v23 }
0x2ded   : > { %16382 = vpow2.f32 %v13715_v24  ;;  %v13702_v62 = vrot.slane %v13701_v45, 1 }
0x2dee   : > { %16384 = vpow2.f32 %v13717_v25  ;;  %v13709_v26 = vrot.slane %v13708_v57, 1 }
0x2def   : > { %v13703_v8 = vmax.f32 %v13701_v45, %v13702_v62 }
0x2df0   : > { %v13710_v29 = vmax.f32 %v13708_v57, %v13709_v26 }
0x2df1   : > { %v13713_v31 = vsub.f32 %v15453_v4, %v13703_v8 }
0x2df2   : > { %v13714_v32 = vsub.f32 %v15454_v18, %v13710_v29 }
0x2df3   : > { %v13719_v34 = vmul.f32 1.442695, %v13713_v31 }
0x2df4   : > { %v13721_v35 = vmul.f32 1.442695, %v13714_v32 }
0x2df5   : > { %16386 = vpow2.f32 %v13719_v34 }
0x2df6   : > { %16388 = vpow2.f32 %v13721_v35 }
0x2df7   : > { %v16383_v33 = vpop.eup %16382 }
0x2df8   : > { %v16385_v36 = vpop.eup %16384  ;;  %v13723_v37 = vsel %vm6075_vm5, %v16383_v33, 0.0 }
0x2df9   : > { %v13724_v38 = vrot.slane %v13723_v37, 4  ;;  %v13730_v40 = vsel %vm6075_vm5, %v16385_v36, 0.0 }
0x2dfa   : > { %v13731_v42 = vrot.slane %v13730_v40, 4 }
0x2dfb   : > { %v13725_v46 = vadd.f32 %v13724_v38, %v13723_v37 }
0x2dfc   : > { %v13732_v41 = vadd.f32 %v13731_v42, %v13730_v40 }
0x2dfd   : > { %v13726_v48 = vrot.slane %v13725_v46, 2 }
0x2dfe   : > { %v13733_v43 = vrot.slane %v13732_v41, 2 }
0x2dff   : > { %v16387_v44 = vpop.eup %16386  ;;  %v13727_v53 = vadd.f32 %v13726_v48, %v13725_v46 }
0x2e00   : > { %v16389_v47 = vpop.eup %16388  ;;  %v13734_v49 = vadd.f32 %v13733_v43, %v13732_v41  ;;  %v13737_v50 = vsel %vm6075_vm5, %v16387_v44, 0.0 }
0x2e01   : > { %v13728_v51 = vrot.slane %v13727_v53, 1  ;;  %v13738_v52 = vrot.slane %v13737_v50, 4  ;;  %v13744_v54 = vsel %vm6075_vm5, %v16389_v47, 0.0 }
0x2e02   : > { %v13735_v55 = vrot.slane %v13734_v49, 1  ;;  %v13745_v56 = vrot.slane %v13744_v54, 4 }
0x2e03   : > { %v13729_v58 = vadd.f32 %v13728_v51, %v13727_v53  ;;  %v13739_v59 = vadd.f32 %v13738_v52, %v13737_v50 }
0x2e04   : > { %v13736_v9 = vadd.f32 %v13735_v55, %v13734_v49  ;;  %v13746_v60 = vadd.f32 %v13745_v56, %v13744_v54 }
0x2e05   : > { %16390 = vrcp.f32 %v13729_v58  ;;  %v13740_v61 = vrot.slane %v13739_v59, 2 }
0x2e06   : > { %16392 = vrcp.f32 %v13736_v9  ;;  %v13747_v63 = vrot.slane %v13746_v60, 2 }
0x2e07   : > { %v13741_v0 = vadd.f32 %v13740_v61, %v13739_v59 }
0x2e08   : > { %v13748_v1 = vadd.f32 %v13747_v63, %v13746_v60 }
0x2e09   : > { %v13742_v2 = vrot.slane %v13741_v0, 1 }
0x2e0a   : > { %v13749_v3 = vrot.slane %v13748_v1, 1 }
0x2e0b   : > { %v13743_v30 = vadd.f32 %v13742_v2, %v13741_v0 }
0x2e0c   : > { %v13750_v4 = vadd.f32 %v13749_v3, %v13748_v1 }
0x2e0d   : > { %16394 = vrcp.f32 %v13743_v30 }
0x2e0e   : > { %16396 = vrcp.f32 %v13750_v4 }
0x2e0f   : > { %v16391_v5 = vpop.eup %16390 }
0x2e10   : > { %v16393_v39 = vpop.eup %16392  ;;  %v13752_v18 = vmul.f32 %v16391_v5, %v16383_v33 }
0x2e11   : > { %v13754_v6 = vmul.f32 %v16393_v39, %v16385_v36 }
0x2e13   : > { %v13763_v27 = vcombine.low %v13752_v18, %v13754_v6 }
0x2e15   : > { %13767 = vst [vmem:[%s332_s15] sm:$0x77] %v13763_v27 }
0x2e17   : > { %v16395_v7 = vpop.eup %16394 }
0x2e18   : > { %v16397_v28 = vpop.eup %16396  ;;  %v13756_v10 = vmul.f32 %v16395_v7, %v16387_v44 }
0x2e19   : > { %v13758_v11 = vmul.f32 %v16397_v28, %v16389_v47 }
0x2e1b   : > { %v13764_v21 = vcombine.low %v13756_v10, %v13758_v11 }
0x2e1d   : > { %13768 = vst [vmem:[%s332_s15 + $0x8] sm:$0x77] %v13764_v21 }
0x2e1e PF: > { %s19_s30 = sadd.s32 1, %s16404_s30  }
0x2e1f   : > { %p16_p4 = scmp.ge.s32.totalorder %s19_s30, 4  }
0x2e21   :  { %18 = sbr.rel (!%p16_p4) target bundleno = 1 (0x1), region = 86 }

</bundles_post_ra>
